<compile_context>
chip_gen: v6e
topology: v6e:2x2x1
jax: 0.10.0
libtpu: 0.0.40
codegen_flags: <defaults>
</compile_context>

<pallas_src>
import jax
import jax.numpy as jnp
from jax import lax
from jax.experimental import pallas as pl
from jax.experimental.pallas import tpu as pltpu

EPS = 1e-5  # nn.BatchNorm2d default eps


# ----------------------------------------------------------------------------
# Fused kernel: maxpool 2x2/2 -> conv3x3 + BN + ReLU -> conv3x3 + BN + ReLU
# ----------------------------------------------------------------------------
def _double_down_kernel(x_ref, w1_ref, g1_ref, be1_ref, w2_ref, g2_ref, be2_ref,
                        o_ref, pad_ref, col_ref):
    B, Hp, Wp, Cmax = pad_ref.shape
    H, W = Hp - 2, Wp - 2
    Cin = x_ref.shape[3] // 2
    Cout = o_ref.shape[1]
    HW = H * W
    N = B * HW
    inv_n = 1.0 / N

    # ---- fused 2x2 stride-2 max-pool --------------------------------------
    # The pool window was exposed as tiny trailing dims by a *free* wrapper
    # reshape, so pooling is plain slicing + jnp.maximum (no strided slices,
    # no relayout-heavy reshapes).
    a = jnp.maximum(x_ref[:, 0, :, :], x_ref[:, 1, :, :])        # (B*H, W, 2*Cin)
    pooled = jnp.maximum(a[:, :, 0:Cin], a[:, :, Cin:2 * Cin])   # (B*H, W, Cin)
    pooled = pooled.reshape(B, H, W, Cin)                        # NHWC

    # ---- zero ONLY the 1-pixel halo of the shared padded scratch (once) ----
    pad_ref[:, 0:1, :, :] = jnp.zeros((B, 1, Wp, Cmax), jnp.float32)
    pad_ref[:, H + 1:Hp, :, :] = jnp.zeros((B, 1, Wp, Cmax), jnp.float32)
    pad_ref[:, :, 0:1, :] = jnp.zeros((B, Hp, 1, Cmax), jnp.float32)
    pad_ref[:, :, W + 1:Wp, :] = jnp.zeros((B, Hp, 1, Cmax), jnp.float32)

    taps = tuple((dy, dx) for dy in range(3) for dx in range(3))

    def im2col(cin):
        # build the (N, 9*cin) window matrix -> one wide-K matmul per conv
        for t, (dy, dx) in enumerate(taps):
            col_ref[:, t * cin:(t + 1) * cin] = (
                pad_ref[:, dy:dy + H, dx:dx + W, 0:cin].reshape(N, cin))
        return col_ref[:, 0:9 * cin]

    # ---- conv1 (3x3, pad=1) + BN (batch stats, one pass) + ReLU ------------
    pad_ref[:, 1:H + 1, 1:W + 1, 0:Cin] = pooled
    y1 = jnp.dot(im2col(Cin), w1_ref[...],
                 preferred_element_type=jnp.float32)             # (N, Cout)
    s1 = jnp.sum(y1, axis=0, keepdims=True) * inv_n              # mean  (1, Cout)
    q1 = jnp.sum(y1 * y1, axis=0, keepdims=True) * inv_n         # E[x^2]
    scale1 = g1_ref[...] * lax.rsqrt(q1 - s1 * s1 + EPS)
    shift1 = be1_ref[...] - s1 * scale1
    h1 = jnp.maximum(y1 * scale1 + shift1, 0.0)                  # (N, Cout)

    # ---- conv2 (3x3, pad=1) + BN + ReLU ------------------------------------
    pad_ref[:, 1:H + 1, 1:W + 1, 0:Cout] = h1.reshape(B, H, W, Cout)
    col2 = im2col(Cout)                                          # (N, 9*Cout)
    # Contract the minor dim of both operands -> result is (Cout, N):
    # lane-dense (N lanes) BN reductions, normalize/ReLU, and output stores.
    y2 = lax.dot_general(w2_ref[...], col2,
                         dimension_numbers=(((1,), (1,)), ((), ())),
                         preferred_element_type=jnp.float32)     # (Cout, N)
    s2 = jnp.sum(y2, axis=1, keepdims=True) * inv_n              # (Cout, 1)
    q2 = jnp.sum(y2 * y2, axis=1, keepdims=True) * inv_n
    scale2 = g2_ref[...] * lax.rsqrt(q2 - s2 * s2 + EPS)
    shift2 = be2_ref[...] - s2 * scale2
    out = jnp.maximum(y2 * scale2 + shift2, 0.0)                 # (Cout, N)

    # ---- lane-dense NCHW-flat store: o_ref is (B, Cout, H*W) ---------------
    for b in range(B):
        o_ref[b, :, :] = out[:, b * HW:(b + 1) * HW]


# ----------------------------------------------------------------------------
# Wrapper
# ----------------------------------------------------------------------------
def double_down_forward(x_nchw, p):
    """Equivalent of DoubleDown.forward(x). Input/output are NCHW (torch layout)."""
    B, Cin, H2, W2 = x_nchw.shape
    H, W = H2 // 2, W2 // 2
    Cout = p["w1"].shape[0]            # torch conv1 weight: (Cout, Cin, 3, 3)
    Cmax = max(Cin, Cout)

    # One XLA transpose at the input boundary (NCHW -> NHWC), then a FREE
    # reshape exposing the 2x2 pool window as trailing dims for the kernel.
    x_nhwc = jnp.transpose(x_nchw, (0, 2, 3, 1)).astype(jnp.float32)
    x5 = x_nhwc.reshape(B * H, 2, W, 2 * Cin)

    # Conv weights in im2col layout (tap index t = dy*3 + dx).
    w1k = jnp.transpose(p["w1"], (2, 3, 1, 0)).reshape(9 * Cin, Cout).astype(jnp.float32)
    w2k = jnp.transpose(p["w2"], (0, 2, 3, 1)).reshape(Cout, 9 * Cout).astype(jnp.float32)
    g1 = p["g1"].reshape(1, Cout).astype(jnp.float32)
    be1 = p["be1"].reshape(1, Cout).astype(jnp.float32)
    g2 = p["g2"].reshape(Cout, 1).astype(jnp.float32)
    be2 = p["be2"].reshape(Cout, 1).astype(jnp.float32)
    # NOTE: conv biases p["b1"], p["b2"] are intentionally NOT passed to the
    # kernel: a per-channel constant added before training-mode BatchNorm is
    # exactly cancelled by the batch-mean subtraction (verified vs reference).

    out_flat = pl.pallas_call(
        _double_down_kernel,
        out_shape=jax.ShapeDtypeStruct((B, Cout, H * W), jnp.float32),
        scratch_shapes=[
            pltpu.VMEM((B, H + 2, W + 2, Cmax), jnp.float32),    # shared padded buf
            pltpu.VMEM((B * H * W, 9 * Cmax), jnp.float32),      # shared im2col buf
        ],
        compiler_params=pltpu.CompilerParams(
            vmem_limit_bytes=32 * 1024 * 1024),
    )(x5, w1k, g1, be1, w2k, g2, be2)

    return out_flat.reshape(B, Cout, H, W)                       # free reshape -> NCHW


# ----------------------------------------------------------------------------
# Pure-JAX reference (same math as the PyTorch module, incl. conv biases).
# ----------------------------------------------------------------------------
def _ref_double_down(x_nchw, p):
    x = jnp.transpose(x_nchw, (0, 2, 3, 1)).astype(jnp.float32)  # NHWC
    B, H2, W2, Cin = x.shape
    H, W = H2 // 2, W2 // 2
    # MaxPool2d(2, 2)
    x = x.reshape(B, H, 2, W, 2, Cin)
    x = jnp.max(jnp.max(x, axis=4), axis=2)                      # (B, H, W, Cin)

    def conv_bn_relu(x, w_oihw, bias, g, be):
        wk = jnp.transpose(w_oihw, (2, 3, 1, 0))                 # (3, 3, I, O)
        xp = jnp.pad(x, ((0, 0), (1, 1), (1, 1), (0, 0)))
        out = jnp.zeros(x.shape[:3] + (w_oihw.shape[0],), jnp.float32)
        for dy in range(3):
            for dx in range(3):
                out = out + jnp.einsum(
                    "bhwc,co->bhwo",
                    xp[:, dy:dy + H, dx:dx + W, :], wk[dy, dx],
                    precision=lax.Precision.HIGHEST)
        out = out + bias[None, None, None, :]
        m = jnp.mean(out, axis=(0, 1, 2), keepdims=True)
        v = jnp.mean(jnp.square(out - m), axis=(0, 1, 2), keepdims=True)
        return jnp.maximum((out - m) * lax.rsqrt(v + EPS) * g + be, 0.0)

    h = conv_bn_relu(x, p["w1"], p["b1"], p["g1"], p["be1"])
    h = conv_bn_relu(h, p["w2"], p["b2"], p["g2"], p["be2"])
    return jnp.transpose(h, (0, 3, 1, 2))                        # back to NCHW


if __name__ == "__main__":
    B, IN_CH, OUT_CH = 2, 4, 8        # DoubleDown(in_chan=4, out_chan=8)
    H2 = W2 = 32                      # input spatial; output spatial = 16

    key = jax.random.PRNGKey(0)
    ks = jax.random.split(key, 9)
    x = jax.random.normal(ks[0], (B, IN_CH, H2, W2), jnp.float32)

    params = {
        # Conv2d weights in torch layout (O, I, 3, 3)
        "w1": 0.2 * jax.random.normal(ks[1], (OUT_CH, IN_CH, 3, 3), jnp.float32),
        "b1": 0.1 * jax.random.normal(ks[2], (OUT_CH,), jnp.float32),
        "g1": 1.0 + 0.1 * jax.random.normal(ks[3], (OUT_CH,), jnp.float32),
        "be1": 0.1 * jax.random.normal(ks[4], (OUT_CH,), jnp.float32),
        "w2": 0.2 * jax.random.normal(ks[5], (OUT_CH, OUT_CH, 3, 3), jnp.float32),
        "b2": 0.1 * jax.random.normal(ks[6], (OUT_CH,), jnp.float32),
        "g2": 1.0 + 0.1 * jax.random.normal(ks[7], (OUT_CH,), jnp.float32),
        "be2": 0.1 * jax.random.normal(ks[8], (OUT_CH,), jnp.float32),
    }

    out = jax.block_until_ready(double_down_forward(x, params))
    ref = jax.block_until_ready(_ref_double_down(x, params))

    assert out.shape == (B, OUT_CH, H2 // 2, W2 // 2), out.shape
    if not jnp.allclose(out, ref, atol=1e-2, rtol=1e-2):
        err = float(jnp.max(jnp.abs(out - ref)))
        raise RuntimeError(f"Pallas output mismatch vs JAX reference (max err {err})")
    print("KERNEL_OK")
</pallas_src>

<mosaic_0001>
module attributes {stable_mosaic.version = 11 : i64} {
  func.func @_double_down_kernel(%arg0: memref<32x2x16x8xf32, #tpu.memory_space<vmem>>, %arg1: memref<36x8xf32, #tpu.memory_space<vmem>>, %arg2: memref<1x8xf32, #tpu.memory_space<vmem>>, %arg3: memref<1x8xf32, #tpu.memory_space<vmem>>, %arg4: memref<8x72xf32, #tpu.memory_space<vmem>>, %arg5: memref<8x1xf32, #tpu.memory_space<vmem>>, %arg6: memref<8x1xf32, #tpu.memory_space<vmem>>, %arg7: memref<2x8x256xf32, #tpu.memory_space<vmem>>, %arg8: memref<2x18x18x8xf32, #tpu.memory_space<vmem>>, %arg9: memref<512x72xf32, #tpu.memory_space<vmem>>) attributes {dimension_semantics = [], scalar_prefetch = 0 : i64, scratch_operands = 2 : i64, tpu.core_type = #tpu.core_type<tc>} {
    %c0 = arith.constant 0 : index
    %c0_0 = arith.constant 0 : index
    %c0_1 = arith.constant 0 : index
    %c0_2 = arith.constant 0 : index
    %0 = vector.load %arg0[%c0, %c0_0, %c0_1, %c0_2] : memref<32x2x16x8xf32, #tpu.memory_space<vmem>>, vector<32x1x16x8xf32>
    %1 = vector.shape_cast %0 : vector<32x1x16x8xf32> to vector<32x16x8xf32>
    %c0_3 = arith.constant 0 : index
    %c1 = arith.constant 1 : index
    %c0_4 = arith.constant 0 : index
    %c0_5 = arith.constant 0 : index
    %2 = vector.load %arg0[%c0_3, %c1, %c0_4, %c0_5] : memref<32x2x16x8xf32, #tpu.memory_space<vmem>>, vector<32x1x16x8xf32>
    %3 = vector.shape_cast %2 : vector<32x1x16x8xf32> to vector<32x16x8xf32>
    %4 = arith.maximumf %1, %3 : vector<32x16x8xf32>
    %5 = vector.extract_strided_slice %4 {offsets = [0, 0, 0], sizes = [32, 16, 4], strides = [1, 1, 1]} : vector<32x16x8xf32> to vector<32x16x4xf32>
    %6 = vector.extract_strided_slice %4 {offsets = [0, 0, 4], sizes = [32, 16, 4], strides = [1, 1, 1]} : vector<32x16x8xf32> to vector<32x16x4xf32>
    %7 = arith.maximumf %5, %6 : vector<32x16x4xf32>
    %8 = vector.shape_cast %7 : vector<32x16x4xf32> to vector<2x16x16x4xf32>
    %cst = arith.constant 0.000000e+00 : f32
    %9 = vector.broadcast %cst : f32 to vector<2x1x18x8xf32>
    %c0_6 = arith.constant 0 : index
    %c0_7 = arith.constant 0 : index
    %c0_8 = arith.constant 0 : index
    %c0_9 = arith.constant 0 : index
    %10 = vector.load %arg8[%c0_6, %c0_7, %c0_8, %c0_9] : memref<2x18x18x8xf32, #tpu.memory_space<vmem>>, vector<2x1x18x8xf32>
    tpu.vector_store %arg8[%c0_6, %c0_7, %c0_8, %c0_9], %9 {strides = array<i32>} : memref<2x18x18x8xf32, #tpu.memory_space<vmem>>, vector<2x1x18x8xf32>,
    %cst_10 = arith.constant 0.000000e+00 : f32
    %11 = vector.broadcast %cst_10 : f32 to vector<2x1x18x8xf32>
    %c0_11 = arith.constant 0 : index
    %c17 = arith.constant 17 : index
    %c0_12 = arith.constant 0 : index
    %c0_13 = arith.constant 0 : index
    %12 = vector.load %arg8[%c0_11, %c17, %c0_12, %c0_13] : memref<2x18x18x8xf32, #tpu.memory_space<vmem>>, vector<2x1x18x8xf32>
    tpu.vector_store %arg8[%c0_11, %c17, %c0_12, %c0_13], %11 {strides = array<i32>} : memref<2x18x18x8xf32, #tpu.memory_space<vmem>>, vector<2x1x18x8xf32>,
    %cst_14 = arith.constant 0.000000e+00 : f32
    %13 = vector.broadcast %cst_14 : f32 to vector<2x18x1x8xf32>
    %c0_15 = arith.constant 0 : index
    %c0_16 = arith.constant 0 : index
    %c0_17 = arith.constant 0 : index
    %c0_18 = arith.constant 0 : index
    %14 = vector.load %arg8[%c0_15, %c0_16, %c0_17, %c0_18] : memref<2x18x18x8xf32, #tpu.memory_space<vmem>>, vector<2x18x1x8xf32>
    tpu.vector_store %arg8[%c0_15, %c0_16, %c0_17, %c0_18], %13 {strides = array<i32>} : memref<2x18x18x8xf32, #tpu.memory_space<vmem>>, vector<2x18x1x8xf32>,
    %cst_19 = arith.constant 0.000000e+00 : f32
    %15 = vector.broadcast %cst_19 : f32 to vector<2x18x1x8xf32>
    %c0_20 = arith.constant 0 : index
    %c0_21 = arith.constant 0 : index
    %c17_22 = arith.constant 17 : index
    %c0_23 = arith.constant 0 : index
    %16 = vector.load %arg8[%c0_20, %c0_21, %c17_22, %c0_23] : memref<2x18x18x8xf32, #tpu.memory_space<vmem>>, vector<2x18x1x8xf32>
    tpu.vector_store %arg8[%c0_20, %c0_21, %c17_22, %c0_23], %15 {strides = array<i32>} : memref<2x18x18x8xf32, #tpu.memory_space<vmem>>, vector<2x18x1x8xf32>,
    %c0_24 = arith.constant 0 : index
    %c1_25 = arith.constant 1 : index
    %c1_26 = arith.constant 1 : index
    %c0_27 = arith.constant 0 : index
    %17 = vector.load %arg8[%c0_24, %c1_25, %c1_26, %c0_27] : memref<2x18x18x8xf32, #tpu.memory_space<vmem>>, vector<2x16x16x4xf32>
    tpu.vector_store %arg8[%c0_24, %c1_25, %c1_26, %c0_27], %8 {strides = array<i32>} : memref<2x18x18x8xf32, #tpu.memory_space<vmem>>, vector<2x16x16x4xf32>,
    %c0_28 = arith.constant 0 : index
    %c0_29 = arith.constant 0 : index
    %c0_30 = arith.constant 0 : index
    %c0_31 = arith.constant 0 : index
    %18 = vector.load %arg8[%c0_28, %c0_29, %c0_30, %c0_31] : memref<2x18x18x8xf32, #tpu.memory_space<vmem>>, vector<2x16x16x4xf32>
    %19 = vector.shape_cast %18 : vector<2x16x16x4xf32> to vector<512x4xf32>
    %c0_32 = arith.constant 0 : index
    %c0_33 = arith.constant 0 : index
    %20 = vector.load %arg9[%c0_32, %c0_33] : memref<512x72xf32, #tpu.memory_space<vmem>>, vector<512x4xf32>
    tpu.vector_store %arg9[%c0_32, %c0_33], %19 {strides = array<i32>} : memref<512x72xf32, #tpu.memory_space<vmem>>, vector<512x4xf32>,
    %c0_34 = arith.constant 0 : index
    %c0_35 = arith.constant 0 : index
    %c1_36 = arith.constant 1 : index
    %c0_37 = arith.constant 0 : index
    %21 = vector.load %arg8[%c0_34, %c0_35, %c1_36, %c0_37] : memref<2x18x18x8xf32, #tpu.memory_space<vmem>>, vector<2x16x16x4xf32>
    %22 = vector.shape_cast %21 : vector<2x16x16x4xf32> to vector<512x4xf32>
    %c0_38 = arith.constant 0 : index
    %c4 = arith.constant 4 : index
    %23 = vector.load %arg9[%c0_38, %c4] : memref<512x72xf32, #tpu.memory_space<vmem>>, vector<512x4xf32>
    tpu.vector_store %arg9[%c0_38, %c4], %22 {strides = array<i32>} : memref<512x72xf32, #tpu.memory_space<vmem>>, vector<512x4xf32>,
    %c0_39 = arith.constant 0 : index
    %c0_40 = arith.constant 0 : index
    %c2 = arith.constant 2 : index
    %c0_41 = arith.constant 0 : index
    %24 = vector.load %arg8[%c0_39, %c0_40, %c2, %c0_41] : memref<2x18x18x8xf32, #tpu.memory_space<vmem>>, vector<2x16x16x4xf32>
    %25 = vector.shape_cast %24 : vector<2x16x16x4xf32> to vector<512x4xf32>
    %c0_42 = arith.constant 0 : index
    %c8 = arith.constant 8 : index
    %26 = vector.load %arg9[%c0_42, %c8] : memref<512x72xf32, #tpu.memory_space<vmem>>, vector<512x4xf32>
    tpu.vector_store %arg9[%c0_42, %c8], %25 {strides = array<i32>} : memref<512x72xf32, #tpu.memory_space<vmem>>, vector<512x4xf32>,
    %c0_43 = arith.constant 0 : index
    %c1_44 = arith.constant 1 : index
    %c0_45 = arith.constant 0 : index
    %c0_46 = arith.constant 0 : index
    %27 = vector.load %arg8[%c0_43, %c1_44, %c0_45, %c0_46] : memref<2x18x18x8xf32, #tpu.memory_space<vmem>>, vector<2x16x16x4xf32>
    %28 = vector.shape_cast %27 : vector<2x16x16x4xf32> to vector<512x4xf32>
    %c0_47 = arith.constant 0 : index
    %c12 = arith.constant 12 : index
    %29 = vector.load %arg9[%c0_47, %c12] : memref<512x72xf32, #tpu.memory_space<vmem>>, vector<512x4xf32>
    tpu.vector_store %arg9[%c0_47, %c12], %28 {strides = array<i32>} : memref<512x72xf32, #tpu.memory_space<vmem>>, vector<512x4xf32>,
    %c0_48 = arith.constant 0 : index
    %c1_49 = arith.constant 1 : index
    %c1_50 = arith.constant 1 : index
    %c0_51 = arith.constant 0 : index
    %30 = vector.load %arg8[%c0_48, %c1_49, %c1_50, %c0_51] : memref<2x18x18x8xf32, #tpu.memory_space<vmem>>, vector<2x16x16x4xf32>
    %31 = vector.shape_cast %30 : vector<2x16x16x4xf32> to vector<512x4xf32>
    %c0_52 = arith.constant 0 : index
    %c16 = arith.constant 16 : index
    %32 = vector.load %arg9[%c0_52, %c16] : memref<512x72xf32, #tpu.memory_space<vmem>>, vector<512x4xf32>
    tpu.vector_store %arg9[%c0_52, %c16], %31 {strides = array<i32>} : memref<512x72xf32, #tpu.memory_space<vmem>>, vector<512x4xf32>,
    %c0_53 = arith.constant 0 : index
    %c1_54 = arith.constant 1 : index
    %c2_55 = arith.constant 2 : index
    %c0_56 = arith.constant 0 : index
    %33 = vector.load %arg8[%c0_53, %c1_54, %c2_55, %c0_56] : memref<2x18x18x8xf32, #tpu.memory_space<vmem>>, vector<2x16x16x4xf32>
    %34 = vector.shape_cast %33 : vector<2x16x16x4xf32> to vector<512x4xf32>
    %c0_57 = arith.constant 0 : index
    %c20 = arith.constant 20 : index
    %35 = vector.load %arg9[%c0_57, %c20] : memref<512x72xf32, #tpu.memory_space<vmem>>, vector<512x4xf32>
    tpu.vector_store %arg9[%c0_57, %c20], %34 {strides = array<i32>} : memref<512x72xf32, #tpu.memory_space<vmem>>, vector<512x4xf32>,
    %c0_58 = arith.constant 0 : index
    %c2_59 = arith.constant 2 : index
    %c0_60 = arith.constant 0 : index
    %c0_61 = arith.constant 0 : index
    %36 = vector.load %arg8[%c0_58, %c2_59, %c0_60, %c0_61] : memref<2x18x18x8xf32, #tpu.memory_space<vmem>>, vector<2x16x16x4xf32>
    %37 = vector.shape_cast %36 : vector<2x16x16x4xf32> to vector<512x4xf32>
    %c0_62 = arith.constant 0 : index
    %c24 = arith.constant 24 : index
    %38 = vector.load %arg9[%c0_62, %c24] : memref<512x72xf32, #tpu.memory_space<vmem>>, vector<512x4xf32>
    tpu.vector_store %arg9[%c0_62, %c24], %37 {strides = array<i32>} : memref<512x72xf32, #tpu.memory_space<vmem>>, vector<512x4xf32>,
    %c0_63 = arith.constant 0 : index
    %c2_64 = arith.constant 2 : index
    %c1_65 = arith.constant 1 : index
    %c0_66 = arith.constant 0 : index
    %39 = vector.load %arg8[%c0_63, %c2_64, %c1_65, %c0_66] : memref<2x18x18x8xf32, #tpu.memory_space<vmem>>, vector<2x16x16x4xf32>
    %40 = vector.shape_cast %39 : vector<2x16x16x4xf32> to vector<512x4xf32>
    %c0_67 = arith.constant 0 : index
    %c28 = arith.constant 28 : index
    %41 = vector.load %arg9[%c0_67, %c28] : memref<512x72xf32, #tpu.memory_space<vmem>>, vector<512x4xf32>
    tpu.vector_store %arg9[%c0_67, %c28], %40 {strides = array<i32>} : memref<512x72xf32, #tpu.memory_space<vmem>>, vector<512x4xf32>,
    %c0_68 = arith.constant 0 : index
    %c2_69 = arith.constant 2 : index
    %c2_70 = arith.constant 2 : index
    %c0_71 = arith.constant 0 : index
    %42 = vector.load %arg8[%c0_68, %c2_69, %c2_70, %c0_71] : memref<2x18x18x8xf32, #tpu.memory_space<vmem>>, vector<2x16x16x4xf32>
    %43 = vector.shape_cast %42 : vector<2x16x16x4xf32> to vector<512x4xf32>
    %c0_72 = arith.constant 0 : index
    %c32 = arith.constant 32 : index
    %44 = vector.load %arg9[%c0_72, %c32] : memref<512x72xf32, #tpu.memory_space<vmem>>, vector<512x4xf32>
    tpu.vector_store %arg9[%c0_72, %c32], %43 {strides = array<i32>} : memref<512x72xf32, #tpu.memory_space<vmem>>, vector<512x4xf32>,
    %c0_73 = arith.constant 0 : index
    %c0_74 = arith.constant 0 : index
    %45 = vector.load %arg9[%c0_73, %c0_74] : memref<512x72xf32, #tpu.memory_space<vmem>>, vector<512x36xf32>
    %c0_75 = arith.constant 0 : index
    %c0_76 = arith.constant 0 : index
    %46 = vector.load %arg1[%c0_75, %c0_76] : memref<36x8xf32, #tpu.memory_space<vmem>>, vector<36x8xf32>
    %cst_77 = arith.constant dense<0.000000e+00> : vector<512x8xf32>
    %47 = tpu.matmul %45, %46, %cst_77 {dimension_numbers = #tpu.dot_dimension_numbers<[1], [0], [0], [1], [0, 0, 1, 1], [], []>} : vector<512x36xf32>, vector<36x8xf32>, vector<512x8xf32> -> vector<512x8xf32>
    %cst_78 = arith.constant dense<0.000000e+00> : vector<8xf32>
    %48 = vector.multi_reduction <add>, %47, %cst_78 [0] : vector<512x8xf32> to vector<8xf32>
    %49 = vector.shape_cast %48 : vector<8xf32> to vector<1x8xf32>
    %cst_79 = arith.constant 0.001953125 : f32
    %50 = vector.broadcast %cst_79 : f32 to vector<1x8xf32>
    %51 = arith.mulf %49, %50 : vector<1x8xf32>
    %52 = arith.mulf %47, %47 : vector<512x8xf32>
    %cst_80 = arith.constant dense<0.000000e+00> : vector<8xf32>
    %53 = vector.multi_reduction <add>, %52, %cst_80 [0] : vector<512x8xf32> to vector<8xf32>
    %54 = vector.shape_cast %53 : vector<8xf32> to vector<1x8xf32>
    %cst_81 = arith.constant 0.001953125 : f32
    %55 = vector.broadcast %cst_81 : f32 to vector<1x8xf32>
    %56 = arith.mulf %54, %55 : vector<1x8xf32>
    %c0_82 = arith.constant 0 : index
    %c0_83 = arith.constant 0 : index
    %57 = vector.load %arg2[%c0_82, %c0_83] : memref<1x8xf32, #tpu.memory_space<vmem>>, vector<1x8xf32>
    %58 = arith.mulf %51, %51 : vector<1x8xf32>
    %59 = arith.subf %56, %58 : vector<1x8xf32>
    %cst_84 = arith.constant 9.99999974E-6 : f32
    %60 = vector.broadcast %cst_84 : f32 to vector<1x8xf32>
    %61 = arith.addf %59, %60 : vector<1x8xf32>
    %62 = math.rsqrt %61 : vector<1x8xf32>
    %63 = arith.mulf %57, %62 : vector<1x8xf32>
    %c0_85 = arith.constant 0 : index
    %c0_86 = arith.constant 0 : index
    %64 = vector.load %arg3[%c0_85, %c0_86] : memref<1x8xf32, #tpu.memory_space<vmem>>, vector<1x8xf32>
    %65 = arith.mulf %51, %63 : vector<1x8xf32>
    %66 = arith.subf %64, %65 : vector<1x8xf32>
    %67 = vector.broadcast %63 : vector<1x8xf32> to vector<512x8xf32>
    %68 = arith.mulf %47, %67 : vector<512x8xf32>
    %69 = vector.broadcast %66 : vector<1x8xf32> to vector<512x8xf32>
    %70 = arith.addf %68, %69 : vector<512x8xf32>
    %cst_87 = arith.constant 0.000000e+00 : f32
    %71 = vector.broadcast %cst_87 : f32 to vector<512x8xf32>
    %72 = arith.maximumf %70, %71 : vector<512x8xf32>
    %73 = vector.shape_cast %72 : vector<512x8xf32> to vector<2x16x16x8xf32>
    %c0_88 = arith.constant 0 : index
    %c1_89 = arith.constant 1 : index
    %c1_90 = arith.constant 1 : index
    %c0_91 = arith.constant 0 : index
    %74 = vector.load %arg8[%c0_88, %c1_89, %c1_90, %c0_91] : memref<2x18x18x8xf32, #tpu.memory_space<vmem>>, vector<2x16x16x8xf32>
    tpu.vector_store %arg8[%c0_88, %c1_89, %c1_90, %c0_91], %73 {strides = array<i32>} : memref<2x18x18x8xf32, #tpu.memory_space<vmem>>, vector<2x16x16x8xf32>,
    %c0_92 = arith.constant 0 : index
    %c0_93 = arith.constant 0 : index
    %c0_94 = arith.constant 0 : index
    %c0_95 = arith.constant 0 : index
    %75 = vector.load %arg8[%c0_92, %c0_93, %c0_94, %c0_95] : memref<2x18x18x8xf32, #tpu.memory_space<vmem>>, vector<2x16x16x8xf32>
    %76 = vector.shape_cast %75 : vector<2x16x16x8xf32> to vector<512x8xf32>
    %c0_96 = arith.constant 0 : index
    %c0_97 = arith.constant 0 : index
    %77 = vector.load %arg9[%c0_96, %c0_97] : memref<512x72xf32, #tpu.memory_space<vmem>>, vector<512x8xf32>
    tpu.vector_store %arg9[%c0_96, %c0_97], %76 {strides = array<i32>} : memref<512x72xf32, #tpu.memory_space<vmem>>, vector<512x8xf32>,
    %c0_98 = arith.constant 0 : index
    %c0_99 = arith.constant 0 : index
    %c1_100 = arith.constant 1 : index
    %c0_101 = arith.constant 0 : index
    %78 = vector.load %arg8[%c0_98, %c0_99, %c1_100, %c0_101] : memref<2x18x18x8xf32, #tpu.memory_space<vmem>>, vector<2x16x16x8xf32>
    %79 = vector.shape_cast %78 : vector<2x16x16x8xf32> to vector<512x8xf32>
    %c0_102 = arith.constant 0 : index
    %c8_103 = arith.constant 8 : index
    %80 = vector.load %arg9[%c0_102, %c8_103] : memref<512x72xf32, #tpu.memory_space<vmem>>, vector<512x8xf32>
    tpu.vector_store %arg9[%c0_102, %c8_103], %79 {strides = array<i32>} : memref<512x72xf32, #tpu.memory_space<vmem>>, vector<512x8xf32>,
    %c0_104 = arith.constant 0 : index
    %c0_105 = arith.constant 0 : index
    %c2_106 = arith.constant 2 : index
    %c0_107 = arith.constant 0 : index
    %81 = vector.load %arg8[%c0_104, %c0_105, %c2_106, %c0_107] : memref<2x18x18x8xf32, #tpu.memory_space<vmem>>, vector<2x16x16x8xf32>
    %82 = vector.shape_cast %81 : vector<2x16x16x8xf32> to vector<512x8xf32>
    %c0_108 = arith.constant 0 : index
    %c16_109 = arith.constant 16 : index
    %83 = vector.load %arg9[%c0_108, %c16_109] : memref<512x72xf32, #tpu.memory_space<vmem>>, vector<512x8xf32>
    tpu.vector_store %arg9[%c0_108, %c16_109], %82 {strides = array<i32>} : memref<512x72xf32, #tpu.memory_space<vmem>>, vector<512x8xf32>,
    %c0_110 = arith.constant 0 : index
    %c1_111 = arith.constant 1 : index
    %c0_112 = arith.constant 0 : index
    %c0_113 = arith.constant 0 : index
    %84 = vector.load %arg8[%c0_110, %c1_111, %c0_112, %c0_113] : memref<2x18x18x8xf32, #tpu.memory_space<vmem>>, vector<2x16x16x8xf32>
    %85 = vector.shape_cast %84 : vector<2x16x16x8xf32> to vector<512x8xf32>
    %c0_114 = arith.constant 0 : index
    %c24_115 = arith.constant 24 : index
    %86 = vector.load %arg9[%c0_114, %c24_115] : memref<512x72xf32, #tpu.memory_space<vmem>>, vector<512x8xf32>
    tpu.vector_store %arg9[%c0_114, %c24_115], %85 {strides = array<i32>} : memref<512x72xf32, #tpu.memory_space<vmem>>, vector<512x8xf32>,
    %c0_116 = arith.constant 0 : index
    %c1_117 = arith.constant 1 : index
    %c1_118 = arith.constant 1 : index
    %c0_119 = arith.constant 0 : index
    %87 = vector.load %arg8[%c0_116, %c1_117, %c1_118, %c0_119] : memref<2x18x18x8xf32, #tpu.memory_space<vmem>>, vector<2x16x16x8xf32>
    %88 = vector.shape_cast %87 : vector<2x16x16x8xf32> to vector<512x8xf32>
    %c0_120 = arith.constant 0 : index
    %c32_121 = arith.constant 32 : index
    %89 = vector.load %arg9[%c0_120, %c32_121] : memref<512x72xf32, #tpu.memory_space<vmem>>, vector<512x8xf32>
    tpu.vector_store %arg9[%c0_120, %c32_121], %88 {strides = array<i32>} : memref<512x72xf32, #tpu.memory_space<vmem>>, vector<512x8xf32>,
    %c0_122 = arith.constant 0 : index
    %c1_123 = arith.constant 1 : index
    %c2_124 = arith.constant 2 : index
    %c0_125 = arith.constant 0 : index
    %90 = vector.load %arg8[%c0_122, %c1_123, %c2_124, %c0_125] : memref<2x18x18x8xf32, #tpu.memory_space<vmem>>, vector<2x16x16x8xf32>
    %91 = vector.shape_cast %90 : vector<2x16x16x8xf32> to vector<512x8xf32>
    %c0_126 = arith.constant 0 : index
    %c40 = arith.constant 40 : index
    %92 = vector.load %arg9[%c0_126, %c40] : memref<512x72xf32, #tpu.memory_space<vmem>>, vector<512x8xf32>
    tpu.vector_store %arg9[%c0_126, %c40], %91 {strides = array<i32>} : memref<512x72xf32, #tpu.memory_space<vmem>>, vector<512x8xf32>,
    %c0_127 = arith.constant 0 : index
    %c2_128 = arith.constant 2 : index
    %c0_129 = arith.constant 0 : index
    %c0_130 = arith.constant 0 : index
    %93 = vector.load %arg8[%c0_127, %c2_128, %c0_129, %c0_130] : memref<2x18x18x8xf32, #tpu.memory_space<vmem>>, vector<2x16x16x8xf32>
    %94 = vector.shape_cast %93 : vector<2x16x16x8xf32> to vector<512x8xf32>
    %c0_131 = arith.constant 0 : index
    %c48 = arith.constant 48 : index
    %95 = vector.load %arg9[%c0_131, %c48] : memref<512x72xf32, #tpu.memory_space<vmem>>, vector<512x8xf32>
    tpu.vector_store %arg9[%c0_131, %c48], %94 {strides = array<i32>} : memref<512x72xf32, #tpu.memory_space<vmem>>, vector<512x8xf32>,
    %c0_132 = arith.constant 0 : index
    %c2_133 = arith.constant 2 : index
    %c1_134 = arith.constant 1 : index
    %c0_135 = arith.constant 0 : index
    %96 = vector.load %arg8[%c0_132, %c2_133, %c1_134, %c0_135] : memref<2x18x18x8xf32, #tpu.memory_space<vmem>>, vector<2x16x16x8xf32>
    %97 = vector.shape_cast %96 : vector<2x16x16x8xf32> to vector<512x8xf32>
    %c0_136 = arith.constant 0 : index
    %c56 = arith.constant 56 : index
    %98 = vector.load %arg9[%c0_136, %c56] : memref<512x72xf32, #tpu.memory_space<vmem>>, vector<512x8xf32>
    tpu.vector_store %arg9[%c0_136, %c56], %97 {strides = array<i32>} : memref<512x72xf32, #tpu.memory_space<vmem>>, vector<512x8xf32>,
    %c0_137 = arith.constant 0 : index
    %c2_138 = arith.constant 2 : index
    %c2_139 = arith.constant 2 : index
    %c0_140 = arith.constant 0 : index
    %99 = vector.load %arg8[%c0_137, %c2_138, %c2_139, %c0_140] : memref<2x18x18x8xf32, #tpu.memory_space<vmem>>, vector<2x16x16x8xf32>
    %100 = vector.shape_cast %99 : vector<2x16x16x8xf32> to vector<512x8xf32>
    %c0_141 = arith.constant 0 : index
    %c64 = arith.constant 64 : index
    %101 = vector.load %arg9[%c0_141, %c64] : memref<512x72xf32, #tpu.memory_space<vmem>>, vector<512x8xf32>
    tpu.vector_store %arg9[%c0_141, %c64], %100 {strides = array<i32>} : memref<512x72xf32, #tpu.memory_space<vmem>>, vector<512x8xf32>,
    %c0_142 = arith.constant 0 : index
    %c0_143 = arith.constant 0 : index
    %102 = vector.load %arg9[%c0_142, %c0_143] : memref<512x72xf32, #tpu.memory_space<vmem>>, vector<512x72xf32>
    %c0_144 = arith.constant 0 : index
    %c0_145 = arith.constant 0 : index
    %103 = vector.load %arg4[%c0_144, %c0_145] : memref<8x72xf32, #tpu.memory_space<vmem>>, vector<8x72xf32>
    %cst_146 = arith.constant dense<0.000000e+00> : vector<8x512xf32>
    %104 = tpu.matmul %103, %102, %cst_146 {dimension_numbers = #tpu.dot_dimension_numbers<[1], [1], [0], [0], [0, 0, 1, 0], [], []>} : vector<8x72xf32>, vector<512x72xf32>, vector<8x512xf32> -> vector<8x512xf32>
    %cst_147 = arith.constant dense<0.000000e+00> : vector<8xf32>
    %105 = vector.multi_reduction <add>, %104, %cst_147 [1] : vector<8x512xf32> to vector<8xf32>
    %106 = vector.shape_cast %105 : vector<8xf32> to vector<8x1xf32>
    %cst_148 = arith.constant 0.001953125 : f32
    %107 = vector.broadcast %cst_148 : f32 to vector<8x1xf32>
    %108 = arith.mulf %106, %107 : vector<8x1xf32>
    %109 = arith.mulf %104, %104 : vector<8x512xf32>
    %cst_149 = arith.constant dense<0.000000e+00> : vector<8xf32>
    %110 = vector.multi_reduction <add>, %109, %cst_149 [1] : vector<8x512xf32> to vector<8xf32>
    %111 = vector.shape_cast %110 : vector<8xf32> to vector<8x1xf32>
    %cst_150 = arith.constant 0.001953125 : f32
    %112 = vector.broadcast %cst_150 : f32 to vector<8x1xf32>
    %113 = arith.mulf %111, %112 : vector<8x1xf32>
    %c0_151 = arith.constant 0 : index
    %c0_152 = arith.constant 0 : index
    %114 = vector.load %arg5[%c0_151, %c0_152] : memref<8x1xf32, #tpu.memory_space<vmem>>, vector<8x1xf32>
    %115 = arith.mulf %108, %108 : vector<8x1xf32>
    %116 = arith.subf %113, %115 : vector<8x1xf32>
    %cst_153 = arith.constant 9.99999974E-6 : f32
    %117 = vector.broadcast %cst_153 : f32 to vector<8x1xf32>
    %118 = arith.addf %116, %117 : vector<8x1xf32>
    %119 = math.rsqrt %118 : vector<8x1xf32>
    %120 = arith.mulf %114, %119 : vector<8x1xf32>
    %c0_154 = arith.constant 0 : index
    %c0_155 = arith.constant 0 : index
    %121 = vector.load %arg6[%c0_154, %c0_155] : memref<8x1xf32, #tpu.memory_space<vmem>>, vector<8x1xf32>
    %122 = arith.mulf %108, %120 : vector<8x1xf32>
    %123 = arith.subf %121, %122 : vector<8x1xf32>
    %124 = vector.broadcast %120 : vector<8x1xf32> to vector<8x512xf32>
    %125 = arith.mulf %104, %124 : vector<8x512xf32>
    %126 = vector.broadcast %123 : vector<8x1xf32> to vector<8x512xf32>
    %127 = arith.addf %125, %126 : vector<8x512xf32>
    %cst_156 = arith.constant 0.000000e+00 : f32
    %128 = vector.broadcast %cst_156 : f32 to vector<8x512xf32>
    %129 = arith.maximumf %127, %128 : vector<8x512xf32>
    %130 = vector.extract_strided_slice %129 {offsets = [0, 0], sizes = [8, 256], strides = [1, 1]} : vector<8x512xf32> to vector<8x256xf32>
    %c0_157 = arith.constant 0 : index
    %c0_158 = arith.constant 0 : index
    %c0_159 = arith.constant 0 : index
    %131 = vector.load %arg7[%c0_157, %c0_158, %c0_159] : memref<2x8x256xf32, #tpu.memory_space<vmem>>, vector<1x8x256xf32>
    %132 = vector.shape_cast %131 : vector<1x8x256xf32> to vector<8x256xf32>
    %133 = vector.shape_cast %130 : vector<8x256xf32> to vector<1x8x256xf32>
    tpu.vector_store %arg7[%c0_157, %c0_158, %c0_159], %133 {strides = array<i32>} : memref<2x8x256xf32, #tpu.memory_space<vmem>>, vector<1x8x256xf32>,
    %134 = vector.extract_strided_slice %129 {offsets = [0, 256], sizes = [8, 256], strides = [1, 1]} : vector<8x512xf32> to vector<8x256xf32>
    %c1_160 = arith.constant 1 : index
    %c0_161 = arith.constant 0 : index
    %c0_162 = arith.constant 0 : index
    %135 = vector.load %arg7[%c1_160, %c0_161, %c0_162] : memref<2x8x256xf32, #tpu.memory_space<vmem>>, vector<1x8x256xf32>
    %136 = vector.shape_cast %135 : vector<1x8x256xf32> to vector<8x256xf32>
    %137 = vector.shape_cast %134 : vector<8x256xf32> to vector<1x8x256xf32>
    tpu.vector_store %arg7[%c1_160, %c0_161, %c0_162], %137 {strides = array<i32>} : memref<2x8x256xf32, #tpu.memory_space<vmem>>, vector<1x8x256xf32>,
    return
  }
}

</mosaic_0001>

<bundles_post_ra>
// kernel: tpu_custom_call.1
= control target key start
LH: loop header
LB: loop body
LE: loop exit
PB: predicated region body
PF: predicated region fallthrough
CT: control target
= control target key end

     0   :  { %vm540_vm0 = vcmask 64512   ;;  %vm543_vm1 = vcmask 58368   ;;  %vm555_vm2 = vcmask 57344   ;;  %v9326_v10 = vmov 0.0   ;;  %s9327_s17 = smov 124   ;;  %s14565_s0 = inlined_call_operand.vmem [shape: f32[32,2,16,8], index: 0, kind: input, shape index: {}]   ;;  %s14566_s1 = inlined_call_operand.vmem [shape: f32[36,8], index: 1, kind: input, shape index: {}]   ;;  %s14567_s2 = inlined_call_operand.vmem [shape: f32[1,8], index: 2, kind: input, shape index: {}]   ;;  %s14568_s3 = inlined_call_operand.vmem [shape: f32[1,8], index: 3, kind: input, shape index: {}]   ;;  %s14569_s4 = inlined_call_operand.vmem [shape: f32[8,72], index: 4, kind: input, shape index: {}]   ;;  %s14570_s5 = inlined_call_operand.vmem [shape: f32[8,1], index: 5, kind: input, shape index: {}]   ;;  %s14571_s6 = inlined_call_operand.vmem [shape: f32[8,1], index: 6, kind: input, shape index: {}]   ;;  %s14572_s7 = inlined_call_operand.hbm [shape: f32[2,8,256], index: 7, kind: output, shape index: {}]  }
   0x1   :  { %v29_v0 = vld [vmem:[%s14565_s0 + $0x20] sm:$0xff]  ;;  %v8844_v1 = vld [vmem:[%s14565_s0 + $0x30] sm:$0xff]  ;;  %v9400_v5 = vld [vmem:[%s14565_s0 + $0x28] sm:$0xff]  ;;  %542 = vst.msk [vmem:[#allocation2 + $0x8] sm:$0xff] %vm540_vm0, %v9326_v10 }
   0x2   :  { %v27_v2 = vld [vmem:[%s14565_s0] sm:$0xff]  ;;  %v9392_v3 = vmax.f32 %v29_v0, %v8844_v1  ;;  %v8842_v4 = vld [vmem:[%s14565_s0 + $0x10] sm:$0xff]  ;;  %v9405_v6 = vld [vmem:[%s14565_s0 + $0x38] sm:$0xff]  ;;  %544 = vst.msk [vmem:[#allocation2 + $0x10] sm:$0x3] %vm543_vm1, %v9326_v10 }
   0x3   :  { %v9407_v7 = vmax.f32 %v27_v2, %v8842_v4  ;;  %v9412_v8 = vld [vmem:[%s14565_s0 + $0x8] sm:$0xff]  ;;  %v9417_v9 = vld [vmem:[%s14565_s0 + $0x18] sm:$0xff]  ;;  %541 = vst.msk [vmem:[#allocation2] sm:$0xff] %vm540_vm0, %v9326_v10  ;;  %545 = vst.msk [vmem:[#allocation2 + $0x1b0] sm:$0xff] %vm540_vm0, %v9326_v10  ;;  %v9575_v11 = vmax.f32 %v9400_v5, %v9405_v6 }
   0x4   :  { %546 = vst.msk [vmem:[#allocation2 + $0x1b8] sm:$0xff] %vm540_vm0, %v9326_v10  ;;  %549 = vst.msk [vmem:[#allocation2 + $0x198] sm:$0xff] %vm540_vm0, %v9326_v10  ;;  %288 = vrot.lane.b32.xlu1 %v9392_v3, %s9327_s17  ;;  %v9597_v12 = vmax.f32 %v9412_v8, %v9417_v9  ;;  %v32_v13 = vld [vmem:[%s14565_s0 + $0x48] sm:$0xff]  ;;  %v8847_v14 = vld [vmem:[%s14565_s0 + $0x58] sm:$0xff] }
   0x5   :  { %547 = vst.msk [vmem:[#allocation2 + $0x1c0] sm:$0x3] %vm543_vm1, %v9326_v10  ;;  %551 = vst.msk [vmem:[#allocation2 + $0x1a8] sm:$0x3] %vm543_vm1, %v9326_v10  ;;  %284 = vrot.lane.b32.xlu0 %v9407_v7, %s9327_s17  ;;  %v31_v15 = vld [vmem:[%s14565_s0 + $0x40] sm:$0xff]  ;;  %v8846_v16 = vld [vmem:[%s14565_s0 + $0x50] sm:$0xff]  ;;  %v9613_v17 = vmax.f32 %v32_v13, %v8847_v14 }
   0x6   :  { %550 = vst.msk [vmem:[#allocation2 + $0x1a0] sm:$0xff] %vm540_vm0, %v9326_v10  ;;  %552 = vst.msk [vmem:[#allocation2 + $0x348] sm:$0xff] %vm540_vm0, %v9326_v10  ;;  %v9617_v18 = vmax.f32 %v31_v15, %v8846_v16  ;;  %v34_v19 = vld [vmem:[%s14565_s0 + $0x68] sm:$0xff]  ;;  %v8849_v20 = vld [vmem:[%s14565_s0 + $0x78] sm:$0xff] }
   0x7   :  { %553 = vst.msk [vmem:[#allocation2 + $0x350] sm:$0xff] %vm540_vm0, %v9326_v10  ;;  %v33_v21 = vld [vmem:[%s14565_s0 + $0x60] sm:$0xff]  ;;  %v8848_v22 = vld [vmem:[%s14565_s0 + $0x70] sm:$0xff]  ;;  %v9633_v23 = vmax.f32 %v34_v19, %v8849_v20  ;;  %v36_v25 = vld [vmem:[%s14565_s0 + $0x88] sm:$0xff] }
   0x8   :  { %554 = vst.msk [vmem:[#allocation2 + $0x358] sm:$0x3] %vm543_vm1, %v9326_v10  ;;  %290 = vrot.lane.b32.xlu1 %v9575_v11, %s9327_s17  ;;  %v9637_v24 = vmax.f32 %v33_v21, %v8848_v22  ;;  %v8851_v26 = vld [vmem:[%s14565_s0 + $0x98] sm:$0xff]  ;;  %v35_v27 = vld [vmem:[%s14565_s0 + $0x80] sm:$0xff]  ;;  %v8850_v28 = vld [vmem:[%s14565_s0 + $0x90] sm:$0xff] }
   0x9   :  { %557 = vst.msk [vmem:[#allocation2 + $0x18] sm:$0x1] %vm555_vm2, %v9326_v10  ;;  %558 = vst.msk [vmem:[#allocation2 + $0x30] sm:$0x1] %vm555_vm2, %v9326_v10  ;;  %286 = vrot.lane.b32.xlu0 %v9597_v12, %s9327_s17  ;;  %v9653_v29 = vmax.f32 %v36_v25, %v8851_v26  ;;  %v9657_v30 = vmax.f32 %v35_v27, %v8850_v28  ;;  %v38_v31 = vld [vmem:[%s14565_s0 + $0xa8] sm:$0xff]  ;;  %v8853_v32 = vld [vmem:[%s14565_s0 + $0xb8] sm:$0xff] }
   0xa   :  { %559 = vst.msk [vmem:[#allocation2 + $0x48] sm:$0x1] %vm555_vm2, %v9326_v10  ;;  %560 = vst.msk [vmem:[#allocation2 + $0x60] sm:$0x1] %vm555_vm2, %v9326_v10  ;;  %v37_v33 = vld [vmem:[%s14565_s0 + $0xa0] sm:$0xff]  ;;  %v8852_v34 = vld [vmem:[%s14565_s0 + $0xb0] sm:$0xff]  ;;  %v9673_v35 = vmax.f32 %v38_v31, %v8853_v32 }
   0xb   :  { %561 = vst.msk [vmem:[#allocation2 + $0x78] sm:$0x1] %vm555_vm2, %v9326_v10  ;;  %562 = vst.msk [vmem:[#allocation2 + $0x90] sm:$0x1] %vm555_vm2, %v9326_v10  ;;  %v9677_v36 = vmax.f32 %v37_v33, %v8852_v34  ;;  %v40_v37 = vld [vmem:[%s14565_s0 + $0xc8] sm:$0xff]  ;;  %v8855_v38 = vld [vmem:[%s14565_s0 + $0xd8] sm:$0xff] }
   0xc   :  { %563 = vst.msk [vmem:[#allocation2 + $0xa8] sm:$0x1] %vm555_vm2, %v9326_v10  ;;  %564 = vst.msk [vmem:[#allocation2 + $0xc0] sm:$0x1] %vm555_vm2, %v9326_v10  ;;  %294 = vrot.lane.b32.xlu1 %v9613_v17, %s9327_s17  ;;  %v39_v39 = vld [vmem:[%s14565_s0 + $0xc0] sm:$0xff]  ;;  %v8854_v40 = vld [vmem:[%s14565_s0 + $0xd0] sm:$0xff]  ;;  %v9693_v41 = vmax.f32 %v40_v37, %v8855_v38 }
   0xd   :  { %565 = vst.msk [vmem:[#allocation2 + $0xd8] sm:$0x1] %vm555_vm2, %v9326_v10  ;;  %566 = vst.msk [vmem:[#allocation2 + $0xf0] sm:$0x1] %vm555_vm2, %v9326_v10  ;;  %292 = vrot.lane.b32.xlu0 %v9617_v18, %s9327_s17  ;;  %v9697_v42 = vmax.f32 %v39_v39, %v8854_v40  ;;  %v42_v43 = vld [vmem:[%s14565_s0 + $0xe8] sm:$0xff]  ;;  %v8857_v44 = vld [vmem:[%s14565_s0 + $0xf8] sm:$0xff] }
   0xe   :  { %567 = vst.msk [vmem:[#allocation2 + $0x108] sm:$0x1] %vm555_vm2, %v9326_v10  ;;  %568 = vst.msk [vmem:[#allocation2 + $0x120] sm:$0x1] %vm555_vm2, %v9326_v10  ;;  %v41_v45 = vld [vmem:[%s14565_s0 + $0xe0] sm:$0xff]  ;;  %v8856_v46 = vld [vmem:[%s14565_s0 + $0xf0] sm:$0xff]  ;;  %v9713_v47 = vmax.f32 %v42_v43, %v8857_v44 }
   0xf   :  { %569 = vst.msk [vmem:[#allocation2 + $0x138] sm:$0x1] %vm555_vm2, %v9326_v10  ;;  %570 = vst.msk [vmem:[#allocation2 + $0x150] sm:$0x1] %vm555_vm2, %v9326_v10  ;;  %v9717_v48 = vmax.f32 %v41_v45, %v8856_v46  ;;  %v44_v49 = vld [vmem:[%s14565_s0 + $0x108] sm:$0xff]  ;;  %v8859_v50 = vld [vmem:[%s14565_s0 + $0x118] sm:$0xff] }
  0x10   :  { %571 = vst.msk [vmem:[#allocation2 + $0x168] sm:$0x1] %vm555_vm2, %v9326_v10  ;;  %572 = vst.msk [vmem:[#allocation2 + $0x180] sm:$0x1] %vm555_vm2, %v9326_v10  ;;  %298 = vrot.lane.b32.xlu1 %v9633_v23, %s9327_s17  ;;  %v43_v51 = vld [vmem:[%s14565_s0 + $0x100] sm:$0xff]  ;;  %v8858_v52 = vld [vmem:[%s14565_s0 + $0x110] sm:$0xff]  ;;  %v9733_v53 = vmax.f32 %v44_v49, %v8859_v50 }
  0x11   :  { %575 = vst.msk [vmem:[#allocation2 + $0x1c8] sm:$0x1] %vm555_vm2, %v9326_v10  ;;  %576 = vst.msk [vmem:[#allocation2 + $0x1e0] sm:$0x1] %vm555_vm2, %v9326_v10  ;;  %296 = vrot.lane.b32.xlu0 %v9637_v24, %s9327_s17  ;;  %v9737_v54 = vmax.f32 %v43_v51, %v8858_v52  ;;  %v46_v55 = vld [vmem:[%s14565_s0 + $0x128] sm:$0xff]  ;;  %v8861_v56 = vld [vmem:[%s14565_s0 + $0x138] sm:$0xff] }
  0x12   :  { %577 = vst.msk [vmem:[#allocation2 + $0x1f8] sm:$0x1] %vm555_vm2, %v9326_v10  ;;  %578 = vst.msk [vmem:[#allocation2 + $0x210] sm:$0x1] %vm555_vm2, %v9326_v10  ;;  %v45_v57 = vld [vmem:[%s14565_s0 + $0x120] sm:$0xff]  ;;  %v8860_v58 = vld [vmem:[%s14565_s0 + $0x130] sm:$0xff]  ;;  %v9753_v59 = vmax.f32 %v46_v55, %v8861_v56 }
  0x13   :  { %579 = vst.msk [vmem:[#allocation2 + $0x228] sm:$0x1] %vm555_vm2, %v9326_v10  ;;  %580 = vst.msk [vmem:[#allocation2 + $0x240] sm:$0x1] %vm555_vm2, %v9326_v10  ;;  %v9757_v60 = vmax.f32 %v45_v57, %v8860_v58  ;;  %v48_v61 = vld [vmem:[%s14565_s0 + $0x148] sm:$0xff]  ;;  %v8863_v62 = vld [vmem:[%s14565_s0 + $0x158] sm:$0xff] }
  0x14   :  { %581 = vst.msk [vmem:[#allocation2 + $0x258] sm:$0x1] %vm555_vm2, %v9326_v10  ;;  %582 = vst.msk [vmem:[#allocation2 + $0x270] sm:$0x1] %vm555_vm2, %v9326_v10  ;;  %302 = vrot.lane.b32.xlu1 %v9653_v29, %s9327_s17  ;;  %v47_v63 = vld [vmem:[%s14565_s0 + $0x140] sm:$0xff]  ;;  %v8862_v0 = vld [vmem:[%s14565_s0 + $0x150] sm:$0xff]  ;;  %v9773_v1 = vmax.f32 %v48_v61, %v8863_v62 }
  0x15   :  { %583 = vst.msk [vmem:[#allocation2 + $0x288] sm:$0x1] %vm555_vm2, %v9326_v10  ;;  %584 = vst.msk [vmem:[#allocation2 + $0x2a0] sm:$0x1] %vm555_vm2, %v9326_v10  ;;  %300 = vrot.lane.b32.xlu0 %v9657_v30, %s9327_s17  ;;  %v9777_v2 = vmax.f32 %v47_v63, %v8862_v0  ;;  %v50_v4 = vld [vmem:[%s14565_s0 + $0x168] sm:$0xff]  ;;  %v8865_v5 = vld [vmem:[%s14565_s0 + $0x178] sm:$0xff] }
  0x16   :  { %585 = vst.msk [vmem:[#allocation2 + $0x2b8] sm:$0x1] %vm555_vm2, %v9326_v10  ;;  %586 = vst.msk [vmem:[#allocation2 + $0x2d0] sm:$0x1] %vm555_vm2, %v9326_v10  ;;  %v49_v6 = vld [vmem:[%s14565_s0 + $0x160] sm:$0xff]  ;;  %v8864_v8 = vld [vmem:[%s14565_s0 + $0x170] sm:$0xff]  ;;  %v9793_v9 = vmax.f32 %v50_v4, %v8865_v5 }
  0x17   :  { %587 = vst.msk [vmem:[#allocation2 + $0x2e8] sm:$0x1] %vm555_vm2, %v9326_v10  ;;  %588 = vst.msk [vmem:[#allocation2 + $0x300] sm:$0x1] %vm555_vm2, %v9326_v10 }
  0x18   :  { %589 = vst.msk [vmem:[#allocation2 + $0x318] sm:$0x1] %vm555_vm2, %v9326_v10  ;;  %590 = vst.msk [vmem:[#allocation2 + $0x330] sm:$0x1] %vm555_vm2, %v9326_v10  ;;  %306 = vrot.lane.b32.xlu1 %v9673_v35, %s9327_s17 }
  0x19   :  { %593 = vst.msk [vmem:[#allocation2 + $0x29] sm:$0x1] %vm555_vm2, %v9326_v10  ;;  %594 = vst.msk [vmem:[#allocation2 + $0x41] sm:$0x1] %vm555_vm2, %v9326_v10  ;;  %304 = vrot.lane.b32.xlu0 %v9677_v36, %s9327_s17 }
  0x1a   :  { %595 = vst.msk [vmem:[#allocation2 + $0x59] sm:$0x1] %vm555_vm2, %v9326_v10  ;;  %596 = vst.msk [vmem:[#allocation2 + $0x71] sm:$0x1] %vm555_vm2, %v9326_v10 }
  0x1b   :  { %597 = vst.msk [vmem:[#allocation2 + $0x89] sm:$0x1] %vm555_vm2, %v9326_v10  ;;  %598 = vst.msk [vmem:[#allocation2 + $0xa1] sm:$0x1] %vm555_vm2, %v9326_v10 }
  0x1c   :  { %599 = vst.msk [vmem:[#allocation2 + $0xb9] sm:$0x1] %vm555_vm2, %v9326_v10  ;;  %600 = vst.msk [vmem:[#allocation2 + $0xd1] sm:$0x1] %vm555_vm2, %v9326_v10  ;;  %310 = vrot.lane.b32.xlu1 %v9693_v41, %s9327_s17 }
  0x1d   :  { %601 = vst.msk [vmem:[#allocation2 + $0xe9] sm:$0x1] %vm555_vm2, %v9326_v10  ;;  %602 = vst.msk [vmem:[#allocation2 + $0x101] sm:$0x1] %vm555_vm2, %v9326_v10  ;;  %308 = vrot.lane.b32.xlu0 %v9697_v42, %s9327_s17 }
  0x1e   :  { %603 = vst.msk [vmem:[#allocation2 + $0x119] sm:$0x1] %vm555_vm2, %v9326_v10  ;;  %604 = vst.msk [vmem:[#allocation2 + $0x131] sm:$0x1] %vm555_vm2, %v9326_v10 }
  0x1f   :  { %605 = vst.msk [vmem:[#allocation2 + $0x149] sm:$0x1] %vm555_vm2, %v9326_v10  ;;  %606 = vst.msk [vmem:[#allocation2 + $0x161] sm:$0x1] %vm555_vm2, %v9326_v10 }
  0x20   :  { %607 = vst.msk [vmem:[#allocation2 + $0x179] sm:$0x1] %vm555_vm2, %v9326_v10  ;;  %608 = vst.msk [vmem:[#allocation2 + $0x191] sm:$0x1] %vm555_vm2, %v9326_v10  ;;  %314 = vrot.lane.b32.xlu1 %v9713_v47, %s9327_s17 }
  0x21   :  { %611 = vst.msk [vmem:[#allocation2 + $0x1d9] sm:$0x1] %vm555_vm2, %v9326_v10  ;;  %612 = vst.msk [vmem:[#allocation2 + $0x1f1] sm:$0x1] %vm555_vm2, %v9326_v10  ;;  %312 = vrot.lane.b32.xlu0 %v9717_v48, %s9327_s17 }
  0x22   :  { %613 = vst.msk [vmem:[#allocation2 + $0x209] sm:$0x1] %vm555_vm2, %v9326_v10  ;;  %614 = vst.msk [vmem:[#allocation2 + $0x221] sm:$0x1] %vm555_vm2, %v9326_v10 }
  0x23   :  { %615 = vst.msk [vmem:[#allocation2 + $0x239] sm:$0x1] %vm555_vm2, %v9326_v10  ;;  %616 = vst.msk [vmem:[#allocation2 + $0x251] sm:$0x1] %vm555_vm2, %v9326_v10 }
  0x24   :  { %617 = vst.msk [vmem:[#allocation2 + $0x269] sm:$0x1] %vm555_vm2, %v9326_v10  ;;  %618 = vst.msk [vmem:[#allocation2 + $0x281] sm:$0x1] %vm555_vm2, %v9326_v10  ;;  %318 = vrot.lane.b32.xlu1 %v9733_v53, %s9327_s17 }
  0x25   :  { %619 = vst.msk [vmem:[#allocation2 + $0x299] sm:$0x1] %vm555_vm2, %v9326_v10  ;;  %620 = vst.msk [vmem:[#allocation2 + $0x2b1] sm:$0x1] %vm555_vm2, %v9326_v10  ;;  %316 = vrot.lane.b32.xlu0 %v9737_v54, %s9327_s17 }
  0x26   :  { %621 = vst.msk [vmem:[#allocation2 + $0x2c9] sm:$0x1] %vm555_vm2, %v9326_v10  ;;  %622 = vst.msk [vmem:[#allocation2 + $0x2e1] sm:$0x1] %vm555_vm2, %v9326_v10 }
  0x27   :  { %623 = vst.msk [vmem:[#allocation2 + $0x2f9] sm:$0x1] %vm555_vm2, %v9326_v10  ;;  %624 = vst.msk [vmem:[#allocation2 + $0x311] sm:$0x1] %vm555_vm2, %v9326_v10 }
  0x28   :  { %625 = vst.msk [vmem:[#allocation2 + $0x329] sm:$0x1] %vm555_vm2, %v9326_v10  ;;  %626 = vst.msk [vmem:[#allocation2 + $0x341] sm:$0x1] %vm555_vm2, %v9326_v10  ;;  %322 = vrot.lane.b32.xlu1 %v9753_v59, %s9327_s17 }
  0x29   :  { %556 = vst.msk [vmem:[#allocation2] sm:$0x1] %vm555_vm2, %v9326_v10  ;;  %573 = vst.msk [vmem:[#allocation2 + $0x198] sm:$0x1] %vm555_vm2, %v9326_v10  ;;  %320 = vrot.lane.b32.xlu0 %v9757_v60, %s9327_s17 }
  0x2a   :  { %574 = vst.msk [vmem:[#allocation2 + $0x1b0] sm:$0x1] %vm555_vm2, %v9326_v10  ;;  %591 = vst.msk [vmem:[#allocation2 + $0x348] sm:$0x1] %vm555_vm2, %v9326_v10 }
  0x2b   :  { %592 = vst.msk [vmem:[#allocation2 + $0x11] sm:$0x1] %vm555_vm2, %v9326_v10  ;;  %609 = vst.msk [vmem:[#allocation2 + $0x1a9] sm:$0x1] %vm555_vm2, %v9326_v10 }
  0x2c   :  { %610 = vst.msk [vmem:[#allocation2 + $0x1c1] sm:$0x1] %vm555_vm2, %v9326_v10  ;;  %627 = vst.msk [vmem:[#allocation2 + $0x359] sm:$0x1] %vm555_vm2, %v9326_v10  ;;  %326 = vrot.lane.b32.xlu1 %v9773_v1, %s9327_s17 }
  0x2d   :  { %12 = vsyncpa [#allocation5], 0  ;;  %324 = vrot.lane.b32.xlu0 %v9777_v2, %s9327_s17  ;;  %v9797_v10 = vmax.f32 %v49_v6, %v8864_v8  ;;  %v52_v13 = vld [vmem:[%s14565_s0 + $0x188] sm:$0xff]  ;;  %v8867_v14 = vld [vmem:[%s14565_s0 + $0x198] sm:$0xff]  ;;  %vm629_vm3 = vcmask 31744   ;;  %vm1142_vm4 = vcmask 64544  }
  0x2e   :  { %v51_v15 = vld [vmem:[%s14565_s0 + $0x180] sm:$0xff]  ;;  %v8866_v16 = vld [vmem:[%s14565_s0 + $0x190] sm:$0xff]  ;;  %v9813_v19 = vmax.f32 %v52_v13, %v8867_v14  ;;  %v54_v21 = vld [vmem:[%s14565_s0 + $0x1a8] sm:$0xff]  ;;  %vm1527_vm5 = vcmask 97344   ;;  %s9330_s15 = smov 12   ;;  %vm1912_vm6 = vcmask 130144  }
  0x2f   :  { %v9817_v20 = vmax.f32 %v51_v15, %v8866_v16  ;;  %v8869_v22 = vld [vmem:[%s14565_s0 + $0x1b8] sm:$0xff]  ;;  %v53_v25 = vld [vmem:[%s14565_s0 + $0x1a0] sm:$0xff]  ;;  %v8868_v26 = vld [vmem:[%s14565_s0 + $0x1b0] sm:$0xff]  ;;  %s9331_s16 = smov 16   ;;  %vm2297_vm7 = vcmask 162944   ;;  %s9332_s18 = smov 20  }
  0x30   :  { %330 = vrot.lane.b32.xlu1 %v9793_v9, %s9327_s17  ;;  %v9833_v27 = vmax.f32 %v54_v21, %v8869_v22  ;;  %v9837_v28 = vmax.f32 %v53_v25, %v8868_v26  ;;  %v56_v31 = vld [vmem:[%s14565_s0 + $0x1c8] sm:$0xff]  ;;  %v8871_v32 = vld [vmem:[%s14565_s0 + $0x1d8] sm:$0xff]  ;;  %v55_v33 = vld [vmem:[%s14565_s0 + $0x1c0] sm:$0xff]  ;;  %vm2682_vm8 = vcmask 195744   ;;  %s9333_s19 = smov 24   ;;  %vm3068_vm9 = vcmask 228544  }
  0x31   :  { %328 = vrot.lane.b32.xlu0 %v9797_v10, %s9327_s17  ;;  %v8870_v34 = vld [vmem:[%s14565_s0 + $0x1d0] sm:$0xff]  ;;  %v9853_v37 = vmax.f32 %v56_v31, %v8871_v32  ;;  %v58_v39 = vld [vmem:[%s14565_s0 + $0x1e8] sm:$0xff]  ;;  %v8873_v40 = vld [vmem:[%s14565_s0 + $0x1f8] sm:$0xff]  ;;  %s9334_s20 = smov 28   ;;  %vm3453_vm10 = vcmask 261344   ;;  %vm4165_vm11 = vcmask 1043456  }
  0x32   :  { %v9857_v38 = vmax.f32 %v55_v33, %v8870_v34  ;;  %v57_v43 = vld [vmem:[%s14565_s0 + $0x1e0] sm:$0xff]  ;;  %v8872_v44 = vld [vmem:[%s14565_s0 + $0x1f0] sm:$0xff]  ;;  %v9873_v45 = vmax.f32 %v58_v39, %v8873_v40  ;;  %v60_v49 = vld [vmem:[%s14565_s0 + $0x208] sm:$0xff]  ;;  %vm3838_vm12 = vcmask 294144   ;;  %vm3972_vm13 = vcmask 293888   ;;  %s9338_s12 = smov 56  }
  0x33   :  { %v9877_v46 = vmax.f32 %v57_v43, %v8872_v44  ;;  %v8875_v50 = vld [vmem:[%s14565_s0 + $0x218] sm:$0xff]  ;;  %v59_v51 = vld [vmem:[%s14565_s0 + $0x200] sm:$0xff]  ;;  %v8874_v52 = vld [vmem:[%s14565_s0 + $0x210] sm:$0xff]  ;;  %vm5611_vm14 = vcmask 130112   ;;  %vm5996_vm15 = vcmask 195712   ;;  %vm6766_vm1 = vcmask 326912  }
  0x34   :  { %334 = vrot.lane.b32.xlu1 %v9813_v19, %s9327_s17  ;;  %v9893_v55 = vmax.f32 %v60_v49, %v8875_v50  ;;  %v9897_v56 = vmax.f32 %v59_v51, %v8874_v52  ;;  %v62_v57 = vld [vmem:[%s14565_s0 + $0x228] sm:$0xff]  ;;  %v8877_v58 = vld [vmem:[%s14565_s0 + $0x238] sm:$0xff]  ;;  %v61_v61 = vld [vmem:[%s14565_s0 + $0x220] sm:$0xff]  ;;  %s9339_s13 = smov 64   ;;  %vm7151_vm2 = vcmask 392512   ;;  %s9341_s21 = smov [#allocation4]  }
  0x35   :  { %332 = vrot.lane.b32.xlu0 %v9817_v20, %s9327_s17  ;;  %v8876_v62 = vld [vmem:[%s14565_s0 + $0x230] sm:$0xff]  ;;  %v9913_v63 = vmax.f32 %v62_v57, %v8877_v58  ;;  %v64_v4 = vld [vmem:[%s14565_s0 + $0x248] sm:$0xff]  ;;  %v8879_v5 = vld [vmem:[%s14565_s0 + $0x258] sm:$0xff]  ;;  %s8831_s22 = sshll.u32 %s9341_s21, 4  ;;  %s8832_s22 = int_to_ptr.vmem [resolvable:$true] %s8831_s22 }
  0x36   :  { %v9917_v0 = vmax.f32 %v61_v61, %v8876_v62  ;;  %v63_v6 = vld [vmem:[%s14565_s0 + $0x240] sm:$0xff]  ;;  %v8878_v8 = vld [vmem:[%s14565_s0 + $0x250] sm:$0xff]  ;;  %v9933_v13 = vmax.f32 %v64_v4, %v8879_v5  ;;  %v66_v15 = vld [vmem:[%s14565_s0 + $0x268] sm:$0xff]  ;;  %p9309_p1 = scmp.lt.s32.totalorder %s8832_s22, %s8832_s22 }
  0x37   :  { %v9937_v14 = vmax.f32 %v63_v6, %v8878_v8  ;;  %v8881_v16 = vld [vmem:[%s14565_s0 + $0x278] sm:$0xff]  ;;  %v65_v21 = vld [vmem:[%s14565_s0 + $0x260] sm:$0xff]  ;;  %v8880_v22 = vld [vmem:[%s14565_s0 + $0x270] sm:$0xff] }
  0x38   :  { %338 = vrot.lane.b32.xlu1 %v9833_v27, %s9327_s17  ;;  %v9953_v25 = vmax.f32 %v66_v15, %v8881_v16  ;;  %v9957_v26 = vmax.f32 %v65_v21, %v8880_v22  ;;  %v68_v31 = vld [vmem:[%s14565_s0 + $0x288] sm:$0xff]  ;;  %v8883_v32 = vld [vmem:[%s14565_s0 + $0x298] sm:$0xff]  ;;  %v67_v33 = vld [vmem:[%s14565_s0 + $0x280] sm:$0xff] }
  0x39   :  { %336 = vrot.lane.b32.xlu0 %v9837_v28, %s9327_s17  ;;  %v8882_v34 = vld [vmem:[%s14565_s0 + $0x290] sm:$0xff]  ;;  %v9973_v39 = vmax.f32 %v68_v31, %v8883_v32  ;;  %v70_v43 = vld [vmem:[%s14565_s0 + $0x2a8] sm:$0xff]  ;;  %v8885_v44 = vld [vmem:[%s14565_s0 + $0x2b8] sm:$0xff] }
  0x3a   :  { %v9977_v40 = vmax.f32 %v67_v33, %v8882_v34  ;;  %v69_v49 = vld [vmem:[%s14565_s0 + $0x2a0] sm:$0xff]  ;;  %v8884_v50 = vld [vmem:[%s14565_s0 + $0x2b0] sm:$0xff]  ;;  %v9993_v51 = vmax.f32 %v70_v43, %v8885_v44  ;;  %v72_v57 = vld [vmem:[%s14565_s0 + $0x2c8] sm:$0xff] }
  0x3b   :  { %v9997_v52 = vmax.f32 %v69_v49, %v8884_v50  ;;  %v8887_v58 = vld [vmem:[%s14565_s0 + $0x2d8] sm:$0xff]  ;;  %v71_v61 = vld [vmem:[%s14565_s0 + $0x2c0] sm:$0xff]  ;;  %v8886_v62 = vld [vmem:[%s14565_s0 + $0x2d0] sm:$0xff] }
  0x3c   :  { %342 = vrot.lane.b32.xlu1 %v9853_v37, %s9327_s17  ;;  %v10013_v4 = vmax.f32 %v72_v57, %v8887_v58  ;;  %v10017_v5 = vmax.f32 %v71_v61, %v8886_v62  ;;  %v74_v6 = vld [vmem:[%s14565_s0 + $0x2e8] sm:$0xff]  ;;  %v8889_v8 = vld [vmem:[%s14565_s0 + $0x2f8] sm:$0xff]  ;;  %v73_v15 = vld [vmem:[%s14565_s0 + $0x2e0] sm:$0xff] }
  0x3d   :  { %340 = vrot.lane.b32.xlu0 %v9857_v38, %s9327_s17  ;;  %v8888_v16 = vld [vmem:[%s14565_s0 + $0x2f0] sm:$0xff]  ;;  %v10033_v21 = vmax.f32 %v74_v6, %v8889_v8  ;;  %v76_v31 = vld [vmem:[%s14565_s0 + $0x308] sm:$0xff]  ;;  %v8891_v32 = vld [vmem:[%s14565_s0 + $0x318] sm:$0xff] }
  0x3e   :  { %v10037_v22 = vmax.f32 %v73_v15, %v8888_v16  ;;  %v75_v33 = vld [vmem:[%s14565_s0 + $0x300] sm:$0xff]  ;;  %v8890_v34 = vld [vmem:[%s14565_s0 + $0x310] sm:$0xff]  ;;  %v10053_v43 = vmax.f32 %v76_v31, %v8891_v32  ;;  %v78_v49 = vld [vmem:[%s14565_s0 + $0x328] sm:$0xff] }
  0x3f   :  { %v10057_v44 = vmax.f32 %v75_v33, %v8890_v34  ;;  %v8893_v50 = vld [vmem:[%s14565_s0 + $0x338] sm:$0xff]  ;;  %v77_v57 = vld [vmem:[%s14565_s0 + $0x320] sm:$0xff]  ;;  %v8892_v58 = vld [vmem:[%s14565_s0 + $0x330] sm:$0xff] }
  0x40   :  { %346 = vrot.lane.b32.xlu1 %v9873_v45, %s9327_s17  ;;  %v10073_v61 = vmax.f32 %v78_v49, %v8893_v50  ;;  %v10077_v62 = vmax.f32 %v77_v57, %v8892_v58  ;;  %v80_v6 = vld [vmem:[%s14565_s0 + $0x348] sm:$0xff]  ;;  %v8895_v8 = vld [vmem:[%s14565_s0 + $0x358] sm:$0xff]  ;;  %v79_v15 = vld [vmem:[%s14565_s0 + $0x340] sm:$0xff] }
  0x41   :  { %344 = vrot.lane.b32.xlu0 %v9877_v46, %s9327_s17  ;;  %v8894_v16 = vld [vmem:[%s14565_s0 + $0x350] sm:$0xff]  ;;  %v10093_v31 = vmax.f32 %v80_v6, %v8895_v8  ;;  %v82_v33 = vld [vmem:[%s14565_s0 + $0x368] sm:$0xff]  ;;  %v8897_v34 = vld [vmem:[%s14565_s0 + $0x378] sm:$0xff] }
  0x42   :  { %14616 = vst [vmem:[#allocation7_spill] sm:$0xff] %v10073_v61  ;;  %14617 = vst [vmem:[#allocation8_spill] sm:$0xff] %v10077_v62  ;;  %v10097_v32 = vmax.f32 %v79_v15, %v8894_v16  ;;  %v81_v49 = vld [vmem:[%s14565_s0 + $0x360] sm:$0xff]  ;;  %v8896_v50 = vld [vmem:[%s14565_s0 + $0x370] sm:$0xff]  ;;  %v10113_v57 = vmax.f32 %v82_v33, %v8897_v34 }
  0x43   :  { %14618 = vst [vmem:[#allocation9_spill] sm:$0xff] %v10093_v31  ;;  %v10117_v58 = vmax.f32 %v81_v49, %v8896_v50  ;;  %v84_v6 = vld [vmem:[%s14565_s0 + $0x388] sm:$0xff]  ;;  %v8899_v8 = vld [vmem:[%s14565_s0 + $0x398] sm:$0xff]  ;;  %v83_v15 = vld [vmem:[%s14565_s0 + $0x380] sm:$0xff] }
  0x44   :  { %350 = vrot.lane.b32.xlu1 %v9893_v55, %s9327_s17  ;;  %14619 = vst [vmem:[#allocation10_spill] sm:$0xff] %v10097_v32  ;;  %14620 = vst [vmem:[#allocation11_spill] sm:$0xff] %v10113_v57  ;;  %v8898_v16 = vld [vmem:[%s14565_s0 + $0x390] sm:$0xff]  ;;  %v10133_v33 = vmax.f32 %v84_v6, %v8899_v8  ;;  %v86_v49 = vld [vmem:[%s14565_s0 + $0x3a8] sm:$0xff] }
  0x45   :  { %348 = vrot.lane.b32.xlu0 %v9897_v56, %s9327_s17  ;;  %14621 = vst [vmem:[#allocation12_spill] sm:$0xff] %v10117_v58  ;;  %v10137_v34 = vmax.f32 %v83_v15, %v8898_v16  ;;  %v8901_v50 = vld [vmem:[%s14565_s0 + $0x3b8] sm:$0xff]  ;;  %v8900_v6 = vld [vmem:[%s14565_s0 + $0x3b0] sm:$0xff]  ;;  %v88_v16 = vld [vmem:[%s14565_s0 + $0x3c8] sm:$0xff] }
  0x46   :  { %14622 = vst [vmem:[#allocation13_spill] sm:$0xff] %v10133_v33  ;;  %v10153_v8 = vmax.f32 %v86_v49, %v8901_v50  ;;  %v8902_v50 = vld [vmem:[%s14565_s0 + $0x3d0] sm:$0xff] }
  0x47   :  { %14623 = vst [vmem:[#allocation14_spill] sm:$0xff] %v10137_v34 }
  0x48   :  { %354 = vrot.lane.b32.xlu1 %v9913_v63, %s9327_s17 }
  0x49   :  { %352 = vrot.lane.b32.xlu0 %v9917_v0, %s9327_s17 }
  0x4c   :  { %358 = vrot.lane.b32.xlu1 %v9933_v13, %s9327_s17 }
  0x4d   :  { %356 = vrot.lane.b32.xlu0 %v9937_v14, %s9327_s17 }
  0x50   :  { %362 = vrot.lane.b32.xlu1 %v9953_v25, %s9327_s17 }
  0x51   :  { %360 = vrot.lane.b32.xlu0 %v9957_v26, %s9327_s17 }
  0x54   :  { %366 = vrot.lane.b32.xlu1 %v9973_v39, %s9327_s17 }
  0x55   :  { %364 = vrot.lane.b32.xlu0 %v9977_v40, %s9327_s17 }
  0x58   :  { %370 = vrot.lane.b32.xlu1 %v9993_v51, %s9327_s17 }
  0x59   :  { %368 = vrot.lane.b32.xlu0 %v9997_v52, %s9327_s17 }
  0x5c   :  { %374 = vrot.lane.b32.xlu1 %v10013_v4, %s9327_s17 }
  0x5d   :  { %372 = vrot.lane.b32.xlu0 %v10017_v5, %s9327_s17 }
  0x60   :  { %378 = vrot.lane.b32.xlu1 %v10033_v21, %s9327_s17 }
  0x61   :  { %376 = vrot.lane.b32.xlu0 %v10037_v22, %s9327_s17 }
  0x64   :  { %382 = vrot.lane.b32.xlu1 %v10053_v43, %s9327_s17 }
  0x65   :  { %380 = vrot.lane.b32.xlu0 %v10057_v44, %s9327_s17 }
  0x68   :  { %386 = vrot.lane.b32.xlu1 %v10073_v61, %s9327_s17 }
  0x69   :  { %384 = vrot.lane.b32.xlu0 %v10077_v62, %s9327_s17 }
  0x6c   :  { %390 = vrot.lane.b32.xlu1 %v10093_v31, %s9327_s17 }
  0x6d   :  { %388 = vrot.lane.b32.xlu0 %v10097_v32, %s9327_s17  ;;  %v85_v32 = vld [vmem:[%s14565_s0 + $0x3a0] sm:$0xff] }
  0x6e   :  { %v10157_v15 = vmax.f32 %v85_v32, %v8900_v6  ;;  %v695_v32 = vld [vmem:[#allocation2 + $0x8] sm:$0xff]  ;;  %v694_v6 = vld [vmem:[#allocation2] sm:$0xff] }
  0x6f   :  { %759 = vst.msk [vmem:[#allocation3 + $0x8] sm:$0xff] %vm629_vm3, %v695_v32  ;;  %758 = vst.msk [vmem:[#allocation3] sm:$0xff] %vm629_vm3, %v694_v6 }
  0x70   :  { %394 = vrot.lane.b32.xlu1 %v10113_v57, %s9327_s17  ;;  %v87_v57 = vld [vmem:[%s14565_s0 + $0x3c0] sm:$0xff] }
  0x71   :  { %392 = vrot.lane.b32.xlu0 %v10117_v58, %s9327_s17  ;;  %v8903_v58 = vld [vmem:[%s14565_s0 + $0x3d8] sm:$0xff]  ;;  %v10182_v61 = vmax.f32 %v87_v57, %v8902_v50  ;;  %v8904_v57 = vld [vmem:[%s14565_s0 + $0x3f0] sm:$0xff] }
  0x72   :  { %v10177_v62 = vmax.f32 %v88_v16, %v8903_v58  ;;  %v89_v58 = vld [vmem:[%s14565_s0 + $0x3e0] sm:$0xff] }
  0x74   :  { %398 = vrot.lane.b32.xlu1 %v10133_v33, %s9327_s17 }
  0x75   :  { %396 = vrot.lane.b32.xlu0 %v10137_v34, %s9327_s17 }
  0x76   :  { %v289_v49 = vpop.permute.xlu1 %288 }
  0x77   :  { %v478_v34 = vmax.f32 %v9392_v3, %v289_v49  ;;  %v285_v33 = vpop.permute.xlu0 %284  ;;  %v90_v3 = vld [vmem:[%s14565_s0 + $0x3e8] sm:$0xff] }
  0x78   :  { %v476_v31 = vmax.f32 %v9407_v7, %v285_v33  ;;  %402 = vrot.lane.b32.xlu1 %v10153_v8, %s9327_s17  ;;  %v8905_v7 = vld [vmem:[%s14565_s0 + $0x3f8] sm:$0xff]  ;;  %s9328_s0 = smov 4  }
  0x79   :  { %632 = vst.msk [vmem:[#allocation2 + $0x31] sm:$0xff] %vm629_vm3, %v478_v34  ;;  %400 = vrot.lane.b32.xlu0 %v10157_v15, %s9327_s17  ;;  %v10201_v50 = vmax.f32 %v90_v3, %v8905_v7  ;;  %v823_v7 = vld [vmem:[#allocation2 + $0x9] sm:$0xff] }
  0x7a   :  { %630 = vst.msk [vmem:[#allocation2 + $0x19] sm:$0xff] %vm629_vm3, %v476_v31  ;;  %v291_v33 = vpop.permute.xlu1 %290  ;;  %v10206_v31 = vmax.f32 %v89_v58, %v8904_v57 }
  0x7b   :  { %v479_v34 = vmax.f32 %v9575_v11, %v291_v33  ;;  %v287_v16 = vpop.permute.xlu0 %286 }
  0x7c   :  { %v477_v49 = vmax.f32 %v9597_v12, %v287_v16  ;;  %406 = vrot.lane.b32.xlu1 %v10177_v62, %s9327_s17 }
  0x7d   :  { %633 = vst.msk [vmem:[#allocation2 + $0x39] sm:$0xff] %vm629_vm3, %v479_v34  ;;  %404 = vrot.lane.b32.xlu0 %v10182_v61, %s9327_s17 }
  0x7e   :  { %631 = vst.msk [vmem:[#allocation2 + $0x21] sm:$0xff] %vm629_vm3, %v477_v49  ;;  %v295_v32 = vpop.permute.xlu1 %294 }
  0x7f   :  { %v481_v11 = vmax.f32 %v9613_v17, %v295_v32  ;;  %v293_v6 = vpop.permute.xlu0 %292 }
  0x80   :  { %v480_v12 = vmax.f32 %v9617_v18, %v293_v6  ;;  %410 = vrot.lane.b32.xlu1 %v10201_v50, %s9327_s17  ;;  %v10213_v3 = vld [vmem:[#allocation2 + $0x30] sm:$0xff]  ;;  %v822_v18 = vld [vmem:[#allocation2 + $0x1] sm:$0xff] }
  0x81   :  { %635 = vst.msk [vmem:[#allocation2 + $0x51] sm:$0xff] %vm629_vm3, %v481_v11  ;;  %408 = vrot.lane.b32.xlu0 %v10206_v31, %s9327_s17  ;;  %v10218_v33 = vld [vmem:[#allocation2 + $0x18] sm:$0xff]  ;;  %762 = vst.msk [vmem:[#allocation3 + $0x20] sm:$0xff] %vm629_vm3, %v10213_v3  ;;  %s9329_s17 = smov 8  }
  0x82   :  { %634 = vst.msk [vmem:[#allocation2 + $0x49] sm:$0xff] %vm629_vm3, %v480_v12  ;;  %v299_v17 = vpop.permute.xlu1 %298  ;;  %760 = vst.msk [vmem:[#allocation3 + $0x10] sm:$0xff] %vm629_vm3, %v10218_v33  ;;  %v824_v12 = vld [vmem:[#allocation2 + $0x19] sm:$0xff] }
  0x83   :  { %v483_v58 = vmax.f32 %v9633_v23, %v299_v17  ;;  %v297_v57 = vpop.permute.xlu0 %296 }
  0x84   :  { %v482_v34 = vmax.f32 %v9637_v24, %v297_v57  ;;  %952 = vrot.lane.b32.xlu1 %v823_v7, %s9328_s0  ;;  %v10228_v16 = vld [vmem:[#allocation2 + $0x38] sm:$0xff] }
  0x85   :  { %637 = vst.msk [vmem:[#allocation2 + $0x69] sm:$0xff] %vm629_vm3, %v483_v58  ;;  %950 = vrot.lane.b32.xlu0 %v822_v18, %s9328_s0  ;;  %v10232_v49 = vld [vmem:[#allocation2 + $0x20] sm:$0xff]  ;;  %763 = vst.msk [vmem:[#allocation3 + $0x28] sm:$0xff] %vm629_vm3, %v10228_v16 }
  0x86   :  { %636 = vst.msk [vmem:[#allocation2 + $0x61] sm:$0xff] %vm629_vm3, %v482_v34  ;;  %v303_v23 = vpop.permute.xlu1 %302  ;;  %761 = vst.msk [vmem:[#allocation3 + $0x18] sm:$0xff] %vm629_vm3, %v10232_v49  ;;  %v825_v11 = vld [vmem:[#allocation2 + $0x21] sm:$0xff]  ;;  %v827_v58 = vld [vmem:[#allocation2 + $0x39] sm:$0xff] }
  0x87   :  { %v485_v24 = vmax.f32 %v9653_v29, %v303_v23  ;;  %v301_v32 = vpop.permute.xlu0 %300  ;;  %v826_v34 = vld [vmem:[#allocation2 + $0x31] sm:$0xff] }
  0x88   :  { %v484_v6 = vmax.f32 %v9657_v30, %v301_v32  ;;  %956 = vrot.lane.b32.xlu1 %v825_v11, %s9328_s0  ;;  %v829_v11 = vld [vmem:[#allocation2 + $0x51] sm:$0xff] }
  0x89   :  { %639 = vst.msk [vmem:[#allocation2 + $0x81] sm:$0xff] %vm629_vm3, %v485_v24  ;;  %954 = vrot.lane.b32.xlu0 %v824_v12, %s9328_s0  ;;  %v10244_v7 = vld [vmem:[#allocation2 + $0x50] sm:$0xff]  ;;  %v10246_v17 = vld [vmem:[#allocation2 + $0x48] sm:$0xff] }
  0x8a   :  { %638 = vst.msk [vmem:[#allocation2 + $0x79] sm:$0xff] %vm629_vm3, %v484_v6  ;;  %v307_v18 = vpop.permute.xlu1 %306  ;;  %765 = vst.msk [vmem:[#allocation3 + $0x38] sm:$0xff] %vm629_vm3, %v10244_v7  ;;  %v828_v12 = vld [vmem:[#allocation2 + $0x49] sm:$0xff] }
  0x8b   :  { %764 = vst.msk [vmem:[#allocation3 + $0x30] sm:$0xff] %vm629_vm3, %v10246_v17  ;;  %v487_v29 = vmax.f32 %v9673_v35, %v307_v18  ;;  %v305_v30 = vpop.permute.xlu0 %304 }
  0x8c   :  { %v486_v57 = vmax.f32 %v9677_v36, %v305_v30  ;;  %960 = vrot.lane.b32.xlu1 %v827_v58, %s9328_s0  ;;  %v831_v58 = vld [vmem:[#allocation2 + $0x69] sm:$0xff] }
  0x8d   :  { %641 = vst.msk [vmem:[#allocation2 + $0x99] sm:$0xff] %vm629_vm3, %v487_v29  ;;  %958 = vrot.lane.b32.xlu0 %v826_v34, %s9328_s0  ;;  %v10258_v23 = vld [vmem:[#allocation2 + $0x68] sm:$0xff]  ;;  %v10260_v24 = vld [vmem:[#allocation2 + $0x60] sm:$0xff] }
  0x8e   :  { %640 = vst.msk [vmem:[#allocation2 + $0x91] sm:$0xff] %vm629_vm3, %v486_v57  ;;  %v311_v32 = vpop.permute.xlu1 %310  ;;  %767 = vst.msk [vmem:[#allocation3 + $0x48] sm:$0xff] %vm629_vm3, %v10258_v23  ;;  %v830_v34 = vld [vmem:[#allocation2 + $0x61] sm:$0xff] }
  0x8f   :  { %766 = vst.msk [vmem:[#allocation3 + $0x40] sm:$0xff] %vm629_vm3, %v10260_v24  ;;  %v489_v35 = vmax.f32 %v9693_v41, %v311_v32  ;;  %v309_v36 = vpop.permute.xlu0 %308 }
  0x90   :  { %v488_v6 = vmax.f32 %v9697_v42, %v309_v36  ;;  %964 = vrot.lane.b32.xlu1 %v829_v11, %s9328_s0  ;;  %v833_v11 = vld [vmem:[#allocation2 + $0x81] sm:$0xff] }
  0x91   :  { %643 = vst.msk [vmem:[#allocation2 + $0xb1] sm:$0xff] %vm629_vm3, %v489_v35  ;;  %962 = vrot.lane.b32.xlu0 %v828_v12, %s9328_s0  ;;  %v10272_v18 = vld [vmem:[#allocation2 + $0x80] sm:$0xff]  ;;  %v10274_v29 = vld [vmem:[#allocation2 + $0x78] sm:$0xff] }
  0x92   :  { %642 = vst.msk [vmem:[#allocation2 + $0xa9] sm:$0xff] %vm629_vm3, %v488_v6  ;;  %v315_v30 = vpop.permute.xlu1 %314  ;;  %769 = vst.msk [vmem:[#allocation3 + $0x58] sm:$0xff] %vm629_vm3, %v10272_v18  ;;  %v832_v12 = vld [vmem:[#allocation2 + $0x79] sm:$0xff] }
  0x93   :  { %768 = vst.msk [vmem:[#allocation3 + $0x50] sm:$0xff] %vm629_vm3, %v10274_v29  ;;  %v491_v41 = vmax.f32 %v9713_v47, %v315_v30  ;;  %v313_v42 = vpop.permute.xlu0 %312 }
  0x94   :  { %v490_v57 = vmax.f32 %v9717_v48, %v313_v42  ;;  %968 = vrot.lane.b32.xlu1 %v831_v58, %s9328_s0  ;;  %v835_v58 = vld [vmem:[#allocation2 + $0x99] sm:$0xff] }
  0x95   :  { %645 = vst.msk [vmem:[#allocation2 + $0xc9] sm:$0xff] %vm629_vm3, %v491_v41  ;;  %966 = vrot.lane.b32.xlu0 %v830_v34, %s9328_s0  ;;  %v10286_v32 = vld [vmem:[#allocation2 + $0x98] sm:$0xff]  ;;  %v10288_v35 = vld [vmem:[#allocation2 + $0x90] sm:$0xff] }
  0x96   :  { %644 = vst.msk [vmem:[#allocation2 + $0xc1] sm:$0xff] %vm629_vm3, %v490_v57  ;;  %v319_v36 = vpop.permute.xlu1 %318  ;;  %771 = vst.msk [vmem:[#allocation3 + $0x68] sm:$0xff] %vm629_vm3, %v10286_v32  ;;  %v834_v34 = vld [vmem:[#allocation2 + $0x91] sm:$0xff] }
  0x97   :  { %770 = vst.msk [vmem:[#allocation3 + $0x60] sm:$0xff] %vm629_vm3, %v10288_v35  ;;  %v493_v47 = vmax.f32 %v9733_v53, %v319_v36  ;;  %v317_v48 = vpop.permute.xlu0 %316 }
  0x98   :  { %v492_v6 = vmax.f32 %v9737_v54, %v317_v48  ;;  %972 = vrot.lane.b32.xlu1 %v833_v11, %s9328_s0  ;;  %v837_v11 = vld [vmem:[#allocation2 + $0xb1] sm:$0xff] }
  0x99   :  { %647 = vst.msk [vmem:[#allocation2 + $0xe1] sm:$0xff] %vm629_vm3, %v493_v47  ;;  %970 = vrot.lane.b32.xlu0 %v832_v12, %s9328_s0  ;;  %v10300_v30 = vld [vmem:[#allocation2 + $0xb0] sm:$0xff]  ;;  %v10302_v41 = vld [vmem:[#allocation2 + $0xa8] sm:$0xff] }
  0x9a   :  { %646 = vst.msk [vmem:[#allocation2 + $0xd9] sm:$0xff] %vm629_vm3, %v492_v6  ;;  %v323_v42 = vpop.permute.xlu1 %322  ;;  %773 = vst.msk [vmem:[#allocation3 + $0x78] sm:$0xff] %vm629_vm3, %v10300_v30  ;;  %v836_v12 = vld [vmem:[#allocation2 + $0xa9] sm:$0xff] }
  0x9b   :  { %772 = vst.msk [vmem:[#allocation3 + $0x70] sm:$0xff] %vm629_vm3, %v10302_v41  ;;  %v495_v53 = vmax.f32 %v9753_v59, %v323_v42  ;;  %v321_v54 = vpop.permute.xlu0 %320 }
  0x9c   :  { %v494_v57 = vmax.f32 %v9757_v60, %v321_v54  ;;  %976 = vrot.lane.b32.xlu1 %v835_v58, %s9328_s0  ;;  %v839_v58 = vld [vmem:[#allocation2 + $0xc9] sm:$0xff] }
  0x9d   :  { %649 = vst.msk [vmem:[#allocation2 + $0xf9] sm:$0xff] %vm629_vm3, %v495_v53  ;;  %974 = vrot.lane.b32.xlu0 %v834_v34, %s9328_s0  ;;  %v10314_v36 = vld [vmem:[#allocation2 + $0xc8] sm:$0xff]  ;;  %v10316_v47 = vld [vmem:[#allocation2 + $0xc0] sm:$0xff] }
  0x9e   :  { %648 = vst.msk [vmem:[#allocation2 + $0xf1] sm:$0xff] %vm629_vm3, %v494_v57  ;;  %v327_v48 = vpop.permute.xlu1 %326  ;;  %775 = vst.msk [vmem:[#allocation3 + $0x88] sm:$0xff] %vm629_vm3, %v10314_v36  ;;  %v838_v34 = vld [vmem:[#allocation2 + $0xc1] sm:$0xff] }
  0x9f   :  { %774 = vst.msk [vmem:[#allocation3 + $0x80] sm:$0xff] %vm629_vm3, %v10316_v47  ;;  %v497_v59 = vmax.f32 %v9773_v1, %v327_v48  ;;  %v325_v60 = vpop.permute.xlu0 %324 }
  0xa0   :  { %v496_v6 = vmax.f32 %v9777_v2, %v325_v60  ;;  %980 = vrot.lane.b32.xlu1 %v837_v11, %s9328_s0  ;;  %v841_v11 = vld [vmem:[#allocation2 + $0xe1] sm:$0xff] }
  0xa1   :  { %651 = vst.msk [vmem:[#allocation2 + $0x111] sm:$0xff] %vm629_vm3, %v497_v59  ;;  %978 = vrot.lane.b32.xlu0 %v836_v12, %s9328_s0  ;;  %v10328_v42 = vld [vmem:[#allocation2 + $0xe0] sm:$0xff]  ;;  %v10330_v53 = vld [vmem:[#allocation2 + $0xd8] sm:$0xff] }
  0xa2   :  { %650 = vst.msk [vmem:[#allocation2 + $0x109] sm:$0xff] %vm629_vm3, %v496_v6  ;;  %v331_v54 = vpop.permute.xlu1 %330  ;;  %777 = vst.msk [vmem:[#allocation3 + $0x98] sm:$0xff] %vm629_vm3, %v10328_v42  ;;  %v840_v12 = vld [vmem:[#allocation2 + $0xd9] sm:$0xff] }
  0xa3   :  { %776 = vst.msk [vmem:[#allocation3 + $0x90] sm:$0xff] %vm629_vm3, %v10330_v53  ;;  %v499_v1 = vmax.f32 %v9793_v9, %v331_v54  ;;  %v329_v2 = vpop.permute.xlu0 %328 }
  0xa4   :  { %v498_v57 = vmax.f32 %v9797_v10, %v329_v2  ;;  %984 = vrot.lane.b32.xlu1 %v839_v58, %s9328_s0  ;;  %v843_v58 = vld [vmem:[#allocation2 + $0xf9] sm:$0xff] }
  0xa5   :  { %653 = vst.msk [vmem:[#allocation2 + $0x129] sm:$0xff] %vm629_vm3, %v499_v1  ;;  %982 = vrot.lane.b32.xlu0 %v838_v34, %s9328_s0  ;;  %v10342_v48 = vld [vmem:[#allocation2 + $0xf8] sm:$0xff]  ;;  %v10344_v59 = vld [vmem:[#allocation2 + $0xf0] sm:$0xff] }
  0xa6   :  { %652 = vst.msk [vmem:[#allocation2 + $0x121] sm:$0xff] %vm629_vm3, %v498_v57  ;;  %v335_v60 = vpop.permute.xlu1 %334  ;;  %779 = vst.msk [vmem:[#allocation3 + $0xa8] sm:$0xff] %vm629_vm3, %v10342_v48  ;;  %v842_v34 = vld [vmem:[#allocation2 + $0xf1] sm:$0xff] }
  0xa7   :  { %778 = vst.msk [vmem:[#allocation3 + $0xa0] sm:$0xff] %vm629_vm3, %v10344_v59  ;;  %v501_v9 = vmax.f32 %v9813_v19, %v335_v60  ;;  %v333_v10 = vpop.permute.xlu0 %332 }
  0xa8   :  { %v500_v6 = vmax.f32 %v9817_v20, %v333_v10  ;;  %988 = vrot.lane.b32.xlu1 %v841_v11, %s9328_s0  ;;  %v845_v11 = vld [vmem:[#allocation2 + $0x111] sm:$0xff] }
  0xa9   :  { %655 = vst.msk [vmem:[#allocation2 + $0x141] sm:$0xff] %vm629_vm3, %v501_v9  ;;  %986 = vrot.lane.b32.xlu0 %v840_v12, %s9328_s0  ;;  %v10356_v54 = vld [vmem:[#allocation2 + $0x110] sm:$0xff]  ;;  %v10358_v1 = vld [vmem:[#allocation2 + $0x108] sm:$0xff] }
  0xaa   :  { %654 = vst.msk [vmem:[#allocation2 + $0x139] sm:$0xff] %vm629_vm3, %v500_v6  ;;  %v339_v2 = vpop.permute.xlu1 %338  ;;  %781 = vst.msk [vmem:[#allocation3 + $0xb8] sm:$0xff] %vm629_vm3, %v10356_v54  ;;  %v844_v12 = vld [vmem:[#allocation2 + $0x109] sm:$0xff] }
  0xab   :  { %780 = vst.msk [vmem:[#allocation3 + $0xb0] sm:$0xff] %vm629_vm3, %v10358_v1  ;;  %v503_v19 = vmax.f32 %v9833_v27, %v339_v2  ;;  %v337_v20 = vpop.permute.xlu0 %336 }
  0xac   :  { %v502_v57 = vmax.f32 %v9837_v28, %v337_v20  ;;  %992 = vrot.lane.b32.xlu1 %v843_v58, %s9328_s0  ;;  %v847_v58 = vld [vmem:[#allocation2 + $0x129] sm:$0xff] }
  0xad   :  { %657 = vst.msk [vmem:[#allocation2 + $0x159] sm:$0xff] %vm629_vm3, %v503_v19  ;;  %990 = vrot.lane.b32.xlu0 %v842_v34, %s9328_s0  ;;  %v10370_v60 = vld [vmem:[#allocation2 + $0x128] sm:$0xff]  ;;  %v10372_v9 = vld [vmem:[#allocation2 + $0x120] sm:$0xff] }
  0xae   :  { %656 = vst.msk [vmem:[#allocation2 + $0x151] sm:$0xff] %vm629_vm3, %v502_v57  ;;  %v343_v10 = vpop.permute.xlu1 %342  ;;  %783 = vst.msk [vmem:[#allocation3 + $0xc8] sm:$0xff] %vm629_vm3, %v10370_v60  ;;  %v846_v34 = vld [vmem:[#allocation2 + $0x121] sm:$0xff] }
  0xaf   :  { %782 = vst.msk [vmem:[#allocation3 + $0xc0] sm:$0xff] %vm629_vm3, %v10372_v9  ;;  %v505_v27 = vmax.f32 %v9853_v37, %v343_v10  ;;  %v341_v28 = vpop.permute.xlu0 %340 }
  0xb0   :  { %v504_v6 = vmax.f32 %v9857_v38, %v341_v28  ;;  %996 = vrot.lane.b32.xlu1 %v845_v11, %s9328_s0 }
  0xb1   :  { %659 = vst.msk [vmem:[#allocation2 + $0x171] sm:$0xff] %vm629_vm3, %v505_v27  ;;  %994 = vrot.lane.b32.xlu0 %v844_v12, %s9328_s0  ;;  %v10384_v2 = vld [vmem:[#allocation2 + $0x140] sm:$0xff]  ;;  %v10386_v19 = vld [vmem:[#allocation2 + $0x138] sm:$0xff]  ;;  %v726_v12 = vld [vmem:[#allocation2 + $0x1b0] sm:$0xff] }
  0xb2   :  { %658 = vst.msk [vmem:[#allocation2 + $0x169] sm:$0xff] %vm629_vm3, %v504_v6  ;;  %v347_v20 = vpop.permute.xlu1 %346  ;;  %785 = vst.msk [vmem:[#allocation3 + $0xd8] sm:$0xff] %vm629_vm3, %v10384_v2  ;;  %v849_v6 = vld [vmem:[#allocation2 + $0x141] sm:$0xff] }
  0xb3   :  { %784 = vst.msk [vmem:[#allocation3 + $0xd0] sm:$0xff] %vm629_vm3, %v10386_v19  ;;  %v507_v37 = vmax.f32 %v9873_v45, %v347_v20  ;;  %v345_v38 = vpop.permute.xlu0 %344  ;;  %v727_v45 = vld [vmem:[#allocation2 + $0x1b8] sm:$0xff]  ;;  %790 = vst.msk [vmem:[#allocation3 + $0x100] sm:$0xff] %vm629_vm3, %v726_v12 }
  0xb4   :  { %v506_v57 = vmax.f32 %v9877_v46, %v345_v38  ;;  %1000 = vrot.lane.b32.xlu1 %v847_v58, %s9328_s0  ;;  %791 = vst.msk [vmem:[#allocation3 + $0x108] sm:$0xff] %vm629_vm3, %v727_v45 }
  0xb5   :  { %661 = vst.msk [vmem:[#allocation2 + $0x189] sm:$0xff] %vm629_vm3, %v507_v37  ;;  %998 = vrot.lane.b32.xlu0 %v846_v34, %s9328_s0  ;;  %v10398_v10 = vld [vmem:[#allocation2 + $0x158] sm:$0xff]  ;;  %v10400_v27 = vld [vmem:[#allocation2 + $0x150] sm:$0xff] }
  0xb6   :  { %660 = vst.msk [vmem:[#allocation2 + $0x181] sm:$0xff] %vm629_vm3, %v506_v57  ;;  %v351_v28 = vpop.permute.xlu1 %350  ;;  %787 = vst.msk [vmem:[#allocation3 + $0xe8] sm:$0xff] %vm629_vm3, %v10398_v10  ;;  %v848_v37 = vld [vmem:[#allocation2 + $0x139] sm:$0xff]  ;;  %v850_v45 = vld [vmem:[#allocation2 + $0x151] sm:$0xff] }
  0xb7   :  { %786 = vst.msk [vmem:[#allocation3 + $0xe0] sm:$0xff] %vm629_vm3, %v10400_v27  ;;  %v509_v46 = vmax.f32 %v9893_v55, %v351_v28  ;;  %v349_v11 = vpop.permute.xlu0 %348  ;;  %v851_v34 = vld [vmem:[#allocation2 + $0x159] sm:$0xff] }
  0xb8   :  { %v508_v20 = vmax.f32 %v9897_v56, %v349_v11  ;;  %1004 = vrot.lane.b32.xlu1 %v849_v6, %s9328_s0  ;;  %v853_v12 = vld [vmem:[#allocation2 + $0x171] sm:$0xff] }
  0xb9   :  { %663 = vst.msk [vmem:[#allocation2 + $0x1d1] sm:$0xff] %vm629_vm3, %v509_v46  ;;  %1002 = vrot.lane.b32.xlu0 %v848_v37, %s9328_s0  ;;  %v10414_v38 = vld [vmem:[#allocation2 + $0x170] sm:$0xff]  ;;  %v10416_v58 = vld [vmem:[#allocation2 + $0x168] sm:$0xff] }
  0xba   :  { %662 = vst.msk [vmem:[#allocation2 + $0x1c9] sm:$0xff] %vm629_vm3, %v508_v20  ;;  %v355_v55 = vpop.permute.xlu1 %354  ;;  %789 = vst.msk [vmem:[#allocation3 + $0xf8] sm:$0xff] %vm629_vm3, %v10414_v38  ;;  %v852_v20 = vld [vmem:[#allocation2 + $0x169] sm:$0xff] }
  0xbb   :  { %788 = vst.msk [vmem:[#allocation3 + $0xf0] sm:$0xff] %vm629_vm3, %v10416_v58  ;;  %v511_v56 = vmax.f32 %v9913_v63, %v355_v55  ;;  %v353_v57 = vpop.permute.xlu0 %352 }
  0xbc   :  { %v510_v28 = vmax.f32 %v9917_v0, %v353_v57  ;;  %1008 = vrot.lane.b32.xlu1 %v851_v34, %s9328_s0  ;;  %v855_v0 = vld [vmem:[#allocation2 + $0x1b9] sm:$0xff] }
  0xbd   :  { %665 = vst.msk [vmem:[#allocation2 + $0x1e9] sm:$0xff] %vm629_vm3, %v511_v56  ;;  %1006 = vrot.lane.b32.xlu0 %v850_v45, %s9328_s0 }
  0xbe   :  { %664 = vst.msk [vmem:[#allocation2 + $0x1e1] sm:$0xff] %vm629_vm3, %v510_v28  ;;  %v359_v46 = vpop.permute.xlu1 %358 }
  0xbf   :  { %v513_v11 = vmax.f32 %v9933_v13, %v359_v46  ;;  %v357_v6 = vpop.permute.xlu0 %356  ;;  %v854_v13 = vld [vmem:[#allocation2 + $0x1b1] sm:$0xff] }
  0xc0   :  { %v512_v63 = vmax.f32 %v9937_v14, %v357_v6  ;;  %1012 = vrot.lane.b32.xlu1 %v853_v12, %s9328_s0 }
  0xc1   :  { %667 = vst.msk [vmem:[#allocation2 + $0x201] sm:$0xff] %vm629_vm3, %v513_v11  ;;  %1010 = vrot.lane.b32.xlu0 %v852_v20, %s9328_s0  ;;  %v10434_v37 = vld [vmem:[#allocation2 + $0x1d0] sm:$0xff]  ;;  %v10436_v55 = vld [vmem:[#allocation2 + $0x1c8] sm:$0xff] }
  0xc2   :  { %666 = vst.msk [vmem:[#allocation2 + $0x1f9] sm:$0xff] %vm629_vm3, %v512_v63  ;;  %v363_v56 = vpop.permute.xlu1 %362  ;;  %793 = vst.msk [vmem:[#allocation3 + $0x118] sm:$0xff] %vm629_vm3, %v10434_v37  ;;  %v857_v11 = vld [vmem:[#allocation2 + $0x1d1] sm:$0xff]  ;;  %v856_v12 = vld [vmem:[#allocation2 + $0x1c9] sm:$0xff] }
  0xc3   :  { %792 = vst.msk [vmem:[#allocation3 + $0x110] sm:$0xff] %vm629_vm3, %v10436_v55  ;;  %v515_v14 = vmax.f32 %v9953_v25, %v363_v56  ;;  %v361_v57 = vpop.permute.xlu0 %360 }
  0xc4   :  { %v514_v34 = vmax.f32 %v9957_v26, %v361_v57  ;;  %1016 = vrot.lane.b32.xlu1 %v855_v0, %s9328_s0  ;;  %v859_v56 = vld [vmem:[#allocation2 + $0x1e9] sm:$0xff] }
  0xc5   :  { %669 = vst.msk [vmem:[#allocation2 + $0x219] sm:$0xff] %vm629_vm3, %v515_v14  ;;  %1014 = vrot.lane.b32.xlu0 %v854_v13, %s9328_s0  ;;  %v10448_v28 = vld [vmem:[#allocation2 + $0x1e8] sm:$0xff]  ;;  %v10450_v45 = vld [vmem:[#allocation2 + $0x1e0] sm:$0xff] }
  0xc6   :  { %668 = vst.msk [vmem:[#allocation2 + $0x211] sm:$0xff] %vm629_vm3, %v514_v34  ;;  %v367_v46 = vpop.permute.xlu1 %366  ;;  %795 = vst.msk [vmem:[#allocation3 + $0x128] sm:$0xff] %vm629_vm3, %v10448_v28  ;;  %v858_v14 = vld [vmem:[#allocation2 + $0x1e1] sm:$0xff] }
  0xc7   :  { %794 = vst.msk [vmem:[#allocation3 + $0x120] sm:$0xff] %vm629_vm3, %v10450_v45  ;;  %v517_v25 = vmax.f32 %v9973_v39, %v367_v46  ;;  %v365_v26 = vpop.permute.xlu0 %364 }
  0xc8   :  { %v516_v6 = vmax.f32 %v9977_v40, %v365_v26  ;;  %1020 = vrot.lane.b32.xlu1 %v857_v11, %s9328_s0 }
  0xc9   :  { %671 = vst.msk [vmem:[#allocation2 + $0x231] sm:$0xff] %vm629_vm3, %v517_v25  ;;  %1018 = vrot.lane.b32.xlu0 %v856_v12, %s9328_s0  ;;  %v10462_v63 = vld [vmem:[#allocation2 + $0x200] sm:$0xff]  ;;  %v10464_v20 = vld [vmem:[#allocation2 + $0x1f8] sm:$0xff] }
  0xca   :  { %670 = vst.msk [vmem:[#allocation2 + $0x229] sm:$0xff] %vm629_vm3, %v516_v6  ;;  %v371_v0 = vpop.permute.xlu1 %370  ;;  %797 = vst.msk [vmem:[#allocation3 + $0x138] sm:$0xff] %vm629_vm3, %v10462_v63  ;;  %v861_v25 = vld [vmem:[#allocation2 + $0x201] sm:$0xff]  ;;  %v860_v11 = vld [vmem:[#allocation2 + $0x1f9] sm:$0xff] }
  0xcb   :  { %796 = vst.msk [vmem:[#allocation3 + $0x130] sm:$0xff] %vm629_vm3, %v10464_v20  ;;  %v519_v39 = vmax.f32 %v9993_v51, %v371_v0  ;;  %v369_v40 = vpop.permute.xlu0 %368 }
  0xcc   :  { %v518_v13 = vmax.f32 %v9997_v52, %v369_v40  ;;  %1024 = vrot.lane.b32.xlu1 %v859_v56, %s9328_s0 }
  0xcd   :  { %673 = vst.msk [vmem:[#allocation2 + $0x249] sm:$0xff] %vm629_vm3, %v519_v39  ;;  %1022 = vrot.lane.b32.xlu0 %v858_v14, %s9328_s0  ;;  %v10476_v57 = vld [vmem:[#allocation2 + $0x218] sm:$0xff]  ;;  %v10478_v34 = vld [vmem:[#allocation2 + $0x210] sm:$0xff] }
  0xce   :  { %672 = vst.msk [vmem:[#allocation2 + $0x241] sm:$0xff] %vm629_vm3, %v518_v13  ;;  %v375_v46 = vpop.permute.xlu1 %374  ;;  %799 = vst.msk [vmem:[#allocation3 + $0x148] sm:$0xff] %vm629_vm3, %v10476_v57  ;;  %v863_v39 = vld [vmem:[#allocation2 + $0x219] sm:$0xff]  ;;  %v862_v56 = vld [vmem:[#allocation2 + $0x211] sm:$0xff] }
  0xcf   :  { %798 = vst.msk [vmem:[#allocation3 + $0x140] sm:$0xff] %vm629_vm3, %v10478_v34  ;;  %v521_v51 = vmax.f32 %v10013_v4, %v375_v46  ;;  %v373_v52 = vpop.permute.xlu0 %372 }
  0xd0   :  { %v520_v26 = vmax.f32 %v10017_v5, %v373_v52  ;;  %1028 = vrot.lane.b32.xlu1 %v861_v25, %s9328_s0 }
  0xd1   :  { %675 = vst.msk [vmem:[#allocation2 + $0x261] sm:$0xff] %vm629_vm3, %v521_v51  ;;  %1026 = vrot.lane.b32.xlu0 %v860_v11, %s9328_s0  ;;  %v10490_v6 = vld [vmem:[#allocation2 + $0x230] sm:$0xff]  ;;  %v10492_v12 = vld [vmem:[#allocation2 + $0x228] sm:$0xff] }
  0xd2   :  { %674 = vst.msk [vmem:[#allocation2 + $0x259] sm:$0xff] %vm629_vm3, %v520_v26  ;;  %v379_v0 = vpop.permute.xlu1 %378  ;;  %801 = vst.msk [vmem:[#allocation3 + $0x158] sm:$0xff] %vm629_vm3, %v10490_v6  ;;  %v865_v51 = vld [vmem:[#allocation2 + $0x231] sm:$0xff]  ;;  %v864_v25 = vld [vmem:[#allocation2 + $0x229] sm:$0xff] }
  0xd3   :  { %800 = vst.msk [vmem:[#allocation3 + $0x150] sm:$0xff] %vm629_vm3, %v10492_v12  ;;  %v523_v4 = vmax.f32 %v10033_v21, %v379_v0  ;;  %v377_v5 = vpop.permute.xlu0 %376 }
  0xd4   :  { %v522_v40 = vmax.f32 %v10037_v22, %v377_v5  ;;  %1032 = vrot.lane.b32.xlu1 %v863_v39, %s9328_s0  ;;  %v867_v5 = vld [vmem:[#allocation2 + $0x249] sm:$0xff] }
  0xd5   :  { %677 = vst.msk [vmem:[#allocation2 + $0x279] sm:$0xff] %vm629_vm3, %v523_v4  ;;  %1030 = vrot.lane.b32.xlu0 %v862_v56, %s9328_s0  ;;  %v10504_v13 = vld [vmem:[#allocation2 + $0x248] sm:$0xff]  ;;  %v10506_v14 = vld [vmem:[#allocation2 + $0x240] sm:$0xff] }
  0xd6   :  { %676 = vst.msk [vmem:[#allocation2 + $0x271] sm:$0xff] %vm629_vm3, %v522_v40  ;;  %v383_v46 = vpop.permute.xlu1 %382  ;;  %803 = vst.msk [vmem:[#allocation3 + $0x168] sm:$0xff] %vm629_vm3, %v10504_v13  ;;  %v14625_v39 = vld [vmem:[#allocation8_spill] sm:$0xff] }
  0xd7   :  { %802 = vst.msk [vmem:[#allocation3 + $0x160] sm:$0xff] %vm629_vm3, %v10506_v14  ;;  %v525_v21 = vmax.f32 %v10053_v43, %v383_v46  ;;  %v381_v22 = vpop.permute.xlu0 %380  ;;  %v14624_v43 = vld [vmem:[#allocation7_spill] sm:$0xff] }
  0xd8   :  { %v524_v52 = vmax.f32 %v10057_v44, %v381_v22  ;;  %1036 = vrot.lane.b32.xlu1 %v865_v51, %s9328_s0  ;;  %v866_v56 = vld [vmem:[#allocation2 + $0x241] sm:$0xff]  ;;  %v14626_v51 = vld [vmem:[#allocation9_spill] sm:$0xff] }
  0xd9   :  { %679 = vst.msk [vmem:[#allocation2 + $0x291] sm:$0xff] %vm629_vm3, %v525_v21  ;;  %1034 = vrot.lane.b32.xlu0 %v864_v25, %s9328_s0  ;;  %v10518_v26 = vld [vmem:[#allocation2 + $0x260] sm:$0xff]  ;;  %v10520_v11 = vld [vmem:[#allocation2 + $0x258] sm:$0xff] }
  0xda   :  { %678 = vst.msk [vmem:[#allocation2 + $0x289] sm:$0xff] %vm629_vm3, %v524_v52  ;;  %v387_v0 = vpop.permute.xlu1 %386  ;;  %805 = vst.msk [vmem:[#allocation3 + $0x178] sm:$0xff] %vm629_vm3, %v10518_v26 }
  0xdb   :  { %804 = vst.msk [vmem:[#allocation3 + $0x170] sm:$0xff] %vm629_vm3, %v10520_v11  ;;  %v527_v44 = vmax.f32 %v14624_v43, %v387_v0  ;;  %v385_v4 = vpop.permute.xlu0 %384  ;;  %v869_v0 = vld [vmem:[#allocation2 + $0x261] sm:$0xff]  ;;  %v14627_v43 = vld [vmem:[#allocation10_spill] sm:$0xff] }
  0xdc   :  { %v526_v40 = vmax.f32 %v14625_v39, %v385_v4  ;;  %1040 = vrot.lane.b32.xlu1 %v867_v5, %s9328_s0  ;;  %v868_v4 = vld [vmem:[#allocation2 + $0x259] sm:$0xff] }
  0xdd   :  { %681 = vst.msk [vmem:[#allocation2 + $0x2a9] sm:$0xff] %vm629_vm3, %v527_v44  ;;  %1038 = vrot.lane.b32.xlu0 %v866_v56, %s9328_s0  ;;  %v10532_v46 = vld [vmem:[#allocation2 + $0x278] sm:$0xff]  ;;  %v10534_v21 = vld [vmem:[#allocation2 + $0x270] sm:$0xff]  ;;  %v14630_v56 = vld [vmem:[#allocation11_spill] sm:$0xff] }
  0xde   :  { %680 = vst.msk [vmem:[#allocation2 + $0x2a1] sm:$0xff] %vm629_vm3, %v526_v40  ;;  %v391_v22 = vpop.permute.xlu1 %390  ;;  %807 = vst.msk [vmem:[#allocation3 + $0x188] sm:$0xff] %vm629_vm3, %v10532_v46 }
  0xdf   :  { %806 = vst.msk [vmem:[#allocation3 + $0x180] sm:$0xff] %vm629_vm3, %v10534_v21  ;;  %v529_v52 = vmax.f32 %v14626_v51, %v391_v22  ;;  %v389_v25 = vpop.permute.xlu0 %388 }
  0xe0   :  { %v528_v44 = vmax.f32 %v14627_v43, %v389_v25  ;;  %1044 = vrot.lane.b32.xlu1 %v869_v0, %s9328_s0  ;;  %v871_v25 = vld [vmem:[#allocation2 + $0x279] sm:$0xff]  ;;  %v870_v43 = vld [vmem:[#allocation2 + $0x271] sm:$0xff] }
  0xe1   :  { %683 = vst.msk [vmem:[#allocation2 + $0x2c1] sm:$0xff] %vm629_vm3, %v529_v52  ;;  %1042 = vrot.lane.b32.xlu0 %v868_v4, %s9328_s0  ;;  %v10546_v5 = vld [vmem:[#allocation2 + $0x290] sm:$0xff]  ;;  %v10548_v39 = vld [vmem:[#allocation2 + $0x288] sm:$0xff] }
  0xe2   :  { %14628 = vst [vmem:[#allocation7_spill] sm:$0xff] %v10546_v5  ;;  %14629 = vst [vmem:[#allocation8_spill] sm:$0xff] %v10548_v39  ;;  %v395_v40 = vpop.permute.xlu1 %394  ;;  %v14631_v52 = vld [vmem:[#allocation12_spill] sm:$0xff] }
  0xe3   :  { %682 = vst.msk [vmem:[#allocation2 + $0x2b9] sm:$0xff] %vm629_vm3, %v528_v44  ;;  %809 = vst.msk [vmem:[#allocation3 + $0x198] sm:$0xff] %vm629_vm3, %v10546_v5  ;;  %v531_v22 = vmax.f32 %v14630_v56, %v395_v40  ;;  %v393_v51 = vpop.permute.xlu0 %392  ;;  %v14633_v40 = vld [vmem:[#allocation13_spill] sm:$0xff] }
  0xe4   :  { %808 = vst.msk [vmem:[#allocation3 + $0x190] sm:$0xff] %vm629_vm3, %v10548_v39  ;;  %v530_v0 = vmax.f32 %v14631_v52, %v393_v51  ;;  %1048 = vrot.lane.b32.xlu1 %v871_v25, %s9328_s0  ;;  %v873_v25 = vld [vmem:[#allocation2 + $0x291] sm:$0xff] }
  0xe5   :  { %685 = vst.msk [vmem:[#allocation2 + $0x2d9] sm:$0xff] %vm629_vm3, %v531_v22  ;;  %1046 = vrot.lane.b32.xlu0 %v870_v43, %s9328_s0  ;;  %v10560_v44 = vld [vmem:[#allocation2 + $0x2a8] sm:$0xff]  ;;  %v10562_v4 = vld [vmem:[#allocation2 + $0x2a0] sm:$0xff]  ;;  %v14634_v22 = vld [vmem:[#allocation14_spill] sm:$0xff] }
  0xe6   :  { %14632 = vst [vmem:[#allocation9_spill] sm:$0xff] %v10562_v4  ;;  %684 = vst.msk [vmem:[#allocation2 + $0x2d1] sm:$0xff] %vm629_vm3, %v530_v0  ;;  %v399_v39 = vpop.permute.xlu1 %398  ;;  %v872_v43 = vld [vmem:[#allocation2 + $0x289] sm:$0xff] }
  0xe7   :  { %811 = vst.msk [vmem:[#allocation3 + $0x1a8] sm:$0xff] %vm629_vm3, %v10560_v44  ;;  %810 = vst.msk [vmem:[#allocation3 + $0x1a0] sm:$0xff] %vm629_vm3, %v10562_v4  ;;  %v533_v56 = vmax.f32 %v14633_v40, %v399_v39  ;;  %v397_v51 = vpop.permute.xlu0 %396 }
  0xe8   :  { %v532_v52 = vmax.f32 %v14634_v22, %v397_v51  ;;  %1052 = vrot.lane.b32.xlu1 %v873_v25, %s9328_s0  ;;  %v875_v51 = vld [vmem:[#allocation2 + $0x2a9] sm:$0xff]  ;;  %v874_v25 = vld [vmem:[#allocation2 + $0x2a1] sm:$0xff] }
  0xe9   :  { %687 = vst.msk [vmem:[#allocation2 + $0x2f1] sm:$0xff] %vm629_vm3, %v533_v56  ;;  %1050 = vrot.lane.b32.xlu0 %v872_v43, %s9328_s0 }
  0xea   :  { %v10574_v0 = vld [vmem:[#allocation2 + $0x2c0] sm:$0xff]  ;;  %v10576_v5 = vld [vmem:[#allocation2 + $0x2b8] sm:$0xff]  ;;  %686 = vst.msk [vmem:[#allocation2 + $0x2e9] sm:$0xff] %vm629_vm3, %v532_v52  ;;  %v403_v4 = vpop.permute.xlu1 %402 }
  0xeb   :  { %813 = vst.msk [vmem:[#allocation3 + $0x1b8] sm:$0xff] %vm629_vm3, %v10574_v0  ;;  %812 = vst.msk [vmem:[#allocation3 + $0x1b0] sm:$0xff] %vm629_vm3, %v10576_v5  ;;  %v535_v39 = vmax.f32 %v10153_v8, %v403_v4  ;;  %v401_v40 = vpop.permute.xlu0 %400  ;;  %v877_v4 = vld [vmem:[#allocation2 + $0x2c1] sm:$0xff] }
  0xec   :  { %v534_v56 = vmax.f32 %v10157_v15, %v401_v40  ;;  %1056 = vrot.lane.b32.xlu1 %v875_v51, %s9328_s0  ;;  %v876_v40 = vld [vmem:[#allocation2 + $0x2b9] sm:$0xff] }
  0xed   :  { %689 = vst.msk [vmem:[#allocation2 + $0x309] sm:$0xff] %vm629_vm3, %v535_v39  ;;  %1054 = vrot.lane.b32.xlu0 %v874_v25, %s9328_s0  ;;  %v10588_v22 = vld [vmem:[#allocation2 + $0x2d8] sm:$0xff]  ;;  %v10590_v52 = vld [vmem:[#allocation2 + $0x2d0] sm:$0xff] }
  0xee   :  { %688 = vst.msk [vmem:[#allocation2 + $0x301] sm:$0xff] %vm629_vm3, %v534_v56  ;;  %v407_v43 = vpop.permute.xlu1 %406  ;;  %815 = vst.msk [vmem:[#allocation3 + $0x1c8] sm:$0xff] %vm629_vm3, %v10588_v22 }
  0xef   :  { %814 = vst.msk [vmem:[#allocation3 + $0x1c0] sm:$0xff] %vm629_vm3, %v10590_v52  ;;  %v537_v8 = vmax.f32 %v10177_v62, %v407_v43  ;;  %v405_v15 = vpop.permute.xlu0 %404  ;;  %v879_v43 = vld [vmem:[#allocation2 + $0x2d9] sm:$0xff] }
  0xf0   :  { %v536_v39 = vmax.f32 %v10182_v61, %v405_v15  ;;  %1060 = vrot.lane.b32.xlu1 %v877_v4, %s9328_s0  ;;  %v878_v15 = vld [vmem:[#allocation2 + $0x2d1] sm:$0xff] }
  0xf1   :  { %691 = vst.msk [vmem:[#allocation2 + $0x321] sm:$0xff] %vm629_vm3, %v537_v8  ;;  %1058 = vrot.lane.b32.xlu0 %v876_v40, %s9328_s0  ;;  %v10602_v51 = vld [vmem:[#allocation2 + $0x2f0] sm:$0xff]  ;;  %v10604_v56 = vld [vmem:[#allocation2 + $0x2e8] sm:$0xff] }
  0xf2   :  { %690 = vst.msk [vmem:[#allocation2 + $0x319] sm:$0xff] %vm629_vm3, %v536_v39  ;;  %v411_v25 = vpop.permute.xlu1 %410  ;;  %817 = vst.msk [vmem:[#allocation3 + $0x1d8] sm:$0xff] %vm629_vm3, %v10602_v51 }
  0xf3   :  { %816 = vst.msk [vmem:[#allocation3 + $0x1d0] sm:$0xff] %vm629_vm3, %v10604_v56  ;;  %v539_v61 = vmax.f32 %v10201_v50, %v411_v25  ;;  %v409_v62 = vpop.permute.xlu0 %408  ;;  %v880_v25 = vld [vmem:[#allocation2 + $0x2e9] sm:$0xff] }
  0xf4   :  { %v538_v8 = vmax.f32 %v10206_v31, %v409_v62  ;;  %1064 = vrot.lane.b32.xlu1 %v879_v43, %s9328_s0  ;;  %v881_v31 = vld [vmem:[#allocation2 + $0x2f1] sm:$0xff] }
  0xf5   :  { %693 = vst.msk [vmem:[#allocation2 + $0x339] sm:$0xff] %vm629_vm3, %v539_v61  ;;  %1062 = vrot.lane.b32.xlu0 %v878_v15, %s9328_s0  ;;  %v10616_v4 = vld [vmem:[#allocation2 + $0x308] sm:$0xff]  ;;  %v10618_v39 = vld [vmem:[#allocation2 + $0x300] sm:$0xff] }
  0xf6   :  { %692 = vst.msk [vmem:[#allocation2 + $0x331] sm:$0xff] %vm629_vm3, %v538_v8  ;;  %v953_v40 = vpop.permute.xlu1 %952  ;;  %819 = vst.msk [vmem:[#allocation3 + $0x1e8] sm:$0xff] %vm629_vm3, %v10616_v4  ;;  %v883_v15 = vld [vmem:[#allocation2 + $0x309] sm:$0xff] }
  0xf7   :  { %818 = vst.msk [vmem:[#allocation3 + $0x1e0] sm:$0xff] %vm629_vm3, %v10618_v39  ;;  %v951_v50 = vpop.permute.xlu0 %950 }
  0xf8   :  { %1144 = vst.msk [vmem:[#allocation3 + $0x8] sm:$0xff] %vm1142_vm4, %v953_v40  ;;  %1143 = vst.msk [vmem:[#allocation3] sm:$0xff] %vm1142_vm4, %v951_v50  ;;  %1068 = vrot.lane.b32.xlu1 %v881_v31, %s9328_s0  ;;  %v882_v40 = vld [vmem:[#allocation2 + $0x301] sm:$0xff] }
  0xf9   :  { %1066 = vrot.lane.b32.xlu0 %v880_v25, %s9328_s0  ;;  %v10629_v61 = vld [vmem:[#allocation2 + $0x320] sm:$0xff]  ;;  %v10631_v62 = vld [vmem:[#allocation2 + $0x318] sm:$0xff] }
  0xfa   :  { %14635 = vst [vmem:[#allocation10_spill] sm:$0xff] %v10629_v61  ;;  %14636 = vst [vmem:[#allocation11_spill] sm:$0xff] %v10631_v62  ;;  %v957_v43 = vpop.permute.xlu1 %956  ;;  %v885_v25 = vld [vmem:[#allocation2 + $0x321] sm:$0xff] }
  0xfb   :  { %821 = vst.msk [vmem:[#allocation3 + $0x1f8] sm:$0xff] %vm629_vm3, %v10629_v61  ;;  %820 = vst.msk [vmem:[#allocation3 + $0x1f0] sm:$0xff] %vm629_vm3, %v10631_v62  ;;  %v955_v8 = vpop.permute.xlu0 %954  ;;  %v884_v62 = vld [vmem:[#allocation2 + $0x319] sm:$0xff]  ;;  %vm7536_vm3 = vcmask 458112  }
  0xfc   :  { %1146 = vst.msk [vmem:[#allocation3 + $0x18] sm:$0xff] %vm1142_vm4, %v957_v43  ;;  %1145 = vst.msk [vmem:[#allocation3 + $0x10] sm:$0xff] %vm1142_vm4, %v955_v8  ;;  %1072 = vrot.lane.b32.xlu1 %v883_v15, %s9328_s0  ;;  %v1208_v43 = vld [vmem:[#allocation2 + $0xa] sm:$0xff]  ;;  %v1207_v8 = vld [vmem:[#allocation2 + $0x2] sm:$0xff] }
  0xfd   :  { %1070 = vrot.lane.b32.xlu0 %v882_v40, %s9328_s0 }
  0xfe   :  { %v961_v50 = vpop.permute.xlu1 %960 }
  0xff   :  { %1148 = vst.msk [vmem:[#allocation3 + $0x28] sm:$0xff] %vm1142_vm4, %v961_v50  ;;  %v959_v31 = vpop.permute.xlu0 %958 }
 0x100   :  { %1147 = vst.msk [vmem:[#allocation3 + $0x20] sm:$0xff] %vm1142_vm4, %v959_v31  ;;  %1076 = vrot.lane.b32.xlu1 %v885_v25, %s9328_s0  ;;  %v1210_v31 = vld [vmem:[#allocation2 + $0x22] sm:$0xff] }
 0x101   :  { %1074 = vrot.lane.b32.xlu0 %v884_v62, %s9328_s0  ;;  %v1209_v62 = vld [vmem:[#allocation2 + $0x1a] sm:$0xff] }
 0x102   :  { %v965_v61 = vpop.permute.xlu1 %964 }
 0x103   :  { %1150 = vst.msk [vmem:[#allocation3 + $0x38] sm:$0xff] %vm1142_vm4, %v965_v61  ;;  %v963_v15 = vpop.permute.xlu0 %962 }
 0x104   :  { %1149 = vst.msk [vmem:[#allocation3 + $0x30] sm:$0xff] %vm1142_vm4, %v963_v15  ;;  %1337 = vrot.lane.b32.xlu1 %v1208_v43, %s9329_s17  ;;  %v1212_v15 = vld [vmem:[#allocation2 + $0x3a] sm:$0xff]  ;;  %v1211_v43 = vld [vmem:[#allocation2 + $0x32] sm:$0xff] }
 0x105   :  { %1335 = vrot.lane.b32.xlu0 %v1207_v8, %s9329_s17 }
 0x106   :  { %v969_v40 = vpop.permute.xlu1 %968 }
 0x107   :  { %1152 = vst.msk [vmem:[#allocation3 + $0x48] sm:$0xff] %vm1142_vm4, %v969_v40  ;;  %v967_v50 = vpop.permute.xlu0 %966 }
 0x108   :  { %1151 = vst.msk [vmem:[#allocation3 + $0x40] sm:$0xff] %vm1142_vm4, %v967_v50  ;;  %1341 = vrot.lane.b32.xlu1 %v1210_v31, %s9329_s17  ;;  %v1214_v50 = vld [vmem:[#allocation2 + $0x52] sm:$0xff]  ;;  %v1213_v31 = vld [vmem:[#allocation2 + $0x4a] sm:$0xff] }
 0x109   :  { %1339 = vrot.lane.b32.xlu0 %v1209_v62, %s9329_s17 }
 0x10a   :  { %v973_v61 = vpop.permute.xlu1 %972 }
 0x10b   :  { %1154 = vst.msk [vmem:[#allocation3 + $0x58] sm:$0xff] %vm1142_vm4, %v973_v61  ;;  %v971_v25 = vpop.permute.xlu0 %970 }
 0x10c   :  { %1153 = vst.msk [vmem:[#allocation3 + $0x50] sm:$0xff] %vm1142_vm4, %v971_v25  ;;  %1345 = vrot.lane.b32.xlu1 %v1212_v15, %s9329_s17  ;;  %v1216_v25 = vld [vmem:[#allocation2 + $0x6a] sm:$0xff]  ;;  %v1215_v15 = vld [vmem:[#allocation2 + $0x62] sm:$0xff] }
 0x10d   :  { %1343 = vrot.lane.b32.xlu0 %v1211_v43, %s9329_s17 }
 0x10e   :  { %v977_v8 = vpop.permute.xlu1 %976 }
 0x10f   :  { %1156 = vst.msk [vmem:[#allocation3 + $0x68] sm:$0xff] %vm1142_vm4, %v977_v8  ;;  %v975_v40 = vpop.permute.xlu0 %974 }
 0x110   :  { %1155 = vst.msk [vmem:[#allocation3 + $0x60] sm:$0xff] %vm1142_vm4, %v975_v40  ;;  %1349 = vrot.lane.b32.xlu1 %v1214_v50, %s9329_s17  ;;  %v1218_v40 = vld [vmem:[#allocation2 + $0x82] sm:$0xff]  ;;  %v1217_v50 = vld [vmem:[#allocation2 + $0x7a] sm:$0xff] }
 0x111   :  { %1347 = vrot.lane.b32.xlu0 %v1213_v31, %s9329_s17 }
 0x112   :  { %v981_v62 = vpop.permute.xlu1 %980 }
 0x113   :  { %1158 = vst.msk [vmem:[#allocation3 + $0x78] sm:$0xff] %vm1142_vm4, %v981_v62  ;;  %v979_v61 = vpop.permute.xlu0 %978 }
 0x114   :  { %1157 = vst.msk [vmem:[#allocation3 + $0x70] sm:$0xff] %vm1142_vm4, %v979_v61  ;;  %1353 = vrot.lane.b32.xlu1 %v1216_v25, %s9329_s17  ;;  %v1220_v61 = vld [vmem:[#allocation2 + $0x9a] sm:$0xff]  ;;  %v1219_v25 = vld [vmem:[#allocation2 + $0x92] sm:$0xff] }
 0x115   :  { %1351 = vrot.lane.b32.xlu0 %v1215_v15, %s9329_s17 }
 0x116   :  { %v985_v43 = vpop.permute.xlu1 %984 }
 0x117   :  { %1160 = vst.msk [vmem:[#allocation3 + $0x88] sm:$0xff] %vm1142_vm4, %v985_v43  ;;  %v983_v8 = vpop.permute.xlu0 %982 }
 0x118   :  { %1159 = vst.msk [vmem:[#allocation3 + $0x80] sm:$0xff] %vm1142_vm4, %v983_v8  ;;  %1357 = vrot.lane.b32.xlu1 %v1218_v40, %s9329_s17  ;;  %v1222_v8 = vld [vmem:[#allocation2 + $0xb2] sm:$0xff]  ;;  %v1221_v40 = vld [vmem:[#allocation2 + $0xaa] sm:$0xff] }
 0x119   :  { %1355 = vrot.lane.b32.xlu0 %v1217_v50, %s9329_s17 }
 0x11a   :  { %v989_v31 = vpop.permute.xlu1 %988 }
 0x11b   :  { %1162 = vst.msk [vmem:[#allocation3 + $0x98] sm:$0xff] %vm1142_vm4, %v989_v31  ;;  %v987_v62 = vpop.permute.xlu0 %986 }
 0x11c   :  { %1161 = vst.msk [vmem:[#allocation3 + $0x90] sm:$0xff] %vm1142_vm4, %v987_v62  ;;  %1361 = vrot.lane.b32.xlu1 %v1220_v61, %s9329_s17  ;;  %v1224_v62 = vld [vmem:[#allocation2 + $0xca] sm:$0xff]  ;;  %v1223_v61 = vld [vmem:[#allocation2 + $0xc2] sm:$0xff] }
 0x11d   :  { %1359 = vrot.lane.b32.xlu0 %v1219_v25, %s9329_s17 }
 0x11e   :  { %v993_v15 = vpop.permute.xlu1 %992 }
 0x11f   :  { %1164 = vst.msk [vmem:[#allocation3 + $0xa8] sm:$0xff] %vm1142_vm4, %v993_v15  ;;  %v991_v43 = vpop.permute.xlu0 %990 }
 0x120   :  { %1163 = vst.msk [vmem:[#allocation3 + $0xa0] sm:$0xff] %vm1142_vm4, %v991_v43  ;;  %1365 = vrot.lane.b32.xlu1 %v1222_v8, %s9329_s17  ;;  %v1226_v43 = vld [vmem:[#allocation2 + $0xe2] sm:$0xff]  ;;  %v1225_v8 = vld [vmem:[#allocation2 + $0xda] sm:$0xff] }
 0x121   :  { %1363 = vrot.lane.b32.xlu0 %v1221_v40, %s9329_s17 }
 0x122   :  { %v997_v50 = vpop.permute.xlu1 %996 }
 0x123   :  { %1166 = vst.msk [vmem:[#allocation3 + $0xb8] sm:$0xff] %vm1142_vm4, %v997_v50  ;;  %v995_v31 = vpop.permute.xlu0 %994 }
 0x124   :  { %1165 = vst.msk [vmem:[#allocation3 + $0xb0] sm:$0xff] %vm1142_vm4, %v995_v31  ;;  %1369 = vrot.lane.b32.xlu1 %v1224_v62, %s9329_s17  ;;  %v1228_v31 = vld [vmem:[#allocation2 + $0xfa] sm:$0xff]  ;;  %v1227_v62 = vld [vmem:[#allocation2 + $0xf2] sm:$0xff] }
 0x125   :  { %1367 = vrot.lane.b32.xlu0 %v1223_v61, %s9329_s17 }
 0x126   :  { %v1001_v25 = vpop.permute.xlu1 %1000 }
 0x127   :  { %1168 = vst.msk [vmem:[#allocation3 + $0xc8] sm:$0xff] %vm1142_vm4, %v1001_v25  ;;  %v999_v15 = vpop.permute.xlu0 %998 }
 0x128   :  { %1167 = vst.msk [vmem:[#allocation3 + $0xc0] sm:$0xff] %vm1142_vm4, %v999_v15  ;;  %1373 = vrot.lane.b32.xlu1 %v1226_v43, %s9329_s17  ;;  %v1230_v15 = vld [vmem:[#allocation2 + $0x112] sm:$0xff]  ;;  %v1229_v43 = vld [vmem:[#allocation2 + $0x10a] sm:$0xff] }
 0x129   :  { %1371 = vrot.lane.b32.xlu0 %v1225_v8, %s9329_s17 }
 0x12a   :  { %v1005_v40 = vpop.permute.xlu1 %1004 }
 0x12b   :  { %1170 = vst.msk [vmem:[#allocation3 + $0xd8] sm:$0xff] %vm1142_vm4, %v1005_v40  ;;  %v1003_v50 = vpop.permute.xlu0 %1002 }
 0x12c   :  { %1169 = vst.msk [vmem:[#allocation3 + $0xd0] sm:$0xff] %vm1142_vm4, %v1003_v50  ;;  %1377 = vrot.lane.b32.xlu1 %v1228_v31, %s9329_s17  ;;  %v1232_v50 = vld [vmem:[#allocation2 + $0x12a] sm:$0xff]  ;;  %v1231_v31 = vld [vmem:[#allocation2 + $0x122] sm:$0xff] }
 0x12d   :  { %1375 = vrot.lane.b32.xlu0 %v1227_v62, %s9329_s17 }
 0x12e   :  { %v1009_v61 = vpop.permute.xlu1 %1008 }
 0x12f   :  { %1172 = vst.msk [vmem:[#allocation3 + $0xe8] sm:$0xff] %vm1142_vm4, %v1009_v61  ;;  %v1007_v25 = vpop.permute.xlu0 %1006 }
 0x130   :  { %1171 = vst.msk [vmem:[#allocation3 + $0xe0] sm:$0xff] %vm1142_vm4, %v1007_v25  ;;  %1381 = vrot.lane.b32.xlu1 %v1230_v15, %s9329_s17  ;;  %v1234_v25 = vld [vmem:[#allocation2 + $0x142] sm:$0xff]  ;;  %v1233_v15 = vld [vmem:[#allocation2 + $0x13a] sm:$0xff] }
 0x131   :  { %1379 = vrot.lane.b32.xlu0 %v1229_v43, %s9329_s17 }
 0x132   :  { %v1013_v8 = vpop.permute.xlu1 %1012 }
 0x133   :  { %1174 = vst.msk [vmem:[#allocation3 + $0xf8] sm:$0xff] %vm1142_vm4, %v1013_v8  ;;  %v1011_v40 = vpop.permute.xlu0 %1010 }
 0x134   :  { %1173 = vst.msk [vmem:[#allocation3 + $0xf0] sm:$0xff] %vm1142_vm4, %v1011_v40  ;;  %1385 = vrot.lane.b32.xlu1 %v1232_v50, %s9329_s17  ;;  %v1236_v40 = vld [vmem:[#allocation2 + $0x15a] sm:$0xff]  ;;  %v1235_v50 = vld [vmem:[#allocation2 + $0x152] sm:$0xff] }
 0x135   :  { %1383 = vrot.lane.b32.xlu0 %v1231_v31, %s9329_s17 }
 0x136   :  { %v1017_v62 = vpop.permute.xlu1 %1016 }
 0x137   :  { %1176 = vst.msk [vmem:[#allocation3 + $0x108] sm:$0xff] %vm1142_vm4, %v1017_v62  ;;  %v1015_v61 = vpop.permute.xlu0 %1014 }
 0x138   :  { %1175 = vst.msk [vmem:[#allocation3 + $0x100] sm:$0xff] %vm1142_vm4, %v1015_v61  ;;  %1389 = vrot.lane.b32.xlu1 %v1234_v25, %s9329_s17  ;;  %v1238_v61 = vld [vmem:[#allocation2 + $0x172] sm:$0xff]  ;;  %v1237_v25 = vld [vmem:[#allocation2 + $0x16a] sm:$0xff] }
 0x139   :  { %1387 = vrot.lane.b32.xlu0 %v1233_v15, %s9329_s17  ;;  %v1240_v15 = vld [vmem:[#allocation2 + $0x1ba] sm:$0xff] }
 0x13a   :  { %v1021_v43 = vpop.permute.xlu1 %1020 }
 0x13b   :  { %1178 = vst.msk [vmem:[#allocation3 + $0x118] sm:$0xff] %vm1142_vm4, %v1021_v43  ;;  %v1019_v8 = vpop.permute.xlu0 %1018 }
 0x13c   :  { %1177 = vst.msk [vmem:[#allocation3 + $0x110] sm:$0xff] %vm1142_vm4, %v1019_v8  ;;  %1393 = vrot.lane.b32.xlu1 %v1236_v40, %s9329_s17  ;;  %v1239_v8 = vld [vmem:[#allocation2 + $0x1b2] sm:$0xff] }
 0x13d   :  { %1391 = vrot.lane.b32.xlu0 %v1235_v50, %s9329_s17 }
 0x13e   :  { %v1025_v31 = vpop.permute.xlu1 %1024 }
 0x13f   :  { %1180 = vst.msk [vmem:[#allocation3 + $0x128] sm:$0xff] %vm1142_vm4, %v1025_v31  ;;  %v1023_v62 = vpop.permute.xlu0 %1022 }
 0x140   :  { %1179 = vst.msk [vmem:[#allocation3 + $0x120] sm:$0xff] %vm1142_vm4, %v1023_v62  ;;  %1397 = vrot.lane.b32.xlu1 %v1238_v61, %s9329_s17  ;;  %v1242_v62 = vld [vmem:[#allocation2 + $0x1d2] sm:$0xff]  ;;  %v1241_v61 = vld [vmem:[#allocation2 + $0x1ca] sm:$0xff] }
 0x141   :  { %1395 = vrot.lane.b32.xlu0 %v1237_v25, %s9329_s17 }
 0x142   :  { %v1029_v43 = vpop.permute.xlu1 %1028 }
 0x143   :  { %1182 = vst.msk [vmem:[#allocation3 + $0x138] sm:$0xff] %vm1142_vm4, %v1029_v43  ;;  %v1027_v40 = vpop.permute.xlu0 %1026 }
 0x144   :  { %1181 = vst.msk [vmem:[#allocation3 + $0x130] sm:$0xff] %vm1142_vm4, %v1027_v40  ;;  %1401 = vrot.lane.b32.xlu1 %v1240_v15, %s9329_s17  ;;  %v1244_v40 = vld [vmem:[#allocation2 + $0x1ea] sm:$0xff]  ;;  %v1243_v15 = vld [vmem:[#allocation2 + $0x1e2] sm:$0xff] }
 0x145   :  { %1399 = vrot.lane.b32.xlu0 %v1239_v8, %s9329_s17 }
 0x146   :  { %v1033_v50 = vpop.permute.xlu1 %1032 }
 0x147   :  { %1184 = vst.msk [vmem:[#allocation3 + $0x148] sm:$0xff] %vm1142_vm4, %v1033_v50  ;;  %v1031_v31 = vpop.permute.xlu0 %1030 }
 0x148   :  { %1183 = vst.msk [vmem:[#allocation3 + $0x140] sm:$0xff] %vm1142_vm4, %v1031_v31  ;;  %1405 = vrot.lane.b32.xlu1 %v1242_v62, %s9329_s17  ;;  %v1246_v31 = vld [vmem:[#allocation2 + $0x202] sm:$0xff]  ;;  %v1245_v62 = vld [vmem:[#allocation2 + $0x1fa] sm:$0xff] }
 0x149   :  { %1403 = vrot.lane.b32.xlu0 %v1241_v61, %s9329_s17 }
 0x14a   :  { %v1037_v25 = vpop.permute.xlu1 %1036 }
 0x14b   :  { %1186 = vst.msk [vmem:[#allocation3 + $0x158] sm:$0xff] %vm1142_vm4, %v1037_v25  ;;  %v1035_v43 = vpop.permute.xlu0 %1034 }
 0x14c   :  { %1185 = vst.msk [vmem:[#allocation3 + $0x150] sm:$0xff] %vm1142_vm4, %v1035_v43  ;;  %1409 = vrot.lane.b32.xlu1 %v1244_v40, %s9329_s17  ;;  %v1248_v43 = vld [vmem:[#allocation2 + $0x21a] sm:$0xff]  ;;  %v1247_v40 = vld [vmem:[#allocation2 + $0x212] sm:$0xff] }
 0x14d   :  { %1407 = vrot.lane.b32.xlu0 %v1243_v15, %s9329_s17 }
 0x14e   :  { %v1041_v8 = vpop.permute.xlu1 %1040 }
 0x14f   :  { %1188 = vst.msk [vmem:[#allocation3 + $0x168] sm:$0xff] %vm1142_vm4, %v1041_v8  ;;  %v1039_v50 = vpop.permute.xlu0 %1038 }
 0x150   :  { %1187 = vst.msk [vmem:[#allocation3 + $0x160] sm:$0xff] %vm1142_vm4, %v1039_v50  ;;  %1413 = vrot.lane.b32.xlu1 %v1246_v31, %s9329_s17  ;;  %v1250_v50 = vld [vmem:[#allocation2 + $0x232] sm:$0xff]  ;;  %v1249_v31 = vld [vmem:[#allocation2 + $0x22a] sm:$0xff] }
 0x151   :  { %1411 = vrot.lane.b32.xlu0 %v1245_v62, %s9329_s17 }
 0x152   :  { %v1045_v61 = vpop.permute.xlu1 %1044 }
 0x153   :  { %1190 = vst.msk [vmem:[#allocation3 + $0x178] sm:$0xff] %vm1142_vm4, %v1045_v61  ;;  %v1043_v25 = vpop.permute.xlu0 %1042 }
 0x154   :  { %1189 = vst.msk [vmem:[#allocation3 + $0x170] sm:$0xff] %vm1142_vm4, %v1043_v25  ;;  %1417 = vrot.lane.b32.xlu1 %v1248_v43, %s9329_s17  ;;  %v1252_v25 = vld [vmem:[#allocation2 + $0x24a] sm:$0xff]  ;;  %v1251_v43 = vld [vmem:[#allocation2 + $0x242] sm:$0xff] }
 0x155   :  { %1415 = vrot.lane.b32.xlu0 %v1247_v40, %s9329_s17 }
 0x156   :  { %v1049_v15 = vpop.permute.xlu1 %1048 }
 0x157   :  { %1192 = vst.msk [vmem:[#allocation3 + $0x188] sm:$0xff] %vm1142_vm4, %v1049_v15  ;;  %v1047_v8 = vpop.permute.xlu0 %1046 }
 0x158   :  { %1191 = vst.msk [vmem:[#allocation3 + $0x180] sm:$0xff] %vm1142_vm4, %v1047_v8  ;;  %1421 = vrot.lane.b32.xlu1 %v1250_v50, %s9329_s17  ;;  %v1254_v8 = vld [vmem:[#allocation2 + $0x262] sm:$0xff]  ;;  %v1253_v50 = vld [vmem:[#allocation2 + $0x25a] sm:$0xff] }
 0x159   :  { %1419 = vrot.lane.b32.xlu0 %v1249_v31, %s9329_s17 }
 0x15a   :  { %v1053_v62 = vpop.permute.xlu1 %1052 }
 0x15b   :  { %1194 = vst.msk [vmem:[#allocation3 + $0x198] sm:$0xff] %vm1142_vm4, %v1053_v62  ;;  %v1051_v61 = vpop.permute.xlu0 %1050 }
 0x15c   :  { %1193 = vst.msk [vmem:[#allocation3 + $0x190] sm:$0xff] %vm1142_vm4, %v1051_v61  ;;  %1425 = vrot.lane.b32.xlu1 %v1252_v25, %s9329_s17  ;;  %v1256_v61 = vld [vmem:[#allocation2 + $0x27a] sm:$0xff]  ;;  %v1255_v25 = vld [vmem:[#allocation2 + $0x272] sm:$0xff] }
 0x15d   :  { %1423 = vrot.lane.b32.xlu0 %v1251_v43, %s9329_s17 }
 0x15e   :  { %v1057_v40 = vpop.permute.xlu1 %1056 }
 0x15f   :  { %1196 = vst.msk [vmem:[#allocation3 + $0x1a8] sm:$0xff] %vm1142_vm4, %v1057_v40  ;;  %v1055_v15 = vpop.permute.xlu0 %1054 }
 0x160   :  { %1195 = vst.msk [vmem:[#allocation3 + $0x1a0] sm:$0xff] %vm1142_vm4, %v1055_v15  ;;  %1429 = vrot.lane.b32.xlu1 %v1254_v8, %s9329_s17  ;;  %v1258_v15 = vld [vmem:[#allocation2 + $0x292] sm:$0xff]  ;;  %v1257_v8 = vld [vmem:[#allocation2 + $0x28a] sm:$0xff] }
 0x161   :  { %1427 = vrot.lane.b32.xlu0 %v1253_v50, %s9329_s17 }
 0x162   :  { %v1061_v31 = vpop.permute.xlu1 %1060 }
 0x163   :  { %1198 = vst.msk [vmem:[#allocation3 + $0x1b8] sm:$0xff] %vm1142_vm4, %v1061_v31  ;;  %v1059_v62 = vpop.permute.xlu0 %1058 }
 0x164   :  { %1197 = vst.msk [vmem:[#allocation3 + $0x1b0] sm:$0xff] %vm1142_vm4, %v1059_v62  ;;  %1433 = vrot.lane.b32.xlu1 %v1256_v61, %s9329_s17  ;;  %v1260_v62 = vld [vmem:[#allocation2 + $0x2aa] sm:$0xff]  ;;  %v1259_v61 = vld [vmem:[#allocation2 + $0x2a2] sm:$0xff] }
 0x165   :  { %1431 = vrot.lane.b32.xlu0 %v1255_v25, %s9329_s17 }
 0x166   :  { %v1065_v43 = vpop.permute.xlu1 %1064 }
 0x167   :  { %1200 = vst.msk [vmem:[#allocation3 + $0x1c8] sm:$0xff] %vm1142_vm4, %v1065_v43  ;;  %v1063_v40 = vpop.permute.xlu0 %1062 }
 0x168   :  { %1199 = vst.msk [vmem:[#allocation3 + $0x1c0] sm:$0xff] %vm1142_vm4, %v1063_v40  ;;  %1437 = vrot.lane.b32.xlu1 %v1258_v15, %s9329_s17  ;;  %v1262_v40 = vld [vmem:[#allocation2 + $0x2c2] sm:$0xff]  ;;  %v1261_v15 = vld [vmem:[#allocation2 + $0x2ba] sm:$0xff] }
 0x169   :  { %1435 = vrot.lane.b32.xlu0 %v1257_v8, %s9329_s17 }
 0x16a   :  { %v1069_v50 = vpop.permute.xlu1 %1068 }
 0x16b   :  { %1202 = vst.msk [vmem:[#allocation3 + $0x1d8] sm:$0xff] %vm1142_vm4, %v1069_v50  ;;  %v1067_v31 = vpop.permute.xlu0 %1066 }
 0x16c   :  { %1201 = vst.msk [vmem:[#allocation3 + $0x1d0] sm:$0xff] %vm1142_vm4, %v1067_v31  ;;  %1441 = vrot.lane.b32.xlu1 %v1260_v62, %s9329_s17  ;;  %v1264_v31 = vld [vmem:[#allocation2 + $0x2da] sm:$0xff]  ;;  %v1263_v62 = vld [vmem:[#allocation2 + $0x2d2] sm:$0xff] }
 0x16d   :  { %1439 = vrot.lane.b32.xlu0 %v1259_v61, %s9329_s17 }
 0x16e   :  { %v1073_v25 = vpop.permute.xlu1 %1072 }
 0x16f   :  { %1204 = vst.msk [vmem:[#allocation3 + $0x1e8] sm:$0xff] %vm1142_vm4, %v1073_v25  ;;  %v1071_v43 = vpop.permute.xlu0 %1070 }
 0x170   :  { %1203 = vst.msk [vmem:[#allocation3 + $0x1e0] sm:$0xff] %vm1142_vm4, %v1071_v43  ;;  %1445 = vrot.lane.b32.xlu1 %v1262_v40, %s9329_s17  ;;  %v1266_v43 = vld [vmem:[#allocation2 + $0x2f2] sm:$0xff]  ;;  %v1265_v40 = vld [vmem:[#allocation2 + $0x2ea] sm:$0xff] }
 0x171   :  { %1443 = vrot.lane.b32.xlu0 %v1261_v15, %s9329_s17 }
 0x172   :  { %v1077_v8 = vpop.permute.xlu1 %1076 }
 0x173   :  { %1206 = vst.msk [vmem:[#allocation3 + $0x1f8] sm:$0xff] %vm1142_vm4, %v1077_v8  ;;  %v1075_v50 = vpop.permute.xlu0 %1074 }
 0x174   :  { %1205 = vst.msk [vmem:[#allocation3 + $0x1f0] sm:$0xff] %vm1142_vm4, %v1075_v50  ;;  %1449 = vrot.lane.b32.xlu1 %v1264_v31, %s9329_s17  ;;  %v1268_v50 = vld [vmem:[#allocation2 + $0x30a] sm:$0xff]  ;;  %v1267_v31 = vld [vmem:[#allocation2 + $0x302] sm:$0xff]  ;;  %vm7921_vm4 = vcmask 523712  }
 0x175   :  { %1447 = vrot.lane.b32.xlu0 %v1263_v62, %s9329_s17 }
 0x176   :  { %v1338_v61 = vpop.permute.xlu1 %1337 }
 0x177   :  { %1529 = vst.msk [vmem:[#allocation3 + $0x8] sm:$0xff] %vm1527_vm5, %v1338_v61  ;;  %v1336_v25 = vpop.permute.xlu0 %1335 }
 0x178   :  { %1528 = vst.msk [vmem:[#allocation3] sm:$0xff] %vm1527_vm5, %v1336_v25  ;;  %1453 = vrot.lane.b32.xlu1 %v1266_v43, %s9329_s17  ;;  %v1270_v25 = vld [vmem:[#allocation2 + $0x322] sm:$0xff]  ;;  %v1269_v43 = vld [vmem:[#allocation2 + $0x31a] sm:$0xff] }
 0x179   :  { %1451 = vrot.lane.b32.xlu0 %v1265_v40, %s9329_s17 }
 0x17a   :  { %v1342_v15 = vpop.permute.xlu1 %1341 }
 0x17b   :  { %1531 = vst.msk [vmem:[#allocation3 + $0x18] sm:$0xff] %vm1527_vm5, %v1342_v15  ;;  %v1340_v8 = vpop.permute.xlu0 %1339 }
 0x17c   :  { %1530 = vst.msk [vmem:[#allocation3 + $0x10] sm:$0xff] %vm1527_vm5, %v1340_v8  ;;  %1457 = vrot.lane.b32.xlu1 %v1268_v50, %s9329_s17 }
 0x17d   :  { %1455 = vrot.lane.b32.xlu0 %v1267_v31, %s9329_s17 }
 0x17e   :  { %v1346_v62 = vpop.permute.xlu1 %1345 }
 0x17f   :  { %1533 = vst.msk [vmem:[#allocation3 + $0x28] sm:$0xff] %vm1527_vm5, %v1346_v62  ;;  %v1344_v61 = vpop.permute.xlu0 %1343 }
 0x180   :  { %1532 = vst.msk [vmem:[#allocation3 + $0x20] sm:$0xff] %vm1527_vm5, %v1344_v61  ;;  %1461 = vrot.lane.b32.xlu1 %v1270_v25, %s9329_s17 }
 0x181   :  { %1459 = vrot.lane.b32.xlu0 %v1269_v43, %s9329_s17 }
 0x182   :  { %v1350_v40 = vpop.permute.xlu1 %1349 }
 0x183   :  { %1535 = vst.msk [vmem:[#allocation3 + $0x38] sm:$0xff] %vm1527_vm5, %v1350_v40  ;;  %v1348_v15 = vpop.permute.xlu0 %1347 }
 0x184   :  { %1534 = vst.msk [vmem:[#allocation3 + $0x30] sm:$0xff] %vm1527_vm5, %v1348_v15  ;;  %1722 = vrot.lane.b32.xlu1 %v10232_v49, %s9330_s15 }
 0x185   :  { %1720 = vrot.lane.b32.xlu0 %v10218_v33, %s9330_s15 }
 0x186   :  { %v1354_v8 = vpop.permute.xlu1 %1353 }
 0x187   :  { %1537 = vst.msk [vmem:[#allocation3 + $0x48] sm:$0xff] %vm1527_vm5, %v1354_v8  ;;  %v1352_v50 = vpop.permute.xlu0 %1351 }
 0x188   :  { %1536 = vst.msk [vmem:[#allocation3 + $0x40] sm:$0xff] %vm1527_vm5, %v1352_v50  ;;  %1726 = vrot.lane.b32.xlu1 %v10228_v16, %s9330_s15 }
 0x189   :  { %1724 = vrot.lane.b32.xlu0 %v10213_v3, %s9330_s15 }
 0x18a   :  { %v1358_v31 = vpop.permute.xlu1 %1357 }
 0x18b   :  { %1539 = vst.msk [vmem:[#allocation3 + $0x58] sm:$0xff] %vm1527_vm5, %v1358_v31  ;;  %v1356_v62 = vpop.permute.xlu0 %1355 }
 0x18c   :  { %1538 = vst.msk [vmem:[#allocation3 + $0x50] sm:$0xff] %vm1527_vm5, %v1356_v62  ;;  %1730 = vrot.lane.b32.xlu1 %v10244_v7, %s9330_s15 }
 0x18d   :  { %1728 = vrot.lane.b32.xlu0 %v10246_v17, %s9330_s15 }
 0x18e   :  { %v1362_v33 = vpop.permute.xlu1 %1361 }
 0x18f   :  { %1541 = vst.msk [vmem:[#allocation3 + $0x68] sm:$0xff] %vm1527_vm5, %v1362_v33  ;;  %v1360_v49 = vpop.permute.xlu0 %1359 }
 0x190   :  { %1540 = vst.msk [vmem:[#allocation3 + $0x60] sm:$0xff] %vm1527_vm5, %v1360_v49  ;;  %1734 = vrot.lane.b32.xlu1 %v10258_v23, %s9330_s15 }
 0x191   :  { %1732 = vrot.lane.b32.xlu0 %v10260_v24, %s9330_s15 }
 0x192   :  { %v1366_v3 = vpop.permute.xlu1 %1365 }
 0x193   :  { %1543 = vst.msk [vmem:[#allocation3 + $0x78] sm:$0xff] %vm1527_vm5, %v1366_v3  ;;  %v1364_v16 = vpop.permute.xlu0 %1363 }
 0x194   :  { %1542 = vst.msk [vmem:[#allocation3 + $0x70] sm:$0xff] %vm1527_vm5, %v1364_v16  ;;  %1738 = vrot.lane.b32.xlu1 %v10272_v18, %s9330_s15 }
 0x195   :  { %1736 = vrot.lane.b32.xlu0 %v10274_v29, %s9330_s15 }
 0x196   :  { %v1370_v7 = vpop.permute.xlu1 %1369 }
 0x197   :  { %1545 = vst.msk [vmem:[#allocation3 + $0x88] sm:$0xff] %vm1527_vm5, %v1370_v7  ;;  %v1368_v17 = vpop.permute.xlu0 %1367 }
 0x198   :  { %1544 = vst.msk [vmem:[#allocation3 + $0x80] sm:$0xff] %vm1527_vm5, %v1368_v17  ;;  %1742 = vrot.lane.b32.xlu1 %v10286_v32, %s9330_s15  ;;  %v1978_v17 = vld [vmem:[#allocation2 + $0x21] sm:$0xff] }
 0x199   :  { %1740 = vrot.lane.b32.xlu0 %v10288_v35, %s9330_s15 }
 0x19a   :  { %v1374_v23 = vpop.permute.xlu1 %1373 }
 0x19b   :  { %1547 = vst.msk [vmem:[#allocation3 + $0x98] sm:$0xff] %vm1527_vm5, %v1374_v23  ;;  %v1372_v24 = vpop.permute.xlu0 %1371  ;;  %v1977_v23 = vld [vmem:[#allocation2 + $0x19] sm:$0xff] }
 0x19c   :  { %1546 = vst.msk [vmem:[#allocation3 + $0x90] sm:$0xff] %vm1527_vm5, %v1372_v24  ;;  %1746 = vrot.lane.b32.xlu1 %v10300_v30, %s9330_s15 }
 0x19d   :  { %1744 = vrot.lane.b32.xlu0 %v10302_v41, %s9330_s15 }
 0x19e   :  { %v1378_v18 = vpop.permute.xlu1 %1377 }
 0x19f   :  { %1549 = vst.msk [vmem:[#allocation3 + $0xa8] sm:$0xff] %vm1527_vm5, %v1378_v18  ;;  %v1376_v29 = vpop.permute.xlu0 %1375 }
 0x1a0   :  { %1548 = vst.msk [vmem:[#allocation3 + $0xa0] sm:$0xff] %vm1527_vm5, %v1376_v29  ;;  %1750 = vrot.lane.b32.xlu1 %v10314_v36, %s9330_s15  ;;  %v1980_v29 = vld [vmem:[#allocation2 + $0x39] sm:$0xff] }
 0x1a1   :  { %1748 = vrot.lane.b32.xlu0 %v10316_v47, %s9330_s15 }
 0x1a2   :  { %v1382_v32 = vpop.permute.xlu1 %1381 }
 0x1a3   :  { %1551 = vst.msk [vmem:[#allocation3 + $0xb8] sm:$0xff] %vm1527_vm5, %v1382_v32  ;;  %v1380_v35 = vpop.permute.xlu0 %1379  ;;  %v1979_v32 = vld [vmem:[#allocation2 + $0x31] sm:$0xff] }
 0x1a4   :  { %1550 = vst.msk [vmem:[#allocation3 + $0xb0] sm:$0xff] %vm1527_vm5, %v1380_v35  ;;  %1754 = vrot.lane.b32.xlu1 %v10328_v42, %s9330_s15 }
 0x1a5   :  { %1752 = vrot.lane.b32.xlu0 %v10330_v53, %s9330_s15 }
 0x1a6   :  { %v1386_v30 = vpop.permute.xlu1 %1385 }
 0x1a7   :  { %1553 = vst.msk [vmem:[#allocation3 + $0xc8] sm:$0xff] %vm1527_vm5, %v1386_v30  ;;  %v1384_v41 = vpop.permute.xlu0 %1383 }
 0x1a8   :  { %1552 = vst.msk [vmem:[#allocation3 + $0xc0] sm:$0xff] %vm1527_vm5, %v1384_v41  ;;  %1758 = vrot.lane.b32.xlu1 %v10342_v48, %s9330_s15  ;;  %v1982_v41 = vld [vmem:[#allocation2 + $0x51] sm:$0xff] }
 0x1a9   :  { %1756 = vrot.lane.b32.xlu0 %v10344_v59, %s9330_s15 }
 0x1aa   :  { %v1390_v36 = vpop.permute.xlu1 %1389 }
 0x1ab   :  { %1555 = vst.msk [vmem:[#allocation3 + $0xd8] sm:$0xff] %vm1527_vm5, %v1390_v36  ;;  %v1388_v47 = vpop.permute.xlu0 %1387  ;;  %v1981_v36 = vld [vmem:[#allocation2 + $0x49] sm:$0xff] }
 0x1ac   :  { %1554 = vst.msk [vmem:[#allocation3 + $0xd0] sm:$0xff] %vm1527_vm5, %v1388_v47  ;;  %1762 = vrot.lane.b32.xlu1 %v10356_v54, %s9330_s15 }
 0x1ad   :  { %1760 = vrot.lane.b32.xlu0 %v10358_v1, %s9330_s15 }
 0x1ae   :  { %v1394_v42 = vpop.permute.xlu1 %1393 }
 0x1af   :  { %1557 = vst.msk [vmem:[#allocation3 + $0xe8] sm:$0xff] %vm1527_vm5, %v1394_v42  ;;  %v1392_v53 = vpop.permute.xlu0 %1391 }
 0x1b0   :  { %1556 = vst.msk [vmem:[#allocation3 + $0xe0] sm:$0xff] %vm1527_vm5, %v1392_v53  ;;  %1766 = vrot.lane.b32.xlu1 %v10370_v60, %s9330_s15  ;;  %v1984_v53 = vld [vmem:[#allocation2 + $0x69] sm:$0xff] }
 0x1b1   :  { %1764 = vrot.lane.b32.xlu0 %v10372_v9, %s9330_s15 }
 0x1b2   :  { %v1398_v48 = vpop.permute.xlu1 %1397 }
 0x1b3   :  { %1559 = vst.msk [vmem:[#allocation3 + $0xf8] sm:$0xff] %vm1527_vm5, %v1398_v48  ;;  %v1396_v59 = vpop.permute.xlu0 %1395  ;;  %v1983_v48 = vld [vmem:[#allocation2 + $0x61] sm:$0xff] }
 0x1b4   :  { %1558 = vst.msk [vmem:[#allocation3 + $0xf0] sm:$0xff] %vm1527_vm5, %v1396_v59  ;;  %1770 = vrot.lane.b32.xlu1 %v10384_v2, %s9330_s15 }
 0x1b5   :  { %1768 = vrot.lane.b32.xlu0 %v10386_v19, %s9330_s15 }
 0x1b6   :  { %v1402_v54 = vpop.permute.xlu1 %1401 }
 0x1b7   :  { %1561 = vst.msk [vmem:[#allocation3 + $0x108] sm:$0xff] %vm1527_vm5, %v1402_v54  ;;  %v1400_v1 = vpop.permute.xlu0 %1399 }
 0x1b8   :  { %1560 = vst.msk [vmem:[#allocation3 + $0x100] sm:$0xff] %vm1527_vm5, %v1400_v1  ;;  %1774 = vrot.lane.b32.xlu1 %v10398_v10, %s9330_s15  ;;  %v1623_v10 = vld [vmem:[#allocation2 + $0x188] sm:$0xff] }
 0x1b9   :  { %1772 = vrot.lane.b32.xlu0 %v10400_v27, %s9330_s15  ;;  %v1622_v27 = vld [vmem:[#allocation2 + $0x180] sm:$0xff] }
 0x1ba   :  { %v1406_v60 = vpop.permute.xlu1 %1405  ;;  %v1986_v1 = vld [vmem:[#allocation2 + $0x81] sm:$0xff] }
 0x1bb   :  { %1563 = vst.msk [vmem:[#allocation3 + $0x118] sm:$0xff] %vm1527_vm5, %v1406_v60  ;;  %v1404_v9 = vpop.permute.xlu0 %1403  ;;  %v1985_v60 = vld [vmem:[#allocation2 + $0x79] sm:$0xff] }
 0x1bc   :  { %1562 = vst.msk [vmem:[#allocation3 + $0x110] sm:$0xff] %vm1527_vm5, %v1404_v9  ;;  %1778 = vrot.lane.b32.xlu1 %v10414_v38, %s9330_s15 }
 0x1bd   :  { %1776 = vrot.lane.b32.xlu0 %v10416_v58, %s9330_s15 }
 0x1be   :  { %v1410_v2 = vpop.permute.xlu1 %1409 }
 0x1bf   :  { %1565 = vst.msk [vmem:[#allocation3 + $0x128] sm:$0xff] %vm1527_vm5, %v1410_v2  ;;  %v1408_v19 = vpop.permute.xlu0 %1407 }
 0x1c0   :  { %1564 = vst.msk [vmem:[#allocation3 + $0x120] sm:$0xff] %vm1527_vm5, %v1408_v19  ;;  %1782 = vrot.lane.b32.xlu1 %v1623_v10, %s9330_s15  ;;  %v1988_v19 = vld [vmem:[#allocation2 + $0x99] sm:$0xff]  ;;  %v1987_v10 = vld [vmem:[#allocation2 + $0x91] sm:$0xff] }
 0x1c1   :  { %1780 = vrot.lane.b32.xlu0 %v1622_v27, %s9330_s15 }
 0x1c2   :  { %v1414_v61 = vpop.permute.xlu1 %1413 }
 0x1c3   :  { %1567 = vst.msk [vmem:[#allocation3 + $0x138] sm:$0xff] %vm1527_vm5, %v1414_v61  ;;  %v1412_v25 = vpop.permute.xlu0 %1411 }
 0x1c4   :  { %1566 = vst.msk [vmem:[#allocation3 + $0x130] sm:$0xff] %vm1527_vm5, %v1412_v25  ;;  %1786 = vrot.lane.b32.xlu1 %v10434_v37, %s9330_s15  ;;  %v1990_v25 = vld [vmem:[#allocation2 + $0xb1] sm:$0xff] }
 0x1c5   :  { %1784 = vrot.lane.b32.xlu0 %v10436_v55, %s9330_s15 }
 0x1c6   :  { %v1418_v38 = vpop.permute.xlu1 %1417 }
 0x1c7   :  { %1569 = vst.msk [vmem:[#allocation3 + $0x148] sm:$0xff] %vm1527_vm5, %v1418_v38  ;;  %v1416_v58 = vpop.permute.xlu0 %1415  ;;  %v1989_v38 = vld [vmem:[#allocation2 + $0xa9] sm:$0xff] }
 0x1c8   :  { %1568 = vst.msk [vmem:[#allocation3 + $0x140] sm:$0xff] %vm1527_vm5, %v1416_v58  ;;  %1790 = vrot.lane.b32.xlu1 %v10448_v28, %s9330_s15 }
 0x1c9   :  { %1788 = vrot.lane.b32.xlu0 %v10450_v45, %s9330_s15 }
 0x1ca   :  { %v1422_v43 = vpop.permute.xlu1 %1421 }
 0x1cb   :  { %1571 = vst.msk [vmem:[#allocation3 + $0x158] sm:$0xff] %vm1527_vm5, %v1422_v43  ;;  %v1420_v40 = vpop.permute.xlu0 %1419 }
 0x1cc   :  { %1570 = vst.msk [vmem:[#allocation3 + $0x150] sm:$0xff] %vm1527_vm5, %v1420_v40  ;;  %1794 = vrot.lane.b32.xlu1 %v10462_v63, %s9330_s15  ;;  %v1992_v40 = vld [vmem:[#allocation2 + $0xc9] sm:$0xff] }
 0x1cd   :  { %1792 = vrot.lane.b32.xlu0 %v10464_v20, %s9330_s15 }
 0x1ce   :  { %v1426_v37 = vpop.permute.xlu1 %1425 }
 0x1cf   :  { %1573 = vst.msk [vmem:[#allocation3 + $0x168] sm:$0xff] %vm1527_vm5, %v1426_v37  ;;  %v1424_v55 = vpop.permute.xlu0 %1423  ;;  %v1991_v37 = vld [vmem:[#allocation2 + $0xc1] sm:$0xff] }
 0x1d0   :  { %1572 = vst.msk [vmem:[#allocation3 + $0x160] sm:$0xff] %vm1527_vm5, %v1424_v55  ;;  %1798 = vrot.lane.b32.xlu1 %v10476_v57, %s9330_s15 }
 0x1d1   :  { %1796 = vrot.lane.b32.xlu0 %v10478_v34, %s9330_s15 }
 0x1d2   :  { %v1430_v28 = vpop.permute.xlu1 %1429 }
 0x1d3   :  { %1575 = vst.msk [vmem:[#allocation3 + $0x178] sm:$0xff] %vm1527_vm5, %v1430_v28  ;;  %v1428_v45 = vpop.permute.xlu0 %1427 }
 0x1d4   :  { %1574 = vst.msk [vmem:[#allocation3 + $0x170] sm:$0xff] %vm1527_vm5, %v1428_v45  ;;  %1802 = vrot.lane.b32.xlu1 %v10490_v6, %s9330_s15  ;;  %v1994_v45 = vld [vmem:[#allocation2 + $0xe1] sm:$0xff] }
 0x1d5   :  { %1800 = vrot.lane.b32.xlu0 %v10492_v12, %s9330_s15 }
 0x1d6   :  { %v1434_v63 = vpop.permute.xlu1 %1433 }
 0x1d7   :  { %1577 = vst.msk [vmem:[#allocation3 + $0x188] sm:$0xff] %vm1527_vm5, %v1434_v63  ;;  %v1432_v20 = vpop.permute.xlu0 %1431  ;;  %v1993_v63 = vld [vmem:[#allocation2 + $0xd9] sm:$0xff] }
 0x1d8   :  { %1576 = vst.msk [vmem:[#allocation3 + $0x180] sm:$0xff] %vm1527_vm5, %v1432_v20  ;;  %1806 = vrot.lane.b32.xlu1 %v10504_v13, %s9330_s15 }
 0x1d9   :  { %1804 = vrot.lane.b32.xlu0 %v10506_v14, %s9330_s15 }
 0x1da   :  { %v1438_v57 = vpop.permute.xlu1 %1437 }
 0x1db   :  { %1579 = vst.msk [vmem:[#allocation3 + $0x198] sm:$0xff] %vm1527_vm5, %v1438_v57  ;;  %v1436_v34 = vpop.permute.xlu0 %1435 }
 0x1dc   :  { %1578 = vst.msk [vmem:[#allocation3 + $0x190] sm:$0xff] %vm1527_vm5, %v1436_v34  ;;  %1810 = vrot.lane.b32.xlu1 %v10518_v26, %s9330_s15  ;;  %v14637_v26 = vld [vmem:[#allocation7_spill] sm:$0xff] }
 0x1dd   :  { %1808 = vrot.lane.b32.xlu0 %v10520_v11, %s9330_s15  ;;  %v14638_v11 = vld [vmem:[#allocation8_spill] sm:$0xff]  ;;  %v1996_v34 = vld [vmem:[#allocation2 + $0xf9] sm:$0xff] }
 0x1de   :  { %v1442_v6 = vpop.permute.xlu1 %1441 }
 0x1df   :  { %1581 = vst.msk [vmem:[#allocation3 + $0x1a8] sm:$0xff] %vm1527_vm5, %v1442_v6  ;;  %v1440_v12 = vpop.permute.xlu0 %1439  ;;  %v1995_v6 = vld [vmem:[#allocation2 + $0xf1] sm:$0xff] }
 0x1e0   :  { %1580 = vst.msk [vmem:[#allocation3 + $0x1a0] sm:$0xff] %vm1527_vm5, %v1440_v12  ;;  %1814 = vrot.lane.b32.xlu1 %v10532_v46, %s9330_s15  ;;  %v14639_v46 = vld [vmem:[#allocation9_spill] sm:$0xff] }
 0x1e1   :  { %1812 = vrot.lane.b32.xlu0 %v10534_v21, %s9330_s15 }
 0x1e2   :  { %v1446_v13 = vpop.permute.xlu1 %1445 }
 0x1e3   :  { %1583 = vst.msk [vmem:[#allocation3 + $0x1b8] sm:$0xff] %vm1527_vm5, %v1446_v13  ;;  %v1444_v14 = vpop.permute.xlu0 %1443 }
 0x1e4   :  { %1582 = vst.msk [vmem:[#allocation3 + $0x1b0] sm:$0xff] %vm1527_vm5, %v1444_v14  ;;  %1818 = vrot.lane.b32.xlu1 %v14637_v26, %s9330_s15  ;;  %v1998_v14 = vld [vmem:[#allocation2 + $0x111] sm:$0xff]  ;;  %v1997_v26 = vld [vmem:[#allocation2 + $0x109] sm:$0xff] }
 0x1e5   :  { %1816 = vrot.lane.b32.xlu0 %v14638_v11, %s9330_s15 }
 0x1e6   :  { %v1450_v15 = vpop.permute.xlu1 %1449 }
 0x1e7   :  { %1585 = vst.msk [vmem:[#allocation3 + $0x1c8] sm:$0xff] %vm1527_vm5, %v1450_v15  ;;  %v1448_v8 = vpop.permute.xlu0 %1447 }
 0x1e8   :  { %1584 = vst.msk [vmem:[#allocation3 + $0x1c0] sm:$0xff] %vm1527_vm5, %v1448_v8  ;;  %1822 = vrot.lane.b32.xlu1 %v10560_v44, %s9330_s15  ;;  %v2000_v8 = vld [vmem:[#allocation2 + $0x129] sm:$0xff] }
 0x1e9   :  { %1820 = vrot.lane.b32.xlu0 %v14639_v46, %s9330_s15  ;;  %v1999_v46 = vld [vmem:[#allocation2 + $0x121] sm:$0xff] }
 0x1ea   :  { %v1454_v21 = vpop.permute.xlu1 %1453 }
 0x1eb   :  { %1587 = vst.msk [vmem:[#allocation3 + $0x1d8] sm:$0xff] %vm1527_vm5, %v1454_v21  ;;  %v1452_v50 = vpop.permute.xlu0 %1451 }
 0x1ec   :  { %1586 = vst.msk [vmem:[#allocation3 + $0x1d0] sm:$0xff] %vm1527_vm5, %v1452_v50  ;;  %1826 = vrot.lane.b32.xlu1 %v10574_v0, %s9330_s15 }
 0x1ed   :  { %1824 = vrot.lane.b32.xlu0 %v10576_v5, %s9330_s15 }
 0x1ee   :  { %v1458_v31 = vpop.permute.xlu1 %1457 }
 0x1ef   :  { %1589 = vst.msk [vmem:[#allocation3 + $0x1e8] sm:$0xff] %vm1527_vm5, %v1458_v31  ;;  %v1456_v62 = vpop.permute.xlu0 %1455  ;;  %v2002_v31 = vld [vmem:[#allocation2 + $0x141] sm:$0xff] }
 0x1f0   :  { %1588 = vst.msk [vmem:[#allocation3 + $0x1e0] sm:$0xff] %vm1527_vm5, %v1456_v62  ;;  %1830 = vrot.lane.b32.xlu1 %v10588_v22, %s9330_s15  ;;  %v2001_v62 = vld [vmem:[#allocation2 + $0x139] sm:$0xff] }
 0x1f1   :  { %1828 = vrot.lane.b32.xlu0 %v10590_v52, %s9330_s15 }
 0x1f2   :  { %v1462_v44 = vpop.permute.xlu1 %1461 }
 0x1f3   :  { %1591 = vst.msk [vmem:[#allocation3 + $0x1f8] sm:$0xff] %vm1527_vm5, %v1462_v44  ;;  %v1460_v33 = vpop.permute.xlu0 %1459 }
 0x1f4   :  { %1590 = vst.msk [vmem:[#allocation3 + $0x1f0] sm:$0xff] %vm1527_vm5, %v1460_v33  ;;  %1834 = vrot.lane.b32.xlu1 %v10602_v51, %s9330_s15  ;;  %v14640_v51 = vld [vmem:[#allocation10_spill] sm:$0xff]  ;;  %vm8306_vm5 = vcmask 589312  }
 0x1f5   :  { %1832 = vrot.lane.b32.xlu0 %v10604_v56, %s9330_s15  ;;  %v14641_v56 = vld [vmem:[#allocation11_spill] sm:$0xff] }
 0x1f6   :  { %v1723_v5 = vpop.permute.xlu1 %1722 }
 0x1f7   :  { %1914 = vst.msk [vmem:[#allocation3 + $0x8] sm:$0xff] %vm1912_vm6, %v1723_v5  ;;  %v1721_v0 = vpop.permute.xlu0 %1720  ;;  %v2004_v5 = vld [vmem:[#allocation2 + $0x159] sm:$0xff] }
 0x1f8   :  { %1913 = vst.msk [vmem:[#allocation3] sm:$0xff] %vm1912_vm6, %v1721_v0  ;;  %1838 = vrot.lane.b32.xlu1 %v10616_v4, %s9330_s15  ;;  %v1655_v4 = vld [vmem:[#allocation2 + $0x338] sm:$0xff] }
 0x1f9   :  { %1836 = vrot.lane.b32.xlu0 %v10618_v39, %s9330_s15  ;;  %v1654_v39 = vld [vmem:[#allocation2 + $0x330] sm:$0xff] }
 0x1fa   :  { %v1727_v22 = vpop.permute.xlu1 %1726  ;;  %v2003_v0 = vld [vmem:[#allocation2 + $0x151] sm:$0xff] }
 0x1fb   :  { %1916 = vst.msk [vmem:[#allocation3 + $0x18] sm:$0xff] %vm1912_vm6, %v1727_v22  ;;  %v1725_v52 = vpop.permute.xlu0 %1724 }
 0x1fc   :  { %1915 = vst.msk [vmem:[#allocation3 + $0x10] sm:$0xff] %vm1912_vm6, %v1725_v52  ;;  %1842 = vrot.lane.b32.xlu1 %v14640_v51, %s9330_s15  ;;  %v2006_v51 = vld [vmem:[#allocation2 + $0x171] sm:$0xff] }
 0x1fd   :  { %1840 = vrot.lane.b32.xlu0 %v14641_v56, %s9330_s15  ;;  %v2005_v56 = vld [vmem:[#allocation2 + $0x169] sm:$0xff] }
 0x1fe   :  { %v1731_v49 = vpop.permute.xlu1 %1730 }
 0x1ff   :  { %1918 = vst.msk [vmem:[#allocation3 + $0x28] sm:$0xff] %vm1912_vm6, %v1731_v49  ;;  %v1729_v3 = vpop.permute.xlu0 %1728 }
 0x200   :  { %1917 = vst.msk [vmem:[#allocation3 + $0x20] sm:$0xff] %vm1912_vm6, %v1729_v3  ;;  %1846 = vrot.lane.b32.xlu1 %v1655_v4, %s9330_s15  ;;  %v2008_v4 = vld [vmem:[#allocation2 + $0x189] sm:$0xff] }
 0x201   :  { %1844 = vrot.lane.b32.xlu0 %v1654_v39, %s9330_s15  ;;  %v2007_v39 = vld [vmem:[#allocation2 + $0x181] sm:$0xff] }
 0x202   :  { %v1735_v16 = vpop.permute.xlu1 %1734 }
 0x203   :  { %1920 = vst.msk [vmem:[#allocation3 + $0x38] sm:$0xff] %vm1912_vm6, %v1735_v16  ;;  %v1733_v7 = vpop.permute.xlu0 %1732 }
 0x204   :  { %1919 = vst.msk [vmem:[#allocation3 + $0x30] sm:$0xff] %vm1912_vm6, %v1733_v7  ;;  %2107 = vrot.lane.b32.xlu1 %v1978_v17, %s9331_s16  ;;  %v2010_v17 = vld [vmem:[#allocation2 + $0x1d1] sm:$0xff] }
 0x205   :  { %2105 = vrot.lane.b32.xlu0 %v1977_v23, %s9331_s16  ;;  %v2009_v23 = vld [vmem:[#allocation2 + $0x1c9] sm:$0xff] }
 0x206   :  { %v1739_v24 = vpop.permute.xlu1 %1738 }
 0x207   :  { %1922 = vst.msk [vmem:[#allocation3 + $0x48] sm:$0xff] %vm1912_vm6, %v1739_v24  ;;  %v1737_v18 = vpop.permute.xlu0 %1736 }
 0x208   :  { %1921 = vst.msk [vmem:[#allocation3 + $0x40] sm:$0xff] %vm1912_vm6, %v1737_v18  ;;  %2111 = vrot.lane.b32.xlu1 %v1980_v29, %s9331_s16  ;;  %v2012_v29 = vld [vmem:[#allocation2 + $0x1e9] sm:$0xff] }
 0x209   :  { %2109 = vrot.lane.b32.xlu0 %v1979_v32, %s9331_s16  ;;  %v2011_v32 = vld [vmem:[#allocation2 + $0x1e1] sm:$0xff] }
 0x20a   :  { %v1743_v35 = vpop.permute.xlu1 %1742 }
 0x20b   :  { %1924 = vst.msk [vmem:[#allocation3 + $0x58] sm:$0xff] %vm1912_vm6, %v1743_v35  ;;  %v1741_v30 = vpop.permute.xlu0 %1740 }
 0x20c   :  { %1923 = vst.msk [vmem:[#allocation3 + $0x50] sm:$0xff] %vm1912_vm6, %v1741_v30  ;;  %2115 = vrot.lane.b32.xlu1 %v1982_v41, %s9331_s16  ;;  %v2014_v41 = vld [vmem:[#allocation2 + $0x201] sm:$0xff] }
 0x20d   :  { %2113 = vrot.lane.b32.xlu0 %v1981_v36, %s9331_s16  ;;  %v2013_v36 = vld [vmem:[#allocation2 + $0x1f9] sm:$0xff] }
 0x20e   :  { %v1747_v47 = vpop.permute.xlu1 %1746 }
 0x20f   :  { %1926 = vst.msk [vmem:[#allocation3 + $0x68] sm:$0xff] %vm1912_vm6, %v1747_v47  ;;  %v1745_v42 = vpop.permute.xlu0 %1744 }
 0x210   :  { %1925 = vst.msk [vmem:[#allocation3 + $0x60] sm:$0xff] %vm1912_vm6, %v1745_v42  ;;  %2119 = vrot.lane.b32.xlu1 %v1984_v53, %s9331_s16  ;;  %v2016_v53 = vld [vmem:[#allocation2 + $0x219] sm:$0xff] }
 0x211   :  { %2117 = vrot.lane.b32.xlu0 %v1983_v48, %s9331_s16  ;;  %v2015_v48 = vld [vmem:[#allocation2 + $0x211] sm:$0xff] }
 0x212   :  { %v1751_v59 = vpop.permute.xlu1 %1750 }
 0x213   :  { %1928 = vst.msk [vmem:[#allocation3 + $0x78] sm:$0xff] %vm1912_vm6, %v1751_v59  ;;  %v1749_v54 = vpop.permute.xlu0 %1748 }
 0x214   :  { %1927 = vst.msk [vmem:[#allocation3 + $0x70] sm:$0xff] %vm1912_vm6, %v1749_v54  ;;  %2123 = vrot.lane.b32.xlu1 %v1986_v1, %s9331_s16  ;;  %v2018_v1 = vld [vmem:[#allocation2 + $0x231] sm:$0xff] }
 0x215   :  { %2121 = vrot.lane.b32.xlu0 %v1985_v60, %s9331_s16  ;;  %v2017_v60 = vld [vmem:[#allocation2 + $0x229] sm:$0xff] }
 0x216   :  { %v1755_v9 = vpop.permute.xlu1 %1754 }
 0x217   :  { %1930 = vst.msk [vmem:[#allocation3 + $0x88] sm:$0xff] %vm1912_vm6, %v1755_v9  ;;  %v1753_v2 = vpop.permute.xlu0 %1752 }
 0x218   :  { %1929 = vst.msk [vmem:[#allocation3 + $0x80] sm:$0xff] %vm1912_vm6, %v1753_v2  ;;  %2127 = vrot.lane.b32.xlu1 %v1988_v19, %s9331_s16  ;;  %v2020_v19 = vld [vmem:[#allocation2 + $0x249] sm:$0xff] }
 0x219   :  { %2125 = vrot.lane.b32.xlu0 %v1987_v10, %s9331_s16  ;;  %v2019_v10 = vld [vmem:[#allocation2 + $0x241] sm:$0xff] }
 0x21a   :  { %v1759_v27 = vpop.permute.xlu1 %1758 }
 0x21b   :  { %1932 = vst.msk [vmem:[#allocation3 + $0x98] sm:$0xff] %vm1912_vm6, %v1759_v27  ;;  %v1757_v61 = vpop.permute.xlu0 %1756 }
 0x21c   :  { %1931 = vst.msk [vmem:[#allocation3 + $0x90] sm:$0xff] %vm1912_vm6, %v1757_v61  ;;  %2131 = vrot.lane.b32.xlu1 %v1990_v25, %s9331_s16  ;;  %v2022_v25 = vld [vmem:[#allocation2 + $0x261] sm:$0xff] }
 0x21d   :  { %2129 = vrot.lane.b32.xlu0 %v1989_v38, %s9331_s16  ;;  %v2021_v38 = vld [vmem:[#allocation2 + $0x259] sm:$0xff] }
 0x21e   :  { %v1763_v58 = vpop.permute.xlu1 %1762 }
 0x21f   :  { %1934 = vst.msk [vmem:[#allocation3 + $0xa8] sm:$0xff] %vm1912_vm6, %v1763_v58  ;;  %v1761_v43 = vpop.permute.xlu0 %1760 }
 0x220   :  { %1933 = vst.msk [vmem:[#allocation3 + $0xa0] sm:$0xff] %vm1912_vm6, %v1761_v43  ;;  %2135 = vrot.lane.b32.xlu1 %v1992_v40, %s9331_s16  ;;  %v2024_v40 = vld [vmem:[#allocation2 + $0x279] sm:$0xff] }
 0x221   :  { %2133 = vrot.lane.b32.xlu0 %v1991_v37, %s9331_s16  ;;  %v2023_v37 = vld [vmem:[#allocation2 + $0x271] sm:$0xff] }
 0x222   :  { %v1767_v55 = vpop.permute.xlu1 %1766 }
 0x223   :  { %1936 = vst.msk [vmem:[#allocation3 + $0xb8] sm:$0xff] %vm1912_vm6, %v1767_v55  ;;  %v1765_v28 = vpop.permute.xlu0 %1764 }
 0x224   :  { %1935 = vst.msk [vmem:[#allocation3 + $0xb0] sm:$0xff] %vm1912_vm6, %v1765_v28  ;;  %2139 = vrot.lane.b32.xlu1 %v1994_v45, %s9331_s16  ;;  %v2026_v45 = vld [vmem:[#allocation2 + $0x291] sm:$0xff] }
 0x225   :  { %2137 = vrot.lane.b32.xlu0 %v1993_v63, %s9331_s16  ;;  %v2025_v63 = vld [vmem:[#allocation2 + $0x289] sm:$0xff] }
 0x226   :  { %v1771_v20 = vpop.permute.xlu1 %1770 }
 0x227   :  { %1938 = vst.msk [vmem:[#allocation3 + $0xc8] sm:$0xff] %vm1912_vm6, %v1771_v20  ;;  %v1769_v57 = vpop.permute.xlu0 %1768 }
 0x228   :  { %1937 = vst.msk [vmem:[#allocation3 + $0xc0] sm:$0xff] %vm1912_vm6, %v1769_v57  ;;  %2143 = vrot.lane.b32.xlu1 %v1996_v34, %s9331_s16  ;;  %v2028_v34 = vld [vmem:[#allocation2 + $0x2a9] sm:$0xff] }
 0x229   :  { %2141 = vrot.lane.b32.xlu0 %v1995_v6, %s9331_s16  ;;  %v2027_v6 = vld [vmem:[#allocation2 + $0x2a1] sm:$0xff] }
 0x22a   :  { %v1775_v12 = vpop.permute.xlu1 %1774 }
 0x22b   :  { %1940 = vst.msk [vmem:[#allocation3 + $0xd8] sm:$0xff] %vm1912_vm6, %v1775_v12  ;;  %v1773_v13 = vpop.permute.xlu0 %1772 }
 0x22c   :  { %1939 = vst.msk [vmem:[#allocation3 + $0xd0] sm:$0xff] %vm1912_vm6, %v1773_v13  ;;  %2147 = vrot.lane.b32.xlu1 %v1998_v14, %s9331_s16  ;;  %v2030_v14 = vld [vmem:[#allocation2 + $0x2c1] sm:$0xff] }
 0x22d   :  { %2145 = vrot.lane.b32.xlu0 %v1997_v26, %s9331_s16  ;;  %v2029_v26 = vld [vmem:[#allocation2 + $0x2b9] sm:$0xff] }
 0x22e   :  { %v1779_v11 = vpop.permute.xlu1 %1778 }
 0x22f   :  { %1942 = vst.msk [vmem:[#allocation3 + $0xe8] sm:$0xff] %vm1912_vm6, %v1779_v11  ;;  %v1777_v15 = vpop.permute.xlu0 %1776 }
 0x230   :  { %1941 = vst.msk [vmem:[#allocation3 + $0xe0] sm:$0xff] %vm1912_vm6, %v1777_v15  ;;  %2151 = vrot.lane.b32.xlu1 %v2000_v8, %s9331_s16  ;;  %v2032_v8 = vld [vmem:[#allocation2 + $0x2d9] sm:$0xff] }
 0x231   :  { %2149 = vrot.lane.b32.xlu0 %v1999_v46, %s9331_s16  ;;  %v2031_v46 = vld [vmem:[#allocation2 + $0x2d1] sm:$0xff] }
 0x232   :  { %v1783_v21 = vpop.permute.xlu1 %1782 }
 0x233   :  { %1944 = vst.msk [vmem:[#allocation3 + $0xf8] sm:$0xff] %vm1912_vm6, %v1783_v21  ;;  %v1781_v50 = vpop.permute.xlu0 %1780 }
 0x234   :  { %1943 = vst.msk [vmem:[#allocation3 + $0xf0] sm:$0xff] %vm1912_vm6, %v1781_v50  ;;  %2155 = vrot.lane.b32.xlu1 %v2002_v31, %s9331_s16  ;;  %v2034_v31 = vld [vmem:[#allocation2 + $0x2f1] sm:$0xff] }
 0x235   :  { %2153 = vrot.lane.b32.xlu0 %v2001_v62, %s9331_s16  ;;  %v2033_v62 = vld [vmem:[#allocation2 + $0x2e9] sm:$0xff] }
 0x236   :  { %v1787_v44 = vpop.permute.xlu1 %1786 }
 0x237   :  { %1946 = vst.msk [vmem:[#allocation3 + $0x108] sm:$0xff] %vm1912_vm6, %v1787_v44  ;;  %v1785_v33 = vpop.permute.xlu0 %1784 }
 0x238   :  { %1945 = vst.msk [vmem:[#allocation3 + $0x100] sm:$0xff] %vm1912_vm6, %v1785_v33  ;;  %2159 = vrot.lane.b32.xlu1 %v2004_v5, %s9331_s16  ;;  %v2036_v5 = vld [vmem:[#allocation2 + $0x309] sm:$0xff] }
 0x239   :  { %2157 = vrot.lane.b32.xlu0 %v2003_v0, %s9331_s16  ;;  %v2035_v0 = vld [vmem:[#allocation2 + $0x301] sm:$0xff] }
 0x23a   :  { %v1791_v22 = vpop.permute.xlu1 %1790 }
 0x23b   :  { %1948 = vst.msk [vmem:[#allocation3 + $0x118] sm:$0xff] %vm1912_vm6, %v1791_v22  ;;  %v1789_v52 = vpop.permute.xlu0 %1788 }
 0x23c   :  { %1947 = vst.msk [vmem:[#allocation3 + $0x110] sm:$0xff] %vm1912_vm6, %v1789_v52  ;;  %2163 = vrot.lane.b32.xlu1 %v2006_v51, %s9331_s16  ;;  %v2038_v51 = vld [vmem:[#allocation2 + $0x321] sm:$0xff] }
 0x23d   :  { %2161 = vrot.lane.b32.xlu0 %v2005_v56, %s9331_s16  ;;  %v2037_v56 = vld [vmem:[#allocation2 + $0x319] sm:$0xff] }
 0x23e   :  { %v1795_v49 = vpop.permute.xlu1 %1794 }
 0x23f   :  { %1950 = vst.msk [vmem:[#allocation3 + $0x128] sm:$0xff] %vm1912_vm6, %v1795_v49  ;;  %v1793_v3 = vpop.permute.xlu0 %1792 }
 0x240   :  { %1949 = vst.msk [vmem:[#allocation3 + $0x120] sm:$0xff] %vm1912_vm6, %v1793_v3  ;;  %2167 = vrot.lane.b32.xlu1 %v2008_v4, %s9331_s16  ;;  %v2040_v4 = vld [vmem:[#allocation2 + $0x339] sm:$0xff] }
 0x241   :  { %2165 = vrot.lane.b32.xlu0 %v2007_v39, %s9331_s16  ;;  %v2039_v39 = vld [vmem:[#allocation2 + $0x331] sm:$0xff] }
 0x242   :  { %v1799_v16 = vpop.permute.xlu1 %1798 }
 0x243   :  { %1952 = vst.msk [vmem:[#allocation3 + $0x138] sm:$0xff] %vm1912_vm6, %v1799_v16  ;;  %v1797_v7 = vpop.permute.xlu0 %1796 }
 0x244   :  { %1951 = vst.msk [vmem:[#allocation3 + $0x130] sm:$0xff] %vm1912_vm6, %v1797_v7  ;;  %2171 = vrot.lane.b32.xlu1 %v2010_v17, %s9331_s16  ;;  %v2363_v17 = vld [vmem:[#allocation2 + $0x22] sm:$0xff] }
 0x245   :  { %2169 = vrot.lane.b32.xlu0 %v2009_v23, %s9331_s16  ;;  %v2362_v23 = vld [vmem:[#allocation2 + $0x1a] sm:$0xff] }
 0x246   :  { %v1803_v24 = vpop.permute.xlu1 %1802 }
 0x247   :  { %1954 = vst.msk [vmem:[#allocation3 + $0x148] sm:$0xff] %vm1912_vm6, %v1803_v24  ;;  %v1801_v18 = vpop.permute.xlu0 %1800 }
 0x248   :  { %1953 = vst.msk [vmem:[#allocation3 + $0x140] sm:$0xff] %vm1912_vm6, %v1801_v18  ;;  %2175 = vrot.lane.b32.xlu1 %v2012_v29, %s9331_s16  ;;  %v2365_v29 = vld [vmem:[#allocation2 + $0x3a] sm:$0xff] }
 0x249   :  { %2173 = vrot.lane.b32.xlu0 %v2011_v32, %s9331_s16  ;;  %v2364_v32 = vld [vmem:[#allocation2 + $0x32] sm:$0xff] }
 0x24a   :  { %v1807_v35 = vpop.permute.xlu1 %1806 }
 0x24b   :  { %1956 = vst.msk [vmem:[#allocation3 + $0x158] sm:$0xff] %vm1912_vm6, %v1807_v35  ;;  %v1805_v30 = vpop.permute.xlu0 %1804 }
 0x24c   :  { %1955 = vst.msk [vmem:[#allocation3 + $0x150] sm:$0xff] %vm1912_vm6, %v1805_v30  ;;  %2179 = vrot.lane.b32.xlu1 %v2014_v41, %s9331_s16  ;;  %v2367_v41 = vld [vmem:[#allocation2 + $0x52] sm:$0xff] }
 0x24d   :  { %2177 = vrot.lane.b32.xlu0 %v2013_v36, %s9331_s16  ;;  %v2366_v36 = vld [vmem:[#allocation2 + $0x4a] sm:$0xff] }
 0x24e   :  { %v1811_v47 = vpop.permute.xlu1 %1810 }
 0x24f   :  { %1958 = vst.msk [vmem:[#allocation3 + $0x168] sm:$0xff] %vm1912_vm6, %v1811_v47  ;;  %v1809_v42 = vpop.permute.xlu0 %1808 }
 0x250   :  { %1957 = vst.msk [vmem:[#allocation3 + $0x160] sm:$0xff] %vm1912_vm6, %v1809_v42  ;;  %2183 = vrot.lane.b32.xlu1 %v2016_v53, %s9331_s16  ;;  %v2369_v53 = vld [vmem:[#allocation2 + $0x6a] sm:$0xff] }
 0x251   :  { %2181 = vrot.lane.b32.xlu0 %v2015_v48, %s9331_s16  ;;  %v2368_v48 = vld [vmem:[#allocation2 + $0x62] sm:$0xff] }
 0x252   :  { %v1815_v59 = vpop.permute.xlu1 %1814 }
 0x253   :  { %1960 = vst.msk [vmem:[#allocation3 + $0x178] sm:$0xff] %vm1912_vm6, %v1815_v59  ;;  %v1813_v54 = vpop.permute.xlu0 %1812 }
 0x254   :  { %1959 = vst.msk [vmem:[#allocation3 + $0x170] sm:$0xff] %vm1912_vm6, %v1813_v54  ;;  %2187 = vrot.lane.b32.xlu1 %v2018_v1, %s9331_s16  ;;  %v2371_v1 = vld [vmem:[#allocation2 + $0x82] sm:$0xff] }
 0x255   :  { %2185 = vrot.lane.b32.xlu0 %v2017_v60, %s9331_s16  ;;  %v2370_v60 = vld [vmem:[#allocation2 + $0x7a] sm:$0xff] }
 0x256   :  { %v1819_v9 = vpop.permute.xlu1 %1818 }
 0x257   :  { %1962 = vst.msk [vmem:[#allocation3 + $0x188] sm:$0xff] %vm1912_vm6, %v1819_v9  ;;  %v1817_v2 = vpop.permute.xlu0 %1816 }
 0x258   :  { %1961 = vst.msk [vmem:[#allocation3 + $0x180] sm:$0xff] %vm1912_vm6, %v1817_v2  ;;  %2191 = vrot.lane.b32.xlu1 %v2020_v19, %s9331_s16  ;;  %v2373_v19 = vld [vmem:[#allocation2 + $0x9a] sm:$0xff] }
 0x259   :  { %2189 = vrot.lane.b32.xlu0 %v2019_v10, %s9331_s16  ;;  %v2372_v10 = vld [vmem:[#allocation2 + $0x92] sm:$0xff] }
 0x25a   :  { %v1823_v27 = vpop.permute.xlu1 %1822 }
 0x25b   :  { %1964 = vst.msk [vmem:[#allocation3 + $0x198] sm:$0xff] %vm1912_vm6, %v1823_v27  ;;  %v1821_v61 = vpop.permute.xlu0 %1820 }
 0x25c   :  { %1963 = vst.msk [vmem:[#allocation3 + $0x190] sm:$0xff] %vm1912_vm6, %v1821_v61  ;;  %2195 = vrot.lane.b32.xlu1 %v2022_v25, %s9331_s16  ;;  %v2375_v25 = vld [vmem:[#allocation2 + $0xb2] sm:$0xff] }
 0x25d   :  { %2193 = vrot.lane.b32.xlu0 %v2021_v38, %s9331_s16  ;;  %v2374_v38 = vld [vmem:[#allocation2 + $0xaa] sm:$0xff] }
 0x25e   :  { %v1827_v58 = vpop.permute.xlu1 %1826 }
 0x25f   :  { %1966 = vst.msk [vmem:[#allocation3 + $0x1a8] sm:$0xff] %vm1912_vm6, %v1827_v58  ;;  %v1825_v43 = vpop.permute.xlu0 %1824 }
 0x260   :  { %1965 = vst.msk [vmem:[#allocation3 + $0x1a0] sm:$0xff] %vm1912_vm6, %v1825_v43  ;;  %2199 = vrot.lane.b32.xlu1 %v2024_v40, %s9331_s16  ;;  %v2377_v40 = vld [vmem:[#allocation2 + $0xca] sm:$0xff] }
 0x261   :  { %2197 = vrot.lane.b32.xlu0 %v2023_v37, %s9331_s16  ;;  %v2376_v37 = vld [vmem:[#allocation2 + $0xc2] sm:$0xff] }
 0x262   :  { %v1831_v55 = vpop.permute.xlu1 %1830 }
 0x263   :  { %1968 = vst.msk [vmem:[#allocation3 + $0x1b8] sm:$0xff] %vm1912_vm6, %v1831_v55  ;;  %v1829_v28 = vpop.permute.xlu0 %1828 }
 0x264   :  { %1967 = vst.msk [vmem:[#allocation3 + $0x1b0] sm:$0xff] %vm1912_vm6, %v1829_v28  ;;  %2203 = vrot.lane.b32.xlu1 %v2026_v45, %s9331_s16  ;;  %v2379_v45 = vld [vmem:[#allocation2 + $0xe2] sm:$0xff] }
 0x265   :  { %2201 = vrot.lane.b32.xlu0 %v2025_v63, %s9331_s16  ;;  %v2378_v63 = vld [vmem:[#allocation2 + $0xda] sm:$0xff] }
 0x266   :  { %v1835_v20 = vpop.permute.xlu1 %1834 }
 0x267   :  { %1970 = vst.msk [vmem:[#allocation3 + $0x1c8] sm:$0xff] %vm1912_vm6, %v1835_v20  ;;  %v1833_v57 = vpop.permute.xlu0 %1832 }
 0x268   :  { %1969 = vst.msk [vmem:[#allocation3 + $0x1c0] sm:$0xff] %vm1912_vm6, %v1833_v57  ;;  %2207 = vrot.lane.b32.xlu1 %v2028_v34, %s9331_s16  ;;  %v2381_v34 = vld [vmem:[#allocation2 + $0xfa] sm:$0xff] }
 0x269   :  { %2205 = vrot.lane.b32.xlu0 %v2027_v6, %s9331_s16  ;;  %v2380_v6 = vld [vmem:[#allocation2 + $0xf2] sm:$0xff] }
 0x26a   :  { %v1839_v12 = vpop.permute.xlu1 %1838 }
 0x26b   :  { %1972 = vst.msk [vmem:[#allocation3 + $0x1d8] sm:$0xff] %vm1912_vm6, %v1839_v12  ;;  %v1837_v13 = vpop.permute.xlu0 %1836 }
 0x26c   :  { %1971 = vst.msk [vmem:[#allocation3 + $0x1d0] sm:$0xff] %vm1912_vm6, %v1837_v13  ;;  %2211 = vrot.lane.b32.xlu1 %v2030_v14, %s9331_s16  ;;  %v2383_v14 = vld [vmem:[#allocation2 + $0x112] sm:$0xff] }
 0x26d   :  { %2209 = vrot.lane.b32.xlu0 %v2029_v26, %s9331_s16  ;;  %v2382_v26 = vld [vmem:[#allocation2 + $0x10a] sm:$0xff] }
 0x26e   :  { %v1843_v11 = vpop.permute.xlu1 %1842 }
 0x26f   :  { %1974 = vst.msk [vmem:[#allocation3 + $0x1e8] sm:$0xff] %vm1912_vm6, %v1843_v11  ;;  %v1841_v15 = vpop.permute.xlu0 %1840 }
 0x270   :  { %1973 = vst.msk [vmem:[#allocation3 + $0x1e0] sm:$0xff] %vm1912_vm6, %v1841_v15  ;;  %2215 = vrot.lane.b32.xlu1 %v2032_v8, %s9331_s16  ;;  %v2385_v8 = vld [vmem:[#allocation2 + $0x12a] sm:$0xff] }
 0x271   :  { %2213 = vrot.lane.b32.xlu0 %v2031_v46, %s9331_s16  ;;  %v2384_v46 = vld [vmem:[#allocation2 + $0x122] sm:$0xff] }
 0x272   :  { %v1847_v21 = vpop.permute.xlu1 %1846 }
 0x273   :  { %1976 = vst.msk [vmem:[#allocation3 + $0x1f8] sm:$0xff] %vm1912_vm6, %v1847_v21  ;;  %v1845_v50 = vpop.permute.xlu0 %1844 }
 0x274   :  { %1975 = vst.msk [vmem:[#allocation3 + $0x1f0] sm:$0xff] %vm1912_vm6, %v1845_v50  ;;  %2219 = vrot.lane.b32.xlu1 %v2034_v31, %s9331_s16  ;;  %v2387_v31 = vld [vmem:[#allocation2 + $0x142] sm:$0xff]  ;;  %vm8436_vm6 = vcmask 588800  }
 0x275   :  { %2217 = vrot.lane.b32.xlu0 %v2033_v62, %s9331_s16  ;;  %v2386_v62 = vld [vmem:[#allocation2 + $0x13a] sm:$0xff] }
 0x276   :  { %v2108_v44 = vpop.permute.xlu1 %2107 }
 0x277   :  { %2299 = vst.msk [vmem:[#allocation3 + $0x8] sm:$0xff] %vm2297_vm7, %v2108_v44  ;;  %v2106_v33 = vpop.permute.xlu0 %2105 }
 0x278   :  { %2298 = vst.msk [vmem:[#allocation3] sm:$0xff] %vm2297_vm7, %v2106_v33  ;;  %2223 = vrot.lane.b32.xlu1 %v2036_v5, %s9331_s16  ;;  %v2389_v5 = vld [vmem:[#allocation2 + $0x15a] sm:$0xff] }
 0x279   :  { %2221 = vrot.lane.b32.xlu0 %v2035_v0, %s9331_s16  ;;  %v2388_v0 = vld [vmem:[#allocation2 + $0x152] sm:$0xff] }
 0x27a   :  { %v2112_v22 = vpop.permute.xlu1 %2111 }
 0x27b   :  { %2301 = vst.msk [vmem:[#allocation3 + $0x18] sm:$0xff] %vm2297_vm7, %v2112_v22  ;;  %v2110_v52 = vpop.permute.xlu0 %2109 }
 0x27c   :  { %2300 = vst.msk [vmem:[#allocation3 + $0x10] sm:$0xff] %vm2297_vm7, %v2110_v52  ;;  %2227 = vrot.lane.b32.xlu1 %v2038_v51, %s9331_s16  ;;  %v2391_v51 = vld [vmem:[#allocation2 + $0x172] sm:$0xff] }
 0x27d   :  { %2225 = vrot.lane.b32.xlu0 %v2037_v56, %s9331_s16  ;;  %v2390_v56 = vld [vmem:[#allocation2 + $0x16a] sm:$0xff] }
 0x27e   :  { %v2116_v49 = vpop.permute.xlu1 %2115 }
 0x27f   :  { %2303 = vst.msk [vmem:[#allocation3 + $0x28] sm:$0xff] %vm2297_vm7, %v2116_v49  ;;  %v2114_v3 = vpop.permute.xlu0 %2113 }
 0x280   :  { %2302 = vst.msk [vmem:[#allocation3 + $0x20] sm:$0xff] %vm2297_vm7, %v2114_v3  ;;  %2231 = vrot.lane.b32.xlu1 %v2040_v4, %s9331_s16  ;;  %v2393_v4 = vld [vmem:[#allocation2 + $0x18a] sm:$0xff] }
 0x281   :  { %2229 = vrot.lane.b32.xlu0 %v2039_v39, %s9331_s16  ;;  %v2392_v39 = vld [vmem:[#allocation2 + $0x182] sm:$0xff] }
 0x282   :  { %v2120_v16 = vpop.permute.xlu1 %2119 }
 0x283   :  { %2305 = vst.msk [vmem:[#allocation3 + $0x38] sm:$0xff] %vm2297_vm7, %v2120_v16  ;;  %v2118_v7 = vpop.permute.xlu0 %2117 }
 0x284   :  { %2304 = vst.msk [vmem:[#allocation3 + $0x30] sm:$0xff] %vm2297_vm7, %v2118_v7  ;;  %2492 = vrot.lane.b32.xlu1 %v2363_v17, %s9332_s18  ;;  %v2395_v17 = vld [vmem:[#allocation2 + $0x1d2] sm:$0xff] }
 0x285   :  { %2490 = vrot.lane.b32.xlu0 %v2362_v23, %s9332_s18  ;;  %v2394_v23 = vld [vmem:[#allocation2 + $0x1ca] sm:$0xff] }
 0x286   :  { %v2124_v24 = vpop.permute.xlu1 %2123 }
 0x287   :  { %2307 = vst.msk [vmem:[#allocation3 + $0x48] sm:$0xff] %vm2297_vm7, %v2124_v24  ;;  %v2122_v18 = vpop.permute.xlu0 %2121 }
 0x288   :  { %2306 = vst.msk [vmem:[#allocation3 + $0x40] sm:$0xff] %vm2297_vm7, %v2122_v18  ;;  %2496 = vrot.lane.b32.xlu1 %v2365_v29, %s9332_s18  ;;  %v2397_v29 = vld [vmem:[#allocation2 + $0x1ea] sm:$0xff] }
 0x289   :  { %2494 = vrot.lane.b32.xlu0 %v2364_v32, %s9332_s18  ;;  %v2396_v32 = vld [vmem:[#allocation2 + $0x1e2] sm:$0xff] }
 0x28a   :  { %v2128_v35 = vpop.permute.xlu1 %2127 }
 0x28b   :  { %2309 = vst.msk [vmem:[#allocation3 + $0x58] sm:$0xff] %vm2297_vm7, %v2128_v35  ;;  %v2126_v30 = vpop.permute.xlu0 %2125 }
 0x28c   :  { %2308 = vst.msk [vmem:[#allocation3 + $0x50] sm:$0xff] %vm2297_vm7, %v2126_v30  ;;  %2500 = vrot.lane.b32.xlu1 %v2367_v41, %s9332_s18  ;;  %v2399_v41 = vld [vmem:[#allocation2 + $0x202] sm:$0xff] }
 0x28d   :  { %2498 = vrot.lane.b32.xlu0 %v2366_v36, %s9332_s18  ;;  %v2398_v36 = vld [vmem:[#allocation2 + $0x1fa] sm:$0xff] }
 0x28e   :  { %v2132_v47 = vpop.permute.xlu1 %2131 }
 0x28f   :  { %2311 = vst.msk [vmem:[#allocation3 + $0x68] sm:$0xff] %vm2297_vm7, %v2132_v47  ;;  %v2130_v42 = vpop.permute.xlu0 %2129 }
 0x290   :  { %2310 = vst.msk [vmem:[#allocation3 + $0x60] sm:$0xff] %vm2297_vm7, %v2130_v42  ;;  %2504 = vrot.lane.b32.xlu1 %v2369_v53, %s9332_s18  ;;  %v2401_v53 = vld [vmem:[#allocation2 + $0x21a] sm:$0xff] }
 0x291   :  { %2502 = vrot.lane.b32.xlu0 %v2368_v48, %s9332_s18  ;;  %v2400_v48 = vld [vmem:[#allocation2 + $0x212] sm:$0xff] }
 0x292   :  { %v2136_v59 = vpop.permute.xlu1 %2135 }
 0x293   :  { %2313 = vst.msk [vmem:[#allocation3 + $0x78] sm:$0xff] %vm2297_vm7, %v2136_v59  ;;  %v2134_v54 = vpop.permute.xlu0 %2133 }
 0x294   :  { %2312 = vst.msk [vmem:[#allocation3 + $0x70] sm:$0xff] %vm2297_vm7, %v2134_v54  ;;  %2508 = vrot.lane.b32.xlu1 %v2371_v1, %s9332_s18  ;;  %v2403_v1 = vld [vmem:[#allocation2 + $0x232] sm:$0xff] }
 0x295   :  { %2506 = vrot.lane.b32.xlu0 %v2370_v60, %s9332_s18  ;;  %v2402_v60 = vld [vmem:[#allocation2 + $0x22a] sm:$0xff] }
 0x296   :  { %v2140_v9 = vpop.permute.xlu1 %2139 }
 0x297   :  { %2315 = vst.msk [vmem:[#allocation3 + $0x88] sm:$0xff] %vm2297_vm7, %v2140_v9  ;;  %v2138_v2 = vpop.permute.xlu0 %2137 }
 0x298   :  { %2314 = vst.msk [vmem:[#allocation3 + $0x80] sm:$0xff] %vm2297_vm7, %v2138_v2  ;;  %2512 = vrot.lane.b32.xlu1 %v2373_v19, %s9332_s18  ;;  %v2405_v19 = vld [vmem:[#allocation2 + $0x24a] sm:$0xff] }
 0x299   :  { %2510 = vrot.lane.b32.xlu0 %v2372_v10, %s9332_s18  ;;  %v2404_v10 = vld [vmem:[#allocation2 + $0x242] sm:$0xff] }
 0x29a   :  { %v2144_v27 = vpop.permute.xlu1 %2143 }
 0x29b   :  { %2317 = vst.msk [vmem:[#allocation3 + $0x98] sm:$0xff] %vm2297_vm7, %v2144_v27  ;;  %v2142_v61 = vpop.permute.xlu0 %2141 }
 0x29c   :  { %2316 = vst.msk [vmem:[#allocation3 + $0x90] sm:$0xff] %vm2297_vm7, %v2142_v61  ;;  %2516 = vrot.lane.b32.xlu1 %v2375_v25, %s9332_s18  ;;  %v2407_v25 = vld [vmem:[#allocation2 + $0x262] sm:$0xff] }
 0x29d   :  { %2514 = vrot.lane.b32.xlu0 %v2374_v38, %s9332_s18  ;;  %v2406_v38 = vld [vmem:[#allocation2 + $0x25a] sm:$0xff] }
 0x29e   :  { %v2148_v58 = vpop.permute.xlu1 %2147 }
 0x29f   :  { %2319 = vst.msk [vmem:[#allocation3 + $0xa8] sm:$0xff] %vm2297_vm7, %v2148_v58  ;;  %v2146_v43 = vpop.permute.xlu0 %2145 }
 0x2a0   :  { %2318 = vst.msk [vmem:[#allocation3 + $0xa0] sm:$0xff] %vm2297_vm7, %v2146_v43  ;;  %2520 = vrot.lane.b32.xlu1 %v2377_v40, %s9332_s18  ;;  %v2409_v40 = vld [vmem:[#allocation2 + $0x27a] sm:$0xff] }
 0x2a1   :  { %2518 = vrot.lane.b32.xlu0 %v2376_v37, %s9332_s18  ;;  %v2408_v37 = vld [vmem:[#allocation2 + $0x272] sm:$0xff] }
 0x2a2   :  { %v2152_v55 = vpop.permute.xlu1 %2151 }
 0x2a3   :  { %2321 = vst.msk [vmem:[#allocation3 + $0xb8] sm:$0xff] %vm2297_vm7, %v2152_v55  ;;  %v2150_v28 = vpop.permute.xlu0 %2149 }
 0x2a4   :  { %2320 = vst.msk [vmem:[#allocation3 + $0xb0] sm:$0xff] %vm2297_vm7, %v2150_v28  ;;  %2524 = vrot.lane.b32.xlu1 %v2379_v45, %s9332_s18  ;;  %v2411_v45 = vld [vmem:[#allocation2 + $0x292] sm:$0xff] }
 0x2a5   :  { %2522 = vrot.lane.b32.xlu0 %v2378_v63, %s9332_s18  ;;  %v2410_v63 = vld [vmem:[#allocation2 + $0x28a] sm:$0xff] }
 0x2a6   :  { %v2156_v20 = vpop.permute.xlu1 %2155 }
 0x2a7   :  { %2323 = vst.msk [vmem:[#allocation3 + $0xc8] sm:$0xff] %vm2297_vm7, %v2156_v20  ;;  %v2154_v57 = vpop.permute.xlu0 %2153 }
 0x2a8   :  { %2322 = vst.msk [vmem:[#allocation3 + $0xc0] sm:$0xff] %vm2297_vm7, %v2154_v57  ;;  %2528 = vrot.lane.b32.xlu1 %v2381_v34, %s9332_s18  ;;  %v2413_v34 = vld [vmem:[#allocation2 + $0x2aa] sm:$0xff] }
 0x2a9   :  { %2526 = vrot.lane.b32.xlu0 %v2380_v6, %s9332_s18  ;;  %v2412_v6 = vld [vmem:[#allocation2 + $0x2a2] sm:$0xff] }
 0x2aa   :  { %v2160_v12 = vpop.permute.xlu1 %2159 }
 0x2ab   :  { %2325 = vst.msk [vmem:[#allocation3 + $0xd8] sm:$0xff] %vm2297_vm7, %v2160_v12  ;;  %v2158_v13 = vpop.permute.xlu0 %2157 }
 0x2ac   :  { %2324 = vst.msk [vmem:[#allocation3 + $0xd0] sm:$0xff] %vm2297_vm7, %v2158_v13  ;;  %2532 = vrot.lane.b32.xlu1 %v2383_v14, %s9332_s18  ;;  %v2415_v14 = vld [vmem:[#allocation2 + $0x2c2] sm:$0xff] }
 0x2ad   :  { %2530 = vrot.lane.b32.xlu0 %v2382_v26, %s9332_s18  ;;  %v2414_v26 = vld [vmem:[#allocation2 + $0x2ba] sm:$0xff] }
 0x2ae   :  { %v2164_v11 = vpop.permute.xlu1 %2163 }
 0x2af   :  { %2327 = vst.msk [vmem:[#allocation3 + $0xe8] sm:$0xff] %vm2297_vm7, %v2164_v11  ;;  %v2162_v15 = vpop.permute.xlu0 %2161 }
 0x2b0   :  { %2326 = vst.msk [vmem:[#allocation3 + $0xe0] sm:$0xff] %vm2297_vm7, %v2162_v15  ;;  %2536 = vrot.lane.b32.xlu1 %v2385_v8, %s9332_s18  ;;  %v2417_v8 = vld [vmem:[#allocation2 + $0x2da] sm:$0xff] }
 0x2b1   :  { %2534 = vrot.lane.b32.xlu0 %v2384_v46, %s9332_s18  ;;  %v2416_v46 = vld [vmem:[#allocation2 + $0x2d2] sm:$0xff] }
 0x2b2   :  { %v2168_v21 = vpop.permute.xlu1 %2167 }
 0x2b3   :  { %2329 = vst.msk [vmem:[#allocation3 + $0xf8] sm:$0xff] %vm2297_vm7, %v2168_v21  ;;  %v2166_v50 = vpop.permute.xlu0 %2165 }
 0x2b4   :  { %2328 = vst.msk [vmem:[#allocation3 + $0xf0] sm:$0xff] %vm2297_vm7, %v2166_v50  ;;  %2540 = vrot.lane.b32.xlu1 %v2387_v31, %s9332_s18  ;;  %v2419_v31 = vld [vmem:[#allocation2 + $0x2f2] sm:$0xff] }
 0x2b5   :  { %2538 = vrot.lane.b32.xlu0 %v2386_v62, %s9332_s18  ;;  %v2418_v62 = vld [vmem:[#allocation2 + $0x2ea] sm:$0xff] }
 0x2b6   :  { %v2172_v44 = vpop.permute.xlu1 %2171 }
 0x2b7   :  { %2331 = vst.msk [vmem:[#allocation3 + $0x108] sm:$0xff] %vm2297_vm7, %v2172_v44  ;;  %v2170_v33 = vpop.permute.xlu0 %2169 }
 0x2b8   :  { %2330 = vst.msk [vmem:[#allocation3 + $0x100] sm:$0xff] %vm2297_vm7, %v2170_v33  ;;  %2544 = vrot.lane.b32.xlu1 %v2389_v5, %s9332_s18  ;;  %v2421_v5 = vld [vmem:[#allocation2 + $0x30a] sm:$0xff] }
 0x2b9   :  { %2542 = vrot.lane.b32.xlu0 %v2388_v0, %s9332_s18  ;;  %v2420_v0 = vld [vmem:[#allocation2 + $0x302] sm:$0xff] }
 0x2ba   :  { %v2176_v22 = vpop.permute.xlu1 %2175 }
 0x2bb   :  { %2333 = vst.msk [vmem:[#allocation3 + $0x118] sm:$0xff] %vm2297_vm7, %v2176_v22  ;;  %v2174_v52 = vpop.permute.xlu0 %2173 }
 0x2bc   :  { %2332 = vst.msk [vmem:[#allocation3 + $0x110] sm:$0xff] %vm2297_vm7, %v2174_v52  ;;  %2548 = vrot.lane.b32.xlu1 %v2391_v51, %s9332_s18  ;;  %v2423_v51 = vld [vmem:[#allocation2 + $0x322] sm:$0xff] }
 0x2bd   :  { %2546 = vrot.lane.b32.xlu0 %v2390_v56, %s9332_s18  ;;  %v2422_v56 = vld [vmem:[#allocation2 + $0x31a] sm:$0xff] }
 0x2be   :  { %v2180_v49 = vpop.permute.xlu1 %2179 }
 0x2bf   :  { %2335 = vst.msk [vmem:[#allocation3 + $0x128] sm:$0xff] %vm2297_vm7, %v2180_v49  ;;  %v2178_v3 = vpop.permute.xlu0 %2177 }
 0x2c0   :  { %2334 = vst.msk [vmem:[#allocation3 + $0x120] sm:$0xff] %vm2297_vm7, %v2178_v3  ;;  %2552 = vrot.lane.b32.xlu1 %v2393_v4, %s9332_s18  ;;  %v2425_v4 = vld [vmem:[#allocation2 + $0x33a] sm:$0xff] }
 0x2c1   :  { %2550 = vrot.lane.b32.xlu0 %v2392_v39, %s9332_s18  ;;  %v2424_v39 = vld [vmem:[#allocation2 + $0x332] sm:$0xff] }
 0x2c2   :  { %v2184_v16 = vpop.permute.xlu1 %2183 }
 0x2c3   :  { %2337 = vst.msk [vmem:[#allocation3 + $0x138] sm:$0xff] %vm2297_vm7, %v2184_v16  ;;  %v2182_v7 = vpop.permute.xlu0 %2181 }
 0x2c4   :  { %2336 = vst.msk [vmem:[#allocation3 + $0x130] sm:$0xff] %vm2297_vm7, %v2182_v7  ;;  %2556 = vrot.lane.b32.xlu1 %v2395_v17, %s9332_s18  ;;  %v2749_v17 = vld [vmem:[#allocation2 + $0x38] sm:$0xff] }
 0x2c5   :  { %2554 = vrot.lane.b32.xlu0 %v2394_v23, %s9332_s18  ;;  %v2748_v23 = vld [vmem:[#allocation2 + $0x30] sm:$0xff] }
 0x2c6   :  { %v2188_v24 = vpop.permute.xlu1 %2187 }
 0x2c7   :  { %2339 = vst.msk [vmem:[#allocation3 + $0x148] sm:$0xff] %vm2297_vm7, %v2188_v24  ;;  %v2186_v18 = vpop.permute.xlu0 %2185 }
 0x2c8   :  { %2338 = vst.msk [vmem:[#allocation3 + $0x140] sm:$0xff] %vm2297_vm7, %v2186_v18  ;;  %2560 = vrot.lane.b32.xlu1 %v2397_v29, %s9332_s18  ;;  %v2751_v29 = vld [vmem:[#allocation2 + $0x50] sm:$0xff] }
 0x2c9   :  { %2558 = vrot.lane.b32.xlu0 %v2396_v32, %s9332_s18  ;;  %v2750_v32 = vld [vmem:[#allocation2 + $0x48] sm:$0xff] }
 0x2ca   :  { %v2192_v35 = vpop.permute.xlu1 %2191 }
 0x2cb   :  { %2341 = vst.msk [vmem:[#allocation3 + $0x158] sm:$0xff] %vm2297_vm7, %v2192_v35  ;;  %v2190_v30 = vpop.permute.xlu0 %2189 }
 0x2cc   :  { %2340 = vst.msk [vmem:[#allocation3 + $0x150] sm:$0xff] %vm2297_vm7, %v2190_v30  ;;  %2564 = vrot.lane.b32.xlu1 %v2399_v41, %s9332_s18  ;;  %v2753_v41 = vld [vmem:[#allocation2 + $0x68] sm:$0xff] }
 0x2cd   :  { %2562 = vrot.lane.b32.xlu0 %v2398_v36, %s9332_s18  ;;  %v2752_v36 = vld [vmem:[#allocation2 + $0x60] sm:$0xff] }
 0x2ce   :  { %v2196_v47 = vpop.permute.xlu1 %2195 }
 0x2cf   :  { %2343 = vst.msk [vmem:[#allocation3 + $0x168] sm:$0xff] %vm2297_vm7, %v2196_v47  ;;  %v2194_v42 = vpop.permute.xlu0 %2193 }
 0x2d0   :  { %2342 = vst.msk [vmem:[#allocation3 + $0x160] sm:$0xff] %vm2297_vm7, %v2194_v42  ;;  %2568 = vrot.lane.b32.xlu1 %v2401_v53, %s9332_s18  ;;  %v2755_v53 = vld [vmem:[#allocation2 + $0x80] sm:$0xff] }
 0x2d1   :  { %2566 = vrot.lane.b32.xlu0 %v2400_v48, %s9332_s18  ;;  %v2754_v48 = vld [vmem:[#allocation2 + $0x78] sm:$0xff] }
 0x2d2   :  { %v2200_v59 = vpop.permute.xlu1 %2199 }
 0x2d3   :  { %2345 = vst.msk [vmem:[#allocation3 + $0x178] sm:$0xff] %vm2297_vm7, %v2200_v59  ;;  %v2198_v54 = vpop.permute.xlu0 %2197 }
 0x2d4   :  { %2344 = vst.msk [vmem:[#allocation3 + $0x170] sm:$0xff] %vm2297_vm7, %v2198_v54  ;;  %2572 = vrot.lane.b32.xlu1 %v2403_v1, %s9332_s18  ;;  %v2757_v1 = vld [vmem:[#allocation2 + $0x98] sm:$0xff] }
 0x2d5   :  { %2570 = vrot.lane.b32.xlu0 %v2402_v60, %s9332_s18  ;;  %v2756_v60 = vld [vmem:[#allocation2 + $0x90] sm:$0xff] }
 0x2d6   :  { %v2204_v9 = vpop.permute.xlu1 %2203 }
 0x2d7   :  { %2347 = vst.msk [vmem:[#allocation3 + $0x188] sm:$0xff] %vm2297_vm7, %v2204_v9  ;;  %v2202_v2 = vpop.permute.xlu0 %2201 }
 0x2d8   :  { %2346 = vst.msk [vmem:[#allocation3 + $0x180] sm:$0xff] %vm2297_vm7, %v2202_v2  ;;  %2576 = vrot.lane.b32.xlu1 %v2405_v19, %s9332_s18  ;;  %v2759_v19 = vld [vmem:[#allocation2 + $0xb0] sm:$0xff] }
 0x2d9   :  { %2574 = vrot.lane.b32.xlu0 %v2404_v10, %s9332_s18  ;;  %v2758_v10 = vld [vmem:[#allocation2 + $0xa8] sm:$0xff] }
 0x2da   :  { %v2208_v27 = vpop.permute.xlu1 %2207 }
 0x2db   :  { %2349 = vst.msk [vmem:[#allocation3 + $0x198] sm:$0xff] %vm2297_vm7, %v2208_v27  ;;  %v2206_v61 = vpop.permute.xlu0 %2205 }
 0x2dc   :  { %2348 = vst.msk [vmem:[#allocation3 + $0x190] sm:$0xff] %vm2297_vm7, %v2206_v61  ;;  %2580 = vrot.lane.b32.xlu1 %v2407_v25, %s9332_s18  ;;  %v2761_v25 = vld [vmem:[#allocation2 + $0xc8] sm:$0xff] }
 0x2dd   :  { %2578 = vrot.lane.b32.xlu0 %v2406_v38, %s9332_s18  ;;  %v2760_v38 = vld [vmem:[#allocation2 + $0xc0] sm:$0xff] }
 0x2de   :  { %v2212_v58 = vpop.permute.xlu1 %2211 }
 0x2df   :  { %2351 = vst.msk [vmem:[#allocation3 + $0x1a8] sm:$0xff] %vm2297_vm7, %v2212_v58  ;;  %v2210_v43 = vpop.permute.xlu0 %2209 }
 0x2e0   :  { %2350 = vst.msk [vmem:[#allocation3 + $0x1a0] sm:$0xff] %vm2297_vm7, %v2210_v43  ;;  %2584 = vrot.lane.b32.xlu1 %v2409_v40, %s9332_s18  ;;  %v2763_v40 = vld [vmem:[#allocation2 + $0xe0] sm:$0xff] }
 0x2e1   :  { %2582 = vrot.lane.b32.xlu0 %v2408_v37, %s9332_s18  ;;  %v2762_v37 = vld [vmem:[#allocation2 + $0xd8] sm:$0xff] }
 0x2e2   :  { %v2216_v55 = vpop.permute.xlu1 %2215 }
 0x2e3   :  { %2353 = vst.msk [vmem:[#allocation3 + $0x1b8] sm:$0xff] %vm2297_vm7, %v2216_v55  ;;  %v2214_v28 = vpop.permute.xlu0 %2213 }
 0x2e4   :  { %2352 = vst.msk [vmem:[#allocation3 + $0x1b0] sm:$0xff] %vm2297_vm7, %v2214_v28  ;;  %2588 = vrot.lane.b32.xlu1 %v2411_v45, %s9332_s18  ;;  %v2765_v45 = vld [vmem:[#allocation2 + $0xf8] sm:$0xff] }
 0x2e5   :  { %2586 = vrot.lane.b32.xlu0 %v2410_v63, %s9332_s18  ;;  %v2764_v63 = vld [vmem:[#allocation2 + $0xf0] sm:$0xff] }
 0x2e6   :  { %v2220_v20 = vpop.permute.xlu1 %2219 }
 0x2e7   :  { %2355 = vst.msk [vmem:[#allocation3 + $0x1c8] sm:$0xff] %vm2297_vm7, %v2220_v20  ;;  %v2218_v57 = vpop.permute.xlu0 %2217 }
 0x2e8   :  { %2354 = vst.msk [vmem:[#allocation3 + $0x1c0] sm:$0xff] %vm2297_vm7, %v2218_v57  ;;  %2592 = vrot.lane.b32.xlu1 %v2413_v34, %s9332_s18  ;;  %v2767_v34 = vld [vmem:[#allocation2 + $0x110] sm:$0xff] }
 0x2e9   :  { %2590 = vrot.lane.b32.xlu0 %v2412_v6, %s9332_s18  ;;  %v2766_v6 = vld [vmem:[#allocation2 + $0x108] sm:$0xff] }
 0x2ea   :  { %v2224_v12 = vpop.permute.xlu1 %2223 }
 0x2eb   :  { %2357 = vst.msk [vmem:[#allocation3 + $0x1d8] sm:$0xff] %vm2297_vm7, %v2224_v12  ;;  %v2222_v13 = vpop.permute.xlu0 %2221 }
 0x2ec   :  { %2356 = vst.msk [vmem:[#allocation3 + $0x1d0] sm:$0xff] %vm2297_vm7, %v2222_v13  ;;  %2596 = vrot.lane.b32.xlu1 %v2415_v14, %s9332_s18  ;;  %v2769_v14 = vld [vmem:[#allocation2 + $0x128] sm:$0xff] }
 0x2ed   :  { %2594 = vrot.lane.b32.xlu0 %v2414_v26, %s9332_s18  ;;  %v2768_v26 = vld [vmem:[#allocation2 + $0x120] sm:$0xff] }
 0x2ee   :  { %v2228_v11 = vpop.permute.xlu1 %2227 }
 0x2ef   :  { %2359 = vst.msk [vmem:[#allocation3 + $0x1e8] sm:$0xff] %vm2297_vm7, %v2228_v11  ;;  %v2226_v15 = vpop.permute.xlu0 %2225 }
 0x2f0   :  { %2358 = vst.msk [vmem:[#allocation3 + $0x1e0] sm:$0xff] %vm2297_vm7, %v2226_v15  ;;  %2600 = vrot.lane.b32.xlu1 %v2417_v8, %s9332_s18  ;;  %v2771_v8 = vld [vmem:[#allocation2 + $0x140] sm:$0xff] }
 0x2f1   :  { %2598 = vrot.lane.b32.xlu0 %v2416_v46, %s9332_s18  ;;  %v2770_v46 = vld [vmem:[#allocation2 + $0x138] sm:$0xff] }
 0x2f2   :  { %v2232_v21 = vpop.permute.xlu1 %2231 }
 0x2f3   :  { %2361 = vst.msk [vmem:[#allocation3 + $0x1f8] sm:$0xff] %vm2297_vm7, %v2232_v21  ;;  %v2230_v50 = vpop.permute.xlu0 %2229 }
 0x2f4   :  { %2360 = vst.msk [vmem:[#allocation3 + $0x1f0] sm:$0xff] %vm2297_vm7, %v2230_v50  ;;  %2604 = vrot.lane.b32.xlu1 %v2419_v31, %s9332_s18  ;;  %v2773_v31 = vld [vmem:[#allocation2 + $0x158] sm:$0xff] }
 0x2f5   :  { %2602 = vrot.lane.b32.xlu0 %v2418_v62, %s9332_s18  ;;  %v2772_v62 = vld [vmem:[#allocation2 + $0x150] sm:$0xff] }
 0x2f6   :  { %v2493_v44 = vpop.permute.xlu1 %2492 }
 0x2f7   :  { %2684 = vst.msk [vmem:[#allocation3 + $0x8] sm:$0xff] %vm2682_vm8, %v2493_v44  ;;  %v2491_v33 = vpop.permute.xlu0 %2490 }
 0x2f8   :  { %2683 = vst.msk [vmem:[#allocation3] sm:$0xff] %vm2682_vm8, %v2491_v33  ;;  %2608 = vrot.lane.b32.xlu1 %v2421_v5, %s9332_s18  ;;  %v2775_v5 = vld [vmem:[#allocation2 + $0x170] sm:$0xff] }
 0x2f9   :  { %2606 = vrot.lane.b32.xlu0 %v2420_v0, %s9332_s18  ;;  %v2774_v0 = vld [vmem:[#allocation2 + $0x168] sm:$0xff] }
 0x2fa   :  { %v2497_v22 = vpop.permute.xlu1 %2496 }
 0x2fb   :  { %2686 = vst.msk [vmem:[#allocation3 + $0x18] sm:$0xff] %vm2682_vm8, %v2497_v22  ;;  %v2495_v52 = vpop.permute.xlu0 %2494 }
 0x2fc   :  { %2685 = vst.msk [vmem:[#allocation3 + $0x10] sm:$0xff] %vm2682_vm8, %v2495_v52  ;;  %2612 = vrot.lane.b32.xlu1 %v2423_v51, %s9332_s18  ;;  %v2777_v51 = vld [vmem:[#allocation2 + $0x188] sm:$0xff] }
 0x2fd   :  { %2610 = vrot.lane.b32.xlu0 %v2422_v56, %s9332_s18  ;;  %v2776_v56 = vld [vmem:[#allocation2 + $0x180] sm:$0xff] }
 0x2fe   :  { %v2501_v49 = vpop.permute.xlu1 %2500 }
 0x2ff   :  { %2688 = vst.msk [vmem:[#allocation3 + $0x28] sm:$0xff] %vm2682_vm8, %v2501_v49  ;;  %v2499_v3 = vpop.permute.xlu0 %2498  ;;  %v2779_v49 = vld [vmem:[#allocation2 + $0x1a0] sm:$0xff] }
 0x300   :  { %2687 = vst.msk [vmem:[#allocation3 + $0x20] sm:$0xff] %vm2682_vm8, %v2499_v3  ;;  %2616 = vrot.lane.b32.xlu1 %v2425_v4, %s9332_s18  ;;  %v2778_v4 = vld [vmem:[#allocation2 + $0x198] sm:$0xff] }
 0x301   :  { %2614 = vrot.lane.b32.xlu0 %v2424_v39, %s9332_s18 }
 0x302   :  { %v2505_v16 = vpop.permute.xlu1 %2504 }
 0x303   :  { %2690 = vst.msk [vmem:[#allocation3 + $0x38] sm:$0xff] %vm2682_vm8, %v2505_v16  ;;  %v2503_v7 = vpop.permute.xlu0 %2502 }
 0x304   :  { %2689 = vst.msk [vmem:[#allocation3 + $0x30] sm:$0xff] %vm2682_vm8, %v2503_v7  ;;  %2878 = vrot.lane.b32.xlu1 %v2749_v17, %s9333_s19  ;;  %v2781_v17 = vld [vmem:[#allocation2 + $0x1e8] sm:$0xff] }
 0x305   :  { %2876 = vrot.lane.b32.xlu0 %v2748_v23, %s9333_s19  ;;  %v2780_v23 = vld [vmem:[#allocation2 + $0x1e0] sm:$0xff] }
 0x306   :  { %v2509_v24 = vpop.permute.xlu1 %2508 }
 0x307   :  { %2692 = vst.msk [vmem:[#allocation3 + $0x48] sm:$0xff] %vm2682_vm8, %v2509_v24  ;;  %v2507_v18 = vpop.permute.xlu0 %2506 }
 0x308   :  { %2691 = vst.msk [vmem:[#allocation3 + $0x40] sm:$0xff] %vm2682_vm8, %v2507_v18  ;;  %2882 = vrot.lane.b32.xlu1 %v2751_v29, %s9333_s19  ;;  %v2783_v29 = vld [vmem:[#allocation2 + $0x200] sm:$0xff] }
 0x309   :  { %2880 = vrot.lane.b32.xlu0 %v2750_v32, %s9333_s19  ;;  %v2782_v32 = vld [vmem:[#allocation2 + $0x1f8] sm:$0xff] }
 0x30a   :  { %v2513_v35 = vpop.permute.xlu1 %2512 }
 0x30b   :  { %2694 = vst.msk [vmem:[#allocation3 + $0x58] sm:$0xff] %vm2682_vm8, %v2513_v35  ;;  %v2511_v30 = vpop.permute.xlu0 %2510 }
 0x30c   :  { %2693 = vst.msk [vmem:[#allocation3 + $0x50] sm:$0xff] %vm2682_vm8, %v2511_v30  ;;  %2886 = vrot.lane.b32.xlu1 %v2753_v41, %s9333_s19  ;;  %v2785_v41 = vld [vmem:[#allocation2 + $0x218] sm:$0xff] }
 0x30d   :  { %2884 = vrot.lane.b32.xlu0 %v2752_v36, %s9333_s19  ;;  %v2784_v36 = vld [vmem:[#allocation2 + $0x210] sm:$0xff] }
 0x30e   :  { %v2517_v47 = vpop.permute.xlu1 %2516 }
 0x30f   :  { %2696 = vst.msk [vmem:[#allocation3 + $0x68] sm:$0xff] %vm2682_vm8, %v2517_v47  ;;  %v2515_v42 = vpop.permute.xlu0 %2514 }
 0x310   :  { %2695 = vst.msk [vmem:[#allocation3 + $0x60] sm:$0xff] %vm2682_vm8, %v2515_v42  ;;  %2890 = vrot.lane.b32.xlu1 %v2755_v53, %s9333_s19  ;;  %v2787_v53 = vld [vmem:[#allocation2 + $0x230] sm:$0xff] }
 0x311   :  { %2888 = vrot.lane.b32.xlu0 %v2754_v48, %s9333_s19  ;;  %v2786_v48 = vld [vmem:[#allocation2 + $0x228] sm:$0xff] }
 0x312   :  { %v2521_v59 = vpop.permute.xlu1 %2520 }
 0x313   :  { %2698 = vst.msk [vmem:[#allocation3 + $0x78] sm:$0xff] %vm2682_vm8, %v2521_v59  ;;  %v2519_v54 = vpop.permute.xlu0 %2518 }
 0x314   :  { %2697 = vst.msk [vmem:[#allocation3 + $0x70] sm:$0xff] %vm2682_vm8, %v2519_v54  ;;  %2894 = vrot.lane.b32.xlu1 %v2757_v1, %s9333_s19  ;;  %v2789_v1 = vld [vmem:[#allocation2 + $0x248] sm:$0xff] }
 0x315   :  { %2892 = vrot.lane.b32.xlu0 %v2756_v60, %s9333_s19  ;;  %v2788_v60 = vld [vmem:[#allocation2 + $0x240] sm:$0xff] }
 0x316   :  { %v2525_v9 = vpop.permute.xlu1 %2524 }
 0x317   :  { %2700 = vst.msk [vmem:[#allocation3 + $0x88] sm:$0xff] %vm2682_vm8, %v2525_v9  ;;  %v2523_v2 = vpop.permute.xlu0 %2522 }
 0x318   :  { %2699 = vst.msk [vmem:[#allocation3 + $0x80] sm:$0xff] %vm2682_vm8, %v2523_v2  ;;  %2898 = vrot.lane.b32.xlu1 %v2759_v19, %s9333_s19  ;;  %v2791_v19 = vld [vmem:[#allocation2 + $0x260] sm:$0xff] }
 0x319   :  { %2896 = vrot.lane.b32.xlu0 %v2758_v10, %s9333_s19  ;;  %v2790_v10 = vld [vmem:[#allocation2 + $0x258] sm:$0xff] }
 0x31a   :  { %v2529_v27 = vpop.permute.xlu1 %2528 }
 0x31b   :  { %2702 = vst.msk [vmem:[#allocation3 + $0x98] sm:$0xff] %vm2682_vm8, %v2529_v27  ;;  %v2527_v61 = vpop.permute.xlu0 %2526 }
 0x31c   :  { %2701 = vst.msk [vmem:[#allocation3 + $0x90] sm:$0xff] %vm2682_vm8, %v2527_v61  ;;  %2902 = vrot.lane.b32.xlu1 %v2761_v25, %s9333_s19  ;;  %v2793_v25 = vld [vmem:[#allocation2 + $0x278] sm:$0xff] }
 0x31d   :  { %2900 = vrot.lane.b32.xlu0 %v2760_v38, %s9333_s19  ;;  %v2792_v38 = vld [vmem:[#allocation2 + $0x270] sm:$0xff] }
 0x31e   :  { %v2533_v58 = vpop.permute.xlu1 %2532 }
 0x31f   :  { %2704 = vst.msk [vmem:[#allocation3 + $0xa8] sm:$0xff] %vm2682_vm8, %v2533_v58  ;;  %v2531_v43 = vpop.permute.xlu0 %2530 }
 0x320   :  { %2703 = vst.msk [vmem:[#allocation3 + $0xa0] sm:$0xff] %vm2682_vm8, %v2531_v43  ;;  %2906 = vrot.lane.b32.xlu1 %v2763_v40, %s9333_s19  ;;  %v2795_v40 = vld [vmem:[#allocation2 + $0x290] sm:$0xff] }
 0x321   :  { %2904 = vrot.lane.b32.xlu0 %v2762_v37, %s9333_s19  ;;  %v2794_v37 = vld [vmem:[#allocation2 + $0x288] sm:$0xff] }
 0x322   :  { %v2537_v55 = vpop.permute.xlu1 %2536 }
 0x323   :  { %2706 = vst.msk [vmem:[#allocation3 + $0xb8] sm:$0xff] %vm2682_vm8, %v2537_v55  ;;  %v2535_v28 = vpop.permute.xlu0 %2534 }
 0x324   :  { %2705 = vst.msk [vmem:[#allocation3 + $0xb0] sm:$0xff] %vm2682_vm8, %v2535_v28  ;;  %2910 = vrot.lane.b32.xlu1 %v2765_v45, %s9333_s19  ;;  %v2797_v45 = vld [vmem:[#allocation2 + $0x2a8] sm:$0xff] }
 0x325   :  { %2908 = vrot.lane.b32.xlu0 %v2764_v63, %s9333_s19  ;;  %v2796_v63 = vld [vmem:[#allocation2 + $0x2a0] sm:$0xff] }
 0x326   :  { %v2541_v20 = vpop.permute.xlu1 %2540 }
 0x327   :  { %2708 = vst.msk [vmem:[#allocation3 + $0xc8] sm:$0xff] %vm2682_vm8, %v2541_v20  ;;  %v2539_v57 = vpop.permute.xlu0 %2538 }
 0x328   :  { %2707 = vst.msk [vmem:[#allocation3 + $0xc0] sm:$0xff] %vm2682_vm8, %v2539_v57  ;;  %2914 = vrot.lane.b32.xlu1 %v2767_v34, %s9333_s19  ;;  %v2799_v34 = vld [vmem:[#allocation2 + $0x2c0] sm:$0xff] }
 0x329   :  { %2912 = vrot.lane.b32.xlu0 %v2766_v6, %s9333_s19  ;;  %v2798_v6 = vld [vmem:[#allocation2 + $0x2b8] sm:$0xff] }
 0x32a   :  { %v2545_v12 = vpop.permute.xlu1 %2544 }
 0x32b   :  { %2710 = vst.msk [vmem:[#allocation3 + $0xd8] sm:$0xff] %vm2682_vm8, %v2545_v12  ;;  %v2543_v13 = vpop.permute.xlu0 %2542 }
 0x32c   :  { %2709 = vst.msk [vmem:[#allocation3 + $0xd0] sm:$0xff] %vm2682_vm8, %v2543_v13  ;;  %2918 = vrot.lane.b32.xlu1 %v2769_v14, %s9333_s19  ;;  %v2801_v14 = vld [vmem:[#allocation2 + $0x2d8] sm:$0xff] }
 0x32d   :  { %2916 = vrot.lane.b32.xlu0 %v2768_v26, %s9333_s19  ;;  %v2800_v26 = vld [vmem:[#allocation2 + $0x2d0] sm:$0xff] }
 0x32e   :  { %v2549_v11 = vpop.permute.xlu1 %2548 }
 0x32f   :  { %2712 = vst.msk [vmem:[#allocation3 + $0xe8] sm:$0xff] %vm2682_vm8, %v2549_v11  ;;  %v2547_v15 = vpop.permute.xlu0 %2546 }
 0x330   :  { %2711 = vst.msk [vmem:[#allocation3 + $0xe0] sm:$0xff] %vm2682_vm8, %v2547_v15  ;;  %2922 = vrot.lane.b32.xlu1 %v2771_v8, %s9333_s19  ;;  %v2803_v8 = vld [vmem:[#allocation2 + $0x2f0] sm:$0xff] }
 0x331   :  { %2920 = vrot.lane.b32.xlu0 %v2770_v46, %s9333_s19  ;;  %v2802_v46 = vld [vmem:[#allocation2 + $0x2e8] sm:$0xff] }
 0x332   :  { %v2553_v21 = vpop.permute.xlu1 %2552 }
 0x333   :  { %2714 = vst.msk [vmem:[#allocation3 + $0xf8] sm:$0xff] %vm2682_vm8, %v2553_v21  ;;  %v2551_v50 = vpop.permute.xlu0 %2550 }
 0x334   :  { %2713 = vst.msk [vmem:[#allocation3 + $0xf0] sm:$0xff] %vm2682_vm8, %v2551_v50  ;;  %2926 = vrot.lane.b32.xlu1 %v2773_v31, %s9333_s19  ;;  %v2805_v31 = vld [vmem:[#allocation2 + $0x308] sm:$0xff] }
 0x335   :  { %2924 = vrot.lane.b32.xlu0 %v2772_v62, %s9333_s19  ;;  %v2804_v62 = vld [vmem:[#allocation2 + $0x300] sm:$0xff] }
 0x336   :  { %v2557_v44 = vpop.permute.xlu1 %2556 }
 0x337   :  { %2716 = vst.msk [vmem:[#allocation3 + $0x108] sm:$0xff] %vm2682_vm8, %v2557_v44  ;;  %v2555_v33 = vpop.permute.xlu0 %2554 }
 0x338   :  { %2715 = vst.msk [vmem:[#allocation3 + $0x100] sm:$0xff] %vm2682_vm8, %v2555_v33  ;;  %2930 = vrot.lane.b32.xlu1 %v2775_v5, %s9333_s19  ;;  %v2807_v5 = vld [vmem:[#allocation2 + $0x320] sm:$0xff] }
 0x339   :  { %2928 = vrot.lane.b32.xlu0 %v2774_v0, %s9333_s19  ;;  %v2806_v0 = vld [vmem:[#allocation2 + $0x318] sm:$0xff] }
 0x33a   :  { %v2561_v22 = vpop.permute.xlu1 %2560 }
 0x33b   :  { %2718 = vst.msk [vmem:[#allocation3 + $0x118] sm:$0xff] %vm2682_vm8, %v2561_v22  ;;  %v2559_v52 = vpop.permute.xlu0 %2558 }
 0x33c   :  { %2717 = vst.msk [vmem:[#allocation3 + $0x110] sm:$0xff] %vm2682_vm8, %v2559_v52  ;;  %2934 = vrot.lane.b32.xlu1 %v2777_v51, %s9333_s19  ;;  %v2809_v51 = vld [vmem:[#allocation2 + $0x338] sm:$0xff] }
 0x33d   :  { %2932 = vrot.lane.b32.xlu0 %v2776_v56, %s9333_s19  ;;  %v2808_v56 = vld [vmem:[#allocation2 + $0x330] sm:$0xff] }
 0x33e   :  { %v2565_v3 = vpop.permute.xlu1 %2564 }
 0x33f   :  { %2720 = vst.msk [vmem:[#allocation3 + $0x128] sm:$0xff] %vm2682_vm8, %v2565_v3  ;;  %v2563_v39 = vpop.permute.xlu0 %2562 }
 0x340   :  { %2719 = vst.msk [vmem:[#allocation3 + $0x120] sm:$0xff] %vm2682_vm8, %v2563_v39  ;;  %2938 = vrot.lane.b32.xlu1 %v2779_v49, %s9333_s19  ;;  %v2811_v49 = vld [vmem:[#allocation2 + $0x350] sm:$0xff] }
 0x341   :  { %2936 = vrot.lane.b32.xlu0 %v2778_v4, %s9333_s19  ;;  %v2810_v4 = vld [vmem:[#allocation2 + $0x348] sm:$0xff] }
 0x342   :  { %v2569_v16 = vpop.permute.xlu1 %2568 }
 0x343   :  { %2722 = vst.msk [vmem:[#allocation3 + $0x138] sm:$0xff] %vm2682_vm8, %v2569_v16  ;;  %v2567_v7 = vpop.permute.xlu0 %2566 }
 0x344   :  { %2721 = vst.msk [vmem:[#allocation3 + $0x130] sm:$0xff] %vm2682_vm8, %v2567_v7  ;;  %2942 = vrot.lane.b32.xlu1 %v2781_v17, %s9333_s19  ;;  %v3134_v17 = vld [vmem:[#allocation2 + $0x39] sm:$0xff] }
 0x345   :  { %2940 = vrot.lane.b32.xlu0 %v2780_v23, %s9333_s19  ;;  %v3133_v23 = vld [vmem:[#allocation2 + $0x31] sm:$0xff] }
 0x346   :  { %v2573_v24 = vpop.permute.xlu1 %2572 }
 0x347   :  { %2724 = vst.msk [vmem:[#allocation3 + $0x148] sm:$0xff] %vm2682_vm8, %v2573_v24  ;;  %v2571_v18 = vpop.permute.xlu0 %2570 }
 0x348   :  { %2723 = vst.msk [vmem:[#allocation3 + $0x140] sm:$0xff] %vm2682_vm8, %v2571_v18  ;;  %2946 = vrot.lane.b32.xlu1 %v2783_v29, %s9333_s19  ;;  %v3136_v29 = vld [vmem:[#allocation2 + $0x51] sm:$0xff] }
 0x349   :  { %2944 = vrot.lane.b32.xlu0 %v2782_v32, %s9333_s19  ;;  %v3135_v32 = vld [vmem:[#allocation2 + $0x49] sm:$0xff] }
 0x34a   :  { %v2577_v35 = vpop.permute.xlu1 %2576 }
 0x34b   :  { %2726 = vst.msk [vmem:[#allocation3 + $0x158] sm:$0xff] %vm2682_vm8, %v2577_v35  ;;  %v2575_v30 = vpop.permute.xlu0 %2574 }
 0x34c   :  { %2725 = vst.msk [vmem:[#allocation3 + $0x150] sm:$0xff] %vm2682_vm8, %v2575_v30  ;;  %2950 = vrot.lane.b32.xlu1 %v2785_v41, %s9333_s19  ;;  %v3138_v41 = vld [vmem:[#allocation2 + $0x69] sm:$0xff] }
 0x34d   :  { %2948 = vrot.lane.b32.xlu0 %v2784_v36, %s9333_s19  ;;  %v3137_v36 = vld [vmem:[#allocation2 + $0x61] sm:$0xff] }
 0x34e   :  { %v2581_v47 = vpop.permute.xlu1 %2580 }
 0x34f   :  { %2728 = vst.msk [vmem:[#allocation3 + $0x168] sm:$0xff] %vm2682_vm8, %v2581_v47  ;;  %v2579_v42 = vpop.permute.xlu0 %2578 }
 0x350   :  { %2727 = vst.msk [vmem:[#allocation3 + $0x160] sm:$0xff] %vm2682_vm8, %v2579_v42  ;;  %2954 = vrot.lane.b32.xlu1 %v2787_v53, %s9333_s19  ;;  %v3140_v53 = vld [vmem:[#allocation2 + $0x81] sm:$0xff] }
 0x351   :  { %2952 = vrot.lane.b32.xlu0 %v2786_v48, %s9333_s19  ;;  %v3139_v48 = vld [vmem:[#allocation2 + $0x79] sm:$0xff] }
 0x352   :  { %v2585_v59 = vpop.permute.xlu1 %2584 }
 0x353   :  { %2730 = vst.msk [vmem:[#allocation3 + $0x178] sm:$0xff] %vm2682_vm8, %v2585_v59  ;;  %v2583_v54 = vpop.permute.xlu0 %2582 }
 0x354   :  { %2729 = vst.msk [vmem:[#allocation3 + $0x170] sm:$0xff] %vm2682_vm8, %v2583_v54  ;;  %2958 = vrot.lane.b32.xlu1 %v2789_v1, %s9333_s19  ;;  %v3142_v1 = vld [vmem:[#allocation2 + $0x99] sm:$0xff] }
 0x355   :  { %2956 = vrot.lane.b32.xlu0 %v2788_v60, %s9333_s19  ;;  %v3141_v60 = vld [vmem:[#allocation2 + $0x91] sm:$0xff] }
 0x356   :  { %v2589_v9 = vpop.permute.xlu1 %2588 }
 0x357   :  { %2732 = vst.msk [vmem:[#allocation3 + $0x188] sm:$0xff] %vm2682_vm8, %v2589_v9  ;;  %v2587_v2 = vpop.permute.xlu0 %2586 }
 0x358   :  { %2731 = vst.msk [vmem:[#allocation3 + $0x180] sm:$0xff] %vm2682_vm8, %v2587_v2  ;;  %2962 = vrot.lane.b32.xlu1 %v2791_v19, %s9333_s19  ;;  %v3144_v19 = vld [vmem:[#allocation2 + $0xb1] sm:$0xff] }
 0x359   :  { %2960 = vrot.lane.b32.xlu0 %v2790_v10, %s9333_s19  ;;  %v3143_v10 = vld [vmem:[#allocation2 + $0xa9] sm:$0xff] }
 0x35a   :  { %v2593_v27 = vpop.permute.xlu1 %2592 }
 0x35b   :  { %2734 = vst.msk [vmem:[#allocation3 + $0x198] sm:$0xff] %vm2682_vm8, %v2593_v27  ;;  %v2591_v61 = vpop.permute.xlu0 %2590 }
 0x35c   :  { %2733 = vst.msk [vmem:[#allocation3 + $0x190] sm:$0xff] %vm2682_vm8, %v2591_v61  ;;  %2966 = vrot.lane.b32.xlu1 %v2793_v25, %s9333_s19  ;;  %v3146_v25 = vld [vmem:[#allocation2 + $0xc9] sm:$0xff] }
 0x35d   :  { %2964 = vrot.lane.b32.xlu0 %v2792_v38, %s9333_s19  ;;  %v3145_v38 = vld [vmem:[#allocation2 + $0xc1] sm:$0xff] }
 0x35e   :  { %v2597_v58 = vpop.permute.xlu1 %2596 }
 0x35f   :  { %2736 = vst.msk [vmem:[#allocation3 + $0x1a8] sm:$0xff] %vm2682_vm8, %v2597_v58  ;;  %v2595_v43 = vpop.permute.xlu0 %2594 }
 0x360   :  { %2735 = vst.msk [vmem:[#allocation3 + $0x1a0] sm:$0xff] %vm2682_vm8, %v2595_v43  ;;  %2970 = vrot.lane.b32.xlu1 %v2795_v40, %s9333_s19  ;;  %v3148_v40 = vld [vmem:[#allocation2 + $0xe1] sm:$0xff] }
 0x361   :  { %2968 = vrot.lane.b32.xlu0 %v2794_v37, %s9333_s19  ;;  %v3147_v37 = vld [vmem:[#allocation2 + $0xd9] sm:$0xff] }
 0x362   :  { %v2601_v55 = vpop.permute.xlu1 %2600 }
 0x363   :  { %2738 = vst.msk [vmem:[#allocation3 + $0x1b8] sm:$0xff] %vm2682_vm8, %v2601_v55  ;;  %v2599_v28 = vpop.permute.xlu0 %2598 }
 0x364   :  { %2737 = vst.msk [vmem:[#allocation3 + $0x1b0] sm:$0xff] %vm2682_vm8, %v2599_v28  ;;  %2974 = vrot.lane.b32.xlu1 %v2797_v45, %s9333_s19  ;;  %v3150_v45 = vld [vmem:[#allocation2 + $0xf9] sm:$0xff] }
 0x365   :  { %2972 = vrot.lane.b32.xlu0 %v2796_v63, %s9333_s19  ;;  %v3149_v63 = vld [vmem:[#allocation2 + $0xf1] sm:$0xff] }
 0x366   :  { %v2605_v20 = vpop.permute.xlu1 %2604 }
 0x367   :  { %2740 = vst.msk [vmem:[#allocation3 + $0x1c8] sm:$0xff] %vm2682_vm8, %v2605_v20  ;;  %v2603_v57 = vpop.permute.xlu0 %2602 }
 0x368   :  { %2739 = vst.msk [vmem:[#allocation3 + $0x1c0] sm:$0xff] %vm2682_vm8, %v2603_v57  ;;  %2978 = vrot.lane.b32.xlu1 %v2799_v34, %s9333_s19  ;;  %v3152_v34 = vld [vmem:[#allocation2 + $0x111] sm:$0xff] }
 0x369   :  { %2976 = vrot.lane.b32.xlu0 %v2798_v6, %s9333_s19  ;;  %v3151_v6 = vld [vmem:[#allocation2 + $0x109] sm:$0xff] }
 0x36a   :  { %v2609_v12 = vpop.permute.xlu1 %2608 }
 0x36b   :  { %2742 = vst.msk [vmem:[#allocation3 + $0x1d8] sm:$0xff] %vm2682_vm8, %v2609_v12  ;;  %v2607_v13 = vpop.permute.xlu0 %2606 }
 0x36c   :  { %2741 = vst.msk [vmem:[#allocation3 + $0x1d0] sm:$0xff] %vm2682_vm8, %v2607_v13  ;;  %2982 = vrot.lane.b32.xlu1 %v2801_v14, %s9333_s19  ;;  %v3154_v14 = vld [vmem:[#allocation2 + $0x129] sm:$0xff] }
 0x36d   :  { %2980 = vrot.lane.b32.xlu0 %v2800_v26, %s9333_s19  ;;  %v3153_v26 = vld [vmem:[#allocation2 + $0x121] sm:$0xff] }
 0x36e   :  { %v2613_v11 = vpop.permute.xlu1 %2612 }
 0x36f   :  { %2744 = vst.msk [vmem:[#allocation3 + $0x1e8] sm:$0xff] %vm2682_vm8, %v2613_v11  ;;  %v2611_v15 = vpop.permute.xlu0 %2610 }
 0x370   :  { %2743 = vst.msk [vmem:[#allocation3 + $0x1e0] sm:$0xff] %vm2682_vm8, %v2611_v15  ;;  %2986 = vrot.lane.b32.xlu1 %v2803_v8, %s9333_s19  ;;  %v3156_v8 = vld [vmem:[#allocation2 + $0x141] sm:$0xff] }
 0x371   :  { %2984 = vrot.lane.b32.xlu0 %v2802_v46, %s9333_s19  ;;  %v3155_v46 = vld [vmem:[#allocation2 + $0x139] sm:$0xff] }
 0x372   :  { %v2617_v21 = vpop.permute.xlu1 %2616 }
 0x373   :  { %2746 = vst.msk [vmem:[#allocation3 + $0x1f8] sm:$0xff] %vm2682_vm8, %v2617_v21  ;;  %v2615_v50 = vpop.permute.xlu0 %2614 }
 0x374   :  { %2745 = vst.msk [vmem:[#allocation3 + $0x1f0] sm:$0xff] %vm2682_vm8, %v2615_v50  ;;  %2990 = vrot.lane.b32.xlu1 %v2805_v31, %s9333_s19  ;;  %v3158_v31 = vld [vmem:[#allocation2 + $0x159] sm:$0xff] }
 0x375   :  { %2988 = vrot.lane.b32.xlu0 %v2804_v62, %s9333_s19  ;;  %v3157_v62 = vld [vmem:[#allocation2 + $0x151] sm:$0xff] }
 0x376   :  { %v2879_v44 = vpop.permute.xlu1 %2878 }
 0x377   :  { %3070 = vst.msk [vmem:[#allocation3 + $0x8] sm:$0xff] %vm3068_vm9, %v2879_v44  ;;  %v2877_v33 = vpop.permute.xlu0 %2876 }
 0x378   :  { %3069 = vst.msk [vmem:[#allocation3] sm:$0xff] %vm3068_vm9, %v2877_v33  ;;  %2994 = vrot.lane.b32.xlu1 %v2807_v5, %s9333_s19  ;;  %v3160_v5 = vld [vmem:[#allocation2 + $0x171] sm:$0xff] }
 0x379   :  { %2992 = vrot.lane.b32.xlu0 %v2806_v0, %s9333_s19  ;;  %v3159_v0 = vld [vmem:[#allocation2 + $0x169] sm:$0xff] }
 0x37a   :  { %v2883_v22 = vpop.permute.xlu1 %2882 }
 0x37b   :  { %3072 = vst.msk [vmem:[#allocation3 + $0x18] sm:$0xff] %vm3068_vm9, %v2883_v22  ;;  %v2881_v52 = vpop.permute.xlu0 %2880 }
 0x37c   :  { %3071 = vst.msk [vmem:[#allocation3 + $0x10] sm:$0xff] %vm3068_vm9, %v2881_v52  ;;  %2998 = vrot.lane.b32.xlu1 %v2809_v51, %s9333_s19  ;;  %v3162_v51 = vld [vmem:[#allocation2 + $0x189] sm:$0xff] }
 0x37d   :  { %2996 = vrot.lane.b32.xlu0 %v2808_v56, %s9333_s19  ;;  %v3161_v56 = vld [vmem:[#allocation2 + $0x181] sm:$0xff] }
 0x37e   :  { %v2887_v3 = vpop.permute.xlu1 %2886 }
 0x37f   :  { %3074 = vst.msk [vmem:[#allocation3 + $0x28] sm:$0xff] %vm3068_vm9, %v2887_v3  ;;  %v2885_v39 = vpop.permute.xlu0 %2884 }
 0x380   :  { %3073 = vst.msk [vmem:[#allocation3 + $0x20] sm:$0xff] %vm3068_vm9, %v2885_v39  ;;  %3002 = vrot.lane.b32.xlu1 %v2811_v49, %s9333_s19  ;;  %v3164_v49 = vld [vmem:[#allocation2 + $0x1a1] sm:$0xff] }
 0x381   :  { %3000 = vrot.lane.b32.xlu0 %v2810_v4, %s9333_s19  ;;  %v3163_v4 = vld [vmem:[#allocation2 + $0x199] sm:$0xff] }
 0x382   :  { %v2891_v16 = vpop.permute.xlu1 %2890 }
 0x383   :  { %3076 = vst.msk [vmem:[#allocation3 + $0x38] sm:$0xff] %vm3068_vm9, %v2891_v16  ;;  %v2889_v7 = vpop.permute.xlu0 %2888 }
 0x384   :  { %3075 = vst.msk [vmem:[#allocation3 + $0x30] sm:$0xff] %vm3068_vm9, %v2889_v7  ;;  %3263 = vrot.lane.b32.xlu1 %v3134_v17, %s9334_s20  ;;  %v3166_v17 = vld [vmem:[#allocation2 + $0x1e9] sm:$0xff] }
 0x385   :  { %3261 = vrot.lane.b32.xlu0 %v3133_v23, %s9334_s20  ;;  %v3165_v23 = vld [vmem:[#allocation2 + $0x1e1] sm:$0xff] }
 0x386   :  { %v2895_v24 = vpop.permute.xlu1 %2894 }
 0x387   :  { %3078 = vst.msk [vmem:[#allocation3 + $0x48] sm:$0xff] %vm3068_vm9, %v2895_v24  ;;  %v2893_v18 = vpop.permute.xlu0 %2892 }
 0x388   :  { %3077 = vst.msk [vmem:[#allocation3 + $0x40] sm:$0xff] %vm3068_vm9, %v2893_v18  ;;  %3267 = vrot.lane.b32.xlu1 %v3136_v29, %s9334_s20  ;;  %v3168_v29 = vld [vmem:[#allocation2 + $0x201] sm:$0xff] }
 0x389   :  { %3265 = vrot.lane.b32.xlu0 %v3135_v32, %s9334_s20  ;;  %v3167_v32 = vld [vmem:[#allocation2 + $0x1f9] sm:$0xff] }
 0x38a   :  { %v2899_v35 = vpop.permute.xlu1 %2898 }
 0x38b   :  { %3080 = vst.msk [vmem:[#allocation3 + $0x58] sm:$0xff] %vm3068_vm9, %v2899_v35  ;;  %v2897_v30 = vpop.permute.xlu0 %2896 }
 0x38c   :  { %3079 = vst.msk [vmem:[#allocation3 + $0x50] sm:$0xff] %vm3068_vm9, %v2897_v30  ;;  %3271 = vrot.lane.b32.xlu1 %v3138_v41, %s9334_s20  ;;  %v3170_v41 = vld [vmem:[#allocation2 + $0x219] sm:$0xff] }
 0x38d   :  { %3269 = vrot.lane.b32.xlu0 %v3137_v36, %s9334_s20  ;;  %v3169_v36 = vld [vmem:[#allocation2 + $0x211] sm:$0xff] }
 0x38e   :  { %v2903_v47 = vpop.permute.xlu1 %2902 }
 0x38f   :  { %3082 = vst.msk [vmem:[#allocation3 + $0x68] sm:$0xff] %vm3068_vm9, %v2903_v47  ;;  %v2901_v42 = vpop.permute.xlu0 %2900 }
 0x390   :  { %3081 = vst.msk [vmem:[#allocation3 + $0x60] sm:$0xff] %vm3068_vm9, %v2901_v42  ;;  %3275 = vrot.lane.b32.xlu1 %v3140_v53, %s9334_s20  ;;  %v3172_v53 = vld [vmem:[#allocation2 + $0x231] sm:$0xff] }
 0x391   :  { %3273 = vrot.lane.b32.xlu0 %v3139_v48, %s9334_s20  ;;  %v3171_v48 = vld [vmem:[#allocation2 + $0x229] sm:$0xff] }
 0x392   :  { %v2907_v59 = vpop.permute.xlu1 %2906 }
 0x393   :  { %3084 = vst.msk [vmem:[#allocation3 + $0x78] sm:$0xff] %vm3068_vm9, %v2907_v59  ;;  %v2905_v54 = vpop.permute.xlu0 %2904 }
 0x394   :  { %3083 = vst.msk [vmem:[#allocation3 + $0x70] sm:$0xff] %vm3068_vm9, %v2905_v54  ;;  %3279 = vrot.lane.b32.xlu1 %v3142_v1, %s9334_s20  ;;  %v3174_v1 = vld [vmem:[#allocation2 + $0x249] sm:$0xff] }
 0x395   :  { %3277 = vrot.lane.b32.xlu0 %v3141_v60, %s9334_s20  ;;  %v3173_v60 = vld [vmem:[#allocation2 + $0x241] sm:$0xff] }
 0x396   :  { %v2911_v9 = vpop.permute.xlu1 %2910 }
 0x397   :  { %3086 = vst.msk [vmem:[#allocation3 + $0x88] sm:$0xff] %vm3068_vm9, %v2911_v9  ;;  %v2909_v2 = vpop.permute.xlu0 %2908 }
 0x398   :  { %3085 = vst.msk [vmem:[#allocation3 + $0x80] sm:$0xff] %vm3068_vm9, %v2909_v2  ;;  %3283 = vrot.lane.b32.xlu1 %v3144_v19, %s9334_s20  ;;  %v3176_v19 = vld [vmem:[#allocation2 + $0x261] sm:$0xff] }
 0x399   :  { %3281 = vrot.lane.b32.xlu0 %v3143_v10, %s9334_s20  ;;  %v3175_v10 = vld [vmem:[#allocation2 + $0x259] sm:$0xff] }
 0x39a   :  { %v2915_v27 = vpop.permute.xlu1 %2914 }
 0x39b   :  { %3088 = vst.msk [vmem:[#allocation3 + $0x98] sm:$0xff] %vm3068_vm9, %v2915_v27  ;;  %v2913_v61 = vpop.permute.xlu0 %2912 }
 0x39c   :  { %3087 = vst.msk [vmem:[#allocation3 + $0x90] sm:$0xff] %vm3068_vm9, %v2913_v61  ;;  %3287 = vrot.lane.b32.xlu1 %v3146_v25, %s9334_s20  ;;  %v3178_v25 = vld [vmem:[#allocation2 + $0x279] sm:$0xff] }
 0x39d   :  { %3285 = vrot.lane.b32.xlu0 %v3145_v38, %s9334_s20  ;;  %v3177_v38 = vld [vmem:[#allocation2 + $0x271] sm:$0xff] }
 0x39e   :  { %v2919_v58 = vpop.permute.xlu1 %2918 }
 0x39f   :  { %3090 = vst.msk [vmem:[#allocation3 + $0xa8] sm:$0xff] %vm3068_vm9, %v2919_v58  ;;  %v2917_v43 = vpop.permute.xlu0 %2916 }
 0x3a0   :  { %3089 = vst.msk [vmem:[#allocation3 + $0xa0] sm:$0xff] %vm3068_vm9, %v2917_v43  ;;  %3291 = vrot.lane.b32.xlu1 %v3148_v40, %s9334_s20  ;;  %v3180_v40 = vld [vmem:[#allocation2 + $0x291] sm:$0xff] }
 0x3a1   :  { %3289 = vrot.lane.b32.xlu0 %v3147_v37, %s9334_s20  ;;  %v3179_v37 = vld [vmem:[#allocation2 + $0x289] sm:$0xff] }
 0x3a2   :  { %v2923_v55 = vpop.permute.xlu1 %2922 }
 0x3a3   :  { %3092 = vst.msk [vmem:[#allocation3 + $0xb8] sm:$0xff] %vm3068_vm9, %v2923_v55  ;;  %v2921_v28 = vpop.permute.xlu0 %2920 }
 0x3a4   :  { %3091 = vst.msk [vmem:[#allocation3 + $0xb0] sm:$0xff] %vm3068_vm9, %v2921_v28  ;;  %3295 = vrot.lane.b32.xlu1 %v3150_v45, %s9334_s20  ;;  %v3182_v45 = vld [vmem:[#allocation2 + $0x2a9] sm:$0xff] }
 0x3a5   :  { %3293 = vrot.lane.b32.xlu0 %v3149_v63, %s9334_s20  ;;  %v3181_v63 = vld [vmem:[#allocation2 + $0x2a1] sm:$0xff] }
 0x3a6   :  { %v2927_v20 = vpop.permute.xlu1 %2926 }
 0x3a7   :  { %3094 = vst.msk [vmem:[#allocation3 + $0xc8] sm:$0xff] %vm3068_vm9, %v2927_v20  ;;  %v2925_v57 = vpop.permute.xlu0 %2924 }
 0x3a8   :  { %3093 = vst.msk [vmem:[#allocation3 + $0xc0] sm:$0xff] %vm3068_vm9, %v2925_v57  ;;  %3299 = vrot.lane.b32.xlu1 %v3152_v34, %s9334_s20  ;;  %v3184_v34 = vld [vmem:[#allocation2 + $0x2c1] sm:$0xff] }
 0x3a9   :  { %3297 = vrot.lane.b32.xlu0 %v3151_v6, %s9334_s20  ;;  %v3183_v6 = vld [vmem:[#allocation2 + $0x2b9] sm:$0xff] }
 0x3aa   :  { %v2931_v12 = vpop.permute.xlu1 %2930 }
 0x3ab   :  { %3096 = vst.msk [vmem:[#allocation3 + $0xd8] sm:$0xff] %vm3068_vm9, %v2931_v12  ;;  %v2929_v13 = vpop.permute.xlu0 %2928 }
 0x3ac   :  { %3095 = vst.msk [vmem:[#allocation3 + $0xd0] sm:$0xff] %vm3068_vm9, %v2929_v13  ;;  %3303 = vrot.lane.b32.xlu1 %v3154_v14, %s9334_s20  ;;  %v3186_v14 = vld [vmem:[#allocation2 + $0x2d9] sm:$0xff] }
 0x3ad   :  { %3301 = vrot.lane.b32.xlu0 %v3153_v26, %s9334_s20  ;;  %v3185_v26 = vld [vmem:[#allocation2 + $0x2d1] sm:$0xff] }
 0x3ae   :  { %v2935_v11 = vpop.permute.xlu1 %2934 }
 0x3af   :  { %3098 = vst.msk [vmem:[#allocation3 + $0xe8] sm:$0xff] %vm3068_vm9, %v2935_v11  ;;  %v2933_v15 = vpop.permute.xlu0 %2932 }
 0x3b0   :  { %3097 = vst.msk [vmem:[#allocation3 + $0xe0] sm:$0xff] %vm3068_vm9, %v2933_v15  ;;  %3307 = vrot.lane.b32.xlu1 %v3156_v8, %s9334_s20  ;;  %v3188_v8 = vld [vmem:[#allocation2 + $0x2f1] sm:$0xff] }
 0x3b1   :  { %3305 = vrot.lane.b32.xlu0 %v3155_v46, %s9334_s20  ;;  %v3187_v46 = vld [vmem:[#allocation2 + $0x2e9] sm:$0xff] }
 0x3b2   :  { %v2939_v21 = vpop.permute.xlu1 %2938 }
 0x3b3   :  { %3100 = vst.msk [vmem:[#allocation3 + $0xf8] sm:$0xff] %vm3068_vm9, %v2939_v21  ;;  %v2937_v50 = vpop.permute.xlu0 %2936 }
 0x3b4   :  { %3099 = vst.msk [vmem:[#allocation3 + $0xf0] sm:$0xff] %vm3068_vm9, %v2937_v50  ;;  %3311 = vrot.lane.b32.xlu1 %v3158_v31, %s9334_s20  ;;  %v3190_v31 = vld [vmem:[#allocation2 + $0x309] sm:$0xff] }
 0x3b5   :  { %3309 = vrot.lane.b32.xlu0 %v3157_v62, %s9334_s20  ;;  %v3189_v62 = vld [vmem:[#allocation2 + $0x301] sm:$0xff] }
 0x3b6   :  { %v2943_v44 = vpop.permute.xlu1 %2942 }
 0x3b7   :  { %3102 = vst.msk [vmem:[#allocation3 + $0x108] sm:$0xff] %vm3068_vm9, %v2943_v44  ;;  %v2941_v33 = vpop.permute.xlu0 %2940  ;;  %v3971_v44 = vld [vmem:[%s14566_s1 + $0x20] sm:$0xf] }
 0x3b8   :  { %3101 = vst.msk [vmem:[#allocation3 + $0x100] sm:$0xff] %vm3068_vm9, %v2941_v33  ;;  %3315 = vrot.lane.b32.xlu1 %v3160_v5, %s9334_s20  ;;  %9174 = vmatprep.subr.msk.mxu0 %vm4165_vm11, %v3971_v44 }
 0x3b9   :  { %3313 = vrot.lane.b32.xlu0 %v3159_v0, %s9334_s20  ;;  %v3192_v0 = vld [vmem:[#allocation2 + $0x321] sm:$0xff]  ;;  %9175 = vmatpush3.msk.msra.mxu0 %vm4165_vm11, %v3971_v44 }
 0x3ba   :  { %v2947_v22 = vpop.permute.xlu1 %2946  ;;  %v3540_v44 = vld [vmem:[#allocation2 + $0x13a] sm:$0xff] }
 0x3bb   :  { %3104 = vst.msk [vmem:[#allocation3 + $0x118] sm:$0xff] %vm3068_vm9, %v2947_v22  ;;  %v2945_v52 = vpop.permute.xlu0 %2944  ;;  %v3191_v22 = vld [vmem:[#allocation2 + $0x319] sm:$0xff] }
 0x3bc   :  { %3103 = vst.msk [vmem:[#allocation3 + $0x110] sm:$0xff] %vm3068_vm9, %v2945_v52  ;;  %3319 = vrot.lane.b32.xlu1 %v3162_v51, %s9334_s20  ;;  %v3970_v52 = vld [vmem:[%s14566_s1 + $0x18] sm:$0xff]  ;;  %v3969_v51 = vld [vmem:[%s14566_s1 + $0x10] sm:$0xff] }
 0x3bd   :  { %3317 = vrot.lane.b32.xlu0 %v3161_v56, %s9334_s20  ;;  %9176 = vmatprep.subr.mxu0 %v3970_v52 }
 0x3be   :  { %v2951_v3 = vpop.permute.xlu1 %2950  ;;  %9177 = vmatpush3.msra.mxu0 %v3970_v52 }
 0x3bf   :  { %3106 = vst.msk [vmem:[#allocation3 + $0x128] sm:$0xff] %vm3068_vm9, %v2951_v3  ;;  %v2949_v39 = vpop.permute.xlu0 %2948  ;;  %v3194_v3 = vld [vmem:[#allocation2 + $0x339] sm:$0xff]  ;;  %9178 = vmatprep.subr.mxu0 %v3969_v51 }
 0x3c0   :  { %3105 = vst.msk [vmem:[#allocation3 + $0x120] sm:$0xff] %vm3068_vm9, %v2949_v39  ;;  %3323 = vrot.lane.b32.xlu1 %v3164_v49, %s9334_s20  ;;  %9179 = vmatpush3.msra.mxu0 %v3969_v51  ;;  %v3968_v39 = vld [vmem:[%s14566_s1 + $0x8] sm:$0xff] }
 0x3c1   :  { %3321 = vrot.lane.b32.xlu0 %v3163_v4, %s9334_s20  ;;  %v3193_v4 = vld [vmem:[#allocation2 + $0x331] sm:$0xff]  ;;  %9180 = vmatprep.subr.mxu0 %v3968_v39 }
 0x3c2   :  { %v2955_v16 = vpop.permute.xlu1 %2954  ;;  %9181 = vmatpush3.msra.mxu0 %v3968_v39  ;;  %v3547_v39 = vld [vmem:[#allocation2 + $0x18a] sm:$0xff] }
 0x3c3   :  { %3108 = vst.msk [vmem:[#allocation3 + $0x138] sm:$0xff] %vm3068_vm9, %v2955_v16  ;;  %v2953_v7 = vpop.permute.xlu0 %2952  ;;  %v3196_v16 = vld [vmem:[#allocation2 + $0x351] sm:$0xff] }
 0x3c4   :  { %3107 = vst.msk [vmem:[#allocation3 + $0x130] sm:$0xff] %vm3068_vm9, %v2953_v7  ;;  %3327 = vrot.lane.b32.xlu1 %v3166_v17, %s9334_s20  ;;  %v3967_v7 = vld [vmem:[%s14566_s1] sm:$0xff]  ;;  %s9335_s1 = smov 32  }
 0x3c5   :  { %3325 = vrot.lane.b32.xlu0 %v3165_v23, %s9334_s20  ;;  %v3195_v23 = vld [vmem:[#allocation2 + $0x349] sm:$0xff]  ;;  %9182 = vmatprep.subr.mxu0 %v3967_v7 }
 0x3c6   :  { %v2959_v24 = vpop.permute.xlu1 %2958  ;;  %9183 = vmatpush3.msra.mxu0 %v3967_v7  ;;  %v3549_v7 = vld [vmem:[#allocation2 + $0x1a2] sm:$0xff] }
 0x3c7   :  { %3110 = vst.msk [vmem:[#allocation3 + $0x148] sm:$0xff] %vm3068_vm9, %v2959_v24  ;;  %v2957_v18 = vpop.permute.xlu0 %2956 }
 0x3c8   :  { %3109 = vst.msk [vmem:[#allocation3 + $0x140] sm:$0xff] %vm3068_vm9, %v2957_v18  ;;  %3331 = vrot.lane.b32.xlu1 %v3168_v29, %s9334_s20 }
 0x3c9   :  { %3329 = vrot.lane.b32.xlu0 %v3167_v32, %s9334_s20  ;;  %v3519_v32 = vld [vmem:[#allocation2 + $0x3a] sm:$0xff] }
 0x3ca   :  { %v2963_v35 = vpop.permute.xlu1 %2962 }
 0x3cb   :  { %3112 = vst.msk [vmem:[#allocation3 + $0x158] sm:$0xff] %vm3068_vm9, %v2963_v35  ;;  %v2961_v30 = vpop.permute.xlu0 %2960  ;;  %v3518_v35 = vld [vmem:[#allocation2 + $0x32] sm:$0xff] }
 0x3cc   :  { %3111 = vst.msk [vmem:[#allocation3 + $0x150] sm:$0xff] %vm3068_vm9, %v2961_v30  ;;  %3335 = vrot.lane.b32.xlu1 %v3170_v41, %s9334_s20 }
 0x3cd   :  { %3333 = vrot.lane.b32.xlu0 %v3169_v36, %s9334_s20  ;;  %v3521_v36 = vld [vmem:[#allocation2 + $0x52] sm:$0xff] }
 0x3ce   :  { %v2967_v47 = vpop.permute.xlu1 %2966 }
 0x3cf   :  { %3114 = vst.msk [vmem:[#allocation3 + $0x168] sm:$0xff] %vm3068_vm9, %v2967_v47  ;;  %v2965_v42 = vpop.permute.xlu0 %2964  ;;  %v3520_v47 = vld [vmem:[#allocation2 + $0x4a] sm:$0xff] }
 0x3d0   :  { %3113 = vst.msk [vmem:[#allocation3 + $0x160] sm:$0xff] %vm3068_vm9, %v2965_v42  ;;  %3339 = vrot.lane.b32.xlu1 %v3172_v53, %s9334_s20 }
 0x3d1   :  { %3337 = vrot.lane.b32.xlu0 %v3171_v48, %s9334_s20  ;;  %v3523_v48 = vld [vmem:[#allocation2 + $0x6a] sm:$0xff] }
 0x3d2   :  { %v2971_v59 = vpop.permute.xlu1 %2970 }
 0x3d3   :  { %3116 = vst.msk [vmem:[#allocation3 + $0x178] sm:$0xff] %vm3068_vm9, %v2971_v59  ;;  %v2969_v54 = vpop.permute.xlu0 %2968  ;;  %v3522_v59 = vld [vmem:[#allocation2 + $0x62] sm:$0xff] }
 0x3d4   :  { %3115 = vst.msk [vmem:[#allocation3 + $0x170] sm:$0xff] %vm3068_vm9, %v2969_v54  ;;  %3343 = vrot.lane.b32.xlu1 %v3174_v1, %s9334_s20 }
 0x3d5   :  { %3341 = vrot.lane.b32.xlu0 %v3173_v60, %s9334_s20  ;;  %v3525_v60 = vld [vmem:[#allocation2 + $0x82] sm:$0xff] }
 0x3d6   :  { %v2975_v9 = vpop.permute.xlu1 %2974 }
 0x3d7   :  { %3118 = vst.msk [vmem:[#allocation3 + $0x188] sm:$0xff] %vm3068_vm9, %v2975_v9  ;;  %v2973_v2 = vpop.permute.xlu0 %2972  ;;  %v3524_v9 = vld [vmem:[#allocation2 + $0x7a] sm:$0xff] }
 0x3d8   :  { %3117 = vst.msk [vmem:[#allocation3 + $0x180] sm:$0xff] %vm3068_vm9, %v2973_v2  ;;  %3347 = vrot.lane.b32.xlu1 %v3176_v19, %s9334_s20 }
 0x3d9   :  { %3345 = vrot.lane.b32.xlu0 %v3175_v10, %s9334_s20  ;;  %v3527_v10 = vld [vmem:[#allocation2 + $0x9a] sm:$0xff] }
 0x3da   :  { %v2979_v27 = vpop.permute.xlu1 %2978 }
 0x3db   :  { %3120 = vst.msk [vmem:[#allocation3 + $0x198] sm:$0xff] %vm3068_vm9, %v2979_v27  ;;  %v2977_v61 = vpop.permute.xlu0 %2976  ;;  %v3526_v27 = vld [vmem:[#allocation2 + $0x92] sm:$0xff] }
 0x3dc   :  { %3119 = vst.msk [vmem:[#allocation3 + $0x190] sm:$0xff] %vm3068_vm9, %v2977_v61  ;;  %3351 = vrot.lane.b32.xlu1 %v3178_v25, %s9334_s20 }
 0x3dd   :  { %3349 = vrot.lane.b32.xlu0 %v3177_v38, %s9334_s20  ;;  %v3529_v38 = vld [vmem:[#allocation2 + $0xb2] sm:$0xff] }
 0x3de   :  { %v2983_v58 = vpop.permute.xlu1 %2982 }
 0x3df   :  { %3122 = vst.msk [vmem:[#allocation3 + $0x1a8] sm:$0xff] %vm3068_vm9, %v2983_v58  ;;  %v2981_v43 = vpop.permute.xlu0 %2980  ;;  %v3528_v58 = vld [vmem:[#allocation2 + $0xaa] sm:$0xff] }
 0x3e0   :  { %3121 = vst.msk [vmem:[#allocation3 + $0x1a0] sm:$0xff] %vm3068_vm9, %v2981_v43  ;;  %3355 = vrot.lane.b32.xlu1 %v3180_v40, %s9334_s20 }
 0x3e1   :  { %3353 = vrot.lane.b32.xlu0 %v3179_v37, %s9334_s20  ;;  %v3531_v37 = vld [vmem:[#allocation2 + $0xca] sm:$0xff] }
 0x3e2   :  { %v2987_v55 = vpop.permute.xlu1 %2986 }
 0x3e3   :  { %3124 = vst.msk [vmem:[#allocation3 + $0x1b8] sm:$0xff] %vm3068_vm9, %v2987_v55  ;;  %v2985_v28 = vpop.permute.xlu0 %2984  ;;  %v3530_v55 = vld [vmem:[#allocation2 + $0xc2] sm:$0xff] }
 0x3e4   :  { %3123 = vst.msk [vmem:[#allocation3 + $0x1b0] sm:$0xff] %vm3068_vm9, %v2985_v28  ;;  %3359 = vrot.lane.b32.xlu1 %v3182_v45, %s9334_s20 }
 0x3e5   :  { %3357 = vrot.lane.b32.xlu0 %v3181_v63, %s9334_s20  ;;  %v3533_v63 = vld [vmem:[#allocation2 + $0xe2] sm:$0xff] }
 0x3e6   :  { %v2991_v20 = vpop.permute.xlu1 %2990 }
 0x3e7   :  { %3126 = vst.msk [vmem:[#allocation3 + $0x1c8] sm:$0xff] %vm3068_vm9, %v2991_v20  ;;  %v2989_v57 = vpop.permute.xlu0 %2988  ;;  %v3532_v20 = vld [vmem:[#allocation2 + $0xda] sm:$0xff] }
 0x3e8   :  { %3125 = vst.msk [vmem:[#allocation3 + $0x1c0] sm:$0xff] %vm3068_vm9, %v2989_v57  ;;  %3363 = vrot.lane.b32.xlu1 %v3184_v34, %s9334_s20 }
 0x3e9   :  { %3361 = vrot.lane.b32.xlu0 %v3183_v6, %s9334_s20  ;;  %v3535_v6 = vld [vmem:[#allocation2 + $0xfa] sm:$0xff] }
 0x3ea   :  { %v2995_v12 = vpop.permute.xlu1 %2994 }
 0x3eb   :  { %3128 = vst.msk [vmem:[#allocation3 + $0x1d8] sm:$0xff] %vm3068_vm9, %v2995_v12  ;;  %v2993_v13 = vpop.permute.xlu0 %2992  ;;  %v3534_v12 = vld [vmem:[#allocation2 + $0xf2] sm:$0xff] }
 0x3ec   :  { %3127 = vst.msk [vmem:[#allocation3 + $0x1d0] sm:$0xff] %vm3068_vm9, %v2993_v13  ;;  %3367 = vrot.lane.b32.xlu1 %v3186_v14, %s9334_s20 }
 0x3ed   :  { %3365 = vrot.lane.b32.xlu0 %v3185_v26, %s9334_s20  ;;  %v3537_v26 = vld [vmem:[#allocation2 + $0x112] sm:$0xff] }
 0x3ee   :  { %v2999_v11 = vpop.permute.xlu1 %2998 }
 0x3ef   :  { %3130 = vst.msk [vmem:[#allocation3 + $0x1e8] sm:$0xff] %vm3068_vm9, %v2999_v11  ;;  %v2997_v15 = vpop.permute.xlu0 %2996  ;;  %v3536_v11 = vld [vmem:[#allocation2 + $0x10a] sm:$0xff] }
 0x3f0   :  { %3129 = vst.msk [vmem:[#allocation3 + $0x1e0] sm:$0xff] %vm3068_vm9, %v2997_v15  ;;  %3371 = vrot.lane.b32.xlu1 %v3188_v8, %s9334_s20 }
 0x3f1   :  { %3369 = vrot.lane.b32.xlu0 %v3187_v46, %s9334_s20  ;;  %v3539_v46 = vld [vmem:[#allocation2 + $0x12a] sm:$0xff] }
 0x3f2   :  { %v3003_v21 = vpop.permute.xlu1 %3002 }
 0x3f3   :  { %3132 = vst.msk [vmem:[#allocation3 + $0x1f8] sm:$0xff] %vm3068_vm9, %v3003_v21  ;;  %v3001_v50 = vpop.permute.xlu0 %3000  ;;  %v3538_v21 = vld [vmem:[#allocation2 + $0x122] sm:$0xff] }
 0x3f4   :  { %3131 = vst.msk [vmem:[#allocation3 + $0x1f0] sm:$0xff] %vm3068_vm9, %v3001_v50  ;;  %3375 = vrot.lane.b32.xlu1 %v3190_v31, %s9334_s20 }
 0x3f5   :  { %3373 = vrot.lane.b32.xlu0 %v3189_v62, %s9334_s20  ;;  %v3541_v62 = vld [vmem:[#allocation2 + $0x142] sm:$0xff] }
 0x3f6   :  { %v3264_v33 = vpop.permute.xlu1 %3263 }
 0x3f7   :  { %3455 = vst.msk [vmem:[#allocation3 + $0x8] sm:$0xff] %vm3453_vm10, %v3264_v33  ;;  %v3262_v5 = vpop.permute.xlu0 %3261 }
 0x3f8   :  { %3454 = vst.msk [vmem:[#allocation3] sm:$0xff] %vm3453_vm10, %v3262_v5  ;;  %3379 = vrot.lane.b32.xlu1 %v3192_v0, %s9334_s20  ;;  %v3543_v0 = vld [vmem:[#allocation2 + $0x15a] sm:$0xff] }
 0x3f9   :  { %3377 = vrot.lane.b32.xlu0 %v3191_v22, %s9334_s20  ;;  %v3542_v22 = vld [vmem:[#allocation2 + $0x152] sm:$0xff] }
 0x3fa   :  { %v3268_v56 = vpop.permute.xlu1 %3267 }
 0x3fb   :  { %3457 = vst.msk [vmem:[#allocation3 + $0x18] sm:$0xff] %vm3453_vm10, %v3268_v56  ;;  %v3266_v49 = vpop.permute.xlu0 %3265  ;;  %v3545_v56 = vld [vmem:[#allocation2 + $0x172] sm:$0xff] }
 0x3fc   :  { %3456 = vst.msk [vmem:[#allocation3 + $0x10] sm:$0xff] %vm3453_vm10, %v3266_v49  ;;  %3383 = vrot.lane.b32.xlu1 %v3194_v3, %s9334_s20  ;;  %v3544_v49 = vld [vmem:[#allocation2 + $0x16a] sm:$0xff] }
 0x3fd   :  { %3381 = vrot.lane.b32.xlu0 %v3193_v4, %s9334_s20 }
 0x3fe   :  { %v3272_v17 = vpop.permute.xlu1 %3271 }
 0x3ff   :  { %3459 = vst.msk [vmem:[#allocation3 + $0x28] sm:$0xff] %vm3453_vm10, %v3272_v17  ;;  %v3270_v24 = vpop.permute.xlu0 %3269 }
 0x400   :  { %3458 = vst.msk [vmem:[#allocation3 + $0x20] sm:$0xff] %vm3453_vm10, %v3270_v24  ;;  %3387 = vrot.lane.b32.xlu1 %v3196_v16, %s9334_s20  ;;  %v3546_v16 = vld [vmem:[#allocation2 + $0x182] sm:$0xff] }
 0x401   :  { %3385 = vrot.lane.b32.xlu0 %v3195_v23, %s9334_s20  ;;  %v3548_v23 = vld [vmem:[#allocation2 + $0x19a] sm:$0xff] }
 0x402   :  { %v3276_v18 = vpop.permute.xlu1 %3275 }
 0x403   :  { %3461 = vst.msk [vmem:[#allocation3 + $0x38] sm:$0xff] %vm3453_vm10, %v3276_v18  ;;  %v3274_v29 = vpop.permute.xlu0 %3273 }
 0x404   :  { %3460 = vst.msk [vmem:[#allocation3 + $0x30] sm:$0xff] %vm3453_vm10, %v3274_v29  ;;  %3648 = vrot.lane.b32.xlu1 %v3519_v32, %s9335_s1  ;;  %v3551_v32 = vld [vmem:[#allocation2 + $0x1ea] sm:$0xff] }
 0x405   :  { %3646 = vrot.lane.b32.xlu0 %v3518_v35, %s9335_s1  ;;  %v3550_v35 = vld [vmem:[#allocation2 + $0x1e2] sm:$0xff] }
 0x406   :  { %v3280_v30 = vpop.permute.xlu1 %3279 }
 0x407   :  { %3463 = vst.msk [vmem:[#allocation3 + $0x48] sm:$0xff] %vm3453_vm10, %v3280_v30  ;;  %v3278_v41 = vpop.permute.xlu0 %3277 }
 0x408   :  { %3462 = vst.msk [vmem:[#allocation3 + $0x40] sm:$0xff] %vm3453_vm10, %v3278_v41  ;;  %3652 = vrot.lane.b32.xlu1 %v3521_v36, %s9335_s1  ;;  %v3553_v36 = vld [vmem:[#allocation2 + $0x202] sm:$0xff] }
 0x409   :  { %3650 = vrot.lane.b32.xlu0 %v3520_v47, %s9335_s1  ;;  %v3552_v47 = vld [vmem:[#allocation2 + $0x1fa] sm:$0xff] }
 0x40a   :  { %v3284_v42 = vpop.permute.xlu1 %3283 }
 0x40b   :  { %3465 = vst.msk [vmem:[#allocation3 + $0x58] sm:$0xff] %vm3453_vm10, %v3284_v42  ;;  %v3282_v53 = vpop.permute.xlu0 %3281 }
 0x40c   :  { %3464 = vst.msk [vmem:[#allocation3 + $0x50] sm:$0xff] %vm3453_vm10, %v3282_v53  ;;  %3656 = vrot.lane.b32.xlu1 %v3523_v48, %s9335_s1  ;;  %v3555_v48 = vld [vmem:[#allocation2 + $0x21a] sm:$0xff] }
 0x40d   :  { %3654 = vrot.lane.b32.xlu0 %v3522_v59, %s9335_s1  ;;  %v3554_v59 = vld [vmem:[#allocation2 + $0x212] sm:$0xff] }
 0x40e   :  { %v3288_v54 = vpop.permute.xlu1 %3287 }
 0x40f   :  { %3467 = vst.msk [vmem:[#allocation3 + $0x68] sm:$0xff] %vm3453_vm10, %v3288_v54  ;;  %v3286_v1 = vpop.permute.xlu0 %3285 }
 0x410   :  { %3466 = vst.msk [vmem:[#allocation3 + $0x60] sm:$0xff] %vm3453_vm10, %v3286_v1  ;;  %3660 = vrot.lane.b32.xlu1 %v3525_v60, %s9335_s1  ;;  %v3557_v60 = vld [vmem:[#allocation2 + $0x232] sm:$0xff] }
 0x411   :  { %3658 = vrot.lane.b32.xlu0 %v3524_v9, %s9335_s1  ;;  %v3556_v9 = vld [vmem:[#allocation2 + $0x22a] sm:$0xff] }
 0x412   :  { %v3292_v2 = vpop.permute.xlu1 %3291 }
 0x413   :  { %3469 = vst.msk [vmem:[#allocation3 + $0x78] sm:$0xff] %vm3453_vm10, %v3292_v2  ;;  %v3290_v19 = vpop.permute.xlu0 %3289 }
 0x414   :  { %3468 = vst.msk [vmem:[#allocation3 + $0x70] sm:$0xff] %vm3453_vm10, %v3290_v19  ;;  %3664 = vrot.lane.b32.xlu1 %v3527_v10, %s9335_s1  ;;  %v3559_v10 = vld [vmem:[#allocation2 + $0x24a] sm:$0xff] }
 0x415   :  { %3662 = vrot.lane.b32.xlu0 %v3526_v27, %s9335_s1  ;;  %v3558_v27 = vld [vmem:[#allocation2 + $0x242] sm:$0xff] }
 0x416   :  { %v3296_v61 = vpop.permute.xlu1 %3295 }
 0x417   :  { %3471 = vst.msk [vmem:[#allocation3 + $0x88] sm:$0xff] %vm3453_vm10, %v3296_v61  ;;  %v3294_v25 = vpop.permute.xlu0 %3293 }
 0x418   :  { %3470 = vst.msk [vmem:[#allocation3 + $0x80] sm:$0xff] %vm3453_vm10, %v3294_v25  ;;  %3668 = vrot.lane.b32.xlu1 %v3529_v38, %s9335_s1  ;;  %v3561_v38 = vld [vmem:[#allocation2 + $0x262] sm:$0xff] }
 0x419   :  { %3666 = vrot.lane.b32.xlu0 %v3528_v58, %s9335_s1  ;;  %v3560_v58 = vld [vmem:[#allocation2 + $0x25a] sm:$0xff] }
 0x41a   :  { %v3300_v43 = vpop.permute.xlu1 %3299 }
 0x41b   :  { %3473 = vst.msk [vmem:[#allocation3 + $0x98] sm:$0xff] %vm3453_vm10, %v3300_v43  ;;  %v3298_v40 = vpop.permute.xlu0 %3297 }
 0x41c   :  { %3472 = vst.msk [vmem:[#allocation3 + $0x90] sm:$0xff] %vm3453_vm10, %v3298_v40  ;;  %3672 = vrot.lane.b32.xlu1 %v3531_v37, %s9335_s1  ;;  %v3563_v37 = vld [vmem:[#allocation2 + $0x27a] sm:$0xff] }
 0x41d   :  { %3670 = vrot.lane.b32.xlu0 %v3530_v55, %s9335_s1  ;;  %v3562_v55 = vld [vmem:[#allocation2 + $0x272] sm:$0xff] }
 0x41e   :  { %v3304_v28 = vpop.permute.xlu1 %3303 }
 0x41f   :  { %3475 = vst.msk [vmem:[#allocation3 + $0xa8] sm:$0xff] %vm3453_vm10, %v3304_v28  ;;  %v3302_v45 = vpop.permute.xlu0 %3301 }
 0x420   :  { %3474 = vst.msk [vmem:[#allocation3 + $0xa0] sm:$0xff] %vm3453_vm10, %v3302_v45  ;;  %3676 = vrot.lane.b32.xlu1 %v3533_v63, %s9335_s1  ;;  %v3565_v63 = vld [vmem:[#allocation2 + $0x292] sm:$0xff] }
 0x421   :  { %3674 = vrot.lane.b32.xlu0 %v3532_v20, %s9335_s1  ;;  %v3564_v20 = vld [vmem:[#allocation2 + $0x28a] sm:$0xff] }
 0x422   :  { %v3308_v57 = vpop.permute.xlu1 %3307 }
 0x423   :  { %3477 = vst.msk [vmem:[#allocation3 + $0xb8] sm:$0xff] %vm3453_vm10, %v3308_v57  ;;  %v3306_v34 = vpop.permute.xlu0 %3305 }
 0x424   :  { %3476 = vst.msk [vmem:[#allocation3 + $0xb0] sm:$0xff] %vm3453_vm10, %v3306_v34  ;;  %3680 = vrot.lane.b32.xlu1 %v3535_v6, %s9335_s1  ;;  %v3567_v6 = vld [vmem:[#allocation2 + $0x2aa] sm:$0xff] }
 0x425   :  { %3678 = vrot.lane.b32.xlu0 %v3534_v12, %s9335_s1  ;;  %v3566_v12 = vld [vmem:[#allocation2 + $0x2a2] sm:$0xff] }
 0x426   :  { %v3312_v13 = vpop.permute.xlu1 %3311 }
 0x427   :  { %3479 = vst.msk [vmem:[#allocation3 + $0xc8] sm:$0xff] %vm3453_vm10, %v3312_v13  ;;  %v3310_v14 = vpop.permute.xlu0 %3309 }
 0x428   :  { %3478 = vst.msk [vmem:[#allocation3 + $0xc0] sm:$0xff] %vm3453_vm10, %v3310_v14  ;;  %3684 = vrot.lane.b32.xlu1 %v3537_v26, %s9335_s1  ;;  %v3569_v26 = vld [vmem:[#allocation2 + $0x2c2] sm:$0xff] }
 0x429   :  { %3682 = vrot.lane.b32.xlu0 %v3536_v11, %s9335_s1  ;;  %v3568_v11 = vld [vmem:[#allocation2 + $0x2ba] sm:$0xff] }
 0x42a   :  { %v3316_v15 = vpop.permute.xlu1 %3315 }
 0x42b   :  { %3481 = vst.msk [vmem:[#allocation3 + $0xd8] sm:$0xff] %vm3453_vm10, %v3316_v15  ;;  %v3314_v8 = vpop.permute.xlu0 %3313 }
 0x42c   :  { %3480 = vst.msk [vmem:[#allocation3 + $0xd0] sm:$0xff] %vm3453_vm10, %v3314_v8  ;;  %3688 = vrot.lane.b32.xlu1 %v3539_v46, %s9335_s1  ;;  %v3571_v46 = vld [vmem:[#allocation2 + $0x2da] sm:$0xff] }
 0x42d   :  { %3686 = vrot.lane.b32.xlu0 %v3538_v21, %s9335_s1  ;;  %v3570_v21 = vld [vmem:[#allocation2 + $0x2d2] sm:$0xff] }
 0x42e   :  { %v3320_v50 = vpop.permute.xlu1 %3319 }
 0x42f   :  { %3483 = vst.msk [vmem:[#allocation3 + $0xe8] sm:$0xff] %vm3453_vm10, %v3320_v50  ;;  %v3318_v31 = vpop.permute.xlu0 %3317 }
 0x430   :  { %3482 = vst.msk [vmem:[#allocation3 + $0xe0] sm:$0xff] %vm3453_vm10, %v3318_v31  ;;  %3692 = vrot.lane.b32.xlu1 %v3541_v62, %s9335_s1  ;;  %v3573_v62 = vld [vmem:[#allocation2 + $0x2f2] sm:$0xff] }
 0x431   :  { %3690 = vrot.lane.b32.xlu0 %v3540_v44, %s9335_s1  ;;  %v3572_v44 = vld [vmem:[#allocation2 + $0x2ea] sm:$0xff] }
 0x432   :  { %v3324_v33 = vpop.permute.xlu1 %3323 }
 0x433   :  { %3485 = vst.msk [vmem:[#allocation3 + $0xf8] sm:$0xff] %vm3453_vm10, %v3324_v33  ;;  %v3322_v5 = vpop.permute.xlu0 %3321 }
 0x434   :  { %3484 = vst.msk [vmem:[#allocation3 + $0xf0] sm:$0xff] %vm3453_vm10, %v3322_v5  ;;  %3696 = vrot.lane.b32.xlu1 %v3543_v0, %s9335_s1  ;;  %v3575_v0 = vld [vmem:[#allocation2 + $0x30a] sm:$0xff] }
 0x435   :  { %3694 = vrot.lane.b32.xlu0 %v3542_v22, %s9335_s1  ;;  %v3574_v22 = vld [vmem:[#allocation2 + $0x302] sm:$0xff] }
 0x436   :  { %v3328_v52 = vpop.permute.xlu1 %3327 }
 0x437   :  { %3487 = vst.msk [vmem:[#allocation3 + $0x108] sm:$0xff] %vm3453_vm10, %v3328_v52  ;;  %v3326_v51 = vpop.permute.xlu0 %3325 }
 0x438   :  { %3486 = vst.msk [vmem:[#allocation3 + $0x100] sm:$0xff] %vm3453_vm10, %v3326_v51  ;;  %3700 = vrot.lane.b32.xlu1 %v3545_v56, %s9335_s1  ;;  %v3577_v56 = vld [vmem:[#allocation2 + $0x322] sm:$0xff] }
 0x439   :  { %3698 = vrot.lane.b32.xlu0 %v3544_v49, %s9335_s1  ;;  %v3576_v49 = vld [vmem:[#allocation2 + $0x31a] sm:$0xff] }
 0x43a   :  { %v3332_v3 = vpop.permute.xlu1 %3331 }
 0x43b   :  { %3489 = vst.msk [vmem:[#allocation3 + $0x118] sm:$0xff] %vm3453_vm10, %v3332_v3  ;;  %v3330_v4 = vpop.permute.xlu0 %3329 }
 0x43c   :  { %3488 = vst.msk [vmem:[#allocation3 + $0x110] sm:$0xff] %vm3453_vm10, %v3330_v4  ;;  %3704 = vrot.lane.b32.xlu1 %v3547_v39, %s9335_s1  ;;  %v3579_v39 = vld [vmem:[#allocation2 + $0x33a] sm:$0xff] }
 0x43d   :  { %3702 = vrot.lane.b32.xlu0 %v3546_v16, %s9335_s1  ;;  %v3578_v16 = vld [vmem:[#allocation2 + $0x332] sm:$0xff] }
 0x43e   :  { %v3336_v17 = vpop.permute.xlu1 %3335 }
 0x43f   :  { %3491 = vst.msk [vmem:[#allocation3 + $0x128] sm:$0xff] %vm3453_vm10, %v3336_v17  ;;  %v3334_v24 = vpop.permute.xlu0 %3333 }
 0x440   :  { %3490 = vst.msk [vmem:[#allocation3 + $0x120] sm:$0xff] %vm3453_vm10, %v3334_v24  ;;  %3708 = vrot.lane.b32.xlu1 %v3549_v7, %s9335_s1  ;;  %v3581_v7 = vld [vmem:[#allocation2 + $0x352] sm:$0xff] }
 0x441   :  { %3706 = vrot.lane.b32.xlu0 %v3548_v23, %s9335_s1  ;;  %v3580_v23 = vld [vmem:[#allocation2 + $0x34a] sm:$0xff] }
 0x442   :  { %v3340_v18 = vpop.permute.xlu1 %3339 }
 0x443   :  { %3493 = vst.msk [vmem:[#allocation3 + $0x138] sm:$0xff] %vm3453_vm10, %v3340_v18  ;;  %v3338_v29 = vpop.permute.xlu0 %3337 }
 0x444   :  { %3492 = vst.msk [vmem:[#allocation3 + $0x130] sm:$0xff] %vm3453_vm10, %v3338_v29  ;;  %3712 = vrot.lane.b32.xlu1 %v3551_v32, %s9335_s1 }
 0x445   :  { %3710 = vrot.lane.b32.xlu0 %v3550_v35, %s9335_s1 }
 0x446   :  { %v3344_v30 = vpop.permute.xlu1 %3343 }
 0x447   :  { %3495 = vst.msk [vmem:[#allocation3 + $0x148] sm:$0xff] %vm3453_vm10, %v3344_v30  ;;  %v3342_v41 = vpop.permute.xlu0 %3341 }
 0x448   :  { %3494 = vst.msk [vmem:[#allocation3 + $0x140] sm:$0xff] %vm3453_vm10, %v3342_v41  ;;  %3716 = vrot.lane.b32.xlu1 %v3553_v36, %s9335_s1 }
 0x449   :  { %3714 = vrot.lane.b32.xlu0 %v3552_v47, %s9335_s1 }
 0x44a   :  { %v3348_v42 = vpop.permute.xlu1 %3347 }
 0x44b   :  { %3497 = vst.msk [vmem:[#allocation3 + $0x158] sm:$0xff] %vm3453_vm10, %v3348_v42  ;;  %v3346_v53 = vpop.permute.xlu0 %3345 }
 0x44c   :  { %3496 = vst.msk [vmem:[#allocation3 + $0x150] sm:$0xff] %vm3453_vm10, %v3346_v53  ;;  %3720 = vrot.lane.b32.xlu1 %v3555_v48, %s9335_s1 }
 0x44d   :  { %3718 = vrot.lane.b32.xlu0 %v3554_v59, %s9335_s1 }
 0x44e   :  { %v3352_v54 = vpop.permute.xlu1 %3351 }
 0x44f   :  { %3499 = vst.msk [vmem:[#allocation3 + $0x168] sm:$0xff] %vm3453_vm10, %v3352_v54  ;;  %v3350_v1 = vpop.permute.xlu0 %3349 }
 0x450   :  { %3498 = vst.msk [vmem:[#allocation3 + $0x160] sm:$0xff] %vm3453_vm10, %v3350_v1  ;;  %3724 = vrot.lane.b32.xlu1 %v3557_v60, %s9335_s1 }
 0x451   :  { %3722 = vrot.lane.b32.xlu0 %v3556_v9, %s9335_s1 }
 0x452   :  { %v3356_v2 = vpop.permute.xlu1 %3355 }
 0x453   :  { %3501 = vst.msk [vmem:[#allocation3 + $0x178] sm:$0xff] %vm3453_vm10, %v3356_v2  ;;  %v3354_v19 = vpop.permute.xlu0 %3353 }
 0x454   :  { %3500 = vst.msk [vmem:[#allocation3 + $0x170] sm:$0xff] %vm3453_vm10, %v3354_v19  ;;  %3728 = vrot.lane.b32.xlu1 %v3559_v10, %s9335_s1 }
 0x455   :  { %3726 = vrot.lane.b32.xlu0 %v3558_v27, %s9335_s1 }
 0x456   :  { %v3360_v61 = vpop.permute.xlu1 %3359 }
 0x457   :  { %3503 = vst.msk [vmem:[#allocation3 + $0x188] sm:$0xff] %vm3453_vm10, %v3360_v61  ;;  %v3358_v25 = vpop.permute.xlu0 %3357 }
 0x458   :  { %3502 = vst.msk [vmem:[#allocation3 + $0x180] sm:$0xff] %vm3453_vm10, %v3358_v25  ;;  %3732 = vrot.lane.b32.xlu1 %v3561_v38, %s9335_s1 }
 0x459   :  { %3730 = vrot.lane.b32.xlu0 %v3560_v58, %s9335_s1 }
 0x45a   :  { %v3364_v43 = vpop.permute.xlu1 %3363 }
 0x45b   :  { %3505 = vst.msk [vmem:[#allocation3 + $0x198] sm:$0xff] %vm3453_vm10, %v3364_v43  ;;  %v3362_v40 = vpop.permute.xlu0 %3361 }
 0x45c   :  { %3504 = vst.msk [vmem:[#allocation3 + $0x190] sm:$0xff] %vm3453_vm10, %v3362_v40  ;;  %3736 = vrot.lane.b32.xlu1 %v3563_v37, %s9335_s1 }
 0x45d   :  { %3734 = vrot.lane.b32.xlu0 %v3562_v55, %s9335_s1 }
 0x45e   :  { %v3368_v28 = vpop.permute.xlu1 %3367 }
 0x45f   :  { %3507 = vst.msk [vmem:[#allocation3 + $0x1a8] sm:$0xff] %vm3453_vm10, %v3368_v28  ;;  %v3366_v45 = vpop.permute.xlu0 %3365 }
 0x460   :  { %3506 = vst.msk [vmem:[#allocation3 + $0x1a0] sm:$0xff] %vm3453_vm10, %v3366_v45  ;;  %3740 = vrot.lane.b32.xlu1 %v3565_v63, %s9335_s1 }
 0x461   :  { %3738 = vrot.lane.b32.xlu0 %v3564_v20, %s9335_s1 }
 0x462   :  { %v3372_v57 = vpop.permute.xlu1 %3371 }
 0x463   :  { %3509 = vst.msk [vmem:[#allocation3 + $0x1b8] sm:$0xff] %vm3453_vm10, %v3372_v57  ;;  %v3370_v34 = vpop.permute.xlu0 %3369 }
 0x464   :  { %3508 = vst.msk [vmem:[#allocation3 + $0x1b0] sm:$0xff] %vm3453_vm10, %v3370_v34  ;;  %3744 = vrot.lane.b32.xlu1 %v3567_v6, %s9335_s1 }
 0x465   :  { %3742 = vrot.lane.b32.xlu0 %v3566_v12, %s9335_s1 }
 0x466   :  { %v3376_v13 = vpop.permute.xlu1 %3375 }
 0x467   :  { %3511 = vst.msk [vmem:[#allocation3 + $0x1c8] sm:$0xff] %vm3453_vm10, %v3376_v13  ;;  %v3374_v14 = vpop.permute.xlu0 %3373 }
 0x468   :  { %3510 = vst.msk [vmem:[#allocation3 + $0x1c0] sm:$0xff] %vm3453_vm10, %v3374_v14  ;;  %3748 = vrot.lane.b32.xlu1 %v3569_v26, %s9335_s1 }
 0x469   :  { %3746 = vrot.lane.b32.xlu0 %v3568_v11, %s9335_s1 }
 0x46a   :  { %v3380_v15 = vpop.permute.xlu1 %3379 }
 0x46b   :  { %3513 = vst.msk [vmem:[#allocation3 + $0x1d8] sm:$0xff] %vm3453_vm10, %v3380_v15  ;;  %v3378_v8 = vpop.permute.xlu0 %3377 }
 0x46c   :  { %3512 = vst.msk [vmem:[#allocation3 + $0x1d0] sm:$0xff] %vm3453_vm10, %v3378_v8  ;;  %3752 = vrot.lane.b32.xlu1 %v3571_v46, %s9335_s1 }
 0x46d   :  { %3750 = vrot.lane.b32.xlu0 %v3570_v21, %s9335_s1 }
 0x46e   :  { %v3384_v50 = vpop.permute.xlu1 %3383 }
 0x46f   :  { %3515 = vst.msk [vmem:[#allocation3 + $0x1e8] sm:$0xff] %vm3453_vm10, %v3384_v50  ;;  %v3382_v31 = vpop.permute.xlu0 %3381 }
 0x470   :  { %3514 = vst.msk [vmem:[#allocation3 + $0x1e0] sm:$0xff] %vm3453_vm10, %v3382_v31  ;;  %3756 = vrot.lane.b32.xlu1 %v3573_v62, %s9335_s1 }
 0x471   :  { %3754 = vrot.lane.b32.xlu0 %v3572_v44, %s9335_s1 }
 0x472   :  { %v3388_v33 = vpop.permute.xlu1 %3387 }
 0x473   :  { %3517 = vst.msk [vmem:[#allocation3 + $0x1f8] sm:$0xff] %vm3453_vm10, %v3388_v33  ;;  %v3386_v5 = vpop.permute.xlu0 %3385 }
 0x474   :  { %3516 = vst.msk [vmem:[#allocation3 + $0x1f0] sm:$0xff] %vm3453_vm10, %v3386_v5  ;;  %3760 = vrot.lane.b32.xlu1 %v3575_v0, %s9335_s1 }
 0x475   :  { %3758 = vrot.lane.b32.xlu0 %v3574_v22, %s9335_s1 }
 0x476   :  { %v3649_v52 = vpop.permute.xlu1 %3648 }
 0x477   :  { %3840 = vst.msk [vmem:[#allocation3 + $0x8] sm:$0xff] %vm3838_vm12, %v3649_v52  ;;  %v3647_v51 = vpop.permute.xlu0 %3646 }
 0x478   :  { %3839 = vst.msk [vmem:[#allocation3] sm:$0xff] %vm3838_vm12, %v3647_v51  ;;  %3764 = vrot.lane.b32.xlu1 %v3577_v56, %s9335_s1 }
 0x479   :  { %3762 = vrot.lane.b32.xlu0 %v3576_v49, %s9335_s1 }
 0x47a   :  { %v3653_v3 = vpop.permute.xlu1 %3652 }
 0x47b   :  { %3842 = vst.msk [vmem:[#allocation3 + $0x18] sm:$0xff] %vm3838_vm12, %v3653_v3  ;;  %v3651_v4 = vpop.permute.xlu0 %3650 }
 0x47c   :  { %3841 = vst.msk [vmem:[#allocation3 + $0x10] sm:$0xff] %vm3838_vm12, %v3651_v4  ;;  %3768 = vrot.lane.b32.xlu1 %v3579_v39, %s9335_s1 }
 0x47d   :  { %3766 = vrot.lane.b32.xlu0 %v3578_v16, %s9335_s1 }
 0x47e   :  { %v3657_v17 = vpop.permute.xlu1 %3656  ;;  %v3904_v24 = vld [vmem:[#allocation3 + $0x8] sm:$0xff] }
 0x47f   :  { %3844 = vst.msk [vmem:[#allocation3 + $0x28] sm:$0xff] %vm3838_vm12, %v3657_v17  ;;  %v3655_v18 = vpop.permute.xlu0 %3654  ;;  %v3903_v29 = vld [vmem:[#allocation3] sm:$0xff] }
 0x480   :  { %3843 = vst.msk [vmem:[#allocation3 + $0x20] sm:$0xff] %vm3838_vm12, %v3655_v18  ;;  %9184 = vmatprep.mubr.msk.f32.mxu0 %vm3972_vm13, %v3903_v29  ;;  %3772 = vrot.lane.b32.xlu1 %v3581_v7, %s9335_s1 }
 0x481   :  { %3770 = vrot.lane.b32.xlu0 %v3580_v23, %s9335_s1  ;;  %9185 = vmatmul.mubr.msk.f32.vlgmr.msra.gmra.mxu0 %vm3972_vm13, %v3904_v24 }
 0x482   :  { %v3661_v32 = vpop.permute.xlu1 %3660  ;;  %v3906_v35 = vld [vmem:[#allocation3 + $0x18] sm:$0xff] }
 0x483   :  { %3846 = vst.msk [vmem:[#allocation3 + $0x38] sm:$0xff] %vm3838_vm12, %v3661_v32  ;;  %v3659_v30 = vpop.permute.xlu0 %3658  ;;  %v3905_v41 = vld [vmem:[#allocation3 + $0x10] sm:$0xff] }
 0x484   :  { %3845 = vst.msk [vmem:[#allocation3 + $0x30] sm:$0xff] %vm3838_vm12, %v3659_v30  ;;  %9187 = vmatprep.mubr.msk.f32.mxu0 %vm3972_vm13, %v3905_v41 }
 0x485   :  { %9188 = vmatmul.mubr.msk.f32.gmra.mxu0 %vm3972_vm13, %v3906_v35 }
 0x486   :  { %v3665_v36 = vpop.permute.xlu1 %3664  ;;  %v3908_v47 = vld [vmem:[#allocation3 + $0x28] sm:$0xff] }
 0x487   :  { %3848 = vst.msk [vmem:[#allocation3 + $0x48] sm:$0xff] %vm3838_vm12, %v3665_v36  ;;  %v3663_v42 = vpop.permute.xlu0 %3662  ;;  %v3907_v53 = vld [vmem:[#allocation3 + $0x20] sm:$0xff] }
 0x488   :  { %3847 = vst.msk [vmem:[#allocation3 + $0x40] sm:$0xff] %vm3838_vm12, %v3663_v42  ;;  %9190 = vmatprep.mubr.msk.f32.mxu0 %vm3972_vm13, %v3907_v53 }
 0x489   :  { %9191 = vmatmul.mubr.msk.f32.gmra.mxu0 %vm3972_vm13, %v3908_v47 }
 0x48a   :  { %v3669_v48 = vpop.permute.xlu1 %3668  ;;  %v3910_v59 = vld [vmem:[#allocation3 + $0x38] sm:$0xff] }
 0x48b   :  { %3850 = vst.msk [vmem:[#allocation3 + $0x58] sm:$0xff] %vm3838_vm12, %v3669_v48  ;;  %v3667_v54 = vpop.permute.xlu0 %3666  ;;  %v3909_v1 = vld [vmem:[#allocation3 + $0x30] sm:$0xff] }
 0x48c   :  { %3849 = vst.msk [vmem:[#allocation3 + $0x50] sm:$0xff] %vm3838_vm12, %v3667_v54  ;;  %9193 = vmatprep.mubr.msk.f32.mxu0 %vm3972_vm13, %v3909_v1 }
 0x48d   :  { %9194 = vmatmul.mubr.msk.f32.gmra.mxu0 %vm3972_vm13, %v3910_v59 }
 0x48e   :  { %v3673_v60 = vpop.permute.xlu1 %3672  ;;  %v3912_v9 = vld [vmem:[#allocation3 + $0x48] sm:$0xff] }
 0x48f   :  { %3852 = vst.msk [vmem:[#allocation3 + $0x68] sm:$0xff] %vm3838_vm12, %v3673_v60  ;;  %v3671_v2 = vpop.permute.xlu0 %3670  ;;  %v3911_v19 = vld [vmem:[#allocation3 + $0x40] sm:$0xff] }
 0x490   :  { %3851 = vst.msk [vmem:[#allocation3 + $0x60] sm:$0xff] %vm3838_vm12, %v3671_v2  ;;  %9196 = vmatprep.mubr.msk.f32.mxu0 %vm3972_vm13, %v3911_v19 }
 0x491   :  { %9197 = vmatmul.mubr.msk.f32.gmra.mxu0 %vm3972_vm13, %v3912_v9 }
 0x492   :  { %v3677_v10 = vpop.permute.xlu1 %3676  ;;  %v3914_v27 = vld [vmem:[#allocation3 + $0x58] sm:$0xff] }
 0x493   :  { %3854 = vst.msk [vmem:[#allocation3 + $0x78] sm:$0xff] %vm3838_vm12, %v3677_v10  ;;  %v3675_v61 = vpop.permute.xlu0 %3674  ;;  %v3913_v25 = vld [vmem:[#allocation3 + $0x50] sm:$0xff] }
 0x494   :  { %3853 = vst.msk [vmem:[#allocation3 + $0x70] sm:$0xff] %vm3838_vm12, %v3675_v61  ;;  %9199 = vmatprep.mubr.msk.f32.mxu0 %vm3972_vm13, %v3913_v25 }
 0x495   :  { %9200 = vmatmul.mubr.msk.f32.gmra.mxu0 %vm3972_vm13, %v3914_v27 }
 0x496   :  { %v3681_v38 = vpop.permute.xlu1 %3680  ;;  %v3916_v58 = vld [vmem:[#allocation3 + $0x68] sm:$0xff] }
 0x497   :  { %3856 = vst.msk [vmem:[#allocation3 + $0x88] sm:$0xff] %vm3838_vm12, %v3681_v38  ;;  %v3679_v43 = vpop.permute.xlu0 %3678  ;;  %v3915_v40 = vld [vmem:[#allocation3 + $0x60] sm:$0xff] }
 0x498   :  { %3855 = vst.msk [vmem:[#allocation3 + $0x80] sm:$0xff] %vm3838_vm12, %v3679_v43  ;;  %9202 = vmatprep.mubr.msk.f32.mxu0 %vm3972_vm13, %v3915_v40 }
 0x499   :  { %9203 = vmatmul.mubr.msk.f32.gmra.mxu0 %vm3972_vm13, %v3916_v58 }
 0x49a   :  { %v3685_v37 = vpop.permute.xlu1 %3684  ;;  %v3918_v55 = vld [vmem:[#allocation3 + $0x78] sm:$0xff] }
 0x49b   :  { %3858 = vst.msk [vmem:[#allocation3 + $0x98] sm:$0xff] %vm3838_vm12, %v3685_v37  ;;  %v3683_v28 = vpop.permute.xlu0 %3682  ;;  %v3917_v45 = vld [vmem:[#allocation3 + $0x70] sm:$0xff] }
 0x49c   :  { %3857 = vst.msk [vmem:[#allocation3 + $0x90] sm:$0xff] %vm3838_vm12, %v3683_v28  ;;  %9205 = vmatprep.mubr.msk.f32.mxu0 %vm3972_vm13, %v3917_v45 }
 0x49d   :  { %9206 = vmatmul.mubr.msk.f32.gmra.mxu0 %vm3972_vm13, %v3918_v55 }
 0x49e   :  { %v3689_v63 = vpop.permute.xlu1 %3688  ;;  %v3920_v20 = vld [vmem:[#allocation3 + $0x88] sm:$0xff] }
 0x49f   :  { %3860 = vst.msk [vmem:[#allocation3 + $0xa8] sm:$0xff] %vm3838_vm12, %v3689_v63  ;;  %v3687_v57 = vpop.permute.xlu0 %3686  ;;  %v3919_v34 = vld [vmem:[#allocation3 + $0x80] sm:$0xff] }
 0x4a0   :  { %3859 = vst.msk [vmem:[#allocation3 + $0xa0] sm:$0xff] %vm3838_vm12, %v3687_v57  ;;  %9208 = vmatprep.mubr.msk.f32.mxu0 %vm3972_vm13, %v3919_v34 }
 0x4a1   :  { %9209 = vmatmul.mubr.msk.f32.gmra.mxu0 %vm3972_vm13, %v3920_v20 }
 0x4a2   :  { %v3693_v6 = vpop.permute.xlu1 %3692  ;;  %v3922_v12 = vld [vmem:[#allocation3 + $0x98] sm:$0xff] }
 0x4a3   :  { %3862 = vst.msk [vmem:[#allocation3 + $0xb8] sm:$0xff] %vm3838_vm12, %v3693_v6  ;;  %v3691_v13 = vpop.permute.xlu0 %3690  ;;  %v3921_v14 = vld [vmem:[#allocation3 + $0x90] sm:$0xff] }
 0x4a4   :  { %3861 = vst.msk [vmem:[#allocation3 + $0xb0] sm:$0xff] %vm3838_vm12, %v3691_v13  ;;  %9211 = vmatprep.mubr.msk.f32.mxu0 %vm3972_vm13, %v3921_v14 }
 0x4a5   :  { %9212 = vmatmul.mubr.msk.f32.gmra.mxu0 %vm3972_vm13, %v3922_v12 }
 0x4a6   :  { %v3697_v26 = vpop.permute.xlu1 %3696  ;;  %v3924_v11 = vld [vmem:[#allocation3 + $0xa8] sm:$0xff] }
 0x4a7   :  { %3864 = vst.msk [vmem:[#allocation3 + $0xc8] sm:$0xff] %vm3838_vm12, %v3697_v26  ;;  %v3695_v15 = vpop.permute.xlu0 %3694  ;;  %v3923_v8 = vld [vmem:[#allocation3 + $0xa0] sm:$0xff] }
 0x4a8   :  { %3863 = vst.msk [vmem:[#allocation3 + $0xc0] sm:$0xff] %vm3838_vm12, %v3695_v15  ;;  %9214 = vmatprep.mubr.msk.f32.mxu0 %vm3972_vm13, %v3923_v8 }
 0x4a9   :  { %9215 = vmatmul.mubr.msk.f32.gmra.mxu0 %vm3972_vm13, %v3924_v11 }
 0x4aa   :  { %v3701_v46 = vpop.permute.xlu1 %3700  ;;  %v3926_v21 = vld [vmem:[#allocation3 + $0xb8] sm:$0xff] }
 0x4ab   :  { %3866 = vst.msk [vmem:[#allocation3 + $0xd8] sm:$0xff] %vm3838_vm12, %v3701_v46  ;;  %v3699_v50 = vpop.permute.xlu0 %3698  ;;  %v3925_v31 = vld [vmem:[#allocation3 + $0xb0] sm:$0xff] }
 0x4ac   :  { %3865 = vst.msk [vmem:[#allocation3 + $0xd0] sm:$0xff] %vm3838_vm12, %v3699_v50  ;;  %9217 = vmatprep.mubr.msk.f32.mxu0 %vm3972_vm13, %v3925_v31 }
 0x4ad   :  { %9218 = vmatmul.mubr.msk.f32.gmra.mxu0 %vm3972_vm13, %v3926_v21 }
 0x4ae   :  { %v3705_v62 = vpop.permute.xlu1 %3704  ;;  %v3928_v44 = vld [vmem:[#allocation3 + $0xc8] sm:$0xff] }
 0x4af   :  { %3868 = vst.msk [vmem:[#allocation3 + $0xe8] sm:$0xff] %vm3838_vm12, %v3705_v62  ;;  %v3703_v33 = vpop.permute.xlu0 %3702  ;;  %v3927_v5 = vld [vmem:[#allocation3 + $0xc0] sm:$0xff] }
 0x4b0   :  { %3867 = vst.msk [vmem:[#allocation3 + $0xe0] sm:$0xff] %vm3838_vm12, %v3703_v33  ;;  %9220 = vmatprep.mubr.msk.f32.mxu0 %vm3972_vm13, %v3927_v5 }
 0x4b1   :  { %9221 = vmatmul.mubr.msk.f32.gmra.mxu0 %vm3972_vm13, %v3928_v44 }
 0x4b2   :  { %v3709_v0 = vpop.permute.xlu1 %3708  ;;  %v3930_v22 = vld [vmem:[#allocation3 + $0xd8] sm:$0xff] }
 0x4b3   :  { %3870 = vst.msk [vmem:[#allocation3 + $0xf8] sm:$0xff] %vm3838_vm12, %v3709_v0  ;;  %v3707_v52 = vpop.permute.xlu0 %3706  ;;  %v3929_v51 = vld [vmem:[#allocation3 + $0xd0] sm:$0xff] }
 0x4b4   :  { %3869 = vst.msk [vmem:[#allocation3 + $0xf0] sm:$0xff] %vm3838_vm12, %v3707_v52  ;;  %9223 = vmatprep.mubr.msk.f32.mxu0 %vm3972_vm13, %v3929_v51 }
 0x4b5   :  { %9224 = vmatmul.mubr.msk.f32.gmra.mxu0 %vm3972_vm13, %v3930_v22 }
 0x4b6   :  { %v3713_v56 = vpop.permute.xlu1 %3712  ;;  %v3932_v49 = vld [vmem:[#allocation3 + $0xe8] sm:$0xff] }
 0x4b7   :  { %3872 = vst.msk [vmem:[#allocation3 + $0x108] sm:$0xff] %vm3838_vm12, %v3713_v56  ;;  %v3711_v3 = vpop.permute.xlu0 %3710  ;;  %v3931_v4 = vld [vmem:[#allocation3 + $0xe0] sm:$0xff] }
 0x4b8   :  { %3871 = vst.msk [vmem:[#allocation3 + $0x100] sm:$0xff] %vm3838_vm12, %v3711_v3  ;;  %9226 = vmatprep.mubr.msk.f32.mxu0 %vm3972_vm13, %v3931_v4 }
 0x4b9   :  { %9227 = vmatmul.mubr.msk.f32.gmra.mxu0 %vm3972_vm13, %v3932_v49 }
 0x4ba   :  { %v3717_v39 = vpop.permute.xlu1 %3716  ;;  %v3934_v16 = vld [vmem:[#allocation3 + $0xf8] sm:$0xff] }
 0x4bb   :  { %3874 = vst.msk [vmem:[#allocation3 + $0x118] sm:$0xff] %vm3838_vm12, %v3717_v39  ;;  %v3715_v7 = vpop.permute.xlu0 %3714  ;;  %v3933_v17 = vld [vmem:[#allocation3 + $0xf0] sm:$0xff] }
 0x4bc   :  { %3873 = vst.msk [vmem:[#allocation3 + $0x110] sm:$0xff] %vm3838_vm12, %v3715_v7  ;;  %9229 = vmatprep.mubr.msk.f32.mxu0 %vm3972_vm13, %v3933_v17 }
 0x4bd   :  { %9230 = vmatmul.mubr.msk.f32.gmra.mxu0 %vm3972_vm13, %v3934_v16 }
 0x4be   :  { %v3721_v23 = vpop.permute.xlu1 %3720  ;;  %v3936_v24 = vld [vmem:[#allocation3 + $0x108] sm:$0xff] }
 0x4bf   :  { %3876 = vst.msk [vmem:[#allocation3 + $0x128] sm:$0xff] %vm3838_vm12, %v3721_v23  ;;  %v3719_v18 = vpop.permute.xlu0 %3718  ;;  %v3935_v29 = vld [vmem:[#allocation3 + $0x100] sm:$0xff] }
 0x4c0   :  { %3875 = vst.msk [vmem:[#allocation3 + $0x120] sm:$0xff] %vm3838_vm12, %v3719_v18  ;;  %9232 = vmatprep.mubr.msk.f32.mxu0 %vm3972_vm13, %v3935_v29 }
 0x4c1   :  { %9233 = vmatmul.mubr.msk.f32.gmra.mxu0 %vm3972_vm13, %v3936_v24 }
 0x4c2   :  { %v3725_v32 = vpop.permute.xlu1 %3724  ;;  %v3938_v35 = vld [vmem:[#allocation3 + $0x118] sm:$0xff] }
 0x4c3   :  { %3878 = vst.msk [vmem:[#allocation3 + $0x138] sm:$0xff] %vm3838_vm12, %v3725_v32  ;;  %v3723_v30 = vpop.permute.xlu0 %3722  ;;  %v3937_v41 = vld [vmem:[#allocation3 + $0x110] sm:$0xff] }
 0x4c4   :  { %3877 = vst.msk [vmem:[#allocation3 + $0x130] sm:$0xff] %vm3838_vm12, %v3723_v30  ;;  %9235 = vmatprep.mubr.msk.f32.mxu0 %vm3972_vm13, %v3937_v41 }
 0x4c5   :  { %9236 = vmatmul.mubr.msk.f32.gmra.mxu0 %vm3972_vm13, %v3938_v35 }
 0x4c6   :  { %v3729_v36 = vpop.permute.xlu1 %3728  ;;  %v3940_v47 = vld [vmem:[#allocation3 + $0x128] sm:$0xff] }
 0x4c7   :  { %3880 = vst.msk [vmem:[#allocation3 + $0x148] sm:$0xff] %vm3838_vm12, %v3729_v36  ;;  %v3727_v42 = vpop.permute.xlu0 %3726  ;;  %v3939_v53 = vld [vmem:[#allocation3 + $0x120] sm:$0xff] }
 0x4c8   :  { %3879 = vst.msk [vmem:[#allocation3 + $0x140] sm:$0xff] %vm3838_vm12, %v3727_v42  ;;  %9238 = vmatprep.mubr.msk.f32.mxu0 %vm3972_vm13, %v3939_v53 }
 0x4c9   :  { %9239 = vmatmul.mubr.msk.f32.gmra.mxu0 %vm3972_vm13, %v3940_v47 }
 0x4ca   :  { %v3733_v48 = vpop.permute.xlu1 %3732  ;;  %v3942_v59 = vld [vmem:[#allocation3 + $0x138] sm:$0xff] }
 0x4cb   :  { %3882 = vst.msk [vmem:[#allocation3 + $0x158] sm:$0xff] %vm3838_vm12, %v3733_v48  ;;  %v3731_v54 = vpop.permute.xlu0 %3730  ;;  %v3941_v1 = vld [vmem:[#allocation3 + $0x130] sm:$0xff] }
 0x4cc   :  { %3881 = vst.msk [vmem:[#allocation3 + $0x150] sm:$0xff] %vm3838_vm12, %v3731_v54  ;;  %9241 = vmatprep.mubr.msk.f32.mxu0 %vm3972_vm13, %v3941_v1 }
 0x4cd   :  { %9242 = vmatmul.mubr.msk.f32.gmra.mxu0 %vm3972_vm13, %v3942_v59 }
 0x4ce   :  { %v3737_v60 = vpop.permute.xlu1 %3736  ;;  %v3944_v9 = vld [vmem:[#allocation3 + $0x148] sm:$0xff] }
 0x4cf   :  { %3884 = vst.msk [vmem:[#allocation3 + $0x168] sm:$0xff] %vm3838_vm12, %v3737_v60  ;;  %v3735_v2 = vpop.permute.xlu0 %3734  ;;  %v3943_v19 = vld [vmem:[#allocation3 + $0x140] sm:$0xff] }
 0x4d0   :  { %3883 = vst.msk [vmem:[#allocation3 + $0x160] sm:$0xff] %vm3838_vm12, %v3735_v2  ;;  %9244 = vmatprep.mubr.msk.f32.mxu0 %vm3972_vm13, %v3943_v19 }
 0x4d1   :  { %9245 = vmatmul.mubr.msk.f32.gmra.mxu0 %vm3972_vm13, %v3944_v9 }
 0x4d2   :  { %v3741_v10 = vpop.permute.xlu1 %3740  ;;  %v3946_v27 = vld [vmem:[#allocation3 + $0x158] sm:$0xff] }
 0x4d3   :  { %3886 = vst.msk [vmem:[#allocation3 + $0x178] sm:$0xff] %vm3838_vm12, %v3741_v10  ;;  %v3739_v61 = vpop.permute.xlu0 %3738  ;;  %v3945_v25 = vld [vmem:[#allocation3 + $0x150] sm:$0xff] }
 0x4d4   :  { %3885 = vst.msk [vmem:[#allocation3 + $0x170] sm:$0xff] %vm3838_vm12, %v3739_v61  ;;  %9247 = vmatprep.mubr.msk.f32.mxu0 %vm3972_vm13, %v3945_v25 }
 0x4d5   :  { %9248 = vmatmul.mubr.msk.f32.gmra.mxu0 %vm3972_vm13, %v3946_v27 }
 0x4d6   :  { %v3745_v38 = vpop.permute.xlu1 %3744  ;;  %v3948_v58 = vld [vmem:[#allocation3 + $0x168] sm:$0xff] }
 0x4d7   :  { %3888 = vst.msk [vmem:[#allocation3 + $0x188] sm:$0xff] %vm3838_vm12, %v3745_v38  ;;  %v3743_v43 = vpop.permute.xlu0 %3742  ;;  %v3947_v40 = vld [vmem:[#allocation3 + $0x160] sm:$0xff] }
 0x4d8   :  { %3887 = vst.msk [vmem:[#allocation3 + $0x180] sm:$0xff] %vm3838_vm12, %v3743_v43  ;;  %9250 = vmatprep.mubr.msk.f32.mxu0 %vm3972_vm13, %v3947_v40 }
 0x4d9   :  { %9251 = vmatmul.mubr.msk.f32.gmra.mxu0 %vm3972_vm13, %v3948_v58 }
 0x4da   :  { %v3749_v37 = vpop.permute.xlu1 %3748  ;;  %v3950_v55 = vld [vmem:[#allocation3 + $0x178] sm:$0xff] }
 0x4db   :  { %3890 = vst.msk [vmem:[#allocation3 + $0x198] sm:$0xff] %vm3838_vm12, %v3749_v37  ;;  %v3747_v28 = vpop.permute.xlu0 %3746  ;;  %v3949_v45 = vld [vmem:[#allocation3 + $0x170] sm:$0xff] }
 0x4dc   :  { %3889 = vst.msk [vmem:[#allocation3 + $0x190] sm:$0xff] %vm3838_vm12, %v3747_v28  ;;  %9253 = vmatprep.mubr.msk.f32.mxu0 %vm3972_vm13, %v3949_v45 }
 0x4dd   :  { %9254 = vmatmul.mubr.msk.f32.gmra.mxu0 %vm3972_vm13, %v3950_v55 }
 0x4de   :  { %v3753_v63 = vpop.permute.xlu1 %3752  ;;  %v3952_v20 = vld [vmem:[#allocation3 + $0x188] sm:$0xff] }
 0x4df   :  { %3892 = vst.msk [vmem:[#allocation3 + $0x1a8] sm:$0xff] %vm3838_vm12, %v3753_v63  ;;  %v3751_v57 = vpop.permute.xlu0 %3750  ;;  %v3951_v34 = vld [vmem:[#allocation3 + $0x180] sm:$0xff] }
 0x4e0   :  { %3891 = vst.msk [vmem:[#allocation3 + $0x1a0] sm:$0xff] %vm3838_vm12, %v3751_v57  ;;  %9256 = vmatprep.mubr.msk.f32.mxu0 %vm3972_vm13, %v3951_v34 }
 0x4e1   :  { %9257 = vmatmul.mubr.msk.f32.gmra.mxu0 %vm3972_vm13, %v3952_v20 }
 0x4e2   :  { %v3757_v6 = vpop.permute.xlu1 %3756  ;;  %v3954_v12 = vld [vmem:[#allocation3 + $0x198] sm:$0xff] }
 0x4e3   :  { %3894 = vst.msk [vmem:[#allocation3 + $0x1b8] sm:$0xff] %vm3838_vm12, %v3757_v6  ;;  %v3755_v13 = vpop.permute.xlu0 %3754  ;;  %v3953_v14 = vld [vmem:[#allocation3 + $0x190] sm:$0xff] }
 0x4e4   :  { %3893 = vst.msk [vmem:[#allocation3 + $0x1b0] sm:$0xff] %vm3838_vm12, %v3755_v13  ;;  %9259 = vmatprep.mubr.msk.f32.mxu0 %vm3972_vm13, %v3953_v14 }
 0x4e5   :  { %9260 = vmatmul.mubr.msk.f32.gmra.mxu0 %vm3972_vm13, %v3954_v12 }
 0x4e6   :  { %v3761_v26 = vpop.permute.xlu1 %3760  ;;  %v3956_v11 = vld [vmem:[#allocation3 + $0x1a8] sm:$0xff] }
 0x4e7   :  { %3896 = vst.msk [vmem:[#allocation3 + $0x1c8] sm:$0xff] %vm3838_vm12, %v3761_v26  ;;  %v3759_v15 = vpop.permute.xlu0 %3758  ;;  %v3955_v8 = vld [vmem:[#allocation3 + $0x1a0] sm:$0xff] }
 0x4e8   :  { %3895 = vst.msk [vmem:[#allocation3 + $0x1c0] sm:$0xff] %vm3838_vm12, %v3759_v15  ;;  %9262 = vmatprep.mubr.msk.f32.mxu0 %vm3972_vm13, %v3955_v8 }
 0x4e9   :  { %9263 = vmatmul.mubr.msk.f32.gmra.mxu0 %vm3972_vm13, %v3956_v11 }
 0x4ea   :  { %v3765_v46 = vpop.permute.xlu1 %3764  ;;  %v3958_v21 = vld [vmem:[#allocation3 + $0x1b8] sm:$0xff] }
 0x4eb   :  { %3898 = vst.msk [vmem:[#allocation3 + $0x1d8] sm:$0xff] %vm3838_vm12, %v3765_v46  ;;  %v3763_v50 = vpop.permute.xlu0 %3762  ;;  %v3957_v31 = vld [vmem:[#allocation3 + $0x1b0] sm:$0xff] }
 0x4ec   :  { %3897 = vst.msk [vmem:[#allocation3 + $0x1d0] sm:$0xff] %vm3838_vm12, %v3763_v50  ;;  %9265 = vmatprep.mubr.msk.f32.mxu0 %vm3972_vm13, %v3957_v31 }
 0x4ed   :  { %9266 = vmatmul.mubr.msk.f32.gmra.mxu0 %vm3972_vm13, %v3958_v21 }
 0x4ee   :  { %v3769_v62 = vpop.permute.xlu1 %3768  ;;  %v3960_v44 = vld [vmem:[#allocation3 + $0x1c8] sm:$0xff] }
 0x4ef   :  { %3900 = vst.msk [vmem:[#allocation3 + $0x1e8] sm:$0xff] %vm3838_vm12, %v3769_v62  ;;  %v3767_v33 = vpop.permute.xlu0 %3766  ;;  %v3959_v5 = vld [vmem:[#allocation3 + $0x1c0] sm:$0xff] }
 0x4f0   :  { %3899 = vst.msk [vmem:[#allocation3 + $0x1e0] sm:$0xff] %vm3838_vm12, %v3767_v33  ;;  %9268 = vmatprep.mubr.msk.f32.mxu0 %vm3972_vm13, %v3959_v5 }
 0x4f1   :  { %9269 = vmatmul.mubr.msk.f32.gmra.mxu0 %vm3972_vm13, %v3960_v44 }
 0x4f2   :  { %v3773_v0 = vpop.permute.xlu1 %3772  ;;  %v3962_v22 = vld [vmem:[#allocation3 + $0x1d8] sm:$0xff] }
 0x4f3   :  { %v3771_v52 = vpop.permute.xlu0 %3770  ;;  %3902 = vst.msk [vmem:[#allocation3 + $0x1f8] sm:$0xff] %vm3838_vm12, %v3773_v0  ;;  %v3961_v51 = vld [vmem:[#allocation3 + $0x1d0] sm:$0xff] }
 0x4f4   :  { %3901 = vst.msk [vmem:[#allocation3 + $0x1f0] sm:$0xff] %vm3838_vm12, %v3771_v52  ;;  %9271 = vmatprep.mubr.msk.f32.mxu0 %vm3972_vm13, %v3961_v51 }
 0x4f5   :  { %9272 = vmatmul.mubr.msk.f32.gmra.mxu0 %vm3972_vm13, %v3962_v22 }
 0x4f6   :  { %v3964_v56 = vld [vmem:[#allocation3 + $0x1e8] sm:$0xff] }
 0x4f7   :  { %v3963_v49 = vld [vmem:[#allocation3 + $0x1e0] sm:$0xff] }
 0x4f8   :  { %9274 = vmatprep.mubr.msk.f32.mxu0 %vm3972_vm13, %v3963_v49 }
 0x4f9   :  { %9275 = vmatmul.mubr.msk.f32.gmra.mxu0 %vm3972_vm13, %v3964_v56 }
 0x4fa   :  { %v3966_v3 = vld [vmem:[#allocation3 + $0x1f8] sm:$0xff] }
 0x4fb   :  { %v3965_v4 = vld [vmem:[#allocation3 + $0x1f0] sm:$0xff] }
 0x4fc   :  { %9277 = vmatprep.mubr.msk.f32.mxu0 %vm3972_vm13, %v3965_v4 }
 0x4fd   :  { %9278 = vmatmul.mubr.msk.f32.gmra.mxu0 %vm3972_vm13, %v3966_v3 }
 0x541   :  { %v11738_v39 = vpop.f32.mrf.mxu0 }
 0x542   :  { %v4689_v7 = vmul.f32 %v11738_v39, %v11738_v39  ;;  %v4555_v18 = vsel %vm540_vm0, %v11738_v39, 0.0 }
 0x543   :  { %v11740_v16 = vpop.f32.mrf.mxu0 }
 0x544   :  { %v4554_v17 = vsel %vm540_vm0, %v11740_v16, 0.0  ;;  %v4688_v23 = vmul.f32 %v11740_v16, %v11740_v16  ;;  %v4753_v30 = vsel %vm540_vm0, %v4689_v7, 0.0 }
 0x545   :  { %v11748_v24 = vpop.f32.mrf.mxu0  ;;  %v4556_v32 = vadd.f32 %v4555_v18, %v4554_v17 }
 0x546   :  { %v4752_v29 = vsel %vm540_vm0, %v4688_v23, 0.0  ;;  %v4691_v41 = vmul.f32 %v11748_v24, %v11748_v24  ;;  %v4559_v59 = vsel %vm540_vm0, %v11748_v24, 0.0 }
 0x547   :  { %v11753_v35 = vpop.f32.mrf.mxu0  ;;  %v4754_v42 = vadd.f32 %v4753_v30, %v4752_v29 }
 0x548   :  { %v4557_v36 = vsel %vm540_vm0, %v11753_v35, 0.0  ;;  %v4690_v47 = vmul.f32 %v11753_v35, %v11753_v35  ;;  %v4757_v2 = vsel %vm540_vm0, %v4691_v41, 0.0 }
 0x549   :  { %v4558_v53 = vadd.f32 %v4557_v36, %v4556_v32  ;;  %v11762_v48 = vpop.f32.mrf.mxu0 }
 0x54a   :  { %v4755_v54 = vsel %vm540_vm0, %v4690_v47, 0.0  ;;  %v4693_v19 = vmul.f32 %v11762_v48, %v11762_v48  ;;  %v4563_v58 = vsel %vm540_vm0, %v11762_v48, 0.0 }
 0x54b   :  { %v4560_v1 = vadd.f32 %v4559_v59, %v4558_v53  ;;  %v4756_v60 = vadd.f32 %v4755_v54, %v4754_v42  ;;  %v11767_v9 = vpop.f32.mrf.mxu0 }
 0x54c   :  { %v4561_v10 = vsel %vm540_vm0, %v11767_v9, 0.0  ;;  %v4692_v27 = vmul.f32 %v11767_v9, %v11767_v9  ;;  %v4761_v28 = vsel %vm540_vm0, %v4693_v19, 0.0 }
 0x54d   :  { %v4758_v61 = vadd.f32 %v4757_v2, %v4756_v60  ;;  %v4562_v25 = vadd.f32 %v4561_v10, %v4560_v1  ;;  %v11776_v38 = vpop.f32.mrf.mxu0 }
 0x54e   :  { %v4759_v43 = vsel %vm540_vm0, %v4692_v27, 0.0  ;;  %v4695_v45 = vmul.f32 %v11776_v38, %v11776_v38  ;;  %v4567_v12 = vsel %vm540_vm0, %v11776_v38, 0.0 }
 0x54f   :  { %v4760_v40 = vadd.f32 %v4759_v43, %v4758_v61  ;;  %v11781_v37 = vpop.f32.mrf.mxu0  ;;  %v4564_v55 = vadd.f32 %v4563_v58, %v4562_v25 }
 0x550   :  { %v4565_v63 = vsel %vm540_vm0, %v11781_v37, 0.0  ;;  %v4694_v20 = vmul.f32 %v11781_v37, %v11781_v37  ;;  %v4765_v15 = vsel %vm540_vm0, %v4695_v45, 0.0 }
 0x551   :  { %v4566_v57 = vadd.f32 %v4565_v63, %v4564_v55  ;;  %v4762_v34 = vadd.f32 %v4761_v28, %v4760_v40  ;;  %v11790_v6 = vpop.f32.mrf.mxu0 }
 0x552   :  { %v4763_v13 = vsel %vm540_vm0, %v4694_v20, 0.0  ;;  %v4697_v8 = vmul.f32 %v11790_v6, %v11790_v6  ;;  %v4571_v44 = vsel %vm540_vm0, %v11790_v6, 0.0 }
 0x553   :  { %v4764_v14 = vadd.f32 %v4763_v13, %v4762_v34  ;;  %v11795_v26 = vpop.f32.mrf.mxu0  ;;  %v4568_v11 = vadd.f32 %v4567_v12, %v4566_v57 }
 0x554   :  { %v4569_v46 = vsel %vm540_vm0, %v11795_v26, 0.0  ;;  %v4696_v21 = vmul.f32 %v11795_v26, %v11795_v26  ;;  %v4769_v52 = vsel %vm540_vm0, %v4697_v8, 0.0 }
 0x555   :  { %v4570_v50 = vadd.f32 %v4569_v46, %v4568_v11  ;;  %v4766_v31 = vadd.f32 %v4765_v15, %v4764_v14  ;;  %v11804_v62 = vpop.f32.mrf.mxu0 }
 0x556   :  { %v4767_v33 = vsel %vm540_vm0, %v4696_v21, 0.0  ;;  %v4699_v51 = vmul.f32 %v11804_v62, %v11804_v62  ;;  %v4575_v17 = vsel %vm540_vm0, %v11804_v62, 0.0 }
 0x557   :  { %v4768_v5 = vadd.f32 %v4767_v33, %v4766_v31  ;;  %v11809_v0 = vpop.f32.mrf.mxu0  ;;  %v4572_v22 = vadd.f32 %v4571_v44, %v4570_v50 }
 0x558   :  { %v4573_v56 = vsel %vm540_vm0, %v11809_v0, 0.0  ;;  %v4698_v49 = vmul.f32 %v11809_v0, %v11809_v0  ;;  %v4773_v30 = vsel %vm540_vm0, %v4699_v51, 0.0 }
 0x559   :  { %v4574_v3 = vadd.f32 %v4573_v56, %v4572_v22  ;;  %v4770_v4 = vadd.f32 %v4769_v52, %v4768_v5  ;;  %v11818_v7 = vpop.f32.mrf.mxu0 }
 0x55a   :  { %v4771_v23 = vsel %vm540_vm0, %v4698_v49, 0.0  ;;  %v4701_v41 = vmul.f32 %v11818_v7, %v11818_v7  ;;  %v4579_v54 = vsel %vm540_vm0, %v11818_v7, 0.0 }
 0x55b   :  { %v4772_v18 = vadd.f32 %v4771_v23, %v4770_v4  ;;  %v11823_v29 = vpop.f32.mrf.mxu0  ;;  %v4576_v32 = vadd.f32 %v4575_v17, %v4574_v3 }
 0x55c   :  { %v4577_v36 = vsel %vm540_vm0, %v11823_v29, 0.0  ;;  %v4700_v47 = vmul.f32 %v11823_v29, %v11823_v29  ;;  %v4777_v10 = vsel %vm540_vm0, %v4701_v41, 0.0 }
 0x55d   :  { %v4578_v42 = vadd.f32 %v4577_v36, %v4576_v32  ;;  %v4774_v53 = vadd.f32 %v4773_v30, %v4772_v18  ;;  %v11832_v59 = vpop.f32.mrf.mxu0 }
 0x55e   :  { %v4775_v1 = vsel %vm540_vm0, %v4700_v47, 0.0  ;;  %v4703_v27 = vmul.f32 %v11832_v59, %v11832_v59  ;;  %v4583_v55 = vsel %vm540_vm0, %v11832_v59, 0.0 }
 0x55f   :  { %v4776_v60 = vadd.f32 %v4775_v1, %v4774_v53  ;;  %v11837_v2 = vpop.f32.mrf.mxu0  ;;  %v4580_v19 = vadd.f32 %v4579_v54, %v4578_v42 }
 0x560   :  { %v4581_v61 = vsel %vm540_vm0, %v11837_v2, 0.0  ;;  %v4702_v25 = vmul.f32 %v11837_v2, %v11837_v2  ;;  %v4781_v57 = vsel %vm540_vm0, %v4703_v27, 0.0 }
 0x561   :  { %v4582_v58 = vadd.f32 %v4581_v61, %v4580_v19  ;;  %v4778_v43 = vadd.f32 %v4777_v10, %v4776_v60  ;;  %v11846_v40 = vpop.f32.mrf.mxu0 }
 0x562   :  { %v4779_v28 = vsel %vm540_vm0, %v4702_v25, 0.0  ;;  %v4705_v34 = vmul.f32 %v11846_v40, %v11846_v40  ;;  %v4587_v8 = vsel %vm540_vm0, %v11846_v40, 0.0 }
 0x563   :  { %v4780_v45 = vadd.f32 %v4779_v28, %v4778_v43  ;;  %v11851_v63 = vpop.f32.mrf.mxu0  ;;  %v4584_v20 = vadd.f32 %v4583_v55, %v4582_v58 }
 0x564   :  { %v4585_v12 = vsel %vm540_vm0, %v11851_v63, 0.0  ;;  %v4704_v13 = vmul.f32 %v11851_v63, %v11851_v63  ;;  %v4785_v44 = vsel %vm540_vm0, %v4705_v34, 0.0 }
 0x565   :  { %v4586_v14 = vadd.f32 %v4585_v12, %v4584_v20  ;;  %v4782_v11 = vadd.f32 %v4781_v57, %v4780_v45  ;;  %v11860_v15 = vpop.f32.mrf.mxu0 }
 0x566   :  { %v4783_v46 = vsel %vm540_vm0, %v4704_v13, 0.0  ;;  %v4707_v33 = vmul.f32 %v11860_v15, %v11860_v15  ;;  %v4591_v49 = vsel %vm540_vm0, %v11860_v15, 0.0 }
 0x567   :  { %v4784_v21 = vadd.f32 %v4783_v46, %v4782_v11  ;;  %v11865_v50 = vpop.f32.mrf.mxu0  ;;  %v4588_v31 = vadd.f32 %v4587_v8, %v4586_v14 }
 0x568   :  { %v4589_v5 = vsel %vm540_vm0, %v11865_v50, 0.0  ;;  %v4706_v22 = vmul.f32 %v11865_v50, %v11865_v50  ;;  %v4789_v18 = vsel %vm540_vm0, %v4707_v33, 0.0 }
 0x569   :  { %v4590_v52 = vadd.f32 %v4589_v5, %v4588_v31  ;;  %v4786_v51 = vadd.f32 %v4785_v44, %v4784_v21  ;;  %v11874_v56 = vpop.f32.mrf.mxu0 }
 0x56a   :  { %v4787_v3 = vsel %vm540_vm0, %v4706_v22, 0.0  ;;  %v4709_v32 = vmul.f32 %v11874_v56, %v11874_v56  ;;  %v4595_v53 = vsel %vm540_vm0, %v11874_v56, 0.0 }
 0x56b   :  { %v4788_v4 = vadd.f32 %v4787_v3, %v4786_v51  ;;  %v11879_v17 = vpop.f32.mrf.mxu0  ;;  %v4592_v23 = vadd.f32 %v4591_v49, %v4590_v52 }
 0x56c   :  { %v4593_v30 = vsel %vm540_vm0, %v11879_v17, 0.0  ;;  %v4708_v41 = vmul.f32 %v11879_v17, %v11879_v17  ;;  %v4793_v10 = vsel %vm540_vm0, %v4709_v32, 0.0 }
 0x56d   :  { %v4594_v36 = vadd.f32 %v4593_v30, %v4592_v23  ;;  %v4790_v47 = vadd.f32 %v4789_v18, %v4788_v4  ;;  %v11888_v42 = vpop.f32.mrf.mxu0 }
 0x56e   :  { %v4791_v54 = vsel %vm540_vm0, %v4708_v41, 0.0  ;;  %v4711_v27 = vmul.f32 %v11888_v42, %v11888_v42  ;;  %v4599_v28 = vsel %vm540_vm0, %v11888_v42, 0.0 }
 0x56f   :  { %v4792_v1 = vadd.f32 %v4791_v54, %v4790_v47  ;;  %v11893_v60 = vpop.f32.mrf.mxu0  ;;  %v4596_v19 = vadd.f32 %v4595_v53, %v4594_v36  ;;  %v5292_v53 = vld [vmem:[#allocation2 + $0x9] sm:$0xff] }
 0x570   :  { %v4597_v61 = vsel %vm540_vm0, %v11893_v60, 0.0  ;;  %v4710_v25 = vmul.f32 %v11893_v60, %v11893_v60  ;;  %v4797_v12 = vsel %vm540_vm0, %v4711_v27, 0.0  ;;  %5421 = vrot.lane.b32.xlu1 %v5292_v53, %s9329_s17 }
 0x571   :  { %v4598_v58 = vadd.f32 %v4597_v61, %v4596_v19  ;;  %v4794_v43 = vadd.f32 %v4793_v10, %v4792_v1  ;;  %v11902_v55 = vpop.f32.mrf.mxu0 }
 0x572   :  { %v4795_v45 = vsel %vm540_vm0, %v4710_v25, 0.0  ;;  %v4713_v13 = vmul.f32 %v11902_v55, %v11902_v55  ;;  %v4603_v31 = vsel %vm540_vm0, %v11902_v55, 0.0 }
 0x573   :  { %v4796_v20 = vadd.f32 %v4795_v45, %v4794_v43  ;;  %v11907_v57 = vpop.f32.mrf.mxu0  ;;  %v4600_v34 = vadd.f32 %v4599_v28, %v4598_v58 }
 0x574   :  { %v4601_v14 = vsel %vm540_vm0, %v11907_v57, 0.0  ;;  %v4712_v11 = vmul.f32 %v11907_v57, %v11907_v57  ;;  %v4801_v52 = vsel %vm540_vm0, %v4713_v13, 0.0 }
 0x575   :  { %v4602_v8 = vadd.f32 %v4601_v14, %v4600_v34  ;;  %v4798_v46 = vadd.f32 %v4797_v12, %v4796_v20  ;;  %v11916_v21 = vpop.f32.mrf.mxu0 }
 0x576   :  { %v4799_v44 = vsel %vm540_vm0, %v4712_v11, 0.0  ;;  %v4715_v51 = vmul.f32 %v11916_v21, %v11916_v21  ;;  %v4607_v32 = vsel %vm540_vm0, %v11916_v21, 0.0 }
 0x577   :  { %v4800_v33 = vadd.f32 %v4799_v44, %v4798_v46  ;;  %v11921_v5 = vpop.f32.mrf.mxu0  ;;  %v4604_v22 = vadd.f32 %v4603_v31, %v4602_v8 }
 0x578   :  { %v4605_v49 = vsel %vm540_vm0, %v11921_v5, 0.0  ;;  %v4714_v3 = vmul.f32 %v11921_v5, %v11921_v5  ;;  %v4805_v54 = vsel %vm540_vm0, %v4715_v51, 0.0 }
 0x579   :  { %v4606_v4 = vadd.f32 %v4605_v49, %v4604_v22  ;;  %v4802_v23 = vadd.f32 %v4801_v52, %v4800_v33  ;;  %v11930_v18 = vpop.f32.mrf.mxu0 }
 0x57a   :  { %v4803_v30 = vsel %vm540_vm0, %v4714_v3, 0.0  ;;  %v4717_v1 = vmul.f32 %v11930_v18, %v11930_v18  ;;  %v4611_v58 = vsel %vm540_vm0, %v11930_v18, 0.0 }
 0x57b   :  { %v4804_v41 = vadd.f32 %v4803_v30, %v4802_v23  ;;  %v11935_v36 = vpop.f32.mrf.mxu0  ;;  %v4608_v47 = vadd.f32 %v4607_v32, %v4606_v4 }
 0x57c   :  { %v4609_v19 = vsel %vm540_vm0, %v11935_v36, 0.0  ;;  %v4716_v10 = vmul.f32 %v11935_v36, %v11935_v36  ;;  %v4809_v34 = vsel %vm540_vm0, %v4717_v1, 0.0 }
 0x57d   :  { %v4610_v27 = vadd.f32 %v4609_v19, %v4608_v47  ;;  %v4806_v61 = vadd.f32 %v4805_v54, %v4804_v41  ;;  %v11945_v25 = vpop.f32.mrf.mxu0 }
 0x57e   :  { %v4807_v43 = vsel %vm540_vm0, %v4716_v10, 0.0  ;;  %v4719_v12 = vmul.f32 %v11945_v25, %v11945_v25  ;;  %v4615_v31 = vsel %vm540_vm0, %v11945_v25, 0.0 }
 0x57f   :  { %v4808_v28 = vadd.f32 %v4807_v43, %v4806_v61  ;;  %v11950_v45 = vpop.f32.mrf.mxu0  ;;  %v4612_v20 = vadd.f32 %v4611_v58, %v4610_v27 }
 0x580   :  { %v4613_v13 = vsel %vm540_vm0, %v11950_v45, 0.0  ;;  %v4718_v14 = vmul.f32 %v11950_v45, %v11950_v45  ;;  %v4813_v51 = vsel %vm540_vm0, %v4719_v12, 0.0 }
 0x581   :  { %v4614_v11 = vadd.f32 %v4613_v13, %v4612_v20  ;;  %v4810_v8 = vadd.f32 %v4809_v34, %v4808_v28  ;;  %v11959_v46 = vpop.f32.mrf.mxu0 }
 0x582   :  { %v4811_v44 = vsel %vm540_vm0, %v4718_v14, 0.0  ;;  %v4721_v49 = vmul.f32 %v11959_v46, %v11959_v46  ;;  %v4619_v41 = vsel %vm540_vm0, %v11959_v46, 0.0 }
 0x583   :  { %v4812_v33 = vadd.f32 %v4811_v44, %v4810_v8  ;;  %v11964_v22 = vpop.f32.mrf.mxu0  ;;  %v4616_v52 = vadd.f32 %v4615_v31, %v4614_v11  ;;  %v5291_v11 = vld [vmem:[#allocation2 + $0x1] sm:$0xff] }
 0x584   :  { %v4617_v3 = vsel %vm540_vm0, %v11964_v22, 0.0  ;;  %v4720_v4 = vmul.f32 %v11964_v22, %v11964_v22  ;;  %v4817_v19 = vsel %vm540_vm0, %v4721_v49, 0.0  ;;  %5419 = vrot.lane.b32.xlu0 %v5291_v11, %s9329_s17 }
 0x585   :  { %v4618_v23 = vadd.f32 %v4617_v3, %v4616_v52  ;;  %v4814_v32 = vadd.f32 %v4813_v51, %v4812_v33  ;;  %v11973_v30 = vpop.f32.mrf.mxu0 }
 0x586   :  { %v4815_v47 = vsel %vm540_vm0, %v4720_v4, 0.0  ;;  %v4723_v10 = vmul.f32 %v11973_v30, %v11973_v30  ;;  %v4623_v20 = vsel %vm540_vm0, %v11973_v30, 0.0 }
 0x587   :  { %v4816_v53 = vadd.f32 %v4815_v47, %v4814_v32  ;;  %v11978_v54 = vpop.f32.mrf.mxu0  ;;  %v4620_v1 = vadd.f32 %v4619_v41, %v4618_v23 }
 0x588   :  { %v4621_v27 = vsel %vm540_vm0, %v11978_v54, 0.0  ;;  %v4722_v61 = vmul.f32 %v11978_v54, %v11978_v54  ;;  %v4821_v8 = vsel %vm540_vm0, %v4723_v10, 0.0 }
 0x589   :  { %v4622_v58 = vadd.f32 %v4621_v27, %v4620_v1  ;;  %v4818_v43 = vadd.f32 %v4817_v19, %v4816_v53  ;;  %v11987_v28 = vpop.f32.mrf.mxu0 }
 0x58a   :  { %v4819_v34 = vsel %vm540_vm0, %v4722_v61, 0.0  ;;  %v4725_v31 = vmul.f32 %v11987_v28, %v11987_v28  ;;  %v4627_v3 = vsel %vm540_vm0, %v11987_v28, 0.0 }
 0x58b   :  { %v4820_v12 = vadd.f32 %v4819_v34, %v4818_v43  ;;  %v11992_v13 = vpop.f32.mrf.mxu0  ;;  %v4624_v14 = vadd.f32 %v4623_v20, %v4622_v58 }
 0x58c   :  { %v4625_v44 = vsel %vm540_vm0, %v11992_v13, 0.0  ;;  %v4724_v33 = vmul.f32 %v11992_v13, %v11992_v13  ;;  %v4825_v47 = vsel %vm540_vm0, %v4725_v31, 0.0 }
 0x58d   :  { %v4626_v52 = vadd.f32 %v4625_v44, %v4624_v14  ;;  %v4822_v51 = vadd.f32 %v4821_v8, %v4820_v12  ;;  %v12002_v49 = vpop.f32.mrf.mxu0 }
 0x58e   :  { %14642 = vst [vmem:[#allocation12_spill] sm:$0xff] %v12002_v49  ;;  %v4823_v4 = vsel %vm540_vm0, %v4724_v33, 0.0  ;;  %v4727_v53 = vmul.f32 %v12002_v49, %v12002_v49  ;;  %v4631_v58 = vsel %vm540_vm0, %v12002_v49, 0.0 }
 0x58f   :  { %v4824_v23 = vadd.f32 %v4823_v4, %v4822_v51  ;;  %v12007_v32 = vpop.f32.mrf.mxu0  ;;  %v4628_v41 = vadd.f32 %v4627_v3, %v4626_v52 }
 0x590   :  { %v4629_v1 = vsel %vm540_vm0, %v12007_v32, 0.0  ;;  %v4726_v19 = vmul.f32 %v12007_v32, %v12007_v32  ;;  %v4829_v14 = vsel %vm540_vm0, %v4727_v53, 0.0 }
 0x591   :  { %v4630_v10 = vadd.f32 %v4629_v1, %v4628_v41  ;;  %v4826_v27 = vadd.f32 %v4825_v47, %v4824_v23  ;;  %v12016_v61 = vpop.f32.mrf.mxu0 }
 0x592   :  { %14643 = vst [vmem:[#allocation13_spill] sm:$0xff] %v12016_v61  ;;  %v4827_v43 = vsel %vm540_vm0, %v4726_v19, 0.0  ;;  %v4729_v11 = vmul.f32 %v12016_v61, %v12016_v61  ;;  %v4635_v51 = vsel %vm540_vm0, %v12016_v61, 0.0 }
 0x593   :  { %v4828_v20 = vadd.f32 %v4827_v43, %v4826_v27  ;;  %v12021_v34 = vpop.f32.mrf.mxu0  ;;  %v4632_v12 = vadd.f32 %v4631_v58, %v4630_v10 }
 0x594   :  { %14644 = vst [vmem:[#allocation14_spill] sm:$0xff] %v12021_v34  ;;  %v4633_v8 = vsel %vm540_vm0, %v12021_v34, 0.0  ;;  %v4728_v31 = vmul.f32 %v12021_v34, %v12021_v34  ;;  %v4833_v47 = vsel %vm540_vm0, %v4729_v11, 0.0 }
 0x595   :  { %v4634_v44 = vadd.f32 %v4633_v8, %v4632_v12  ;;  %v4830_v33 = vadd.f32 %v4829_v14, %v4828_v20  ;;  %v12030_v52 = vpop.f32.mrf.mxu0 }
 0x596   :  { %14645 = vst [vmem:[#allocation7_spill] sm:$0xff] %v12030_v52  ;;  %v4831_v3 = vsel %vm540_vm0, %v4728_v31, 0.0  ;;  %v4731_v53 = vmul.f32 %v12030_v52, %v12030_v52  ;;  %v4639_v43 = vsel %vm540_vm0, %v12030_v52, 0.0 }
 0x597   :  { %v4832_v4 = vadd.f32 %v4831_v3, %v4830_v33  ;;  %v12035_v23 = vpop.f32.mrf.mxu0  ;;  %v4636_v41 = vadd.f32 %v4635_v51, %v4634_v44 }
 0x598   :  { %14646 = vst [vmem:[#allocation8_spill] sm:$0xff] %v12035_v23  ;;  %v4637_v1 = vsel %vm540_vm0, %v12035_v23, 0.0  ;;  %v4730_v19 = vmul.f32 %v12035_v23, %v12035_v23  ;;  %v4837_v8 = vsel %vm540_vm0, %v4731_v53, 0.0 }
 0x599   :  { %v4638_v10 = vadd.f32 %v4637_v1, %v4636_v41  ;;  %v4834_v27 = vadd.f32 %v4833_v47, %v4832_v4  ;;  %v12044_v58 = vpop.f32.mrf.mxu0 }
 0x59a   :  { %14647 = vst [vmem:[#allocation9_spill] sm:$0xff] %v12044_v58  ;;  %v4835_v20 = vsel %vm540_vm0, %v4730_v19, 0.0  ;;  %v4733_v31 = vmul.f32 %v12044_v58, %v12044_v58  ;;  %v4643_v41 = vsel %vm540_vm0, %v12044_v58, 0.0 }
 0x59b   :  { %v4836_v12 = vadd.f32 %v4835_v20, %v4834_v27  ;;  %v12049_v14 = vpop.f32.mrf.mxu0  ;;  %v4640_v11 = vadd.f32 %v4639_v43, %v4638_v10 }
 0x59c   :  { %14648 = vst [vmem:[#allocation10_spill] sm:$0xff] %v12049_v14  ;;  %v4641_v44 = vsel %vm540_vm0, %v12049_v14, 0.0  ;;  %v4732_v33 = vmul.f32 %v12049_v14, %v12049_v14  ;;  %v4841_v10 = vsel %vm540_vm0, %v4733_v31, 0.0 }
 0x59d   :  { %v4642_v51 = vadd.f32 %v4641_v44, %v4640_v11  ;;  %v4838_v3 = vadd.f32 %v4837_v8, %v4836_v12  ;;  %v12058_v4 = vpop.f32.mrf.mxu0 }
 0x59e   :  { %14649 = vst [vmem:[#allocation11_spill] sm:$0xff] %v12058_v4  ;;  %v4839_v47 = vsel %vm540_vm0, %v4732_v33, 0.0  ;;  %v4735_v27 = vmul.f32 %v12058_v4, %v12058_v4  ;;  %v4647_v44 = vsel %vm540_vm0, %v12058_v4, 0.0 }
 0x59f   :  { %v4840_v1 = vadd.f32 %v4839_v47, %v4838_v3  ;;  %v12063_v53 = vpop.f32.mrf.mxu0  ;;  %v4644_v19 = vadd.f32 %v4643_v41, %v4642_v51 }
 0x5a0   :  { %14650 = vst [vmem:[#allocation15_spill] sm:$0xff] %v12063_v53  ;;  %v4645_v43 = vsel %vm540_vm0, %v12063_v53, 0.0  ;;  %v4734_v20 = vmul.f32 %v12063_v53, %v12063_v53  ;;  %v4845_v41 = vsel %vm540_vm0, %v4735_v27, 0.0 }
 0x5a1   :  { %v4646_v12 = vadd.f32 %v4645_v43, %v4644_v19  ;;  %v4842_v11 = vadd.f32 %v4841_v10, %v4840_v1  ;;  %v12072_v8 = vpop.f32.mrf.mxu0 }
 0x5a2   :  { %14651 = vst [vmem:[#allocation16_spill] sm:$0xff] %v12072_v8  ;;  %v4843_v33 = vsel %vm540_vm0, %v4734_v20, 0.0  ;;  %v4737_v47 = vmul.f32 %v12072_v8, %v12072_v8  ;;  %v4651_v20 = vsel %vm540_vm0, %v12072_v8, 0.0 }
 0x5a3   :  { %v4844_v51 = vadd.f32 %v4843_v33, %v4842_v11  ;;  %v12077_v31 = vpop.f32.mrf.mxu0  ;;  %v4648_v3 = vadd.f32 %v4647_v44, %v4646_v12 }
 0x5a4   :  { %14652 = vst [vmem:[#allocation17_spill] sm:$0xff] %v12077_v31  ;;  %v4649_v19 = vsel %vm540_vm0, %v12077_v31, 0.0  ;;  %v4736_v1 = vmul.f32 %v12077_v31, %v12077_v31  ;;  %v4849_v33 = vsel %vm540_vm0, %v4737_v47, 0.0 }
 0x5a5   :  { %v4650_v10 = vadd.f32 %v4649_v19, %v4648_v3  ;;  %v4846_v43 = vadd.f32 %v4845_v41, %v4844_v51  ;;  %v12086_v4 = vpop.f32.mrf.mxu0 }
 0x5a6   :  { %14653 = vst [vmem:[#allocation18_spill] sm:$0xff] %v12086_v4  ;;  %v4847_v12 = vsel %vm540_vm0, %v4736_v1, 0.0  ;;  %v4739_v53 = vmul.f32 %v12086_v4, %v12086_v4  ;;  %v4655_v1 = vsel %vm540_vm0, %v12086_v4, 0.0 }
 0x5a7   :  { %v4848_v11 = vadd.f32 %v4847_v12, %v4846_v43  ;;  %v12091_v27 = vpop.f32.mrf.mxu0  ;;  %v4652_v44 = vadd.f32 %v4651_v20, %v4650_v10 }
 0x5a8   :  { %14654 = vst [vmem:[#allocation19_spill] sm:$0xff] %v12091_v27  ;;  %v4653_v3 = vsel %vm540_vm0, %v12091_v27, 0.0  ;;  %v4738_v51 = vmul.f32 %v12091_v27, %v12091_v27  ;;  %v4853_v12 = vsel %vm540_vm0, %v4739_v53, 0.0 }
 0x5a9   :  { %v4654_v41 = vadd.f32 %v4653_v3, %v4652_v44  ;;  %v4850_v19 = vadd.f32 %v4849_v33, %v4848_v11  ;;  %v12100_v8 = vpop.f32.mrf.mxu0 }
 0x5aa   :  { %14655 = vst [vmem:[#allocation20_spill] sm:$0xff] %v12100_v8  ;;  %v4851_v10 = vsel %vm540_vm0, %v4738_v51, 0.0  ;;  %v4741_v31 = vmul.f32 %v12100_v8, %v12100_v8  ;;  %v4659_v51 = vsel %vm540_vm0, %v12100_v8, 0.0 }
 0x5ab   :  { %v4852_v43 = vadd.f32 %v4851_v10, %v4850_v19  ;;  %v12105_v47 = vpop.f32.mrf.mxu0  ;;  %v4656_v20 = vadd.f32 %v4655_v1, %v4654_v41 }
 0x5ac   :  { %14656 = vst [vmem:[#allocation21_spill] sm:$0xff] %v12105_v47  ;;  %v4657_v44 = vsel %vm540_vm0, %v12105_v47, 0.0  ;;  %v4740_v11 = vmul.f32 %v12105_v47, %v12105_v47  ;;  %v4857_v10 = vsel %vm540_vm0, %v4741_v31, 0.0 }
 0x5ad   :  { %v4658_v33 = vadd.f32 %v4657_v44, %v4656_v20  ;;  %v4854_v3 = vadd.f32 %v4853_v12, %v4852_v43  ;;  %v12114_v4 = vpop.f32.mrf.mxu0 }
 0x5ae   :  { %14657 = vst [vmem:[#allocation22_spill] sm:$0xff] %v12114_v4  ;;  %v4855_v41 = vsel %vm540_vm0, %v4740_v11, 0.0  ;;  %v4743_v27 = vmul.f32 %v12114_v4, %v12114_v4  ;;  %v4663_v11 = vsel %vm540_vm0, %v12114_v4, 0.0 }
 0x5af   :  { %v4856_v19 = vadd.f32 %v4855_v41, %v4854_v3  ;;  %v12119_v53 = vpop.f32.mrf.mxu0  ;;  %v4660_v1 = vadd.f32 %v4659_v51, %v4658_v33 }
 0x5b0   :  { %14658 = vst [vmem:[#allocation23_spill] sm:$0xff] %v12119_v53  ;;  %v4661_v20 = vsel %vm540_vm0, %v12119_v53, 0.0  ;;  %v4742_v43 = vmul.f32 %v12119_v53, %v12119_v53  ;;  %v4861_v41 = vsel %vm540_vm0, %v4743_v27, 0.0 }
 0x5b1   :  { %v4662_v12 = vadd.f32 %v4661_v20, %v4660_v1  ;;  %v4858_v44 = vadd.f32 %v4857_v10, %v4856_v19  ;;  %v12128_v8 = vpop.f32.mrf.mxu0 }
 0x5b2   :  { %14659 = vst [vmem:[#allocation24_spill] sm:$0xff] %v12128_v8  ;;  %v4859_v33 = vsel %vm540_vm0, %v4742_v43, 0.0  ;;  %v4745_v47 = vmul.f32 %v12128_v8, %v12128_v8  ;;  %v4667_v43 = vsel %vm540_vm0, %v12128_v8, 0.0 }
 0x5b3   :  { %v4860_v3 = vadd.f32 %v4859_v33, %v4858_v44  ;;  %v12133_v31 = vpop.f32.mrf.mxu0  ;;  %v4664_v51 = vadd.f32 %v4663_v11, %v4662_v12 }
 0x5b4   :  { %14660 = vst [vmem:[#allocation25_spill] sm:$0xff] %v12133_v31  ;;  %v4665_v1 = vsel %vm540_vm0, %v12133_v31, 0.0  ;;  %v4744_v19 = vmul.f32 %v12133_v31, %v12133_v31  ;;  %v4865_v33 = vsel %vm540_vm0, %v4745_v47, 0.0 }
 0x5b5   :  { %v4666_v10 = vadd.f32 %v4665_v1, %v4664_v51  ;;  %v4862_v20 = vadd.f32 %v4861_v41, %v4860_v3  ;;  %v12142_v4 = vpop.f32.mrf.mxu0 }
 0x5b6   :  { %14661 = vst [vmem:[#allocation26_spill] sm:$0xff] %v12142_v4  ;;  %v4863_v12 = vsel %vm540_vm0, %v4744_v19, 0.0  ;;  %v4747_v53 = vmul.f32 %v12142_v4, %v12142_v4  ;;  %v4671_v19 = vsel %vm540_vm0, %v12142_v4, 0.0 }
 0x5b7   :  { %v4864_v44 = vadd.f32 %v4863_v12, %v4862_v20  ;;  %v12147_v27 = vpop.f32.mrf.mxu0  ;;  %v4668_v11 = vadd.f32 %v4667_v43, %v4666_v10 }
 0x5b8   :  { %14662 = vst [vmem:[#allocation27_spill] sm:$0xff] %v12147_v27  ;;  %v4669_v51 = vsel %vm540_vm0, %v12147_v27, 0.0  ;;  %v4746_v3 = vmul.f32 %v12147_v27, %v12147_v27  ;;  %v4869_v12 = vsel %vm540_vm0, %v4747_v53, 0.0 }
 0x5b9   :  { %v4670_v41 = vadd.f32 %v4669_v51, %v4668_v11  ;;  %v4866_v1 = vadd.f32 %v4865_v33, %v4864_v44  ;;  %v12156_v8 = vpop.f32.mrf.mxu0 }
 0x5ba   :  { %14663 = vst [vmem:[#allocation28_spill] sm:$0xff] %v12156_v8  ;;  %v4867_v10 = vsel %vm540_vm0, %v4746_v3, 0.0  ;;  %v4749_v31 = vmul.f32 %v12156_v8, %v12156_v8  ;;  %v4675_v3 = vsel %vm540_vm0, %v12156_v8, 0.0 }
 0x5bb   :  { %v4868_v20 = vadd.f32 %v4867_v10, %v4866_v1  ;;  %v12161_v47 = vpop.f32.mrf.mxu0  ;;  %v4672_v43 = vadd.f32 %v4671_v19, %v4670_v41 }
 0x5bc   :  { %14664 = vst [vmem:[#allocation29_spill] sm:$0xff] %v12161_v47  ;;  %v4673_v11 = vsel %vm540_vm0, %v12161_v47, 0.0  ;;  %v4748_v44 = vmul.f32 %v12161_v47, %v12161_v47  ;;  %v4873_v10 = vsel %vm540_vm0, %v4749_v31, 0.0 }
 0x5bd   :  { %v4674_v33 = vadd.f32 %v4673_v11, %v4672_v43  ;;  %v4870_v51 = vadd.f32 %v4869_v12, %v4868_v20  ;;  %v12170_v4 = vpop.f32.mrf.mxu0 }
 0x5be   :  { %14665 = vst [vmem:[#allocation30_spill] sm:$0xff] %v12170_v4  ;;  %v4871_v41 = vsel %vm540_vm0, %v4748_v44, 0.0  ;;  %v4751_v27 = vmul.f32 %v12170_v4, %v12170_v4  ;;  %v4679_v12 = vsel %vm540_vm0, %v12170_v4, 0.0 }
 0x5bf   :  { %v4872_v1 = vadd.f32 %v4871_v41, %v4870_v51  ;;  %v4545_v53 = vpop.f32.mrf.mxu0  ;;  %v4676_v19 = vadd.f32 %v4675_v3, %v4674_v33 }
 0x5c0   :  { %v4677_v58 = vsel %vm540_vm0, %v4545_v53, 0.0  ;;  %v4750_v47 = vmul.f32 %v4545_v53, %v4545_v53  ;;  %v4877_v51 = vsel %vm540_vm0, %v4751_v27, 0.0  ;;  %v4896_v27 = vlaneseq }
 0x5c1   :  { %v4678_v43 = vadd.f32 %v4677_v58, %v4676_v19  ;;  %v4874_v20 = vadd.f32 %v4873_v10, %v4872_v1 }
 0x5c2   :  { %v4875_v11 = vsel %vm540_vm0, %v4750_v47, 0.0 }
 0x5c3   :  { %v4680_v8 = vadd.f32 %v4679_v12, %v4678_v43  ;;  %v4876_v44 = vadd.f32 %v4875_v11, %v4874_v20  ;;  %v4897_v12 = vshrl.u32 %v4896_v27, 7 }
 0x5c5   :  { %v4681_v33 = vrot.slane %v4680_v8, 4  ;;  %v4878_v3 = vadd.f32 %v4877_v51, %v4876_v44  ;;  %v4898_v11 = vsub.s32 0, %v4897_v12  ;;  %v14672_v12 = vld [vmem:[#allocation9_spill] sm:$0xff] }
 0x5c7   :  { %v4682_v31 = vadd.f32 %v4681_v33, %v4680_v8  ;;  %v4879_v41 = vrot.slane %v4878_v3, 4  ;;  %v4886_v8 = vld [vmem:[%s14567_s2] sm:$0x1]  ;;  %s9336_s2 = smov 40  }
 0x5c9   :  { %v4683_v14 = vrot.slane %v4682_v31, 2  ;;  %v4880_v52 = vadd.f32 %v4879_v41, %v4878_v3 }
 0x5cb   :  { %v4684_v23 = vadd.f32 %v4683_v14, %v4682_v31  ;;  %v4881_v61 = vrot.slane %v4880_v52, 2 }
 0x5cd   :  { %v4685_v34 = vrot.slane %v4684_v23, 1  ;;  %v4882_v58 = vadd.f32 %v4881_v61, %v4880_v52  ;;  %v4892_v61 = vld [vmem:[%s14568_s3] sm:$0x1]  ;;  %s9337_s3 = smov 48  }
 0x5cf   :  { %v4686_v1 = vadd.f32 %v4685_v34, %v4684_v23  ;;  %v4883_v19 = vrot.slane %v4882_v58, 1 }
 0x5d1   :  { %v4687_v10 = vmul.f32 0.001953125, %v4686_v1  ;;  %v4884_v4 = vadd.f32 %v4883_v19, %v4882_v58  ;;  %v14666_v1 = vld [vmem:[#allocation12_spill] sm:$0xff]  ;;  %v14667_v19 = vld [vmem:[#allocation14_spill] sm:$0xff] }
 0x5d3   :  { %v4885_v49 = vmul.f32 0.001953125, %v4884_v4  ;;  %v4887_v47 = vmul.f32 %v4687_v10, %v4687_v10 }
 0x5d5   :  { %v4888_v43 = vsub.f32 %v4885_v49, %v4887_v47  ;;  %v14669_v47 = vld [vmem:[#allocation8_spill] sm:$0xff] }
 0x5d7   :  { %v4889_v20 = vadd.f32 1e-05, %v4888_v43  ;;  %v14670_v43 = vld [vmem:[#allocation7_spill] sm:$0xff] }
 0x5d9   :  { %9299 = vrsqrt.f32 %v4889_v20  ;;  %v14671_v20 = vld [vmem:[#allocation10_spill] sm:$0xff] }
 0x5e6   :  { %v9300_v14 = vpop.eup %9299 }
 0x5e7   :  { %v4891_v44 = vmul.f32 %v9300_v14, %v4886_v8 }
 0x5e9   :  { %v4893_v34 = vmul.f32 %v4891_v44, %v4687_v10  ;;  %v12189_v52 = vrot.slane %v4891_v44, %v4898_v11  ;;  %v14668_v10 = vld [vmem:[#allocation13_spill] sm:$0xff]  ;;  %v14674_v44 = vld [vmem:[#allocation11_spill] sm:$0xff] }
 0x5eb   :  { %v4894_v23 = vsub.f32 %v4892_v61, %v4893_v34  ;;  %v4963_v49 = vmul.f32 %v12189_v52, %v4545_v53  ;;  %v12194_v4 = vmul.f32 %v12189_v52, %v11740_v16  ;;  %v12198_v51 = vmul.f32 %v11738_v39, %v12189_v52  ;;  %v14675_v34 = vld [vmem:[#allocation17_spill] sm:$0xff] }
 0x5ec   :  { %v12202_v33 = vmul.f32 %v12189_v52, %v11753_v35  ;;  %v12206_v3 = vmul.f32 %v11748_v24, %v12189_v52  ;;  %v12210_v31 = vmul.f32 %v12189_v52, %v11767_v9  ;;  %v12214_v16 = vmul.f32 %v11762_v48, %v12189_v52 }
 0x5ed   :  { %v12216_v53 = vrot.slane %v4894_v23, %v4898_v11  ;;  %v12220_v39 = vmul.f32 %v12189_v52, %v11781_v37  ;;  %v12224_v35 = vmul.f32 %v11776_v38, %v12189_v52  ;;  %v12228_v24 = vmul.f32 %v12189_v52, %v11795_v26  ;;  %v14673_v11 = vld [vmem:[#allocation15_spill] sm:$0xff] }
 0x5ee   :  { %v12232_v9 = vmul.f32 %v11790_v6, %v12189_v52  ;;  %v12236_v48 = vmul.f32 %v12189_v52, %v11809_v0  ;;  %v12240_v37 = vmul.f32 %v11804_v62, %v12189_v52  ;;  %v12244_v38 = vmul.f32 %v12189_v52, %v11823_v29 }
 0x5ef   :  { %v5033_v41 = vadd.f32 %v12216_v53, %v4963_v49  ;;  %v12249_v26 = vmul.f32 %v11818_v7, %v12189_v52  ;;  %v12253_v6 = vmul.f32 %v12189_v52, %v11837_v2  ;;  %v12257_v0 = vmul.f32 %v11832_v59, %v12189_v52  ;;  %v14676_v49 = vld [vmem:[#allocation16_spill] sm:$0xff] }
 0x5f0   :  { %v12261_v62 = vmul.f32 %v12189_v52, %v11851_v63  ;;  %v12265_v29 = vmul.f32 %v11846_v40, %v12189_v52  ;;  %v12269_v7 = vmul.f32 %v12189_v52, %v11865_v50  ;;  %v12273_v2 = vmul.f32 %v11860_v15, %v12189_v52 }
 0x5f1   :  { %v5097_v58 = vmax.f32 %v5033_v41, 0.0  ;;  %v12277_v59 = vmul.f32 %v12189_v52, %v11879_v17  ;;  %v12281_v63 = vmul.f32 %v11874_v56, %v12189_v52  ;;  %v12285_v40 = vmul.f32 %v12189_v52, %v11893_v60 }
 0x5f2   :  { %v12289_v50 = vmul.f32 %v11888_v42, %v12189_v52  ;;  %v12293_v15 = vmul.f32 %v12189_v52, %v11907_v57  ;;  %v12297_v17 = vmul.f32 %v11902_v55, %v12189_v52  ;;  %v12301_v56 = vmul.f32 %v12189_v52, %v11921_v5 }
 0x5f3   :  { %v12305_v60 = vmul.f32 %v11916_v21, %v12189_v52  ;;  %v12309_v42 = vmul.f32 %v12189_v52, %v11935_v36  ;;  %v12313_v57 = vmul.f32 %v11930_v18, %v12189_v52  ;;  %v12317_v55 = vmul.f32 %v12189_v52, %v11950_v45  ;;  %5161 = vst.msk [vmem:[#allocation2 + $0x331] sm:$0xff] %vm540_vm0, %v5097_v58  ;;  %v14677_v58 = vld [vmem:[#allocation19_spill] sm:$0xff] }
 0x5f4   :  { %v12322_v5 = vmul.f32 %v11945_v25, %v12189_v52  ;;  %v12326_v21 = vmul.f32 %v12189_v52, %v11964_v22  ;;  %v12330_v36 = vmul.f32 %v11959_v46, %v12189_v52  ;;  %v12334_v18 = vmul.f32 %v12189_v52, %v11978_v54 }
 0x5f5   :  { %v12338_v45 = vmul.f32 %v11973_v30, %v12189_v52  ;;  %v12342_v25 = vmul.f32 %v12189_v52, %v11992_v13  ;;  %v12346_v22 = vmul.f32 %v11987_v28, %v12189_v52  ;;  %v12350_v46 = vmul.f32 %v12189_v52, %v12007_v32 }
 0x5f6   :  { %v12354_v54 = vmul.f32 %v14666_v1, %v12189_v52  ;;  %v12358_v30 = vmul.f32 %v12189_v52, %v14667_v19  ;;  %v12362_v13 = vmul.f32 %v14668_v10, %v12189_v52  ;;  %v12366_v28 = vmul.f32 %v12189_v52, %v14669_v47  ;;  %v14678_v19 = vld [vmem:[#allocation18_spill] sm:$0xff]  ;;  %v14680_v47 = vld [vmem:[#allocation21_spill] sm:$0xff] }
 0x5f7   :  { %v12370_v32 = vmul.f32 %v14670_v43, %v12189_v52  ;;  %v12374_v27 = vmul.f32 %v12189_v52, %v14671_v20  ;;  %v12378_v8 = vmul.f32 %v14672_v12, %v12189_v52  ;;  %v12382_v14 = vmul.f32 %v12189_v52, %v14673_v11  ;;  %v14682_v20 = vld [vmem:[#allocation20_spill] sm:$0xff]  ;;  %v14684_v11 = vld [vmem:[#allocation23_spill] sm:$0xff] }
 0x5f8   :  { %v12386_v61 = vmul.f32 %v14674_v44, %v12189_v52  ;;  %v12390_v23 = vmul.f32 %v12189_v52, %v14675_v34  ;;  %v12394_v41 = vmul.f32 %v14676_v49, %v12189_v52  ;;  %v12398_v1 = vmul.f32 %v12189_v52, %v14677_v58  ;;  %v14686_v34 = vld [vmem:[#allocation22_spill] sm:$0xff]  ;;  %v14688_v58 = vld [vmem:[#allocation25_spill] sm:$0xff] }
 0x5f9   :  { %v12402_v10 = vmul.f32 %v14678_v19, %v12189_v52  ;;  %v12406_v43 = vmul.f32 %v12189_v52, %v14680_v47  ;;  %v12410_v12 = vmul.f32 %v14682_v20, %v12189_v52  ;;  %v12414_v44 = vmul.f32 %v12189_v52, %v14684_v11 }
 0x5fa   :  { %v12418_v49 = vmul.f32 %v14686_v34, %v12189_v52  ;;  %v12422_v19 = vmul.f32 %v12189_v52, %v14688_v58 }
 0x5fb   :  { %14679 = vst [vmem:[#allocation12_spill] sm:$0xff] %v12402_v10  ;;  %14681 = vst [vmem:[#allocation14_spill] sm:$0xff] %v12406_v43  ;;  %v14690_v10 = vld [vmem:[#allocation24_spill] sm:$0xff]  ;;  %v14691_v43 = vld [vmem:[#allocation27_spill] sm:$0xff] }
 0x5fc   :  { %14683 = vst [vmem:[#allocation13_spill] sm:$0xff] %v12410_v12  ;;  %14685 = vst [vmem:[#allocation8_spill] sm:$0xff] %v12414_v44  ;;  %v12426_v47 = vmul.f32 %v14690_v10, %v12189_v52  ;;  %v12430_v20 = vmul.f32 %v12189_v52, %v14691_v43  ;;  %v14692_v12 = vld [vmem:[#allocation26_spill] sm:$0xff]  ;;  %v14693_v44 = vld [vmem:[#allocation29_spill] sm:$0xff]  ;;  %v12450_v43 = vadd.f32 %v12216_v53, %v12194_v4 }
 0x5fd   :  { %14687 = vst [vmem:[#allocation7_spill] sm:$0xff] %v12418_v49  ;;  %14689 = vst [vmem:[#allocation10_spill] sm:$0xff] %v12422_v19  ;;  %v12434_v11 = vmul.f32 %v14692_v12, %v12189_v52  ;;  %v12438_v34 = vmul.f32 %v12189_v52, %v14693_v44  ;;  %v14694_v49 = vld [vmem:[#allocation28_spill] sm:$0xff]  ;;  %v14695_v19 = vld [vmem:[#allocation30_spill] sm:$0xff]  ;;  %v12454_v12 = vadd.f32 %v12216_v53, %v12198_v51 }
 0x5fe   :  { %v12442_v58 = vmul.f32 %v14694_v49, %v12189_v52  ;;  %v12446_v10 = vmul.f32 %v14695_v19, %v12189_v52  ;;  %v12458_v44 = vadd.f32 %v12216_v53, %v12202_v33  ;;  %v12462_v49 = vadd.f32 %v12216_v53, %v12206_v3  ;;  %v5164_v19 = vld [vmem:[#allocation2 + $0x8] sm:$0xff] }
 0x5ff   :  { %v12466_v52 = vadd.f32 %v12216_v53, %v12210_v31  ;;  %v12470_v4 = vadd.f32 %v12216_v53, %v12214_v16  ;;  %v12474_v51 = vadd.f32 %v12216_v53, %v12220_v39  ;;  %v12478_v33 = vadd.f32 %v12216_v53, %v12224_v35  ;;  %5228 = vst.msk [vmem:[#allocation3 + $0x8] sm:$0xff] %vm540_vm0, %v5164_v19 }
 0x600   :  { %v12482_v3 = vadd.f32 %v12216_v53, %v12228_v24  ;;  %v12486_v31 = vadd.f32 %v12216_v53, %v12232_v9  ;;  %v12490_v16 = vadd.f32 %v12216_v53, %v12236_v48  ;;  %v12494_v39 = vadd.f32 %v12216_v53, %v12240_v37 }
 0x601   :  { %v12498_v35 = vadd.f32 %v12216_v53, %v12244_v38  ;;  %v12502_v24 = vadd.f32 %v12216_v53, %v12249_v26  ;;  %v12506_v9 = vadd.f32 %v12216_v53, %v12253_v6  ;;  %v12510_v48 = vadd.f32 %v12216_v53, %v12257_v0 }
 0x602   :  { %v12514_v37 = vadd.f32 %v12216_v53, %v12261_v62  ;;  %v12518_v38 = vadd.f32 %v12216_v53, %v12265_v29  ;;  %v12522_v26 = vadd.f32 %v12216_v53, %v12269_v7  ;;  %v12526_v6 = vadd.f32 %v12216_v53, %v12273_v2  ;;  %v14702_v19 = vld [vmem:[#allocation14_spill] sm:$0xff] }
 0x603   :  { %v12530_v0 = vadd.f32 %v12216_v53, %v12277_v59  ;;  %v12534_v62 = vadd.f32 %v12216_v53, %v12281_v63  ;;  %v12538_v29 = vadd.f32 %v12216_v53, %v12285_v40  ;;  %v12542_v7 = vadd.f32 %v12216_v53, %v12289_v50 }
 0x604   :  { %v12546_v2 = vadd.f32 %v12216_v53, %v12293_v15  ;;  %v12550_v59 = vadd.f32 %v12216_v53, %v12297_v17  ;;  %v12554_v63 = vadd.f32 %v12216_v53, %v12301_v56  ;;  %v12558_v40 = vadd.f32 %v12216_v53, %v12305_v60 }
 0x605   :  { %14696 = vst [vmem:[#allocation9_spill] sm:$0xff] %v12538_v29  ;;  %v5163_v29 = vld [vmem:[#allocation2] sm:$0xff]  ;;  %v12562_v50 = vadd.f32 %v12216_v53, %v12309_v42  ;;  %v12566_v15 = vadd.f32 %v12216_v53, %v12313_v57  ;;  %v12570_v17 = vadd.f32 %v12216_v53, %v12317_v55  ;;  %v12574_v56 = vadd.f32 %v12216_v53, %v12322_v5 }
 0x606   :  { %5227 = vst.msk [vmem:[#allocation3] sm:$0xff] %vm540_vm0, %v5163_v29  ;;  %v12580_v60 = vadd.f32 %v12216_v53, %v12326_v21  ;;  %v12584_v42 = vadd.f32 %v12216_v53, %v12330_v36  ;;  %v12588_v57 = vadd.f32 %v12216_v53, %v12334_v18  ;;  %v12592_v55 = vadd.f32 %v12216_v53, %v12338_v45  ;;  %v14701_v29 = vld [vmem:[#allocation12_spill] sm:$0xff] }
 0x607   :  { %v12596_v5 = vadd.f32 %v12216_v53, %v12342_v25  ;;  %v12600_v21 = vadd.f32 %v12216_v53, %v12346_v22  ;;  %v12604_v36 = vadd.f32 %v12216_v53, %v12350_v46  ;;  %v12608_v18 = vadd.f32 %v12216_v53, %v12354_v54 }
 0x608   :  { %v12612_v45 = vadd.f32 %v12216_v53, %v12358_v30  ;;  %v12616_v25 = vadd.f32 %v12216_v53, %v12362_v13  ;;  %v12620_v22 = vadd.f32 %v12216_v53, %v12366_v28  ;;  %v12624_v46 = vadd.f32 %v12216_v53, %v12370_v32 }
 0x609   :  { %v12628_v54 = vadd.f32 %v12216_v53, %v12374_v27  ;;  %v12632_v30 = vadd.f32 %v12216_v53, %v12378_v8  ;;  %v12636_v13 = vadd.f32 %v12216_v53, %v12382_v14  ;;  %v12640_v28 = vadd.f32 %v12216_v53, %v12386_v61 }
 0x60a   :  { %v12644_v32 = vadd.f32 %v12216_v53, %v12390_v23  ;;  %v12648_v27 = vadd.f32 %v12216_v53, %v12394_v41  ;;  %v12652_v8 = vadd.f32 %v12216_v53, %v12398_v1  ;;  %v12656_v14 = vadd.f32 %v12216_v53, %v14701_v29 }
 0x60b   :  { %14697 = vst [vmem:[#allocation15_spill] sm:$0xff] %v12640_v28  ;;  %v12660_v61 = vadd.f32 %v12216_v53, %v14702_v19  ;;  %v14703_v28 = vld [vmem:[#allocation13_spill] sm:$0xff]  ;;  %v12680_v19 = vadd.f32 %v12216_v53, %v12426_v47  ;;  %v12700_v47 = vadd.f32 %v12216_v53, %v12446_v10  ;;  %v5045_v10 = vmax.f32 %v12490_v16, 0.0 }
 0x60c   :  { %14698 = vst [vmem:[#allocation11_spill] sm:$0xff] %v12644_v32  ;;  %14699 = vst [vmem:[#allocation17_spill] sm:$0xff] %v12648_v27  ;;  %v12664_v23 = vadd.f32 %v12216_v53, %v14703_v28  ;;  %v14704_v32 = vld [vmem:[#allocation8_spill] sm:$0xff]  ;;  %v14705_v27 = vld [vmem:[#allocation7_spill] sm:$0xff]  ;;  %v12684_v28 = vadd.f32 %v12216_v53, %v12430_v20  ;;  %v5036_v20 = vmax.f32 %v12454_v12, 0.0  ;;  %v5047_v12 = vmax.f32 %v12498_v35, 0.0 }
 0x60d   :  { %14700 = vst [vmem:[#allocation16_spill] sm:$0xff] %v12652_v8  ;;  %v12668_v41 = vadd.f32 %v12216_v53, %v14704_v32  ;;  %v12672_v1 = vadd.f32 %v12216_v53, %v14705_v27  ;;  %v14706_v8 = vld [vmem:[#allocation10_spill] sm:$0xff]  ;;  %14707 = vst [vmem:[#allocation19_spill] sm:$0xff] %v12680_v19  ;;  %v12688_v32 = vadd.f32 %v12216_v53, %v12434_v11  ;;  %v5035_v19 = vmax.f32 %v12450_v43, 0.0 }
 0x60e   :  { %v12676_v29 = vadd.f32 %v12216_v53, %v14706_v8  ;;  %14708 = vst [vmem:[#allocation18_spill] sm:$0xff] %v12684_v28  ;;  %v12692_v27 = vadd.f32 %v12216_v53, %v12438_v34  ;;  %v12696_v8 = vadd.f32 %v12216_v53, %v12442_v58  ;;  %v5037_v28 = vmax.f32 %v12458_v44, 0.0  ;;  %5100 = vst.msk [vmem:[#allocation2 + $0x21] sm:$0xff] %vm540_vm0, %v5036_v20 }
 0x60f   :  { %14709 = vst [vmem:[#allocation21_spill] sm:$0xff] %v12688_v32  ;;  %v5038_v11 = vmax.f32 %v12462_v49, 0.0  ;;  %v5039_v32 = vmax.f32 %v12466_v52, 0.0  ;;  %v5040_v34 = vmax.f32 %v12470_v4, 0.0  ;;  %v5042_v58 = vmax.f32 %v12478_v33, 0.0  ;;  %5099 = vst.msk [vmem:[#allocation2 + $0x19] sm:$0xff] %vm540_vm0, %v5035_v19 }
 0x610   :  { %14710 = vst [vmem:[#allocation20_spill] sm:$0xff] %v12692_v27  ;;  %14711 = vst [vmem:[#allocation23_spill] sm:$0xff] %v12696_v8  ;;  %v5041_v27 = vmax.f32 %v12474_v51, 0.0  ;;  %v5043_v8 = vmax.f32 %v12482_v3, 0.0  ;;  %v5044_v53 = vmax.f32 %v12486_v31, 0.0  ;;  %v5046_v43 = vmax.f32 %v12494_v39, 0.0 }
 0x611   :  { %5101 = vst.msk [vmem:[#allocation2 + $0x31] sm:$0xff] %vm540_vm0, %v5037_v28  ;;  %5102 = vst.msk [vmem:[#allocation2 + $0x39] sm:$0xff] %vm540_vm0, %v5038_v11  ;;  %v5048_v44 = vmax.f32 %v12502_v24, 0.0  ;;  %v5049_v49 = vmax.f32 %v12506_v9, 0.0  ;;  %v5050_v52 = vmax.f32 %v12510_v48, 0.0  ;;  %v5051_v4 = vmax.f32 %v12514_v37, 0.0 }
 0x612   :  { %5103 = vst.msk [vmem:[#allocation2 + $0x49] sm:$0xff] %vm540_vm0, %v5039_v32  ;;  %5104 = vst.msk [vmem:[#allocation2 + $0x51] sm:$0xff] %vm540_vm0, %v5040_v34  ;;  %v5052_v51 = vmax.f32 %v12518_v38, 0.0  ;;  %v5053_v33 = vmax.f32 %v12522_v26, 0.0  ;;  %v5054_v3 = vmax.f32 %v12526_v6, 0.0  ;;  %v5055_v31 = vmax.f32 %v12530_v0, 0.0 }
 0x613   :  { %5105 = vst.msk [vmem:[#allocation2 + $0x61] sm:$0xff] %vm540_vm0, %v5041_v27  ;;  %5106 = vst.msk [vmem:[#allocation2 + $0x69] sm:$0xff] %vm540_vm0, %v5042_v58  ;;  %v5056_v16 = vmax.f32 %v12534_v62, 0.0  ;;  %v14712_v39 = vld [vmem:[#allocation9_spill] sm:$0xff]  ;;  %v5058_v24 = vmax.f32 %v12542_v7, 0.0  ;;  %v5059_v9 = vmax.f32 %v12546_v2, 0.0 }
 0x614   :  { %5107 = vst.msk [vmem:[#allocation2 + $0x79] sm:$0xff] %vm540_vm0, %v5043_v8  ;;  %5108 = vst.msk [vmem:[#allocation2 + $0x81] sm:$0xff] %vm540_vm0, %v5044_v53  ;;  %v5057_v35 = vmax.f32 %v14712_v39, 0.0  ;;  %v5060_v48 = vmax.f32 %v12550_v59, 0.0  ;;  %v5061_v37 = vmax.f32 %v12554_v63, 0.0  ;;  %v5062_v38 = vmax.f32 %v12558_v40, 0.0  ;;  %v5420_v53 = vpop.permute.xlu0 %5419 }
 0x615   :  { %5109 = vst.msk [vmem:[#allocation2 + $0x91] sm:$0xff] %vm540_vm0, %v5045_v10  ;;  %5110 = vst.msk [vmem:[#allocation2 + $0x99] sm:$0xff] %vm540_vm0, %v5046_v43  ;;  %v5063_v26 = vmax.f32 %v12562_v50, 0.0  ;;  %v5064_v6 = vmax.f32 %v12566_v15, 0.0  ;;  %v5065_v0 = vmax.f32 %v12570_v17, 0.0  ;;  %v5066_v62 = vmax.f32 %v12574_v56, 0.0 }
 0x616   :  { %5111 = vst.msk [vmem:[#allocation2 + $0xa9] sm:$0xff] %vm540_vm0, %v5047_v12  ;;  %5112 = vst.msk [vmem:[#allocation2 + $0xb1] sm:$0xff] %vm540_vm0, %v5048_v44  ;;  %v5067_v7 = vmax.f32 %v12580_v60, 0.0  ;;  %v5068_v2 = vmax.f32 %v12584_v42, 0.0  ;;  %v5069_v59 = vmax.f32 %v12588_v57, 0.0  ;;  %v5070_v63 = vmax.f32 %v12592_v55, 0.0 }
 0x617   :  { %5113 = vst.msk [vmem:[#allocation2 + $0xc1] sm:$0xff] %vm540_vm0, %v5049_v49  ;;  %5114 = vst.msk [vmem:[#allocation2 + $0xc9] sm:$0xff] %vm540_vm0, %v5050_v52  ;;  %v5071_v40 = vmax.f32 %v12596_v5, 0.0  ;;  %v5293_v50 = vld [vmem:[#allocation2 + $0x19] sm:$0xff]  ;;  %v5072_v17 = vmax.f32 %v12600_v21, 0.0  ;;  %v5073_v56 = vmax.f32 %v12604_v36, 0.0 }
 0x618   :  { %5115 = vst.msk [vmem:[#allocation2 + $0xd9] sm:$0xff] %vm540_vm0, %v5051_v4  ;;  %5116 = vst.msk [vmem:[#allocation2 + $0xe1] sm:$0xff] %vm540_vm0, %v5052_v51  ;;  %v12768_v15 = vld [vmem:[#allocation2 + $0x18] sm:$0xff]  ;;  %v5074_v60 = vmax.f32 %v12608_v18, 0.0  ;;  %v5075_v42 = vmax.f32 %v12612_v45, 0.0  ;;  %v5294_v57 = vld [vmem:[#allocation2 + $0x21] sm:$0xff]  ;;  %5423 = vrot.lane.b32.xlu0 %v5293_v50, %s9329_s17 }
 0x619   :  { %5117 = vst.msk [vmem:[#allocation2 + $0xf1] sm:$0xff] %vm540_vm0, %v5053_v33  ;;  %5118 = vst.msk [vmem:[#allocation2 + $0xf9] sm:$0xff] %vm540_vm0, %v5054_v3  ;;  %v5076_v55 = vmax.f32 %v12616_v25, 0.0  ;;  %v5077_v5 = vmax.f32 %v12620_v22, 0.0  ;;  %v5078_v21 = vmax.f32 %v12624_v46, 0.0  ;;  %v5079_v36 = vmax.f32 %v12628_v54, 0.0  ;;  %5425 = vrot.lane.b32.xlu1 %v5294_v57, %s9329_s17 }
 0x61a   :  { %5119 = vst.msk [vmem:[#allocation2 + $0x109] sm:$0xff] %vm540_vm0, %v5055_v31  ;;  %5120 = vst.msk [vmem:[#allocation2 + $0x111] sm:$0xff] %vm540_vm0, %v5056_v16  ;;  %v5080_v18 = vmax.f32 %v12632_v30, 0.0  ;;  %v5081_v45 = vmax.f32 %v12636_v13, 0.0  ;;  %v14713_v25 = vld [vmem:[#allocation15_spill] sm:$0xff]  ;;  %v14715_v54 = vld [vmem:[#allocation17_spill] sm:$0xff] }
 0x61b   :  { %5121 = vst.msk [vmem:[#allocation2 + $0x121] sm:$0xff] %vm540_vm0, %v5057_v35  ;;  %5122 = vst.msk [vmem:[#allocation2 + $0x129] sm:$0xff] %vm540_vm0, %v5058_v24  ;;  %v5082_v22 = vmax.f32 %v14713_v25, 0.0  ;;  %v14714_v19 = vld [vmem:[#allocation11_spill] sm:$0xff]  ;;  %v5084_v28 = vmax.f32 %v14715_v54, 0.0  ;;  %v14716_v32 = vld [vmem:[#allocation16_spill] sm:$0xff] }
 0x61c   :  { %5123 = vst.msk [vmem:[#allocation2 + $0x139] sm:$0xff] %vm540_vm0, %v5059_v9  ;;  %5124 = vst.msk [vmem:[#allocation2 + $0x141] sm:$0xff] %vm540_vm0, %v5060_v48  ;;  %v5083_v46 = vmax.f32 %v14714_v19, 0.0  ;;  %v5085_v27 = vmax.f32 %v14716_v32, 0.0  ;;  %v5086_v30 = vmax.f32 %v12656_v14, 0.0  ;;  %v5087_v13 = vmax.f32 %v12660_v61, 0.0  ;;  %v5422_v61 = vpop.permute.xlu1 %5421 }
 0x61d   :  { %5125 = vst.msk [vmem:[#allocation2 + $0x151] sm:$0xff] %vm540_vm0, %v5061_v37  ;;  %5126 = vst.msk [vmem:[#allocation2 + $0x159] sm:$0xff] %vm540_vm0, %v5062_v38  ;;  %v5295_v8 = vld [vmem:[#allocation2 + $0x31] sm:$0xff]  ;;  %v5088_v20 = vmax.f32 %v12664_v23, 0.0  ;;  %v5089_v11 = vmax.f32 %v12668_v41, 0.0  ;;  %v5090_v34 = vmax.f32 %v12672_v1, 0.0 }
 0x61e   :  { %5127 = vst.msk [vmem:[#allocation2 + $0x169] sm:$0xff] %vm540_vm0, %v5063_v26  ;;  %5128 = vst.msk [vmem:[#allocation2 + $0x171] sm:$0xff] %vm540_vm0, %v5064_v6  ;;  %v5091_v58 = vmax.f32 %v12676_v29, 0.0  ;;  %v5296_v14 = vld [vmem:[#allocation2 + $0x39] sm:$0xff]  ;;  %5427 = vrot.lane.b32.xlu0 %v5295_v8, %s9329_s17  ;;  %v14719_v1 = vld [vmem:[#allocation21_spill] sm:$0xff]  ;;  %v5098_v4 = vmax.f32 %v12700_v47, 0.0 }
 0x61f   :  { %5129 = vst.msk [vmem:[#allocation2 + $0x181] sm:$0xff] %vm540_vm0, %v5065_v0  ;;  %5130 = vst.msk [vmem:[#allocation2 + $0x189] sm:$0xff] %vm540_vm0, %v5066_v62  ;;  %v14717_v23 = vld [vmem:[#allocation19_spill] sm:$0xff]  ;;  %v14718_v41 = vld [vmem:[#allocation18_spill] sm:$0xff]  ;;  %v5094_v12 = vmax.f32 %v14719_v1, 0.0  ;;  %5429 = vrot.lane.b32.xlu1 %v5296_v14, %s9329_s17 }
 0x620   :  { %5131 = vst.msk [vmem:[#allocation2 + $0x1c9] sm:$0xff] %vm540_vm0, %v5067_v7  ;;  %5229 = vst.msk [vmem:[#allocation3 + $0x10] sm:$0xff] %vm540_vm0, %v12768_v15  ;;  %v5092_v10 = vmax.f32 %v14717_v23, 0.0  ;;  %v5093_v43 = vmax.f32 %v14718_v41, 0.0  ;;  %v14720_v29 = vld [vmem:[#allocation20_spill] sm:$0xff]  ;;  %v14721_v49 = vld [vmem:[#allocation23_spill] sm:$0xff] }
 0x621   :  { %5132 = vst.msk [vmem:[#allocation2 + $0x1d1] sm:$0xff] %vm540_vm0, %v5068_v2  ;;  %5133 = vst.msk [vmem:[#allocation2 + $0x1e1] sm:$0xff] %vm540_vm0, %v5069_v59  ;;  %v5095_v44 = vmax.f32 %v14720_v29, 0.0  ;;  %v5096_v52 = vmax.f32 %v14721_v49, 0.0  ;;  %v5297_v51 = vld [vmem:[#allocation2 + $0x49] sm:$0xff]  ;;  %v5298_v47 = vld [vmem:[#allocation2 + $0x51] sm:$0xff] }
 0x622   :  { %5134 = vst.msk [vmem:[#allocation2 + $0x1e9] sm:$0xff] %vm540_vm0, %v5070_v63  ;;  %5135 = vst.msk [vmem:[#allocation2 + $0x1f9] sm:$0xff] %vm540_vm0, %v5071_v40  ;;  %5431 = vrot.lane.b32.xlu0 %v5297_v51, %s9329_s17  ;;  %v5299_v33 = vld [vmem:[#allocation2 + $0x61] sm:$0xff]  ;;  %v5300_v3 = vld [vmem:[#allocation2 + $0x69] sm:$0xff] }
 0x623   :  { %5136 = vst.msk [vmem:[#allocation2 + $0x201] sm:$0xff] %vm540_vm0, %v5072_v17  ;;  %5137 = vst.msk [vmem:[#allocation2 + $0x211] sm:$0xff] %vm540_vm0, %v5073_v56  ;;  %5433 = vrot.lane.b32.xlu1 %v5298_v47, %s9329_s17  ;;  %v5301_v31 = vld [vmem:[#allocation2 + $0x79] sm:$0xff]  ;;  %v5302_v16 = vld [vmem:[#allocation2 + $0x81] sm:$0xff] }
 0x624   :  { %5138 = vst.msk [vmem:[#allocation2 + $0x219] sm:$0xff] %vm540_vm0, %v5074_v60  ;;  %5139 = vst.msk [vmem:[#allocation2 + $0x229] sm:$0xff] %vm540_vm0, %v5075_v42  ;;  %v5303_v39 = vld [vmem:[#allocation2 + $0x91] sm:$0xff]  ;;  %v5304_v35 = vld [vmem:[#allocation2 + $0x99] sm:$0xff] }
 0x625   :  { %5140 = vst.msk [vmem:[#allocation2 + $0x231] sm:$0xff] %vm540_vm0, %v5076_v55  ;;  %5141 = vst.msk [vmem:[#allocation2 + $0x241] sm:$0xff] %vm540_vm0, %v5077_v5  ;;  %v12845_v24 = vld [vmem:[#allocation2 + $0x20] sm:$0xff]  ;;  %v12850_v9 = vld [vmem:[#allocation2 + $0x38] sm:$0xff] }
 0x626   :  { %5142 = vst.msk [vmem:[#allocation2 + $0x249] sm:$0xff] %vm540_vm0, %v5078_v21  ;;  %5143 = vst.msk [vmem:[#allocation2 + $0x259] sm:$0xff] %vm540_vm0, %v5079_v36  ;;  %5435 = vrot.lane.b32.xlu0 %v5299_v33, %s9329_s17  ;;  %v12852_v48 = vld [vmem:[#allocation2 + $0x30] sm:$0xff]  ;;  %v12862_v26 = vld [vmem:[#allocation2 + $0x48] sm:$0xff] }
 0x627   :  { %5144 = vst.msk [vmem:[#allocation2 + $0x261] sm:$0xff] %vm540_vm0, %v5080_v18  ;;  %5145 = vst.msk [vmem:[#allocation2 + $0x271] sm:$0xff] %vm540_vm0, %v5081_v45  ;;  %5437 = vrot.lane.b32.xlu1 %v5300_v3, %s9329_s17  ;;  %v5305_v37 = vld [vmem:[#allocation2 + $0xa9] sm:$0xff]  ;;  %v12866_v0 = vld [vmem:[#allocation2 + $0x60] sm:$0xff] }
 0x628   :  { %5146 = vst.msk [vmem:[#allocation2 + $0x279] sm:$0xff] %vm540_vm0, %v5082_v22  ;;  %5147 = vst.msk [vmem:[#allocation2 + $0x289] sm:$0xff] %vm540_vm0, %v5083_v46  ;;  %v12858_v38 = vld [vmem:[#allocation2 + $0x50] sm:$0xff]  ;;  %v12864_v6 = vld [vmem:[#allocation2 + $0x68] sm:$0xff] }
 0x629   :  { %5148 = vst.msk [vmem:[#allocation2 + $0x291] sm:$0xff] %vm540_vm0, %v5084_v28  ;;  %5149 = vst.msk [vmem:[#allocation2 + $0x2a1] sm:$0xff] %vm540_vm0, %v5085_v27  ;;  %v5306_v62 = vld [vmem:[#allocation2 + $0xb1] sm:$0xff]  ;;  %v12875_v7 = vld [vmem:[#allocation2 + $0x80] sm:$0xff] }
 0x62a   :  { %5150 = vst.msk [vmem:[#allocation2 + $0x2a9] sm:$0xff] %vm540_vm0, %v5086_v30  ;;  %5151 = vst.msk [vmem:[#allocation2 + $0x2b9] sm:$0xff] %vm540_vm0, %v5087_v13  ;;  %5439 = vrot.lane.b32.xlu0 %v5301_v31, %s9329_s17  ;;  %v12880_v2 = vld [vmem:[#allocation2 + $0x78] sm:$0xff]  ;;  %v12886_v63 = vld [vmem:[#allocation2 + $0x90] sm:$0xff] }
 0x62b   :  { %5152 = vst.msk [vmem:[#allocation2 + $0x2c1] sm:$0xff] %vm540_vm0, %v5088_v20  ;;  %5153 = vst.msk [vmem:[#allocation2 + $0x2d1] sm:$0xff] %vm540_vm0, %v5089_v11  ;;  %5441 = vrot.lane.b32.xlu1 %v5302_v16, %s9329_s17  ;;  %v12884_v59 = vld [vmem:[#allocation2 + $0x98] sm:$0xff]  ;;  %v5307_v40 = vld [vmem:[#allocation2 + $0xc1] sm:$0xff] }
 0x62c   :  { %5154 = vst.msk [vmem:[#allocation2 + $0x2d9] sm:$0xff] %vm540_vm0, %v5090_v34  ;;  %5155 = vst.msk [vmem:[#allocation2 + $0x2e9] sm:$0xff] %vm540_vm0, %v5091_v58  ;;  %v12892_v50 = vld [vmem:[#allocation2 + $0xb0] sm:$0xff]  ;;  %v12894_v17 = vld [vmem:[#allocation2 + $0xa8] sm:$0xff] }
 0x62d   :  { %5156 = vst.msk [vmem:[#allocation2 + $0x2f1] sm:$0xff] %vm540_vm0, %v5092_v10  ;;  %5157 = vst.msk [vmem:[#allocation2 + $0x301] sm:$0xff] %vm540_vm0, %v5093_v43  ;;  %v5308_v56 = vld [vmem:[#allocation2 + $0xc9] sm:$0xff]  ;;  %v12906_v42 = vld [vmem:[#allocation2 + $0xc0] sm:$0xff] }
 0x62e   :  { %5158 = vst.msk [vmem:[#allocation2 + $0x309] sm:$0xff] %vm540_vm0, %v5094_v12  ;;  %5159 = vst.msk [vmem:[#allocation2 + $0x319] sm:$0xff] %vm540_vm0, %v5095_v44  ;;  %5443 = vrot.lane.b32.xlu0 %v5303_v39, %s9329_s17  ;;  %v12901_v60 = vld [vmem:[#allocation2 + $0xc8] sm:$0xff]  ;;  %v12910_v57 = vld [vmem:[#allocation2 + $0xe0] sm:$0xff] }
 0x62f   :  { %5613 = vst.msk [vmem:[#allocation3 + $0x8] sm:$0xff] %vm5611_vm14, %v5422_v61  ;;  %5612 = vst.msk [vmem:[#allocation3] sm:$0xff] %vm5611_vm14, %v5420_v53  ;;  %5445 = vrot.lane.b32.xlu1 %v5304_v35, %s9329_s17  ;;  %v12912_v55 = vld [vmem:[#allocation2 + $0xd8] sm:$0xff]  ;;  %v12920_v36 = vld [vmem:[#allocation2 + $0xf0] sm:$0xff] }
 0x630   :  { %5160 = vst.msk [vmem:[#allocation2 + $0x321] sm:$0xff] %vm540_vm0, %v5096_v52  ;;  %5162 = vst.msk [vmem:[#allocation2 + $0x339] sm:$0xff] %vm540_vm0, %v5098_v4  ;;  %v5309_v5 = vld [vmem:[#allocation2 + $0xd9] sm:$0xff]  ;;  %v5310_v18 = vld [vmem:[#allocation2 + $0xe1] sm:$0xff] }
 0x631   :  { %5230 = vst.msk [vmem:[#allocation3 + $0x18] sm:$0xff] %vm540_vm0, %v12845_v24  ;;  %5232 = vst.msk [vmem:[#allocation3 + $0x28] sm:$0xff] %vm540_vm0, %v12850_v9  ;;  %v12918_v21 = vld [vmem:[#allocation2 + $0xf8] sm:$0xff]  ;;  %v12927_v45 = vld [vmem:[#allocation2 + $0x110] sm:$0xff] }
 0x632   :  { %5231 = vst.msk [vmem:[#allocation3 + $0x20] sm:$0xff] %vm540_vm0, %v12852_v48  ;;  %5234 = vst.msk [vmem:[#allocation3 + $0x38] sm:$0xff] %vm540_vm0, %v12858_v38  ;;  %5447 = vrot.lane.b32.xlu0 %v5305_v37, %s9329_s17  ;;  %v12932_v25 = vld [vmem:[#allocation2 + $0x108] sm:$0xff]  ;;  %v12938_v19 = vld [vmem:[#allocation2 + $0x120] sm:$0xff] }
 0x633   :  { %5233 = vst.msk [vmem:[#allocation3 + $0x30] sm:$0xff] %vm540_vm0, %v12862_v26  ;;  %5236 = vst.msk [vmem:[#allocation3 + $0x48] sm:$0xff] %vm540_vm0, %v12864_v6  ;;  %5449 = vrot.lane.b32.xlu1 %v5306_v62, %s9329_s17  ;;  %v12936_v22 = vld [vmem:[#allocation2 + $0x128] sm:$0xff]  ;;  %v5311_v46 = vld [vmem:[#allocation2 + $0xf1] sm:$0xff] }
 0x634   :  { %5235 = vst.msk [vmem:[#allocation3 + $0x40] sm:$0xff] %vm540_vm0, %v12866_v0  ;;  %5238 = vst.msk [vmem:[#allocation3 + $0x58] sm:$0xff] %vm540_vm0, %v12875_v7  ;;  %v12944_v54 = vld [vmem:[#allocation2 + $0x140] sm:$0xff]  ;;  %v12946_v28 = vld [vmem:[#allocation2 + $0x138] sm:$0xff] }
 0x635   :  { %5237 = vst.msk [vmem:[#allocation3 + $0x50] sm:$0xff] %vm540_vm0, %v12880_v2  ;;  %5240 = vst.msk [vmem:[#allocation3 + $0x68] sm:$0xff] %vm540_vm0, %v12884_v59  ;;  %v5312_v32 = vld [vmem:[#allocation2 + $0xf9] sm:$0xff]  ;;  %v12958_v30 = vld [vmem:[#allocation2 + $0x150] sm:$0xff] }
 0x636   :  { %5239 = vst.msk [vmem:[#allocation3 + $0x60] sm:$0xff] %vm540_vm0, %v12886_v63  ;;  %5451 = vrot.lane.b32.xlu0 %v5307_v40, %s9329_s17  ;;  %5242 = vst.msk [vmem:[#allocation3 + $0x78] sm:$0xff] %vm540_vm0, %v12892_v50  ;;  %v12953_v27 = vld [vmem:[#allocation2 + $0x158] sm:$0xff]  ;;  %v12962_v13 = vld [vmem:[#allocation2 + $0x170] sm:$0xff] }
 0x637   :  { %5241 = vst.msk [vmem:[#allocation3 + $0x70] sm:$0xff] %vm540_vm0, %v12894_v17  ;;  %5453 = vrot.lane.b32.xlu1 %v5308_v56, %s9329_s17  ;;  %5244 = vst.msk [vmem:[#allocation3 + $0x88] sm:$0xff] %vm540_vm0, %v12901_v60  ;;  %v12964_v8 = vld [vmem:[#allocation2 + $0x168] sm:$0xff]  ;;  %v5314_v11 = vld [vmem:[#allocation2 + $0x111] sm:$0xff] }
 0x638   :  { %5243 = vst.msk [vmem:[#allocation3 + $0x80] sm:$0xff] %vm540_vm0, %v12906_v42  ;;  %5246 = vst.msk [vmem:[#allocation3 + $0x98] sm:$0xff] %vm540_vm0, %v12910_v57  ;;  %v5313_v20 = vld [vmem:[#allocation2 + $0x109] sm:$0xff]  ;;  %v12982_v61 = vld [vmem:[#allocation2 + $0x1e0] sm:$0xff] }
 0x639   :  { %5245 = vst.msk [vmem:[#allocation3 + $0x90] sm:$0xff] %vm540_vm0, %v12912_v55  ;;  %5248 = vst.msk [vmem:[#allocation3 + $0xa8] sm:$0xff] %vm540_vm0, %v12918_v21  ;;  %v12971_v34 = vld [vmem:[#allocation2 + $0x1d0] sm:$0xff]  ;;  %v12973_v58 = vld [vmem:[#allocation2 + $0x1c8] sm:$0xff] }
 0x63a   :  { %5455 = vrot.lane.b32.xlu0 %v5309_v5, %s9329_s17  ;;  %5247 = vst.msk [vmem:[#allocation3 + $0xa0] sm:$0xff] %vm540_vm0, %v12920_v36  ;;  %5250 = vst.msk [vmem:[#allocation3 + $0xb8] sm:$0xff] %vm540_vm0, %v12927_v45  ;;  %v12980_v14 = vld [vmem:[#allocation2 + $0x1e8] sm:$0xff]  ;;  %v12988_v23 = vld [vmem:[#allocation2 + $0x200] sm:$0xff] }
 0x63b   :  { %5457 = vrot.lane.b32.xlu1 %v5310_v18, %s9329_s17  ;;  %5249 = vst.msk [vmem:[#allocation3 + $0xb0] sm:$0xff] %vm540_vm0, %v12932_v25  ;;  %5252 = vst.msk [vmem:[#allocation3 + $0xc8] sm:$0xff] %vm540_vm0, %v12936_v22  ;;  %v5315_v53 = vld [vmem:[#allocation2 + $0x121] sm:$0xff]  ;;  %v12992_v10 = vld [vmem:[#allocation2 + $0x1f8] sm:$0xff] }
 0x63c   :  { %5251 = vst.msk [vmem:[#allocation3 + $0xc0] sm:$0xff] %vm540_vm0, %v12938_v19  ;;  %5254 = vst.msk [vmem:[#allocation3 + $0xd8] sm:$0xff] %vm540_vm0, %v12944_v54  ;;  %v12994_v41 = vld [vmem:[#allocation2 + $0x218] sm:$0xff]  ;;  %v12996_v43 = vld [vmem:[#allocation2 + $0x210] sm:$0xff] }
 0x63d   :  { %5253 = vst.msk [vmem:[#allocation3 + $0xd0] sm:$0xff] %vm540_vm0, %v12946_v28  ;;  %5256 = vst.msk [vmem:[#allocation3 + $0xe8] sm:$0xff] %vm540_vm0, %v12953_v27  ;;  %v5316_v1 = vld [vmem:[#allocation2 + $0x129] sm:$0xff]  ;;  %v5196_v29 = vld [vmem:[#allocation2 + $0x1b8] sm:$0xff] }
 0x63e   :  { %5459 = vrot.lane.b32.xlu0 %v5311_v46, %s9329_s17  ;;  %5255 = vst.msk [vmem:[#allocation3 + $0xe0] sm:$0xff] %vm540_vm0, %v12958_v30  ;;  %5258 = vst.msk [vmem:[#allocation3 + $0xf8] sm:$0xff] %vm540_vm0, %v12962_v13  ;;  %v13005_v12 = vld [vmem:[#allocation2 + $0x230] sm:$0xff]  ;;  %v13010_v44 = vld [vmem:[#allocation2 + $0x228] sm:$0xff] }
 0x63f   :  { %5461 = vrot.lane.b32.xlu1 %v5312_v32, %s9329_s17  ;;  %5257 = vst.msk [vmem:[#allocation3 + $0xf0] sm:$0xff] %vm540_vm0, %v12964_v8  ;;  %5262 = vst.msk [vmem:[#allocation3 + $0x118] sm:$0xff] %vm540_vm0, %v12971_v34  ;;  %v13015_v49 = vld [vmem:[#allocation2 + $0x248] sm:$0xff]  ;;  %v13017_v52 = vld [vmem:[#allocation2 + $0x240] sm:$0xff] }
 0x640   :  { %5261 = vst.msk [vmem:[#allocation3 + $0x110] sm:$0xff] %vm540_vm0, %v12973_v58  ;;  %5264 = vst.msk [vmem:[#allocation3 + $0x128] sm:$0xff] %vm540_vm0, %v12980_v14  ;;  %v5317_v4 = vld [vmem:[#allocation2 + $0x139] sm:$0xff]  ;;  %v5318_v47 = vld [vmem:[#allocation2 + $0x141] sm:$0xff] }
 0x641   :  { %5263 = vst.msk [vmem:[#allocation3 + $0x120] sm:$0xff] %vm540_vm0, %v12982_v61  ;;  %5266 = vst.msk [vmem:[#allocation3 + $0x138] sm:$0xff] %vm540_vm0, %v12988_v23  ;;  %v13023_v51 = vld [vmem:[#allocation2 + $0x260] sm:$0xff]  ;;  %v5195_v33 = vld [vmem:[#allocation2 + $0x1b0] sm:$0xff] }
 0x642   :  { %5463 = vrot.lane.b32.xlu0 %v5313_v20, %s9329_s17  ;;  %5265 = vst.msk [vmem:[#allocation3 + $0x130] sm:$0xff] %vm540_vm0, %v12992_v10  ;;  %5268 = vst.msk [vmem:[#allocation3 + $0x148] sm:$0xff] %vm540_vm0, %v12994_v41  ;;  %v13028_v3 = vld [vmem:[#allocation2 + $0x258] sm:$0xff]  ;;  %v13036_v16 = vld [vmem:[#allocation2 + $0x270] sm:$0xff] }
 0x643   :  { %5465 = vrot.lane.b32.xlu1 %v5314_v11, %s9329_s17  ;;  %5267 = vst.msk [vmem:[#allocation3 + $0x140] sm:$0xff] %vm540_vm0, %v12996_v43  ;;  %5270 = vst.msk [vmem:[#allocation3 + $0x158] sm:$0xff] %vm540_vm0, %v13005_v12  ;;  %v13034_v31 = vld [vmem:[#allocation2 + $0x278] sm:$0xff]  ;;  %v13042_v39 = vld [vmem:[#allocation2 + $0x290] sm:$0xff] }
 0x644   :  { %5260 = vst.msk [vmem:[#allocation3 + $0x108] sm:$0xff] %vm540_vm0, %v5196_v29  ;;  %5269 = vst.msk [vmem:[#allocation3 + $0x150] sm:$0xff] %vm540_vm0, %v13010_v44  ;;  %v5319_v35 = vld [vmem:[#allocation2 + $0x151] sm:$0xff]  ;;  %v13046_v37 = vld [vmem:[#allocation2 + $0x288] sm:$0xff] }
 0x645   :  { %5272 = vst.msk [vmem:[#allocation3 + $0x168] sm:$0xff] %vm540_vm0, %v13015_v49  ;;  %5271 = vst.msk [vmem:[#allocation3 + $0x160] sm:$0xff] %vm540_vm0, %v13017_v52  ;;  %v5320_v62 = vld [vmem:[#allocation2 + $0x159] sm:$0xff]  ;;  %v13051_v40 = vld [vmem:[#allocation2 + $0x2a8] sm:$0xff] }
 0x646   :  { %5467 = vrot.lane.b32.xlu0 %v5315_v53, %s9329_s17  ;;  %5274 = vst.msk [vmem:[#allocation3 + $0x178] sm:$0xff] %vm540_vm0, %v13023_v51  ;;  %5259 = vst.msk [vmem:[#allocation3 + $0x100] sm:$0xff] %vm540_vm0, %v5195_v33  ;;  %v13053_v56 = vld [vmem:[#allocation2 + $0x2a0] sm:$0xff]  ;;  %v13062_v18 = vld [vmem:[#allocation2 + $0x2b8] sm:$0xff] }
 0x647   :  { %5469 = vrot.lane.b32.xlu1 %v5316_v1, %s9329_s17  ;;  %5273 = vst.msk [vmem:[#allocation3 + $0x170] sm:$0xff] %vm540_vm0, %v13028_v3  ;;  %5276 = vst.msk [vmem:[#allocation3 + $0x188] sm:$0xff] %vm540_vm0, %v13034_v31  ;;  %v13060_v5 = vld [vmem:[#allocation2 + $0x2c0] sm:$0xff]  ;;  %v13068_v46 = vld [vmem:[#allocation2 + $0x2d8] sm:$0xff] }
 0x648   :  { %5275 = vst.msk [vmem:[#allocation3 + $0x180] sm:$0xff] %vm540_vm0, %v13036_v16  ;;  %5278 = vst.msk [vmem:[#allocation3 + $0x198] sm:$0xff] %vm540_vm0, %v13042_v39  ;;  %v5321_v32 = vld [vmem:[#allocation2 + $0x169] sm:$0xff]  ;;  %v5322_v11 = vld [vmem:[#allocation2 + $0x171] sm:$0xff] }
 0x649   :  { %5277 = vst.msk [vmem:[#allocation3 + $0x190] sm:$0xff] %vm540_vm0, %v13046_v37  ;;  %5280 = vst.msk [vmem:[#allocation3 + $0x1a8] sm:$0xff] %vm540_vm0, %v13051_v40  ;;  %v13072_v20 = vld [vmem:[#allocation2 + $0x2d0] sm:$0xff]  ;;  %v13079_v1 = vld [vmem:[#allocation2 + $0x2e8] sm:$0xff] }
 0x64a   :  { %5471 = vrot.lane.b32.xlu0 %v5317_v4, %s9329_s17  ;;  %5279 = vst.msk [vmem:[#allocation3 + $0x1a0] sm:$0xff] %vm540_vm0, %v13053_v56  ;;  %5282 = vst.msk [vmem:[#allocation3 + $0x1b8] sm:$0xff] %vm540_vm0, %v13060_v5  ;;  %v13077_v53 = vld [vmem:[#allocation2 + $0x2f0] sm:$0xff]  ;;  %v13086_v4 = vld [vmem:[#allocation2 + $0x308] sm:$0xff] }
 0x64b   :  { %5473 = vrot.lane.b32.xlu1 %v5318_v47, %s9329_s17  ;;  %5281 = vst.msk [vmem:[#allocation3 + $0x1b0] sm:$0xff] %vm540_vm0, %v13062_v18  ;;  %5284 = vst.msk [vmem:[#allocation3 + $0x1c8] sm:$0xff] %vm540_vm0, %v13068_v46  ;;  %v5323_v29 = vld [vmem:[#allocation2 + $0x1b1] sm:$0xff]  ;;  %v13088_v47 = vld [vmem:[#allocation2 + $0x300] sm:$0xff] }
 0x64c   :  { %5283 = vst.msk [vmem:[#allocation3 + $0x1c0] sm:$0xff] %vm540_vm0, %v13072_v20  ;;  %14722 = vst [vmem:[#allocation22_spill] sm:$0xff] %v13077_v53  ;;  %v5324_v33 = vld [vmem:[#allocation2 + $0x1b9] sm:$0xff] }
 0x64d   :  { %14723 = vst [vmem:[#allocation25_spill] sm:$0xff] %v13079_v1  ;;  %5286 = vst.msk [vmem:[#allocation3 + $0x1d8] sm:$0xff] %vm540_vm0, %v13077_v53  ;;  %v5330_v53 = vld [vmem:[#allocation2 + $0x201] sm:$0xff] }
 0x64e   :  { %5475 = vrot.lane.b32.xlu0 %v5319_v35, %s9329_s17  ;;  %5285 = vst.msk [vmem:[#allocation3 + $0x1d0] sm:$0xff] %vm540_vm0, %v13079_v1  ;;  %14724 = vst [vmem:[#allocation24_spill] sm:$0xff] %v13086_v4  ;;  %v13094_v35 = vld [vmem:[#allocation2 + $0x320] sm:$0xff] }
 0x64f   :  { %5477 = vrot.lane.b32.xlu1 %v5320_v62, %s9329_s17  ;;  %14725 = vst [vmem:[#allocation27_spill] sm:$0xff] %v13088_v47  ;;  %5288 = vst.msk [vmem:[#allocation3 + $0x1e8] sm:$0xff] %vm540_vm0, %v13086_v4  ;;  %v13098_v62 = vld [vmem:[#allocation2 + $0x318] sm:$0xff]  ;;  %v5327_v4 = vld [vmem:[#allocation2 + $0x1e1] sm:$0xff] }
 0x650   :  { %5287 = vst.msk [vmem:[#allocation3 + $0x1e0] sm:$0xff] %vm540_vm0, %v13088_v47  ;;  %14726 = vst [vmem:[#allocation26_spill] sm:$0xff] %v13094_v35  ;;  %v5328_v47 = vld [vmem:[#allocation2 + $0x1e9] sm:$0xff] }
 0x651   :  { %5290 = vst.msk [vmem:[#allocation3 + $0x1f8] sm:$0xff] %vm540_vm0, %v13094_v35  ;;  %14727 = vst [vmem:[#allocation29_spill] sm:$0xff] %v13098_v62  ;;  %v5329_v35 = vld [vmem:[#allocation2 + $0x1f9] sm:$0xff] }
 0x652   :  { %5479 = vrot.lane.b32.xlu0 %v5321_v32, %s9329_s17  ;;  %5289 = vst.msk [vmem:[#allocation3 + $0x1f0] sm:$0xff] %vm540_vm0, %v13098_v62  ;;  %v5325_v32 = vld [vmem:[#allocation2 + $0x1c9] sm:$0xff]  ;;  %v5351_v62 = vld [vmem:[#allocation2 + $0x301] sm:$0xff]  ;;  %vm6381_vm0 = vcmask 261312  }
 0x653   :  { %5481 = vrot.lane.b32.xlu1 %v5322_v11, %s9329_s17  ;;  %v5326_v11 = vld [vmem:[#allocation2 + $0x1d1] sm:$0xff] }
 0x656   :  { %5483 = vrot.lane.b32.xlu0 %v5323_v29, %s9329_s17  ;;  %v5331_v29 = vld [vmem:[#allocation2 + $0x211] sm:$0xff] }
 0x657   :  { %5485 = vrot.lane.b32.xlu1 %v5324_v33, %s9329_s17  ;;  %v5332_v33 = vld [vmem:[#allocation2 + $0x219] sm:$0xff] }
 0x65a   :  { %5487 = vrot.lane.b32.xlu0 %v5325_v32, %s9329_s17  ;;  %v5333_v32 = vld [vmem:[#allocation2 + $0x229] sm:$0xff] }
 0x65b   :  { %5489 = vrot.lane.b32.xlu1 %v5326_v11, %s9329_s17  ;;  %v5334_v11 = vld [vmem:[#allocation2 + $0x231] sm:$0xff] }
 0x65e   :  { %5491 = vrot.lane.b32.xlu0 %v5327_v4, %s9329_s17  ;;  %v5335_v4 = vld [vmem:[#allocation2 + $0x241] sm:$0xff] }
 0x65f   :  { %5493 = vrot.lane.b32.xlu1 %v5328_v47, %s9329_s17  ;;  %v5336_v47 = vld [vmem:[#allocation2 + $0x249] sm:$0xff] }
 0x662   :  { %5495 = vrot.lane.b32.xlu0 %v5329_v35, %s9329_s17  ;;  %v5337_v35 = vld [vmem:[#allocation2 + $0x259] sm:$0xff] }
 0x663   :  { %5497 = vrot.lane.b32.xlu1 %v5330_v53, %s9329_s17  ;;  %v5338_v53 = vld [vmem:[#allocation2 + $0x261] sm:$0xff] }
 0x666   :  { %5499 = vrot.lane.b32.xlu0 %v5331_v29, %s9329_s17  ;;  %v5339_v29 = vld [vmem:[#allocation2 + $0x271] sm:$0xff] }
 0x667   :  { %5501 = vrot.lane.b32.xlu1 %v5332_v33, %s9329_s17  ;;  %v5340_v33 = vld [vmem:[#allocation2 + $0x279] sm:$0xff] }
 0x66a   :  { %5503 = vrot.lane.b32.xlu0 %v5333_v32, %s9329_s17  ;;  %v5341_v32 = vld [vmem:[#allocation2 + $0x289] sm:$0xff] }
 0x66b   :  { %5505 = vrot.lane.b32.xlu1 %v5334_v11, %s9329_s17  ;;  %v5342_v11 = vld [vmem:[#allocation2 + $0x291] sm:$0xff] }
 0x66e   :  { %5507 = vrot.lane.b32.xlu0 %v5335_v4, %s9329_s17  ;;  %v5343_v4 = vld [vmem:[#allocation2 + $0x2a1] sm:$0xff] }
 0x66f   :  { %5509 = vrot.lane.b32.xlu1 %v5336_v47, %s9329_s17  ;;  %v5344_v47 = vld [vmem:[#allocation2 + $0x2a9] sm:$0xff] }
 0x672   :  { %5511 = vrot.lane.b32.xlu0 %v5337_v35, %s9329_s17  ;;  %v5345_v35 = vld [vmem:[#allocation2 + $0x2b9] sm:$0xff] }
 0x673   :  { %5513 = vrot.lane.b32.xlu1 %v5338_v53, %s9329_s17  ;;  %v5346_v53 = vld [vmem:[#allocation2 + $0x2c1] sm:$0xff] }
 0x676   :  { %5515 = vrot.lane.b32.xlu0 %v5339_v29, %s9329_s17  ;;  %v5347_v29 = vld [vmem:[#allocation2 + $0x2d1] sm:$0xff] }
 0x677   :  { %5517 = vrot.lane.b32.xlu1 %v5340_v33, %s9329_s17  ;;  %v5348_v33 = vld [vmem:[#allocation2 + $0x2d9] sm:$0xff] }
 0x67a   :  { %5519 = vrot.lane.b32.xlu0 %v5341_v32, %s9329_s17  ;;  %v5349_v32 = vld [vmem:[#allocation2 + $0x2e9] sm:$0xff] }
 0x67b   :  { %5521 = vrot.lane.b32.xlu1 %v5342_v11, %s9329_s17  ;;  %v5350_v11 = vld [vmem:[#allocation2 + $0x2f1] sm:$0xff] }
 0x67e   :  { %5523 = vrot.lane.b32.xlu0 %v5343_v4, %s9329_s17 }
 0x67f   :  { %5525 = vrot.lane.b32.xlu1 %v5344_v47, %s9329_s17 }
 0x682   :  { %5527 = vrot.lane.b32.xlu0 %v5345_v35, %s9329_s17  ;;  %v5352_v35 = vld [vmem:[#allocation2 + $0x309] sm:$0xff] }
 0x683   :  { %5529 = vrot.lane.b32.xlu1 %v5346_v53, %s9329_s17 }
 0x686   :  { %5531 = vrot.lane.b32.xlu0 %v5347_v29, %s9329_s17 }
 0x687   :  { %5533 = vrot.lane.b32.xlu1 %v5348_v33, %s9329_s17  ;;  %v5353_v33 = vld [vmem:[#allocation2 + $0x319] sm:$0xff] }
 0x68a   :  { %5535 = vrot.lane.b32.xlu0 %v5349_v32, %s9329_s17  ;;  %v5424_v4 = vpop.permute.xlu0 %5423  ;;  %v5354_v32 = vld [vmem:[#allocation2 + $0x321] sm:$0xff] }
 0x68b   :  { %5537 = vrot.lane.b32.xlu1 %v5350_v11, %s9329_s17  ;;  %v5426_v47 = vpop.permute.xlu1 %5425  ;;  %5614 = vst.msk [vmem:[#allocation3 + $0x10] sm:$0xff] %vm5611_vm14, %v5424_v4  ;;  %v5676_v11 = vld [vmem:[#allocation2 + $0x2] sm:$0xff] }
 0x68c   :  { %5615 = vst.msk [vmem:[#allocation3 + $0x18] sm:$0xff] %vm5611_vm14, %v5426_v47  ;;  %v5677_v47 = vld [vmem:[#allocation2 + $0xa] sm:$0xff] }
 0x68e   :  { %5539 = vrot.lane.b32.xlu0 %v5351_v62, %s9329_s17 }
 0x68f   :  { %5541 = vrot.lane.b32.xlu1 %v5352_v35, %s9329_s17 }
 0x690   :  { %v5428_v53 = vpop.permute.xlu0 %5427 }
 0x691   :  { %v5430_v29 = vpop.permute.xlu1 %5429  ;;  %5616 = vst.msk [vmem:[#allocation3 + $0x20] sm:$0xff] %vm5611_vm14, %v5428_v53  ;;  %v5678_v53 = vld [vmem:[#allocation2 + $0x1a] sm:$0xff] }
 0x692   :  { %5617 = vst.msk [vmem:[#allocation3 + $0x28] sm:$0xff] %vm5611_vm14, %v5430_v29  ;;  %5543 = vrot.lane.b32.xlu0 %v5353_v33, %s9329_s17  ;;  %v5679_v29 = vld [vmem:[#allocation2 + $0x22] sm:$0xff] }
 0x693   :  { %5545 = vrot.lane.b32.xlu1 %v5354_v32, %s9329_s17 }
 0x694   :  { %v5432_v4 = vpop.permute.xlu0 %5431 }
 0x695   :  { %v5434_v1 = vpop.permute.xlu1 %5433  ;;  %5618 = vst.msk [vmem:[#allocation3 + $0x30] sm:$0xff] %vm5611_vm14, %v5432_v4 }
 0x696   :  { %5619 = vst.msk [vmem:[#allocation3 + $0x38] sm:$0xff] %vm5611_vm14, %v5434_v1  ;;  %5804 = vrot.lane.b32.xlu0 %v5676_v11, %s9331_s16  ;;  %v5680_v1 = vld [vmem:[#allocation2 + $0x32] sm:$0xff]  ;;  %v5681_v11 = vld [vmem:[#allocation2 + $0x3a] sm:$0xff] }
 0x697   :  { %5806 = vrot.lane.b32.xlu1 %v5677_v47, %s9331_s16 }
 0x698   :  { %v5436_v62 = vpop.permute.xlu0 %5435 }
 0x699   :  { %v5438_v35 = vpop.permute.xlu1 %5437  ;;  %5620 = vst.msk [vmem:[#allocation3 + $0x40] sm:$0xff] %vm5611_vm14, %v5436_v62  ;;  %v5682_v62 = vld [vmem:[#allocation2 + $0x4a] sm:$0xff] }
 0x69a   :  { %5621 = vst.msk [vmem:[#allocation3 + $0x48] sm:$0xff] %vm5611_vm14, %v5438_v35  ;;  %5808 = vrot.lane.b32.xlu0 %v5678_v53, %s9331_s16  ;;  %v5683_v35 = vld [vmem:[#allocation2 + $0x52] sm:$0xff] }
 0x69b   :  { %5810 = vrot.lane.b32.xlu1 %v5679_v29, %s9331_s16 }
 0x69c   :  { %v5440_v33 = vpop.permute.xlu0 %5439 }
 0x69d   :  { %v5442_v32 = vpop.permute.xlu1 %5441  ;;  %5622 = vst.msk [vmem:[#allocation3 + $0x50] sm:$0xff] %vm5611_vm14, %v5440_v33  ;;  %v5684_v33 = vld [vmem:[#allocation2 + $0x62] sm:$0xff] }
 0x69e   :  { %5623 = vst.msk [vmem:[#allocation3 + $0x58] sm:$0xff] %vm5611_vm14, %v5442_v32  ;;  %5812 = vrot.lane.b32.xlu0 %v5680_v1, %s9331_s16  ;;  %v5685_v32 = vld [vmem:[#allocation2 + $0x6a] sm:$0xff] }
 0x69f   :  { %5814 = vrot.lane.b32.xlu1 %v5681_v11, %s9331_s16 }
 0x6a0   :  { %v5444_v4 = vpop.permute.xlu0 %5443 }
 0x6a1   :  { %v5446_v47 = vpop.permute.xlu1 %5445  ;;  %5624 = vst.msk [vmem:[#allocation3 + $0x60] sm:$0xff] %vm5611_vm14, %v5444_v4  ;;  %v5686_v4 = vld [vmem:[#allocation2 + $0x7a] sm:$0xff] }
 0x6a2   :  { %5625 = vst.msk [vmem:[#allocation3 + $0x68] sm:$0xff] %vm5611_vm14, %v5446_v47  ;;  %5816 = vrot.lane.b32.xlu0 %v5682_v62, %s9331_s16  ;;  %v5687_v47 = vld [vmem:[#allocation2 + $0x82] sm:$0xff] }
 0x6a3   :  { %5818 = vrot.lane.b32.xlu1 %v5683_v35, %s9331_s16 }
 0x6a4   :  { %v5448_v53 = vpop.permute.xlu0 %5447 }
 0x6a5   :  { %v5450_v29 = vpop.permute.xlu1 %5449  ;;  %5626 = vst.msk [vmem:[#allocation3 + $0x70] sm:$0xff] %vm5611_vm14, %v5448_v53  ;;  %v5688_v53 = vld [vmem:[#allocation2 + $0x92] sm:$0xff] }
 0x6a6   :  { %5627 = vst.msk [vmem:[#allocation3 + $0x78] sm:$0xff] %vm5611_vm14, %v5450_v29  ;;  %5820 = vrot.lane.b32.xlu0 %v5684_v33, %s9331_s16  ;;  %v5689_v29 = vld [vmem:[#allocation2 + $0x9a] sm:$0xff] }
 0x6a7   :  { %5822 = vrot.lane.b32.xlu1 %v5685_v32, %s9331_s16 }
 0x6a8   :  { %v5452_v1 = vpop.permute.xlu0 %5451 }
 0x6a9   :  { %v5454_v11 = vpop.permute.xlu1 %5453  ;;  %5628 = vst.msk [vmem:[#allocation3 + $0x80] sm:$0xff] %vm5611_vm14, %v5452_v1  ;;  %v5690_v1 = vld [vmem:[#allocation2 + $0xaa] sm:$0xff] }
 0x6aa   :  { %5629 = vst.msk [vmem:[#allocation3 + $0x88] sm:$0xff] %vm5611_vm14, %v5454_v11  ;;  %5824 = vrot.lane.b32.xlu0 %v5686_v4, %s9331_s16  ;;  %v5691_v11 = vld [vmem:[#allocation2 + $0xb2] sm:$0xff] }
 0x6ab   :  { %5826 = vrot.lane.b32.xlu1 %v5687_v47, %s9331_s16 }
 0x6ac   :  { %v5456_v62 = vpop.permute.xlu0 %5455 }
 0x6ad   :  { %v5458_v35 = vpop.permute.xlu1 %5457  ;;  %5630 = vst.msk [vmem:[#allocation3 + $0x90] sm:$0xff] %vm5611_vm14, %v5456_v62  ;;  %v5692_v62 = vld [vmem:[#allocation2 + $0xc2] sm:$0xff] }
 0x6ae   :  { %5631 = vst.msk [vmem:[#allocation3 + $0x98] sm:$0xff] %vm5611_vm14, %v5458_v35  ;;  %5828 = vrot.lane.b32.xlu0 %v5688_v53, %s9331_s16  ;;  %v5693_v35 = vld [vmem:[#allocation2 + $0xca] sm:$0xff] }
 0x6af   :  { %5830 = vrot.lane.b32.xlu1 %v5689_v29, %s9331_s16 }
 0x6b0   :  { %v5460_v33 = vpop.permute.xlu0 %5459 }
 0x6b1   :  { %v5462_v32 = vpop.permute.xlu1 %5461  ;;  %5632 = vst.msk [vmem:[#allocation3 + $0xa0] sm:$0xff] %vm5611_vm14, %v5460_v33  ;;  %v5694_v33 = vld [vmem:[#allocation2 + $0xda] sm:$0xff] }
 0x6b2   :  { %5633 = vst.msk [vmem:[#allocation3 + $0xa8] sm:$0xff] %vm5611_vm14, %v5462_v32  ;;  %5832 = vrot.lane.b32.xlu0 %v5690_v1, %s9331_s16  ;;  %v5695_v32 = vld [vmem:[#allocation2 + $0xe2] sm:$0xff] }
 0x6b3   :  { %5834 = vrot.lane.b32.xlu1 %v5691_v11, %s9331_s16 }
 0x6b4   :  { %v5464_v4 = vpop.permute.xlu0 %5463 }
 0x6b5   :  { %v5466_v47 = vpop.permute.xlu1 %5465  ;;  %5634 = vst.msk [vmem:[#allocation3 + $0xb0] sm:$0xff] %vm5611_vm14, %v5464_v4  ;;  %v5696_v4 = vld [vmem:[#allocation2 + $0xf2] sm:$0xff] }
 0x6b6   :  { %5635 = vst.msk [vmem:[#allocation3 + $0xb8] sm:$0xff] %vm5611_vm14, %v5466_v47  ;;  %5836 = vrot.lane.b32.xlu0 %v5692_v62, %s9331_s16  ;;  %v5697_v47 = vld [vmem:[#allocation2 + $0xfa] sm:$0xff] }
 0x6b7   :  { %5838 = vrot.lane.b32.xlu1 %v5693_v35, %s9331_s16 }
 0x6b8   :  { %v5468_v53 = vpop.permute.xlu0 %5467 }
 0x6b9   :  { %v5470_v29 = vpop.permute.xlu1 %5469  ;;  %5636 = vst.msk [vmem:[#allocation3 + $0xc0] sm:$0xff] %vm5611_vm14, %v5468_v53  ;;  %v5698_v53 = vld [vmem:[#allocation2 + $0x10a] sm:$0xff] }
 0x6ba   :  { %5637 = vst.msk [vmem:[#allocation3 + $0xc8] sm:$0xff] %vm5611_vm14, %v5470_v29  ;;  %5840 = vrot.lane.b32.xlu0 %v5694_v33, %s9331_s16  ;;  %v5699_v29 = vld [vmem:[#allocation2 + $0x112] sm:$0xff] }
 0x6bb   :  { %5842 = vrot.lane.b32.xlu1 %v5695_v32, %s9331_s16 }
 0x6bc   :  { %v5472_v1 = vpop.permute.xlu0 %5471 }
 0x6bd   :  { %v5474_v11 = vpop.permute.xlu1 %5473  ;;  %5638 = vst.msk [vmem:[#allocation3 + $0xd0] sm:$0xff] %vm5611_vm14, %v5472_v1  ;;  %v5700_v1 = vld [vmem:[#allocation2 + $0x122] sm:$0xff] }
 0x6be   :  { %5639 = vst.msk [vmem:[#allocation3 + $0xd8] sm:$0xff] %vm5611_vm14, %v5474_v11  ;;  %5844 = vrot.lane.b32.xlu0 %v5696_v4, %s9331_s16  ;;  %v5701_v11 = vld [vmem:[#allocation2 + $0x12a] sm:$0xff] }
 0x6bf   :  { %5846 = vrot.lane.b32.xlu1 %v5697_v47, %s9331_s16 }
 0x6c0   :  { %v5476_v62 = vpop.permute.xlu0 %5475 }
 0x6c1   :  { %v5478_v35 = vpop.permute.xlu1 %5477  ;;  %5640 = vst.msk [vmem:[#allocation3 + $0xe0] sm:$0xff] %vm5611_vm14, %v5476_v62  ;;  %v5702_v62 = vld [vmem:[#allocation2 + $0x13a] sm:$0xff] }
 0x6c2   :  { %5641 = vst.msk [vmem:[#allocation3 + $0xe8] sm:$0xff] %vm5611_vm14, %v5478_v35  ;;  %5848 = vrot.lane.b32.xlu0 %v5698_v53, %s9331_s16  ;;  %v5703_v35 = vld [vmem:[#allocation2 + $0x142] sm:$0xff] }
 0x6c3   :  { %5850 = vrot.lane.b32.xlu1 %v5699_v29, %s9331_s16 }
 0x6c4   :  { %v5480_v33 = vpop.permute.xlu0 %5479 }
 0x6c5   :  { %v5482_v32 = vpop.permute.xlu1 %5481  ;;  %5642 = vst.msk [vmem:[#allocation3 + $0xf0] sm:$0xff] %vm5611_vm14, %v5480_v33  ;;  %v5704_v33 = vld [vmem:[#allocation2 + $0x152] sm:$0xff] }
 0x6c6   :  { %5643 = vst.msk [vmem:[#allocation3 + $0xf8] sm:$0xff] %vm5611_vm14, %v5482_v32  ;;  %5852 = vrot.lane.b32.xlu0 %v5700_v1, %s9331_s16  ;;  %v5705_v32 = vld [vmem:[#allocation2 + $0x15a] sm:$0xff] }
 0x6c7   :  { %5854 = vrot.lane.b32.xlu1 %v5701_v11, %s9331_s16 }
 0x6c8   :  { %v5484_v4 = vpop.permute.xlu0 %5483 }
 0x6c9   :  { %v5486_v47 = vpop.permute.xlu1 %5485  ;;  %5644 = vst.msk [vmem:[#allocation3 + $0x100] sm:$0xff] %vm5611_vm14, %v5484_v4  ;;  %v5706_v4 = vld [vmem:[#allocation2 + $0x16a] sm:$0xff] }
 0x6ca   :  { %5645 = vst.msk [vmem:[#allocation3 + $0x108] sm:$0xff] %vm5611_vm14, %v5486_v47  ;;  %5856 = vrot.lane.b32.xlu0 %v5702_v62, %s9331_s16  ;;  %v5707_v47 = vld [vmem:[#allocation2 + $0x172] sm:$0xff] }
 0x6cb   :  { %5858 = vrot.lane.b32.xlu1 %v5703_v35, %s9331_s16  ;;  %v5708_v62 = vld [vmem:[#allocation2 + $0x1b2] sm:$0xff] }
 0x6cc   :  { %v5488_v53 = vpop.permute.xlu0 %5487 }
 0x6cd   :  { %v5490_v29 = vpop.permute.xlu1 %5489  ;;  %5646 = vst.msk [vmem:[#allocation3 + $0x110] sm:$0xff] %vm5611_vm14, %v5488_v53  ;;  %v5709_v53 = vld [vmem:[#allocation2 + $0x1ba] sm:$0xff] }
 0x6ce   :  { %5647 = vst.msk [vmem:[#allocation3 + $0x118] sm:$0xff] %vm5611_vm14, %v5490_v29  ;;  %5860 = vrot.lane.b32.xlu0 %v5704_v33, %s9331_s16 }
 0x6cf   :  { %5862 = vrot.lane.b32.xlu1 %v5705_v32, %s9331_s16 }
 0x6d0   :  { %v5492_v1 = vpop.permute.xlu0 %5491 }
 0x6d1   :  { %v5494_v11 = vpop.permute.xlu1 %5493  ;;  %5648 = vst.msk [vmem:[#allocation3 + $0x120] sm:$0xff] %vm5611_vm14, %v5492_v1  ;;  %v5710_v1 = vld [vmem:[#allocation2 + $0x1ca] sm:$0xff] }
 0x6d2   :  { %5649 = vst.msk [vmem:[#allocation3 + $0x128] sm:$0xff] %vm5611_vm14, %v5494_v11  ;;  %5864 = vrot.lane.b32.xlu0 %v5706_v4, %s9331_s16  ;;  %v5711_v11 = vld [vmem:[#allocation2 + $0x1d2] sm:$0xff] }
 0x6d3   :  { %5866 = vrot.lane.b32.xlu1 %v5707_v47, %s9331_s16 }
 0x6d4   :  { %v5496_v35 = vpop.permute.xlu0 %5495 }
 0x6d5   :  { %v5498_v29 = vpop.permute.xlu1 %5497  ;;  %5650 = vst.msk [vmem:[#allocation3 + $0x130] sm:$0xff] %vm5611_vm14, %v5496_v35  ;;  %v5712_v35 = vld [vmem:[#allocation2 + $0x1e2] sm:$0xff] }
 0x6d6   :  { %5651 = vst.msk [vmem:[#allocation3 + $0x138] sm:$0xff] %vm5611_vm14, %v5498_v29  ;;  %5868 = vrot.lane.b32.xlu0 %v5708_v62, %s9331_s16  ;;  %v5713_v62 = vld [vmem:[#allocation2 + $0x1ea] sm:$0xff] }
 0x6d7   :  { %5870 = vrot.lane.b32.xlu1 %v5709_v53, %s9331_s16 }
 0x6d8   :  { %v5500_v33 = vpop.permute.xlu0 %5499 }
 0x6d9   :  { %v5502_v32 = vpop.permute.xlu1 %5501  ;;  %5652 = vst.msk [vmem:[#allocation3 + $0x140] sm:$0xff] %vm5611_vm14, %v5500_v33  ;;  %v5714_v33 = vld [vmem:[#allocation2 + $0x1fa] sm:$0xff] }
 0x6da   :  { %5653 = vst.msk [vmem:[#allocation3 + $0x148] sm:$0xff] %vm5611_vm14, %v5502_v32  ;;  %5872 = vrot.lane.b32.xlu0 %v5710_v1, %s9331_s16  ;;  %v5715_v32 = vld [vmem:[#allocation2 + $0x202] sm:$0xff] }
 0x6db   :  { %5874 = vrot.lane.b32.xlu1 %v5711_v11, %s9331_s16 }
 0x6dc   :  { %v5504_v4 = vpop.permute.xlu0 %5503 }
 0x6dd   :  { %v5506_v47 = vpop.permute.xlu1 %5505  ;;  %5654 = vst.msk [vmem:[#allocation3 + $0x150] sm:$0xff] %vm5611_vm14, %v5504_v4  ;;  %v5716_v4 = vld [vmem:[#allocation2 + $0x212] sm:$0xff] }
 0x6de   :  { %5655 = vst.msk [vmem:[#allocation3 + $0x158] sm:$0xff] %vm5611_vm14, %v5506_v47  ;;  %5876 = vrot.lane.b32.xlu0 %v5712_v35, %s9331_s16  ;;  %v5717_v47 = vld [vmem:[#allocation2 + $0x21a] sm:$0xff] }
 0x6df   :  { %5878 = vrot.lane.b32.xlu1 %v5713_v62, %s9331_s16 }
 0x6e0   :  { %v5508_v53 = vpop.permute.xlu0 %5507 }
 0x6e1   :  { %v5510_v29 = vpop.permute.xlu1 %5509  ;;  %5656 = vst.msk [vmem:[#allocation3 + $0x160] sm:$0xff] %vm5611_vm14, %v5508_v53  ;;  %v5718_v53 = vld [vmem:[#allocation2 + $0x22a] sm:$0xff] }
 0x6e2   :  { %5657 = vst.msk [vmem:[#allocation3 + $0x168] sm:$0xff] %vm5611_vm14, %v5510_v29  ;;  %5880 = vrot.lane.b32.xlu0 %v5714_v33, %s9331_s16  ;;  %v5719_v29 = vld [vmem:[#allocation2 + $0x232] sm:$0xff] }
 0x6e3   :  { %5882 = vrot.lane.b32.xlu1 %v5715_v32, %s9331_s16 }
 0x6e4   :  { %v5512_v1 = vpop.permute.xlu0 %5511 }
 0x6e5   :  { %v5514_v11 = vpop.permute.xlu1 %5513  ;;  %5658 = vst.msk [vmem:[#allocation3 + $0x170] sm:$0xff] %vm5611_vm14, %v5512_v1  ;;  %v5720_v1 = vld [vmem:[#allocation2 + $0x242] sm:$0xff] }
 0x6e6   :  { %5659 = vst.msk [vmem:[#allocation3 + $0x178] sm:$0xff] %vm5611_vm14, %v5514_v11  ;;  %5884 = vrot.lane.b32.xlu0 %v5716_v4, %s9331_s16  ;;  %v5721_v11 = vld [vmem:[#allocation2 + $0x24a] sm:$0xff] }
 0x6e7   :  { %5886 = vrot.lane.b32.xlu1 %v5717_v47, %s9331_s16 }
 0x6e8   :  { %v5516_v35 = vpop.permute.xlu0 %5515 }
 0x6e9   :  { %v5518_v62 = vpop.permute.xlu1 %5517  ;;  %5660 = vst.msk [vmem:[#allocation3 + $0x180] sm:$0xff] %vm5611_vm14, %v5516_v35  ;;  %v5722_v35 = vld [vmem:[#allocation2 + $0x25a] sm:$0xff] }
 0x6ea   :  { %5661 = vst.msk [vmem:[#allocation3 + $0x188] sm:$0xff] %vm5611_vm14, %v5518_v62  ;;  %5888 = vrot.lane.b32.xlu0 %v5718_v53, %s9331_s16  ;;  %v5723_v62 = vld [vmem:[#allocation2 + $0x262] sm:$0xff] }
 0x6eb   :  { %5890 = vrot.lane.b32.xlu1 %v5719_v29, %s9331_s16 }
 0x6ec   :  { %v5520_v33 = vpop.permute.xlu0 %5519 }
 0x6ed   :  { %v5522_v32 = vpop.permute.xlu1 %5521  ;;  %5662 = vst.msk [vmem:[#allocation3 + $0x190] sm:$0xff] %vm5611_vm14, %v5520_v33  ;;  %v5724_v33 = vld [vmem:[#allocation2 + $0x272] sm:$0xff] }
 0x6ee   :  { %5663 = vst.msk [vmem:[#allocation3 + $0x198] sm:$0xff] %vm5611_vm14, %v5522_v32  ;;  %5892 = vrot.lane.b32.xlu0 %v5720_v1, %s9331_s16  ;;  %v5725_v32 = vld [vmem:[#allocation2 + $0x27a] sm:$0xff] }
 0x6ef   :  { %5894 = vrot.lane.b32.xlu1 %v5721_v11, %s9331_s16 }
 0x6f0   :  { %v5524_v4 = vpop.permute.xlu0 %5523 }
 0x6f1   :  { %v5526_v47 = vpop.permute.xlu1 %5525  ;;  %5664 = vst.msk [vmem:[#allocation3 + $0x1a0] sm:$0xff] %vm5611_vm14, %v5524_v4  ;;  %v5726_v4 = vld [vmem:[#allocation2 + $0x28a] sm:$0xff] }
 0x6f2   :  { %5665 = vst.msk [vmem:[#allocation3 + $0x1a8] sm:$0xff] %vm5611_vm14, %v5526_v47  ;;  %5896 = vrot.lane.b32.xlu0 %v5722_v35, %s9331_s16  ;;  %v5727_v47 = vld [vmem:[#allocation2 + $0x292] sm:$0xff] }
 0x6f3   :  { %5898 = vrot.lane.b32.xlu1 %v5723_v62, %s9331_s16 }
 0x6f4   :  { %v5528_v53 = vpop.permute.xlu0 %5527 }
 0x6f5   :  { %v5530_v29 = vpop.permute.xlu1 %5529  ;;  %5666 = vst.msk [vmem:[#allocation3 + $0x1b0] sm:$0xff] %vm5611_vm14, %v5528_v53  ;;  %v5728_v53 = vld [vmem:[#allocation2 + $0x2a2] sm:$0xff] }
 0x6f6   :  { %5667 = vst.msk [vmem:[#allocation3 + $0x1b8] sm:$0xff] %vm5611_vm14, %v5530_v29  ;;  %5900 = vrot.lane.b32.xlu0 %v5724_v33, %s9331_s16  ;;  %v5729_v29 = vld [vmem:[#allocation2 + $0x2aa] sm:$0xff] }
 0x6f7   :  { %5902 = vrot.lane.b32.xlu1 %v5725_v32, %s9331_s16 }
 0x6f8   :  { %v5532_v1 = vpop.permute.xlu0 %5531 }
 0x6f9   :  { %v5534_v11 = vpop.permute.xlu1 %5533  ;;  %5668 = vst.msk [vmem:[#allocation3 + $0x1c0] sm:$0xff] %vm5611_vm14, %v5532_v1  ;;  %v5730_v1 = vld [vmem:[#allocation2 + $0x2ba] sm:$0xff] }
 0x6fa   :  { %5669 = vst.msk [vmem:[#allocation3 + $0x1c8] sm:$0xff] %vm5611_vm14, %v5534_v11  ;;  %5904 = vrot.lane.b32.xlu0 %v5726_v4, %s9331_s16  ;;  %v5731_v11 = vld [vmem:[#allocation2 + $0x2c2] sm:$0xff] }
 0x6fb   :  { %5906 = vrot.lane.b32.xlu1 %v5727_v47, %s9331_s16 }
 0x6fc   :  { %v5536_v35 = vpop.permute.xlu0 %5535 }
 0x6fd   :  { %v5538_v62 = vpop.permute.xlu1 %5537  ;;  %5670 = vst.msk [vmem:[#allocation3 + $0x1d0] sm:$0xff] %vm5611_vm14, %v5536_v35  ;;  %v5732_v35 = vld [vmem:[#allocation2 + $0x2d2] sm:$0xff] }
 0x6fe   :  { %5671 = vst.msk [vmem:[#allocation3 + $0x1d8] sm:$0xff] %vm5611_vm14, %v5538_v62  ;;  %5908 = vrot.lane.b32.xlu0 %v5728_v53, %s9331_s16  ;;  %v5733_v62 = vld [vmem:[#allocation2 + $0x2da] sm:$0xff] }
 0x6ff   :  { %5910 = vrot.lane.b32.xlu1 %v5729_v29, %s9331_s16 }
 0x700   :  { %v5540_v33 = vpop.permute.xlu0 %5539 }
 0x701   :  { %v5542_v32 = vpop.permute.xlu1 %5541  ;;  %5672 = vst.msk [vmem:[#allocation3 + $0x1e0] sm:$0xff] %vm5611_vm14, %v5540_v33  ;;  %v5734_v33 = vld [vmem:[#allocation2 + $0x2ea] sm:$0xff] }
 0x702   :  { %5673 = vst.msk [vmem:[#allocation3 + $0x1e8] sm:$0xff] %vm5611_vm14, %v5542_v32  ;;  %5912 = vrot.lane.b32.xlu0 %v5730_v1, %s9331_s16  ;;  %v5735_v32 = vld [vmem:[#allocation2 + $0x2f2] sm:$0xff] }
 0x703   :  { %5914 = vrot.lane.b32.xlu1 %v5731_v11, %s9331_s16 }
 0x704   :  { %v5544_v4 = vpop.permute.xlu0 %5543 }
 0x705   :  { %v5546_v47 = vpop.permute.xlu1 %5545  ;;  %5674 = vst.msk [vmem:[#allocation3 + $0x1f0] sm:$0xff] %vm5611_vm14, %v5544_v4  ;;  %v5736_v4 = vld [vmem:[#allocation2 + $0x302] sm:$0xff] }
 0x706   :  { %5675 = vst.msk [vmem:[#allocation3 + $0x1f8] sm:$0xff] %vm5611_vm14, %v5546_v47  ;;  %5916 = vrot.lane.b32.xlu0 %v5732_v35, %s9331_s16  ;;  %v5737_v47 = vld [vmem:[#allocation2 + $0x30a] sm:$0xff] }
 0x707   :  { %5918 = vrot.lane.b32.xlu1 %v5733_v62, %s9331_s16 }
 0x708   :  { %v5805_v53 = vpop.permute.xlu0 %5804 }
 0x709   :  { %v5807_v29 = vpop.permute.xlu1 %5806  ;;  %5997 = vst.msk [vmem:[#allocation3] sm:$0xff] %vm5996_vm15, %v5805_v53  ;;  %v5738_v53 = vld [vmem:[#allocation2 + $0x31a] sm:$0xff] }
 0x70a   :  { %5998 = vst.msk [vmem:[#allocation3 + $0x8] sm:$0xff] %vm5996_vm15, %v5807_v29  ;;  %5920 = vrot.lane.b32.xlu0 %v5734_v33, %s9331_s16  ;;  %v5739_v29 = vld [vmem:[#allocation2 + $0x322] sm:$0xff] }
 0x70b   :  { %5922 = vrot.lane.b32.xlu1 %v5735_v32, %s9331_s16 }
 0x70c   :  { %v5809_v1 = vpop.permute.xlu0 %5808 }
 0x70d   :  { %v5811_v11 = vpop.permute.xlu1 %5810  ;;  %5999 = vst.msk [vmem:[#allocation3 + $0x10] sm:$0xff] %vm5996_vm15, %v5809_v1 }
 0x70e   :  { %6000 = vst.msk [vmem:[#allocation3 + $0x18] sm:$0xff] %vm5996_vm15, %v5811_v11  ;;  %5924 = vrot.lane.b32.xlu0 %v5736_v4, %s9331_s16 }
 0x70f   :  { %5926 = vrot.lane.b32.xlu1 %v5737_v47, %s9331_s16 }
 0x710   :  { %v5813_v35 = vpop.permute.xlu0 %5812 }
 0x711   :  { %v5815_v62 = vpop.permute.xlu1 %5814  ;;  %6001 = vst.msk [vmem:[#allocation3 + $0x20] sm:$0xff] %vm5996_vm15, %v5813_v35 }
 0x712   :  { %6002 = vst.msk [vmem:[#allocation3 + $0x28] sm:$0xff] %vm5996_vm15, %v5815_v62  ;;  %5928 = vrot.lane.b32.xlu0 %v5738_v53, %s9331_s16 }
 0x713   :  { %5930 = vrot.lane.b32.xlu1 %v5739_v29, %s9331_s16 }
 0x714   :  { %v5817_v33 = vpop.permute.xlu0 %5816 }
 0x715   :  { %v5819_v32 = vpop.permute.xlu1 %5818  ;;  %6003 = vst.msk [vmem:[#allocation3 + $0x30] sm:$0xff] %vm5996_vm15, %v5817_v33 }
 0x716   :  { %6004 = vst.msk [vmem:[#allocation3 + $0x38] sm:$0xff] %vm5996_vm15, %v5819_v32  ;;  %6189 = vrot.lane.b32.xlu0 %v12768_v15, %s9333_s19 }
 0x717   :  { %6191 = vrot.lane.b32.xlu1 %v12845_v24, %s9333_s19 }
 0x718   :  { %v5821_v1 = vpop.permute.xlu0 %5820 }
 0x719   :  { %v5823_v11 = vpop.permute.xlu1 %5822  ;;  %6005 = vst.msk [vmem:[#allocation3 + $0x40] sm:$0xff] %vm5996_vm15, %v5821_v1 }
 0x71a   :  { %6006 = vst.msk [vmem:[#allocation3 + $0x48] sm:$0xff] %vm5996_vm15, %v5823_v11  ;;  %6193 = vrot.lane.b32.xlu0 %v12852_v48, %s9333_s19 }
 0x71b   :  { %6195 = vrot.lane.b32.xlu1 %v12850_v9, %s9333_s19 }
 0x71c   :  { %v5825_v4 = vpop.permute.xlu0 %5824 }
 0x71d   :  { %v5827_v47 = vpop.permute.xlu1 %5826  ;;  %6007 = vst.msk [vmem:[#allocation3 + $0x50] sm:$0xff] %vm5996_vm15, %v5825_v4  ;;  %v14732_v4 = vld [vmem:[#allocation29_spill] sm:$0xff] }
 0x71e   :  { %6008 = vst.msk [vmem:[#allocation3 + $0x58] sm:$0xff] %vm5996_vm15, %v5827_v47  ;;  %6197 = vrot.lane.b32.xlu0 %v12862_v26, %s9333_s19  ;;  %v14733_v47 = vld [vmem:[#allocation26_spill] sm:$0xff] }
 0x71f   :  { %6199 = vrot.lane.b32.xlu1 %v12858_v38, %s9333_s19 }
 0x720   :  { %v5829_v15 = vpop.permute.xlu0 %5828 }
 0x721   :  { %v5831_v24 = vpop.permute.xlu1 %5830  ;;  %6009 = vst.msk [vmem:[#allocation3 + $0x60] sm:$0xff] %vm5996_vm15, %v5829_v15 }
 0x722   :  { %6010 = vst.msk [vmem:[#allocation3 + $0x68] sm:$0xff] %vm5996_vm15, %v5831_v24  ;;  %6201 = vrot.lane.b32.xlu0 %v12866_v0, %s9333_s19 }
 0x723   :  { %6203 = vrot.lane.b32.xlu1 %v12864_v6, %s9333_s19 }
 0x724   :  { %v5833_v9 = vpop.permute.xlu0 %5832 }
 0x725   :  { %v5835_v48 = vpop.permute.xlu1 %5834  ;;  %6011 = vst.msk [vmem:[#allocation3 + $0x70] sm:$0xff] %vm5996_vm15, %v5833_v9  ;;  %v6123_v9 = vld [vmem:[#allocation2 + $0x330] sm:$0xff] }
 0x726   :  { %6012 = vst.msk [vmem:[#allocation3 + $0x78] sm:$0xff] %vm5996_vm15, %v5835_v48  ;;  %6205 = vrot.lane.b32.xlu0 %v12880_v2, %s9333_s19  ;;  %v6124_v48 = vld [vmem:[#allocation2 + $0x338] sm:$0xff] }
 0x727   :  { %6207 = vrot.lane.b32.xlu1 %v12875_v7, %s9333_s19 }
 0x728   :  { %v5837_v38 = vpop.permute.xlu0 %5836 }
 0x729   :  { %v5839_v26 = vpop.permute.xlu1 %5838  ;;  %6013 = vst.msk [vmem:[#allocation3 + $0x80] sm:$0xff] %vm5996_vm15, %v5837_v38 }
 0x72a   :  { %6014 = vst.msk [vmem:[#allocation3 + $0x88] sm:$0xff] %vm5996_vm15, %v5839_v26  ;;  %6209 = vrot.lane.b32.xlu0 %v12886_v63, %s9333_s19 }
 0x72b   :  { %6211 = vrot.lane.b32.xlu1 %v12884_v59, %s9333_s19 }
 0x72c   :  { %v5841_v6 = vpop.permute.xlu0 %5840 }
 0x72d   :  { %v5843_v0 = vpop.permute.xlu1 %5842  ;;  %6015 = vst.msk [vmem:[#allocation3 + $0x90] sm:$0xff] %vm5996_vm15, %v5841_v6  ;;  %v6446_v6 = vld [vmem:[#allocation2 + $0x19] sm:$0xff] }
 0x72e   :  { %6016 = vst.msk [vmem:[#allocation3 + $0x98] sm:$0xff] %vm5996_vm15, %v5843_v0  ;;  %6213 = vrot.lane.b32.xlu0 %v12894_v17, %s9333_s19  ;;  %v6447_v0 = vld [vmem:[#allocation2 + $0x21] sm:$0xff] }
 0x72f   :  { %6215 = vrot.lane.b32.xlu1 %v12892_v50, %s9333_s19 }
 0x730   :  { %v5845_v7 = vpop.permute.xlu0 %5844 }
 0x731   :  { %v5847_v2 = vpop.permute.xlu1 %5846  ;;  %6017 = vst.msk [vmem:[#allocation3 + $0xa0] sm:$0xff] %vm5996_vm15, %v5845_v7 }
 0x732   :  { %6018 = vst.msk [vmem:[#allocation3 + $0xa8] sm:$0xff] %vm5996_vm15, %v5847_v2  ;;  %6217 = vrot.lane.b32.xlu0 %v12906_v42, %s9333_s19 }
 0x733   :  { %6219 = vrot.lane.b32.xlu1 %v12901_v60, %s9333_s19 }
 0x734   :  { %v5849_v59 = vpop.permute.xlu0 %5848 }
 0x735   :  { %v5851_v63 = vpop.permute.xlu1 %5850  ;;  %6019 = vst.msk [vmem:[#allocation3 + $0xb0] sm:$0xff] %vm5996_vm15, %v5849_v59  ;;  %v6448_v59 = vld [vmem:[#allocation2 + $0x31] sm:$0xff] }
 0x736   :  { %6020 = vst.msk [vmem:[#allocation3 + $0xb8] sm:$0xff] %vm5996_vm15, %v5851_v63  ;;  %6221 = vrot.lane.b32.xlu0 %v12912_v55, %s9333_s19  ;;  %v6449_v63 = vld [vmem:[#allocation2 + $0x39] sm:$0xff] }
 0x737   :  { %6223 = vrot.lane.b32.xlu1 %v12910_v57, %s9333_s19 }
 0x738   :  { %v5853_v50 = vpop.permute.xlu0 %5852 }
 0x739   :  { %v5855_v17 = vpop.permute.xlu1 %5854  ;;  %6021 = vst.msk [vmem:[#allocation3 + $0xc0] sm:$0xff] %vm5996_vm15, %v5853_v50 }
 0x73a   :  { %6022 = vst.msk [vmem:[#allocation3 + $0xc8] sm:$0xff] %vm5996_vm15, %v5855_v17  ;;  %6225 = vrot.lane.b32.xlu0 %v12920_v36, %s9333_s19 }
 0x73b   :  { %6227 = vrot.lane.b32.xlu1 %v12918_v21, %s9333_s19 }
 0x73c   :  { %v5857_v60 = vpop.permute.xlu0 %5856 }
 0x73d   :  { %v5859_v42 = vpop.permute.xlu1 %5858  ;;  %6023 = vst.msk [vmem:[#allocation3 + $0xd0] sm:$0xff] %vm5996_vm15, %v5857_v60  ;;  %v6450_v60 = vld [vmem:[#allocation2 + $0x49] sm:$0xff] }
 0x73e   :  { %6024 = vst.msk [vmem:[#allocation3 + $0xd8] sm:$0xff] %vm5996_vm15, %v5859_v42  ;;  %6229 = vrot.lane.b32.xlu0 %v12932_v25, %s9333_s19  ;;  %v6451_v42 = vld [vmem:[#allocation2 + $0x51] sm:$0xff] }
 0x73f   :  { %6231 = vrot.lane.b32.xlu1 %v12927_v45, %s9333_s19 }
 0x740   :  { %v5861_v57 = vpop.permute.xlu0 %5860 }
 0x741   :  { %v5863_v55 = vpop.permute.xlu1 %5862  ;;  %6025 = vst.msk [vmem:[#allocation3 + $0xe0] sm:$0xff] %vm5996_vm15, %v5861_v57 }
 0x742   :  { %6026 = vst.msk [vmem:[#allocation3 + $0xe8] sm:$0xff] %vm5996_vm15, %v5863_v55  ;;  %6233 = vrot.lane.b32.xlu0 %v12938_v19, %s9333_s19 }
 0x743   :  { %6235 = vrot.lane.b32.xlu1 %v12936_v22, %s9333_s19 }
 0x744   :  { %v5865_v21 = vpop.permute.xlu0 %5864 }
 0x745   :  { %v5867_v36 = vpop.permute.xlu1 %5866  ;;  %6027 = vst.msk [vmem:[#allocation3 + $0xf0] sm:$0xff] %vm5996_vm15, %v5865_v21  ;;  %v6452_v21 = vld [vmem:[#allocation2 + $0x61] sm:$0xff] }
 0x746   :  { %6028 = vst.msk [vmem:[#allocation3 + $0xf8] sm:$0xff] %vm5996_vm15, %v5867_v36  ;;  %6237 = vrot.lane.b32.xlu0 %v12946_v28, %s9333_s19  ;;  %v6453_v36 = vld [vmem:[#allocation2 + $0x69] sm:$0xff] }
 0x747   :  { %6239 = vrot.lane.b32.xlu1 %v12944_v54, %s9333_s19 }
 0x748   :  { %v5869_v45 = vpop.permute.xlu0 %5868 }
 0x749   :  { %v5871_v25 = vpop.permute.xlu1 %5870  ;;  %6029 = vst.msk [vmem:[#allocation3 + $0x100] sm:$0xff] %vm5996_vm15, %v5869_v45 }
 0x74a   :  { %6030 = vst.msk [vmem:[#allocation3 + $0x108] sm:$0xff] %vm5996_vm15, %v5871_v25  ;;  %6241 = vrot.lane.b32.xlu0 %v12958_v30, %s9333_s19  ;;  %v13357_v30 = vld [vmem:[#allocation2 + $0x180] sm:$0xff] }
 0x74b   :  { %6243 = vrot.lane.b32.xlu1 %v12953_v27, %s9333_s19  ;;  %v13360_v27 = vld [vmem:[#allocation2 + $0x188] sm:$0xff] }
 0x74c   :  { %v5873_v22 = vpop.permute.xlu0 %5872 }
 0x74d   :  { %v5875_v19 = vpop.permute.xlu1 %5874  ;;  %6031 = vst.msk [vmem:[#allocation3 + $0x110] sm:$0xff] %vm5996_vm15, %v5873_v22  ;;  %v6454_v22 = vld [vmem:[#allocation2 + $0x79] sm:$0xff] }
 0x74e   :  { %6032 = vst.msk [vmem:[#allocation3 + $0x118] sm:$0xff] %vm5996_vm15, %v5875_v19  ;;  %6245 = vrot.lane.b32.xlu0 %v12964_v8, %s9333_s19  ;;  %v13478_v19 = vld [vmem:[#allocation2 + $0x81] sm:$0xff] }
 0x74f   :  { %6247 = vrot.lane.b32.xlu1 %v12962_v13, %s9333_s19 }
 0x750   :  { %v5877_v54 = vpop.permute.xlu0 %5876 }
 0x751   :  { %v5879_v28 = vpop.permute.xlu1 %5878  ;;  %6033 = vst.msk [vmem:[#allocation3 + $0x120] sm:$0xff] %vm5996_vm15, %v5877_v54 }
 0x752   :  { %6034 = vst.msk [vmem:[#allocation3 + $0x128] sm:$0xff] %vm5996_vm15, %v5879_v28  ;;  %6249 = vrot.lane.b32.xlu0 %v13357_v30, %s9333_s19 }
 0x753   :  { %6251 = vrot.lane.b32.xlu1 %v13360_v27, %s9333_s19 }
 0x754   :  { %v5881_v8 = vpop.permute.xlu0 %5880 }
 0x755   :  { %v5883_v35 = vpop.permute.xlu1 %5882  ;;  %6035 = vst.msk [vmem:[#allocation3 + $0x130] sm:$0xff] %vm5996_vm15, %v5881_v8  ;;  %v13484_v8 = vld [vmem:[#allocation2 + $0x91] sm:$0xff] }
 0x756   :  { %6036 = vst.msk [vmem:[#allocation3 + $0x138] sm:$0xff] %vm5996_vm15, %v5883_v35  ;;  %6253 = vrot.lane.b32.xlu0 %v12973_v58, %s9333_s19  ;;  %v13487_v35 = vld [vmem:[#allocation2 + $0x99] sm:$0xff] }
 0x757   :  { %6255 = vrot.lane.b32.xlu1 %v12971_v34, %s9333_s19 }
 0x758   :  { %v5885_v13 = vpop.permute.xlu0 %5884 }
 0x759   :  { %v5887_v62 = vpop.permute.xlu1 %5886  ;;  %6037 = vst.msk [vmem:[#allocation3 + $0x140] sm:$0xff] %vm5996_vm15, %v5885_v13 }
 0x75a   :  { %6038 = vst.msk [vmem:[#allocation3 + $0x148] sm:$0xff] %vm5996_vm15, %v5887_v62  ;;  %6257 = vrot.lane.b32.xlu0 %v12982_v61, %s9333_s19 }
 0x75b   :  { %6259 = vrot.lane.b32.xlu1 %v12980_v14, %s9333_s19 }
 0x75c   :  { %v5889_v53 = vpop.permute.xlu0 %5888 }
 0x75d   :  { %v5891_v29 = vpop.permute.xlu1 %5890  ;;  %6039 = vst.msk [vmem:[#allocation3 + $0x150] sm:$0xff] %vm5996_vm15, %v5889_v53  ;;  %v13494_v53 = vld [vmem:[#allocation2 + $0xa9] sm:$0xff] }
 0x75e   :  { %6040 = vst.msk [vmem:[#allocation3 + $0x158] sm:$0xff] %vm5996_vm15, %v5891_v29  ;;  %6261 = vrot.lane.b32.xlu0 %v12992_v10, %s9333_s19  ;;  %v13497_v29 = vld [vmem:[#allocation2 + $0xb1] sm:$0xff] }
 0x75f   :  { %6263 = vrot.lane.b32.xlu1 %v12988_v23, %s9333_s19 }
 0x760   :  { %v5893_v34 = vpop.permute.xlu0 %5892 }
 0x761   :  { %v5895_v58 = vpop.permute.xlu1 %5894  ;;  %6041 = vst.msk [vmem:[#allocation3 + $0x160] sm:$0xff] %vm5996_vm15, %v5893_v34 }
 0x762   :  { %6042 = vst.msk [vmem:[#allocation3 + $0x168] sm:$0xff] %vm5996_vm15, %v5895_v58  ;;  %6265 = vrot.lane.b32.xlu0 %v12996_v43, %s9333_s19 }
 0x763   :  { %6267 = vrot.lane.b32.xlu1 %v12994_v41, %s9333_s19 }
 0x764   :  { %v5897_v14 = vpop.permute.xlu0 %5896 }
 0x765   :  { %v5899_v61 = vpop.permute.xlu1 %5898  ;;  %6043 = vst.msk [vmem:[#allocation3 + $0x170] sm:$0xff] %vm5996_vm15, %v5897_v14  ;;  %v13504_v14 = vld [vmem:[#allocation2 + $0xc1] sm:$0xff] }
 0x766   :  { %6044 = vst.msk [vmem:[#allocation3 + $0x178] sm:$0xff] %vm5996_vm15, %v5899_v61  ;;  %6269 = vrot.lane.b32.xlu0 %v13010_v44, %s9333_s19  ;;  %v13507_v61 = vld [vmem:[#allocation2 + $0xc9] sm:$0xff] }
 0x767   :  { %6271 = vrot.lane.b32.xlu1 %v13005_v12, %s9333_s19 }
 0x768   :  { %v5901_v23 = vpop.permute.xlu0 %5900 }
 0x769   :  { %v5903_v10 = vpop.permute.xlu1 %5902  ;;  %6045 = vst.msk [vmem:[#allocation3 + $0x180] sm:$0xff] %vm5996_vm15, %v5901_v23 }
 0x76a   :  { %6046 = vst.msk [vmem:[#allocation3 + $0x188] sm:$0xff] %vm5996_vm15, %v5903_v10  ;;  %6273 = vrot.lane.b32.xlu0 %v13017_v52, %s9333_s19 }
 0x76b   :  { %6275 = vrot.lane.b32.xlu1 %v13015_v49, %s9333_s19 }
 0x76c   :  { %v5905_v41 = vpop.permute.xlu0 %5904 }
 0x76d   :  { %v5907_v43 = vpop.permute.xlu1 %5906  ;;  %6047 = vst.msk [vmem:[#allocation3 + $0x190] sm:$0xff] %vm5996_vm15, %v5905_v41  ;;  %v13514_v41 = vld [vmem:[#allocation2 + $0xd9] sm:$0xff] }
 0x76e   :  { %6048 = vst.msk [vmem:[#allocation3 + $0x198] sm:$0xff] %vm5996_vm15, %v5907_v43  ;;  %6277 = vrot.lane.b32.xlu0 %v13028_v3, %s9333_s19  ;;  %v13517_v43 = vld [vmem:[#allocation2 + $0xe1] sm:$0xff] }
 0x76f   :  { %6279 = vrot.lane.b32.xlu1 %v13023_v51, %s9333_s19 }
 0x770   :  { %v5909_v12 = vpop.permute.xlu0 %5908 }
 0x771   :  { %v5911_v44 = vpop.permute.xlu1 %5910  ;;  %6049 = vst.msk [vmem:[#allocation3 + $0x1a0] sm:$0xff] %vm5996_vm15, %v5909_v12 }
 0x772   :  { %6050 = vst.msk [vmem:[#allocation3 + $0x1a8] sm:$0xff] %vm5996_vm15, %v5911_v44  ;;  %6281 = vrot.lane.b32.xlu0 %v13036_v16, %s9333_s19 }
 0x773   :  { %6283 = vrot.lane.b32.xlu1 %v13034_v31, %s9333_s19 }
 0x774   :  { %v5913_v49 = vpop.permute.xlu0 %5912 }
 0x775   :  { %v5915_v52 = vpop.permute.xlu1 %5914  ;;  %6051 = vst.msk [vmem:[#allocation3 + $0x1b0] sm:$0xff] %vm5996_vm15, %v5913_v49  ;;  %v6464_v49 = vld [vmem:[#allocation2 + $0xf1] sm:$0xff] }
 0x776   :  { %6052 = vst.msk [vmem:[#allocation3 + $0x1b8] sm:$0xff] %vm5996_vm15, %v5915_v52  ;;  %6285 = vrot.lane.b32.xlu0 %v13046_v37, %s9333_s19  ;;  %v6465_v52 = vld [vmem:[#allocation2 + $0xf9] sm:$0xff] }
 0x777   :  { %6287 = vrot.lane.b32.xlu1 %v13042_v39, %s9333_s19 }
 0x778   :  { %v5917_v51 = vpop.permute.xlu0 %5916 }
 0x779   :  { %v5919_v3 = vpop.permute.xlu1 %5918  ;;  %6053 = vst.msk [vmem:[#allocation3 + $0x1c0] sm:$0xff] %vm5996_vm15, %v5917_v51 }
 0x77a   :  { %6054 = vst.msk [vmem:[#allocation3 + $0x1c8] sm:$0xff] %vm5996_vm15, %v5919_v3  ;;  %6289 = vrot.lane.b32.xlu0 %v13053_v56, %s9333_s19 }
 0x77b   :  { %6291 = vrot.lane.b32.xlu1 %v13051_v40, %s9333_s19 }
 0x77c   :  { %v5921_v31 = vpop.permute.xlu0 %5920 }
 0x77d   :  { %v5923_v16 = vpop.permute.xlu1 %5922  ;;  %6055 = vst.msk [vmem:[#allocation3 + $0x1d0] sm:$0xff] %vm5996_vm15, %v5921_v31  ;;  %v6466_v31 = vld [vmem:[#allocation2 + $0x109] sm:$0xff] }
 0x77e   :  { %6056 = vst.msk [vmem:[#allocation3 + $0x1d8] sm:$0xff] %vm5996_vm15, %v5923_v16  ;;  %6293 = vrot.lane.b32.xlu0 %v13062_v18, %s9333_s19  ;;  %v14729_v18 = vld [vmem:[#allocation22_spill] sm:$0xff] }
 0x77f   :  { %6295 = vrot.lane.b32.xlu1 %v13060_v5, %s9333_s19  ;;  %v14728_v5 = vld [vmem:[#allocation25_spill] sm:$0xff] }
 0x780   :  { %v5925_v39 = vpop.permute.xlu0 %5924  ;;  %v6467_v16 = vld [vmem:[#allocation2 + $0x111] sm:$0xff] }
 0x781   :  { %v5927_v37 = vpop.permute.xlu1 %5926  ;;  %6057 = vst.msk [vmem:[#allocation3 + $0x1e0] sm:$0xff] %vm5996_vm15, %v5925_v39 }
 0x782   :  { %6058 = vst.msk [vmem:[#allocation3 + $0x1e8] sm:$0xff] %vm5996_vm15, %v5927_v37  ;;  %6297 = vrot.lane.b32.xlu0 %v13072_v20, %s9333_s19  ;;  %v14731_v20 = vld [vmem:[#allocation24_spill] sm:$0xff] }
 0x783   :  { %6299 = vrot.lane.b32.xlu1 %v13068_v46, %s9333_s19  ;;  %v14730_v46 = vld [vmem:[#allocation27_spill] sm:$0xff] }
 0x784   :  { %v5929_v40 = vpop.permute.xlu0 %5928 }
 0x785   :  { %v5931_v56 = vpop.permute.xlu1 %5930  ;;  %6059 = vst.msk [vmem:[#allocation3 + $0x1f0] sm:$0xff] %vm5996_vm15, %v5929_v40  ;;  %v6468_v40 = vld [vmem:[#allocation2 + $0x121] sm:$0xff] }
 0x786   :  { %6060 = vst.msk [vmem:[#allocation3 + $0x1f8] sm:$0xff] %vm5996_vm15, %v5931_v56  ;;  %6301 = vrot.lane.b32.xlu0 %v14728_v5, %s9333_s19  ;;  %v6469_v56 = vld [vmem:[#allocation2 + $0x129] sm:$0xff] }
 0x787   :  { %6303 = vrot.lane.b32.xlu1 %v14729_v18, %s9333_s19 }
 0x788   :  { %v6190_v33 = vpop.permute.xlu0 %6189 }
 0x789   :  { %v6192_v32 = vpop.permute.xlu1 %6191  ;;  %6382 = vst.msk [vmem:[#allocation3] sm:$0xff] %vm6381_vm0, %v6190_v33  ;;  %v13536_v33 = vld [vmem:[#allocation2 + $0x139] sm:$0xff] }
 0x78a   :  { %6383 = vst.msk [vmem:[#allocation3 + $0x8] sm:$0xff] %vm6381_vm0, %v6192_v32  ;;  %6305 = vrot.lane.b32.xlu0 %v14730_v46, %s9333_s19  ;;  %v13539_v32 = vld [vmem:[#allocation2 + $0x141] sm:$0xff] }
 0x78b   :  { %6307 = vrot.lane.b32.xlu1 %v14731_v20, %s9333_s19 }
 0x78c   :  { %v6194_v1 = vpop.permute.xlu0 %6193 }
 0x78d   :  { %v6196_v11 = vpop.permute.xlu1 %6195  ;;  %6384 = vst.msk [vmem:[#allocation3 + $0x10] sm:$0xff] %vm6381_vm0, %v6194_v1  ;;  %v13546_v1 = vld [vmem:[#allocation2 + $0x151] sm:$0xff] }
 0x78e   :  { %6385 = vst.msk [vmem:[#allocation3 + $0x18] sm:$0xff] %vm6381_vm0, %v6196_v11  ;;  %6309 = vrot.lane.b32.xlu0 %v14732_v4, %s9333_s19  ;;  %v13549_v11 = vld [vmem:[#allocation2 + $0x159] sm:$0xff] }
 0x78f   :  { %6311 = vrot.lane.b32.xlu1 %v14733_v47, %s9333_s19 }
 0x790   :  { %v6198_v15 = vpop.permute.xlu0 %6197 }
 0x791   :  { %v6200_v24 = vpop.permute.xlu1 %6199  ;;  %6386 = vst.msk [vmem:[#allocation3 + $0x20] sm:$0xff] %vm6381_vm0, %v6198_v15  ;;  %v13556_v15 = vld [vmem:[#allocation2 + $0x169] sm:$0xff] }
 0x792   :  { %6387 = vst.msk [vmem:[#allocation3 + $0x28] sm:$0xff] %vm6381_vm0, %v6200_v24  ;;  %6313 = vrot.lane.b32.xlu0 %v6123_v9, %s9333_s19  ;;  %v13559_v24 = vld [vmem:[#allocation2 + $0x171] sm:$0xff] }
 0x793   :  { %6315 = vrot.lane.b32.xlu1 %v6124_v48, %s9333_s19 }
 0x794   :  { %v6202_v38 = vpop.permute.xlu0 %6201 }
 0x795   :  { %v6204_v26 = vpop.permute.xlu1 %6203  ;;  %6388 = vst.msk [vmem:[#allocation3 + $0x30] sm:$0xff] %vm6381_vm0, %v6202_v38  ;;  %v13566_v38 = vld [vmem:[#allocation2 + $0x181] sm:$0xff] }
 0x796   :  { %6389 = vst.msk [vmem:[#allocation3 + $0x38] sm:$0xff] %vm6381_vm0, %v6204_v26  ;;  %6574 = vrot.lane.b32.xlu0 %v6446_v6, %s9335_s1  ;;  %v13569_v26 = vld [vmem:[#allocation2 + $0x189] sm:$0xff] }
 0x797   :  { %6576 = vrot.lane.b32.xlu1 %v6447_v0, %s9335_s1 }
 0x798   :  { %v6206_v7 = vpop.permute.xlu0 %6205 }
 0x799   :  { %v6208_v2 = vpop.permute.xlu1 %6207  ;;  %6390 = vst.msk [vmem:[#allocation3 + $0x40] sm:$0xff] %vm6381_vm0, %v6206_v7  ;;  %v6478_v7 = vld [vmem:[#allocation2 + $0x1c9] sm:$0xff] }
 0x79a   :  { %6391 = vst.msk [vmem:[#allocation3 + $0x48] sm:$0xff] %vm6381_vm0, %v6208_v2  ;;  %6578 = vrot.lane.b32.xlu0 %v6448_v59, %s9335_s1  ;;  %v6479_v2 = vld [vmem:[#allocation2 + $0x1d1] sm:$0xff] }
 0x79b   :  { %6580 = vrot.lane.b32.xlu1 %v6449_v63, %s9335_s1 }
 0x79c   :  { %v6210_v50 = vpop.permute.xlu0 %6209 }
 0x79d   :  { %v6212_v17 = vpop.permute.xlu1 %6211  ;;  %6392 = vst.msk [vmem:[#allocation3 + $0x50] sm:$0xff] %vm6381_vm0, %v6210_v50  ;;  %v6480_v50 = vld [vmem:[#allocation2 + $0x1e1] sm:$0xff] }
 0x79e   :  { %6393 = vst.msk [vmem:[#allocation3 + $0x58] sm:$0xff] %vm6381_vm0, %v6212_v17  ;;  %6582 = vrot.lane.b32.xlu0 %v6450_v60, %s9335_s1  ;;  %v6481_v17 = vld [vmem:[#allocation2 + $0x1e9] sm:$0xff] }
 0x79f   :  { %6584 = vrot.lane.b32.xlu1 %v6451_v42, %s9335_s1 }
 0x7a0   :  { %v6214_v57 = vpop.permute.xlu0 %6213 }
 0x7a1   :  { %v6216_v55 = vpop.permute.xlu1 %6215  ;;  %6394 = vst.msk [vmem:[#allocation3 + $0x60] sm:$0xff] %vm6381_vm0, %v6214_v57  ;;  %v6482_v57 = vld [vmem:[#allocation2 + $0x1f9] sm:$0xff] }
 0x7a2   :  { %6395 = vst.msk [vmem:[#allocation3 + $0x68] sm:$0xff] %vm6381_vm0, %v6216_v55  ;;  %6586 = vrot.lane.b32.xlu0 %v6452_v21, %s9335_s1  ;;  %v6483_v55 = vld [vmem:[#allocation2 + $0x201] sm:$0xff] }
 0x7a3   :  { %6588 = vrot.lane.b32.xlu1 %v6453_v36, %s9335_s1 }
 0x7a4   :  { %v6218_v45 = vpop.permute.xlu0 %6217 }
 0x7a5   :  { %v6220_v25 = vpop.permute.xlu1 %6219  ;;  %6396 = vst.msk [vmem:[#allocation3 + $0x70] sm:$0xff] %vm6381_vm0, %v6218_v45  ;;  %v6484_v45 = vld [vmem:[#allocation2 + $0x211] sm:$0xff] }
 0x7a6   :  { %6397 = vst.msk [vmem:[#allocation3 + $0x78] sm:$0xff] %vm6381_vm0, %v6220_v25  ;;  %6590 = vrot.lane.b32.xlu0 %v6454_v22, %s9335_s1  ;;  %v6485_v25 = vld [vmem:[#allocation2 + $0x219] sm:$0xff] }
 0x7a7   :  { %6592 = vrot.lane.b32.xlu1 %v13478_v19, %s9335_s1 }
 0x7a8   :  { %v6222_v54 = vpop.permute.xlu0 %6221 }
 0x7a9   :  { %v6224_v28 = vpop.permute.xlu1 %6223  ;;  %6398 = vst.msk [vmem:[#allocation3 + $0x80] sm:$0xff] %vm6381_vm0, %v6222_v54 }
 0x7aa   :  { %6399 = vst.msk [vmem:[#allocation3 + $0x88] sm:$0xff] %vm6381_vm0, %v6224_v28  ;;  %6594 = vrot.lane.b32.xlu0 %v13484_v8, %s9335_s1  ;;  %v6486_v28 = vld [vmem:[#allocation2 + $0x229] sm:$0xff] }
 0x7ab   :  { %6596 = vrot.lane.b32.xlu1 %v13487_v35, %s9335_s1 }
 0x7ac   :  { %v6226_v13 = vpop.permute.xlu0 %6225 }
 0x7ad   :  { %v6228_v62 = vpop.permute.xlu1 %6227  ;;  %6400 = vst.msk [vmem:[#allocation3 + $0x90] sm:$0xff] %vm6381_vm0, %v6226_v13  ;;  %v6487_v13 = vld [vmem:[#allocation2 + $0x231] sm:$0xff] }
 0x7ae   :  { %6401 = vst.msk [vmem:[#allocation3 + $0x98] sm:$0xff] %vm6381_vm0, %v6228_v62  ;;  %6598 = vrot.lane.b32.xlu0 %v13494_v53, %s9335_s1 }
 0x7af   :  { %6600 = vrot.lane.b32.xlu1 %v13497_v29, %s9335_s1 }
 0x7b0   :  { %v6230_v34 = vpop.permute.xlu0 %6229 }
 0x7b1   :  { %v6232_v58 = vpop.permute.xlu1 %6231  ;;  %6402 = vst.msk [vmem:[#allocation3 + $0xa0] sm:$0xff] %vm6381_vm0, %v6230_v34 }
 0x7b2   :  { %6403 = vst.msk [vmem:[#allocation3 + $0xa8] sm:$0xff] %vm6381_vm0, %v6232_v58  ;;  %6602 = vrot.lane.b32.xlu0 %v13504_v14, %s9335_s1  ;;  %v6488_v58 = vld [vmem:[#allocation2 + $0x241] sm:$0xff] }
 0x7b3   :  { %6604 = vrot.lane.b32.xlu1 %v13507_v61, %s9335_s1 }
 0x7b4   :  { %v6234_v23 = vpop.permute.xlu0 %6233 }
 0x7b5   :  { %v6236_v10 = vpop.permute.xlu1 %6235  ;;  %6404 = vst.msk [vmem:[#allocation3 + $0xb0] sm:$0xff] %vm6381_vm0, %v6234_v23  ;;  %v6489_v23 = vld [vmem:[#allocation2 + $0x249] sm:$0xff] }
 0x7b6   :  { %6405 = vst.msk [vmem:[#allocation3 + $0xb8] sm:$0xff] %vm6381_vm0, %v6236_v10  ;;  %6606 = vrot.lane.b32.xlu0 %v13514_v41, %s9335_s1 }
 0x7b7   :  { %6608 = vrot.lane.b32.xlu1 %v13517_v43, %s9335_s1 }
 0x7b8   :  { %v6238_v12 = vpop.permute.xlu0 %6237 }
 0x7b9   :  { %v6240_v44 = vpop.permute.xlu1 %6239  ;;  %6406 = vst.msk [vmem:[#allocation3 + $0xc0] sm:$0xff] %vm6381_vm0, %v6238_v12 }
 0x7ba   :  { %6407 = vst.msk [vmem:[#allocation3 + $0xc8] sm:$0xff] %vm6381_vm0, %v6240_v44  ;;  %6610 = vrot.lane.b32.xlu0 %v6464_v49, %s9335_s1  ;;  %v6490_v44 = vld [vmem:[#allocation2 + $0x259] sm:$0xff]  ;;  %v6491_v49 = vld [vmem:[#allocation2 + $0x261] sm:$0xff] }
 0x7bb   :  { %6612 = vrot.lane.b32.xlu1 %v6465_v52, %s9335_s1 }
 0x7bc   :  { %v6242_v51 = vpop.permute.xlu0 %6241 }
 0x7bd   :  { %v6244_v3 = vpop.permute.xlu1 %6243  ;;  %6408 = vst.msk [vmem:[#allocation3 + $0xd0] sm:$0xff] %vm6381_vm0, %v6242_v51 }
 0x7be   :  { %6409 = vst.msk [vmem:[#allocation3 + $0xd8] sm:$0xff] %vm6381_vm0, %v6244_v3  ;;  %6614 = vrot.lane.b32.xlu0 %v6466_v31, %s9335_s1  ;;  %v6492_v3 = vld [vmem:[#allocation2 + $0x271] sm:$0xff]  ;;  %v6493_v31 = vld [vmem:[#allocation2 + $0x279] sm:$0xff] }
 0x7bf   :  { %6616 = vrot.lane.b32.xlu1 %v6467_v16, %s9335_s1 }
 0x7c0   :  { %v6246_v39 = vpop.permute.xlu0 %6245 }
 0x7c1   :  { %v6248_v37 = vpop.permute.xlu1 %6247  ;;  %6410 = vst.msk [vmem:[#allocation3 + $0xe0] sm:$0xff] %vm6381_vm0, %v6246_v39 }
 0x7c2   :  { %6411 = vst.msk [vmem:[#allocation3 + $0xe8] sm:$0xff] %vm6381_vm0, %v6248_v37  ;;  %6618 = vrot.lane.b32.xlu0 %v6468_v40, %s9335_s1  ;;  %v6494_v37 = vld [vmem:[#allocation2 + $0x289] sm:$0xff]  ;;  %v6495_v40 = vld [vmem:[#allocation2 + $0x291] sm:$0xff] }
 0x7c3   :  { %6620 = vrot.lane.b32.xlu1 %v6469_v56, %s9335_s1 }
 0x7c4   :  { %v6250_v5 = vpop.permute.xlu0 %6249 }
 0x7c5   :  { %v6252_v18 = vpop.permute.xlu1 %6251  ;;  %6412 = vst.msk [vmem:[#allocation3 + $0xf0] sm:$0xff] %vm6381_vm0, %v6250_v5 }
 0x7c6   :  { %6413 = vst.msk [vmem:[#allocation3 + $0xf8] sm:$0xff] %vm6381_vm0, %v6252_v18  ;;  %6622 = vrot.lane.b32.xlu0 %v13536_v33, %s9335_s1  ;;  %v6496_v18 = vld [vmem:[#allocation2 + $0x2a1] sm:$0xff] }
 0x7c7   :  { %6624 = vrot.lane.b32.xlu1 %v13539_v32, %s9335_s1 }
 0x7c8   :  { %v6254_v46 = vpop.permute.xlu0 %6253 }
 0x7c9   :  { %v6256_v20 = vpop.permute.xlu1 %6255  ;;  %6414 = vst.msk [vmem:[#allocation3 + $0x100] sm:$0xff] %vm6381_vm0, %v6254_v46  ;;  %v6497_v46 = vld [vmem:[#allocation2 + $0x2a9] sm:$0xff] }
 0x7ca   :  { %6415 = vst.msk [vmem:[#allocation3 + $0x108] sm:$0xff] %vm6381_vm0, %v6256_v20  ;;  %6626 = vrot.lane.b32.xlu0 %v13546_v1, %s9335_s1 }
 0x7cb   :  { %6628 = vrot.lane.b32.xlu1 %v13549_v11, %s9335_s1 }
 0x7cc   :  { %v6258_v4 = vpop.permute.xlu0 %6257 }
 0x7cd   :  { %v6260_v47 = vpop.permute.xlu1 %6259  ;;  %6416 = vst.msk [vmem:[#allocation3 + $0x110] sm:$0xff] %vm6381_vm0, %v6258_v4 }
 0x7ce   :  { %6417 = vst.msk [vmem:[#allocation3 + $0x118] sm:$0xff] %vm6381_vm0, %v6260_v47  ;;  %6630 = vrot.lane.b32.xlu0 %v13556_v15, %s9335_s1  ;;  %v6498_v47 = vld [vmem:[#allocation2 + $0x2b9] sm:$0xff] }
 0x7cf   :  { %6632 = vrot.lane.b32.xlu1 %v13559_v24, %s9335_s1 }
 0x7d0   :  { %v6262_v9 = vpop.permute.xlu0 %6261 }
 0x7d1   :  { %v6264_v48 = vpop.permute.xlu1 %6263  ;;  %6418 = vst.msk [vmem:[#allocation3 + $0x120] sm:$0xff] %vm6381_vm0, %v6262_v9  ;;  %v6499_v9 = vld [vmem:[#allocation2 + $0x2c1] sm:$0xff] }
 0x7d2   :  { %6419 = vst.msk [vmem:[#allocation3 + $0x128] sm:$0xff] %vm6381_vm0, %v6264_v48  ;;  %6634 = vrot.lane.b32.xlu0 %v13566_v38, %s9335_s1 }
 0x7d3   :  { %6636 = vrot.lane.b32.xlu1 %v13569_v26, %s9335_s1 }
 0x7d4   :  { %v6266_v6 = vpop.permute.xlu0 %6265 }
 0x7d5   :  { %v6268_v0 = vpop.permute.xlu1 %6267  ;;  %6420 = vst.msk [vmem:[#allocation3 + $0x130] sm:$0xff] %vm6381_vm0, %v6266_v6 }
 0x7d6   :  { %6421 = vst.msk [vmem:[#allocation3 + $0x138] sm:$0xff] %vm6381_vm0, %v6268_v0  ;;  %6638 = vrot.lane.b32.xlu0 %v6478_v7, %s9335_s1  ;;  %v6500_v0 = vld [vmem:[#allocation2 + $0x2d1] sm:$0xff]  ;;  %v6501_v7 = vld [vmem:[#allocation2 + $0x2d9] sm:$0xff] }
 0x7d7   :  { %6640 = vrot.lane.b32.xlu1 %v6479_v2, %s9335_s1 }
 0x7d8   :  { %v6270_v59 = vpop.permute.xlu0 %6269 }
 0x7d9   :  { %v6272_v63 = vpop.permute.xlu1 %6271  ;;  %6422 = vst.msk [vmem:[#allocation3 + $0x140] sm:$0xff] %vm6381_vm0, %v6270_v59 }
 0x7da   :  { %6423 = vst.msk [vmem:[#allocation3 + $0x148] sm:$0xff] %vm6381_vm0, %v6272_v63  ;;  %6642 = vrot.lane.b32.xlu0 %v6480_v50, %s9335_s1  ;;  %v6502_v63 = vld [vmem:[#allocation2 + $0x2e9] sm:$0xff]  ;;  %v6503_v50 = vld [vmem:[#allocation2 + $0x2f1] sm:$0xff] }
 0x7db   :  { %6644 = vrot.lane.b32.xlu1 %v6481_v17, %s9335_s1 }
 0x7dc   :  { %v6274_v60 = vpop.permute.xlu0 %6273 }
 0x7dd   :  { %v6276_v42 = vpop.permute.xlu1 %6275  ;;  %6424 = vst.msk [vmem:[#allocation3 + $0x150] sm:$0xff] %vm6381_vm0, %v6274_v60 }
 0x7de   :  { %6425 = vst.msk [vmem:[#allocation3 + $0x158] sm:$0xff] %vm6381_vm0, %v6276_v42  ;;  %6646 = vrot.lane.b32.xlu0 %v6482_v57, %s9335_s1  ;;  %v6504_v42 = vld [vmem:[#allocation2 + $0x301] sm:$0xff]  ;;  %v6505_v57 = vld [vmem:[#allocation2 + $0x309] sm:$0xff] }
 0x7df   :  { %6648 = vrot.lane.b32.xlu1 %v6483_v55, %s9335_s1 }
 0x7e0   :  { %v6278_v21 = vpop.permute.xlu0 %6277 }
 0x7e1   :  { %v6280_v36 = vpop.permute.xlu1 %6279  ;;  %6426 = vst.msk [vmem:[#allocation3 + $0x160] sm:$0xff] %vm6381_vm0, %v6278_v21 }
 0x7e2   :  { %6427 = vst.msk [vmem:[#allocation3 + $0x168] sm:$0xff] %vm6381_vm0, %v6280_v36  ;;  %6650 = vrot.lane.b32.xlu0 %v6484_v45, %s9335_s1  ;;  %v6506_v36 = vld [vmem:[#allocation2 + $0x319] sm:$0xff]  ;;  %v6507_v45 = vld [vmem:[#allocation2 + $0x321] sm:$0xff] }
 0x7e3   :  { %6652 = vrot.lane.b32.xlu1 %v6485_v25, %s9335_s1 }
 0x7e4   :  { %v6282_v22 = vpop.permute.xlu0 %6281 }
 0x7e5   :  { %v6284_v54 = vpop.permute.xlu1 %6283  ;;  %6428 = vst.msk [vmem:[#allocation3 + $0x170] sm:$0xff] %vm6381_vm0, %v6282_v22 }
 0x7e6   :  { %6429 = vst.msk [vmem:[#allocation3 + $0x178] sm:$0xff] %vm6381_vm0, %v6284_v54  ;;  %6654 = vrot.lane.b32.xlu0 %v6486_v28, %s9335_s1  ;;  %v13636_v54 = vld [vmem:[#allocation2 + $0x18a] sm:$0xff] }
 0x7e7   :  { %6656 = vrot.lane.b32.xlu1 %v6487_v13, %s9335_s1  ;;  %v13639_v28 = vld [vmem:[#allocation2 + $0xca] sm:$0xff]  ;;  %v7247_v13 = vld [vmem:[#allocation2 + $0x1a0] sm:$0xff] }
 0x7e8   :  { %v6286_v62 = vpop.permute.xlu0 %6285 }
 0x7e9   :  { %v6288_v34 = vpop.permute.xlu1 %6287  ;;  %6430 = vst.msk [vmem:[#allocation3 + $0x180] sm:$0xff] %vm6381_vm0, %v6286_v62 }
 0x7ea   :  { %6431 = vst.msk [vmem:[#allocation3 + $0x188] sm:$0xff] %vm6381_vm0, %v6288_v34  ;;  %6658 = vrot.lane.b32.xlu0 %v6488_v58, %s9335_s1  ;;  %v7231_v58 = vld [vmem:[#allocation2 + $0xe0] sm:$0xff] }
 0x7eb   :  { %6660 = vrot.lane.b32.xlu1 %v6489_v23, %s9335_s1  ;;  %v7632_v23 = vld [vmem:[#allocation2 + $0x1a1] sm:$0xff] }
 0x7ec   :  { %v6290_v10 = vpop.permute.xlu0 %6289 }
 0x7ed   :  { %v6292_v12 = vpop.permute.xlu1 %6291  ;;  %6432 = vst.msk [vmem:[#allocation3 + $0x190] sm:$0xff] %vm6381_vm0, %v6290_v10 }
 0x7ee   :  { %6433 = vst.msk [vmem:[#allocation3 + $0x198] sm:$0xff] %vm6381_vm0, %v6292_v12  ;;  %6662 = vrot.lane.b32.xlu0 %v6490_v44, %s9335_s1  ;;  %v8017_v44 = vld [vmem:[#allocation2 + $0x1a2] sm:$0xff] }
 0x7ef   :  { %6664 = vrot.lane.b32.xlu1 %v6491_v49, %s9335_s1 }
 0x7f0   :  { %v6294_v52 = vpop.permute.xlu0 %6293 }
 0x7f1   :  { %v6296_v51 = vpop.permute.xlu1 %6295  ;;  %6434 = vst.msk [vmem:[#allocation3 + $0x1a0] sm:$0xff] %vm6381_vm0, %v6294_v52 }
 0x7f2   :  { %6435 = vst.msk [vmem:[#allocation3 + $0x1a8] sm:$0xff] %vm6381_vm0, %v6296_v51  ;;  %6666 = vrot.lane.b32.xlu0 %v6492_v3, %s9335_s1  ;;  %v13656_v51 = vld [vmem:[#allocation2 + $0x182] sm:$0xff] }
 0x7f3   :  { %6668 = vrot.lane.b32.xlu1 %v6493_v31, %s9335_s1 }
 0x7f4   :  { %v6298_v16 = vpop.permute.xlu0 %6297 }
 0x7f5   :  { %v6300_v39 = vpop.permute.xlu1 %6299  ;;  %6436 = vst.msk [vmem:[#allocation3 + $0x1b0] sm:$0xff] %vm6381_vm0, %v6298_v16  ;;  %v13665_v16 = vld [vmem:[#allocation2 + $0xc2] sm:$0xff] }
 0x7f6   :  { %6437 = vst.msk [vmem:[#allocation3 + $0x1b8] sm:$0xff] %vm6381_vm0, %v6300_v39  ;;  %6670 = vrot.lane.b32.xlu0 %v6494_v37, %s9335_s1  ;;  %v7246_v39 = vld [vmem:[#allocation2 + $0x198] sm:$0xff] }
 0x7f7   :  { %6672 = vrot.lane.b32.xlu1 %v6495_v40, %s9335_s1 }
 0x7f8   :  { %v6302_v56 = vpop.permute.xlu0 %6301 }
 0x7f9   :  { %v6304_v5 = vpop.permute.xlu1 %6303  ;;  %6438 = vst.msk [vmem:[#allocation3 + $0x1c0] sm:$0xff] %vm6381_vm0, %v6302_v56  ;;  %v7230_v56 = vld [vmem:[#allocation2 + $0xd8] sm:$0xff] }
 0x7fa   :  { %6439 = vst.msk [vmem:[#allocation3 + $0x1c8] sm:$0xff] %vm6381_vm0, %v6304_v5  ;;  %6674 = vrot.lane.b32.xlu0 %v6496_v18, %s9335_s1  ;;  %v7631_v5 = vld [vmem:[#allocation2 + $0x199] sm:$0xff] }
 0x7fb   :  { %6676 = vrot.lane.b32.xlu1 %v6497_v46, %s9335_s1 }
 0x7fc   :  { %v6306_v20 = vpop.permute.xlu0 %6305 }
 0x7fd   :  { %v6308_v4 = vpop.permute.xlu1 %6307  ;;  %6440 = vst.msk [vmem:[#allocation3 + $0x1d0] sm:$0xff] %vm6381_vm0, %v6306_v20  ;;  %v8016_v20 = vld [vmem:[#allocation2 + $0x19a] sm:$0xff] }
 0x7fe   :  { %6441 = vst.msk [vmem:[#allocation3 + $0x1d8] sm:$0xff] %vm6381_vm0, %v6308_v4  ;;  %6678 = vrot.lane.b32.xlu0 %v6498_v47, %s9335_s1 }
 0x7ff   :  { %6680 = vrot.lane.b32.xlu1 %v6499_v9, %s9335_s1  ;;  %v13682_v9 = vld [vmem:[#allocation2 + $0x172] sm:$0xff] }
 0x800   :  { %v6310_v48 = vpop.permute.xlu0 %6309 }
 0x801   :  { %v6312_v6 = vpop.permute.xlu1 %6311  ;;  %6442 = vst.msk [vmem:[#allocation3 + $0x1e0] sm:$0xff] %vm6381_vm0, %v6310_v48 }
 0x802   :  { %6443 = vst.msk [vmem:[#allocation3 + $0x1e8] sm:$0xff] %vm6381_vm0, %v6312_v6  ;;  %6682 = vrot.lane.b32.xlu0 %v6500_v0, %s9335_s1  ;;  %v13688_v0 = vld [vmem:[#allocation2 + $0xda] sm:$0xff] }
 0x803   :  { %6684 = vrot.lane.b32.xlu1 %v6501_v7, %s9335_s1 }
 0x804   :  { %v6314_v2 = vpop.permute.xlu0 %6313 }
 0x805   :  { %v6316_v59 = vpop.permute.xlu1 %6315  ;;  %6444 = vst.msk [vmem:[#allocation3 + $0x1f0] sm:$0xff] %vm6381_vm0, %v6314_v2 }
 0x806   :  { %6445 = vst.msk [vmem:[#allocation3 + $0x1f8] sm:$0xff] %vm6381_vm0, %v6316_v59  ;;  %6686 = vrot.lane.b32.xlu0 %v6502_v63, %s9335_s1  ;;  %v7229_v59 = vld [vmem:[#allocation2 + $0xc8] sm:$0xff] }
 0x807   :  { %6688 = vrot.lane.b32.xlu1 %v6503_v50, %s9335_s1 }
 0x808   :  { %v6575_v17 = vpop.permute.xlu0 %6574 }
 0x809   :  { %v6577_v60 = vpop.permute.xlu1 %6576  ;;  %6767 = vst.msk [vmem:[#allocation3] sm:$0xff] %vm6766_vm1, %v6575_v17 }
 0x80a   :  { %6768 = vst.msk [vmem:[#allocation3 + $0x8] sm:$0xff] %vm6766_vm1, %v6577_v60  ;;  %6690 = vrot.lane.b32.xlu0 %v6504_v42, %s9335_s1 }
 0x80b   :  { %6692 = vrot.lane.b32.xlu1 %v6505_v57, %s9335_s1 }
 0x80c   :  { %v6579_v55 = vpop.permute.xlu0 %6578 }
 0x80d   :  { %v6581_v21 = vpop.permute.xlu1 %6580  ;;  %6769 = vst.msk [vmem:[#allocation3 + $0x10] sm:$0xff] %vm6766_vm1, %v6579_v55 }
 0x80e   :  { %6770 = vst.msk [vmem:[#allocation3 + $0x18] sm:$0xff] %vm6766_vm1, %v6581_v21  ;;  %6694 = vrot.lane.b32.xlu0 %v6506_v36, %s9335_s1  ;;  %v7228_v21 = vld [vmem:[#allocation2 + $0xc0] sm:$0xff] }
 0x80f   :  { %6696 = vrot.lane.b32.xlu1 %v6507_v45, %s9335_s1 }
 0x810   :  { %v6583_v25 = vpop.permute.xlu0 %6582 }
 0x811   :  { %v6585_v22 = vpop.permute.xlu1 %6584  ;;  %6771 = vst.msk [vmem:[#allocation3 + $0x20] sm:$0xff] %vm6766_vm1, %v6583_v25 }
 0x812   :  { %6772 = vst.msk [vmem:[#allocation3 + $0x28] sm:$0xff] %vm6766_vm1, %v6585_v22  ;;  %7021 = vrot.lane.b32.xlu0 %v13636_v54, %s9336_s2 }
 0x813   :  { %6989 = vrot.lane.b32.xlu1 %v13639_v28, %s9336_s2 }
 0x814   :  { %v6587_v62 = vpop.permute.xlu0 %6586 }
 0x815   :  { %v6589_v34 = vpop.permute.xlu1 %6588  ;;  %6773 = vst.msk [vmem:[#allocation3 + $0x30] sm:$0xff] %vm6766_vm1, %v6587_v62  ;;  %v7243_v62 = vld [vmem:[#allocation2 + $0x170] sm:$0xff] }
 0x816   :  { %6774 = vst.msk [vmem:[#allocation3 + $0x38] sm:$0xff] %vm6766_vm1, %v6589_v34  ;;  %7406 = vrot.lane.b32.xlu0 %v7247_v13, %s9337_s3  ;;  %v7227_v34 = vld [vmem:[#allocation2 + $0xb0] sm:$0xff] }
 0x817   :  { %7374 = vrot.lane.b32.xlu1 %v7231_v58, %s9337_s3 }
 0x818   :  { %v6591_v10 = vpop.permute.xlu0 %6590 }
 0x819   :  { %v6593_v12 = vpop.permute.xlu1 %6592  ;;  %6775 = vst.msk [vmem:[#allocation3 + $0x40] sm:$0xff] %vm6766_vm1, %v6591_v10 }
 0x81a   :  { %6776 = vst.msk [vmem:[#allocation3 + $0x48] sm:$0xff] %vm6766_vm1, %v6593_v12  ;;  %7791 = vrot.lane.b32.xlu0 %v7632_v23, %s9338_s12 }
 0x81b   :  { %7759 = vrot.lane.b32.xlu1 %v13517_v43, %s9338_s12  ;;  %v13662_v43 = vld [vmem:[#allocation2 + $0xe2] sm:$0xff] }
 0x81c   :  { %v6595_v49 = vpop.permute.xlu0 %6594 }
 0x81d   :  { %v6597_v52 = vpop.permute.xlu1 %6596  ;;  %6777 = vst.msk [vmem:[#allocation3 + $0x50] sm:$0xff] %vm6766_vm1, %v6595_v49 }
 0x81e   :  { %6778 = vst.msk [vmem:[#allocation3 + $0x58] sm:$0xff] %vm6766_vm1, %v6597_v52  ;;  %8176 = vrot.lane.b32.xlu0 %v8017_v44, %s9339_s13  ;;  %v13763_v44 = vld [vmem:[#allocation2 + $0x152] sm:$0xff] }
 0x81f   :  { %7019 = vrot.lane.b32.xlu1 %v13656_v51, %s9336_s2 }
 0x820   :  { %v6599_v3 = vpop.permute.xlu0 %6598 }
 0x821   :  { %v6601_v31 = vpop.permute.xlu1 %6600  ;;  %6779 = vst.msk [vmem:[#allocation3 + $0x60] sm:$0xff] %vm6766_vm1, %v6599_v3  ;;  %v7242_v3 = vld [vmem:[#allocation2 + $0x168] sm:$0xff] }
 0x822   :  { %6780 = vst.msk [vmem:[#allocation3 + $0x68] sm:$0xff] %vm6766_vm1, %v6601_v31  ;;  %8144 = vrot.lane.b32.xlu0 %v13662_v43, %s9339_s13  ;;  %v7226_v31 = vld [vmem:[#allocation2 + $0xa8] sm:$0xff] }
 0x823   :  { %6987 = vrot.lane.b32.xlu1 %v13665_v16, %s9336_s2 }
 0x824   :  { %v6603_v37 = vpop.permute.xlu0 %6602 }
 0x825   :  { %v6605_v40 = vpop.permute.xlu1 %6604  ;;  %6781 = vst.msk [vmem:[#allocation3 + $0x70] sm:$0xff] %vm6766_vm1, %v6603_v37 }
 0x826   :  { %6782 = vst.msk [vmem:[#allocation3 + $0x78] sm:$0xff] %vm6766_vm1, %v6605_v40  ;;  %7404 = vrot.lane.b32.xlu0 %v7246_v39, %s9337_s3 }
 0x827   :  { %7372 = vrot.lane.b32.xlu1 %v7230_v56, %s9337_s3  ;;  %v13789_v56 = vld [vmem:[#allocation2 + $0x142] sm:$0xff] }
 0x828   :  { %v6607_v18 = vpop.permute.xlu0 %6606 }
 0x829   :  { %v6609_v46 = vpop.permute.xlu1 %6608  ;;  %6783 = vst.msk [vmem:[#allocation3 + $0x80] sm:$0xff] %vm6766_vm1, %v6607_v18 }
 0x82a   :  { %6784 = vst.msk [vmem:[#allocation3 + $0x88] sm:$0xff] %vm6766_vm1, %v6609_v46  ;;  %7789 = vrot.lane.b32.xlu0 %v7631_v5, %s9338_s12 }
 0x82b   :  { %7757 = vrot.lane.b32.xlu1 %v13514_v41, %s9338_s12  ;;  %v13691_v41 = vld [vmem:[#allocation2 + $0xb2] sm:$0xff] }
 0x82c   :  { %v6611_v4 = vpop.permute.xlu0 %6610 }
 0x82d   :  { %v6613_v47 = vpop.permute.xlu1 %6612  ;;  %6785 = vst.msk [vmem:[#allocation3 + $0x90] sm:$0xff] %vm6766_vm1, %v6611_v4  ;;  %v7225_v4 = vld [vmem:[#allocation2 + $0x98] sm:$0xff] }
 0x82e   :  { %6786 = vst.msk [vmem:[#allocation3 + $0x98] sm:$0xff] %vm6766_vm1, %v6613_v47  ;;  %8174 = vrot.lane.b32.xlu0 %v8016_v20, %s9339_s13  ;;  %v7241_v20 = vld [vmem:[#allocation2 + $0x158] sm:$0xff] }
 0x82f   :  { %7017 = vrot.lane.b32.xlu1 %v13682_v9, %s9336_s2 }
 0x830   :  { %v6615_v48 = vpop.permute.xlu0 %6614 }
 0x831   :  { %v6617_v6 = vpop.permute.xlu1 %6616  ;;  %6787 = vst.msk [vmem:[#allocation3 + $0xa0] sm:$0xff] %vm6766_vm1, %v6615_v48 }
 0x832   :  { %6788 = vst.msk [vmem:[#allocation3 + $0xa8] sm:$0xff] %vm6766_vm1, %v6617_v6  ;;  %8142 = vrot.lane.b32.xlu0 %v13688_v0, %s9339_s13 }
 0x833   :  { %6985 = vrot.lane.b32.xlu1 %v13691_v41, %s9336_s2 }
 0x834   :  { %v6619_v7 = vpop.permute.xlu0 %6618 }
 0x835   :  { %v6621_v2 = vpop.permute.xlu1 %6620  ;;  %6789 = vst.msk [vmem:[#allocation3 + $0xb0] sm:$0xff] %vm6766_vm1, %v6619_v7 }
 0x836   :  { %6790 = vst.msk [vmem:[#allocation3 + $0xb8] sm:$0xff] %vm6766_vm1, %v6621_v2  ;;  %7402 = vrot.lane.b32.xlu0 %v13360_v27, %s9337_s3  ;;  %v13710_v27 = vld [vmem:[#allocation2 + $0x16a] sm:$0xff] }
 0x837   :  { %7370 = vrot.lane.b32.xlu1 %v7229_v59, %s9337_s3 }
 0x838   :  { %v6623_v63 = vpop.permute.xlu0 %6622 }
 0x839   :  { %v6625_v50 = vpop.permute.xlu1 %6624  ;;  %6791 = vst.msk [vmem:[#allocation3 + $0xc0] sm:$0xff] %vm6766_vm1, %v6623_v63  ;;  %v7240_v63 = vld [vmem:[#allocation2 + $0x150] sm:$0xff] }
 0x83a   :  { %6792 = vst.msk [vmem:[#allocation3 + $0xc8] sm:$0xff] %vm6766_vm1, %v6625_v50  ;;  %7787 = vrot.lane.b32.xlu0 %v13569_v26, %s9338_s12  ;;  %v7224_v50 = vld [vmem:[#allocation2 + $0x90] sm:$0xff] }
 0x83b   :  { %7755 = vrot.lane.b32.xlu1 %v13507_v61, %s9338_s12  ;;  %v13718_v61 = vld [vmem:[#allocation2 + $0xaa] sm:$0xff] }
 0x83c   :  { %v6627_v17 = vpop.permute.xlu0 %6626 }
 0x83d   :  { %v6629_v60 = vpop.permute.xlu1 %6628  ;;  %6793 = vst.msk [vmem:[#allocation3 + $0xd0] sm:$0xff] %vm6766_vm1, %v6627_v17 }
 0x83e   :  { %6794 = vst.msk [vmem:[#allocation3 + $0xd8] sm:$0xff] %vm6766_vm1, %v6629_v60  ;;  %8172 = vrot.lane.b32.xlu0 %v13636_v54, %s9339_s13 }
 0x83f   :  { %7015 = vrot.lane.b32.xlu1 %v13710_v27, %s9336_s2 }
 0x840   :  { %v6631_v42 = vpop.permute.xlu0 %6630 }
 0x841   :  { %v6633_v57 = vpop.permute.xlu1 %6632  ;;  %6795 = vst.msk [vmem:[#allocation3 + $0xe0] sm:$0xff] %vm6766_vm1, %v6631_v42 }
 0x842   :  { %6796 = vst.msk [vmem:[#allocation3 + $0xe8] sm:$0xff] %vm6766_vm1, %v6633_v57  ;;  %8140 = vrot.lane.b32.xlu0 %v13639_v28, %s9339_s13  ;;  %v13841_v57 = vld [vmem:[#allocation2 + $0x12a] sm:$0xff] }
 0x843   :  { %6983 = vrot.lane.b32.xlu1 %v13718_v61, %s9336_s2 }
 0x844   :  { %v6635_v26 = vpop.permute.xlu0 %6634 }
 0x845   :  { %v6637_v55 = vpop.permute.xlu1 %6636  ;;  %6797 = vst.msk [vmem:[#allocation3 + $0xf0] sm:$0xff] %vm6766_vm1, %v6635_v26 }
 0x846   :  { %6798 = vst.msk [vmem:[#allocation3 + $0xf8] sm:$0xff] %vm6766_vm1, %v6637_v55  ;;  %7400 = vrot.lane.b32.xlu0 %v13357_v30, %s9337_s3  ;;  %v13737_v30 = vld [vmem:[#allocation2 + $0x15a] sm:$0xff] }
 0x847   :  { %7368 = vrot.lane.b32.xlu1 %v7228_v21, %s9337_s3  ;;  %v7239_v21 = vld [vmem:[#allocation2 + $0x140] sm:$0xff] }
 0x848   :  { %v6639_v36 = vpop.permute.xlu0 %6638 }
 0x849   :  { %v6641_v45 = vpop.permute.xlu1 %6640  ;;  %6799 = vst.msk [vmem:[#allocation3 + $0x100] sm:$0xff] %vm6766_vm1, %v6639_v36  ;;  %v7223_v36 = vld [vmem:[#allocation2 + $0x80] sm:$0xff] }
 0x84a   :  { %6800 = vst.msk [vmem:[#allocation3 + $0x108] sm:$0xff] %vm6766_vm1, %v6641_v45  ;;  %7785 = vrot.lane.b32.xlu0 %v13566_v38, %s9338_s12 }
 0x84b   :  { %7753 = vrot.lane.b32.xlu1 %v13504_v14, %s9338_s12  ;;  %v13745_v14 = vld [vmem:[#allocation2 + $0x9a] sm:$0xff] }
 0x84c   :  { %v6643_v25 = vpop.permute.xlu0 %6642 }
 0x84d   :  { %v6645_v22 = vpop.permute.xlu1 %6644  ;;  %6801 = vst.msk [vmem:[#allocation3 + $0x110] sm:$0xff] %vm6766_vm1, %v6643_v25 }
 0x84e   :  { %6802 = vst.msk [vmem:[#allocation3 + $0x118] sm:$0xff] %vm6766_vm1, %v6645_v22  ;;  %8170 = vrot.lane.b32.xlu0 %v13656_v51, %s9339_s13 }
 0x84f   :  { %7013 = vrot.lane.b32.xlu1 %v13737_v30, %s9336_s2 }
 0x850   :  { %v6647_v54 = vpop.permute.xlu0 %6646 }
 0x851   :  { %v6649_v28 = vpop.permute.xlu1 %6648  ;;  %6803 = vst.msk [vmem:[#allocation3 + $0x120] sm:$0xff] %vm6766_vm1, %v6647_v54 }
 0x852   :  { %6804 = vst.msk [vmem:[#allocation3 + $0x128] sm:$0xff] %vm6766_vm1, %v6649_v28  ;;  %8138 = vrot.lane.b32.xlu0 %v13665_v16, %s9339_s13 }
 0x853   :  { %6981 = vrot.lane.b32.xlu1 %v13745_v14, %s9336_s2 }
 0x854   :  { %v6651_v38 = vpop.permute.xlu0 %6650 }
 0x855   :  { %v6653_v13 = vpop.permute.xlu1 %6652  ;;  %6805 = vst.msk [vmem:[#allocation3 + $0x130] sm:$0xff] %vm6766_vm1, %v6651_v38 }
 0x856   :  { %6806 = vst.msk [vmem:[#allocation3 + $0x138] sm:$0xff] %vm6766_vm1, %v6653_v13  ;;  %7398 = vrot.lane.b32.xlu0 %v7243_v62, %s9337_s3 }
 0x857   :  { %7366 = vrot.lane.b32.xlu1 %v7227_v34, %s9337_s3  ;;  %v7238_v34 = vld [vmem:[#allocation2 + $0x138] sm:$0xff] }
 0x858   :  { %v6655_v58 = vpop.permute.xlu0 %6654 }
 0x859   :  { %v6657_v23 = vpop.permute.xlu1 %6656  ;;  %6807 = vst.msk [vmem:[#allocation3 + $0x140] sm:$0xff] %vm6766_vm1, %v6655_v58  ;;  %v7222_v58 = vld [vmem:[#allocation2 + $0x78] sm:$0xff] }
 0x85a   :  { %6808 = vst.msk [vmem:[#allocation3 + $0x148] sm:$0xff] %vm6766_vm1, %v6657_v23  ;;  %7783 = vrot.lane.b32.xlu0 %v13559_v24, %s9338_s12 }
 0x85b   :  { %7751 = vrot.lane.b32.xlu1 %v13497_v29, %s9338_s12  ;;  %v13771_v29 = vld [vmem:[#allocation2 + $0x92] sm:$0xff] }
 0x85c   :  { %v6659_v10 = vpop.permute.xlu0 %6658 }
 0x85d   :  { %v6661_v12 = vpop.permute.xlu1 %6660  ;;  %6809 = vst.msk [vmem:[#allocation3 + $0x150] sm:$0xff] %vm6766_vm1, %v6659_v10 }
 0x85e   :  { %6810 = vst.msk [vmem:[#allocation3 + $0x158] sm:$0xff] %vm6766_vm1, %v6661_v12  ;;  %8168 = vrot.lane.b32.xlu0 %v13682_v9, %s9339_s13 }
 0x85f   :  { %7011 = vrot.lane.b32.xlu1 %v13763_v44, %s9336_s2 }
 0x860   :  { %v6663_v49 = vpop.permute.xlu0 %6662 }
 0x861   :  { %v6665_v52 = vpop.permute.xlu1 %6664  ;;  %6811 = vst.msk [vmem:[#allocation3 + $0x160] sm:$0xff] %vm6766_vm1, %v6663_v49 }
 0x862   :  { %6812 = vst.msk [vmem:[#allocation3 + $0x168] sm:$0xff] %vm6766_vm1, %v6665_v52  ;;  %8136 = vrot.lane.b32.xlu0 %v13691_v41, %s9339_s13  ;;  %v13815_v41 = vld [vmem:[#allocation2 + $0x13a] sm:$0xff] }
 0x863   :  { %6979 = vrot.lane.b32.xlu1 %v13771_v29, %s9336_s2 }
 0x864   :  { %v6667_v24 = vpop.permute.xlu0 %6666 }
 0x865   :  { %v6669_v51 = vpop.permute.xlu1 %6668  ;;  %6813 = vst.msk [vmem:[#allocation3 + $0x170] sm:$0xff] %vm6766_vm1, %v6667_v24  ;;  %v13896_v24 = vld [vmem:[#allocation2 + $0x112] sm:$0xff] }
 0x866   :  { %6814 = vst.msk [vmem:[#allocation3 + $0x178] sm:$0xff] %vm6766_vm1, %v6669_v51  ;;  %7396 = vrot.lane.b32.xlu0 %v7242_v3, %s9337_s3  ;;  %v13904_v3 = vld [vmem:[#allocation2 + $0x52] sm:$0xff] }
 0x867   :  { %7364 = vrot.lane.b32.xlu1 %v7226_v31, %s9337_s3 }
 0x868   :  { %v6671_v16 = vpop.permute.xlu0 %6670 }
 0x869   :  { %v6673_v39 = vpop.permute.xlu1 %6672  ;;  %6815 = vst.msk [vmem:[#allocation3 + $0x180] sm:$0xff] %vm6766_vm1, %v6671_v16 }
 0x86a   :  { %6816 = vst.msk [vmem:[#allocation3 + $0x188] sm:$0xff] %vm6766_vm1, %v6673_v39  ;;  %7781 = vrot.lane.b32.xlu0 %v13556_v15, %s9338_s12  ;;  %v7237_v39 = vld [vmem:[#allocation2 + $0x128] sm:$0xff] }
 0x86b   :  { %7749 = vrot.lane.b32.xlu1 %v13494_v53, %s9338_s12  ;;  %v13797_v53 = vld [vmem:[#allocation2 + $0x82] sm:$0xff] }
 0x86c   :  { %v6675_v37 = vpop.permute.xlu0 %6674 }
 0x86d   :  { %v6677_v40 = vpop.permute.xlu1 %6676  ;;  %6817 = vst.msk [vmem:[#allocation3 + $0x190] sm:$0xff] %vm6766_vm1, %v6675_v37  ;;  %v7221_v37 = vld [vmem:[#allocation2 + $0x68] sm:$0xff] }
 0x86e   :  { %6818 = vst.msk [vmem:[#allocation3 + $0x198] sm:$0xff] %vm6766_vm1, %v6677_v40  ;;  %8166 = vrot.lane.b32.xlu0 %v13710_v27, %s9339_s13 }
 0x86f   :  { %7009 = vrot.lane.b32.xlu1 %v13789_v56, %s9336_s2 }
 0x870   :  { %v6679_v5 = vpop.permute.xlu0 %6678 }
 0x871   :  { %v6681_v18 = vpop.permute.xlu1 %6680  ;;  %6819 = vst.msk [vmem:[#allocation3 + $0x1a0] sm:$0xff] %vm6766_vm1, %v6679_v5 }
 0x872   :  { %6820 = vst.msk [vmem:[#allocation3 + $0x1a8] sm:$0xff] %vm6766_vm1, %v6681_v18  ;;  %8134 = vrot.lane.b32.xlu0 %v13718_v61, %s9339_s13  ;;  %v7622_v18 = vld [vmem:[#allocation2 + $0x129] sm:$0xff] }
 0x873   :  { %6977 = vrot.lane.b32.xlu1 %v13797_v53, %s9336_s2 }
 0x874   :  { %v6683_v15 = vpop.permute.xlu0 %6682 }
 0x875   :  { %v6685_v46 = vpop.permute.xlu1 %6684  ;;  %6821 = vst.msk [vmem:[#allocation3 + $0x1b0] sm:$0xff] %vm6766_vm1, %v6683_v15 }
 0x876   :  { %6822 = vst.msk [vmem:[#allocation3 + $0x1b8] sm:$0xff] %vm6766_vm1, %v6685_v46  ;;  %7394 = vrot.lane.b32.xlu0 %v7241_v20, %s9337_s3 }
 0x877   :  { %7362 = vrot.lane.b32.xlu1 %v7225_v4, %s9337_s3  ;;  %v13922_v4 = vld [vmem:[#allocation2 + $0x10a] sm:$0xff] }
 0x878   :  { %v6687_v47 = vpop.permute.xlu0 %6686 }
 0x879   :  { %v6689_v9 = vpop.permute.xlu1 %6688  ;;  %6823 = vst.msk [vmem:[#allocation3 + $0x1c0] sm:$0xff] %vm6766_vm1, %v6687_v47 }
 0x87a   :  { %6824 = vst.msk [vmem:[#allocation3 + $0x1c8] sm:$0xff] %vm6766_vm1, %v6689_v9  ;;  %7779 = vrot.lane.b32.xlu0 %v13549_v11, %s9338_s12 }
 0x87b   :  { %7747 = vrot.lane.b32.xlu1 %v13487_v35, %s9338_s12  ;;  %v13823_v35 = vld [vmem:[#allocation2 + $0x7a] sm:$0xff] }
 0x87c   :  { %v6691_v48 = vpop.permute.xlu0 %6690 }
 0x87d   :  { %v6693_v6 = vpop.permute.xlu1 %6692  ;;  %6825 = vst.msk [vmem:[#allocation3 + $0x1d0] sm:$0xff] %vm6766_vm1, %v6691_v48  ;;  %v13930_v48 = vld [vmem:[#allocation2 + $0x4a] sm:$0xff] }
 0x87e   :  { %6826 = vst.msk [vmem:[#allocation3 + $0x1d8] sm:$0xff] %vm6766_vm1, %v6693_v6  ;;  %8164 = vrot.lane.b32.xlu0 %v13737_v30, %s9339_s13 }
 0x87f   :  { %7007 = vrot.lane.b32.xlu1 %v13815_v41, %s9336_s2 }
 0x880   :  { %v6695_v7 = vpop.permute.xlu0 %6694 }
 0x881   :  { %v6697_v2 = vpop.permute.xlu1 %6696  ;;  %6827 = vst.msk [vmem:[#allocation3 + $0x1e0] sm:$0xff] %vm6766_vm1, %v6695_v7  ;;  %v7236_v7 = vld [vmem:[#allocation2 + $0x120] sm:$0xff] }
 0x882   :  { %6828 = vst.msk [vmem:[#allocation3 + $0x1e8] sm:$0xff] %vm6766_vm1, %v6697_v2  ;;  %8132 = vrot.lane.b32.xlu0 %v13745_v14, %s9339_s13  ;;  %v13869_v14 = vld [vmem:[#allocation2 + $0x122] sm:$0xff] }
 0x883   :  { %6975 = vrot.lane.b32.xlu1 %v13823_v35, %s9336_s2  ;;  %v7220_v2 = vld [vmem:[#allocation2 + $0x60] sm:$0xff] }
 0x884   :  { %v7022_v11 = vpop.permute.xlu0 %7021 }
 0x885   :  { %v6990_v59 = vpop.permute.xlu1 %6989  ;;  %7183 = vst.msk [vmem:[#allocation3 + $0xf8] sm:$0xff] %vm7151_vm2, %v7022_v11 }
 0x886   :  { %7167 = vst.msk [vmem:[#allocation3 + $0x78] sm:$0xff] %vm7151_vm2, %v6990_v59  ;;  %7392 = vrot.lane.b32.xlu0 %v7240_v63, %s9337_s3  ;;  %v7621_v63 = vld [vmem:[#allocation2 + $0x121] sm:$0xff] }
 0x887   :  { %7360 = vrot.lane.b32.xlu1 %v7224_v50, %s9337_s3  ;;  %v7605_v50 = vld [vmem:[#allocation2 + $0x61] sm:$0xff] }
 0x888   :  { %v7407_v17 = vpop.permute.xlu0 %7406 }
 0x889   :  { %v7375_v60 = vpop.permute.xlu1 %7374  ;;  %7568 = vst.msk [vmem:[#allocation3 + $0xf8] sm:$0xff] %vm7536_vm3, %v7407_v17 }
 0x88a   :  { %7552 = vst.msk [vmem:[#allocation3 + $0x78] sm:$0xff] %vm7536_vm3, %v7375_v60  ;;  %7777 = vrot.lane.b32.xlu0 %v13546_v1, %s9338_s12 }
 0x88b   :  { %7745 = vrot.lane.b32.xlu1 %v13484_v8, %s9338_s12  ;;  %v13849_v8 = vld [vmem:[#allocation2 + $0x6a] sm:$0xff] }
 0x88c   :  { %v7792_v27 = vpop.permute.xlu0 %7791 }
 0x88d   :  { %v7760_v42 = vpop.permute.xlu1 %7759  ;;  %7953 = vst.msk [vmem:[#allocation3 + $0xf8] sm:$0xff] %vm7921_vm4, %v7792_v27 }
 0x88e   :  { %7937 = vst.msk [vmem:[#allocation3 + $0x78] sm:$0xff] %vm7921_vm4, %v7760_v42  ;;  %8162 = vrot.lane.b32.xlu0 %v13763_v44, %s9339_s13  ;;  %v7607_v44 = vld [vmem:[#allocation2 + $0x79] sm:$0xff] }
 0x88f   :  { %7005 = vrot.lane.b32.xlu1 %v13841_v57, %s9336_s2  ;;  %v13948_v42 = vld [vmem:[#allocation2 + $0xfa] sm:$0xff] }
 0x890   :  { %v8177_v1 = vpop.permute.xlu0 %8176 }
 0x891   :  { %v7020_v61 = vpop.permute.xlu1 %7019  ;;  %8338 = vst.msk [vmem:[#allocation3 + $0xf8] sm:$0xff] %vm8306_vm5, %v8177_v1 }
 0x892   :  { %7182 = vst.msk [vmem:[#allocation3 + $0xf0] sm:$0xff] %vm7151_vm2, %v7020_v61  ;;  %8130 = vrot.lane.b32.xlu0 %v13771_v29, %s9339_s13  ;;  %v13956_v61 = vld [vmem:[#allocation2 + $0x3a] sm:$0xff] }
 0x893   :  { %6973 = vrot.lane.b32.xlu1 %v13849_v8, %s9336_s2 }
 0x894   :  { %v8145_v26 = vpop.permute.xlu0 %8144 }
 0x895   :  { %v6988_v55 = vpop.permute.xlu1 %6987  ;;  %8322 = vst.msk [vmem:[#allocation3 + $0x78] sm:$0xff] %vm8306_vm5, %v8145_v26 }
 0x896   :  { %7166 = vst.msk [vmem:[#allocation3 + $0x70] sm:$0xff] %vm7151_vm2, %v6988_v55  ;;  %7390 = vrot.lane.b32.xlu0 %v7239_v21, %s9337_s3  ;;  %v7235_v55 = vld [vmem:[#allocation2 + $0x110] sm:$0xff] }
 0x897   :  { %7358 = vrot.lane.b32.xlu1 %v7223_v36, %s9337_s3  ;;  %v7219_v21 = vld [vmem:[#allocation2 + $0x50] sm:$0xff] }
 0x898   :  { %v7405_v45 = vpop.permute.xlu0 %7404  ;;  %v8402_v25 = vld [vmem:[#allocation3 + $0xf8] sm:$0xff] }
 0x899   :  { %v7373_v22 = vpop.permute.xlu1 %7372  ;;  %7567 = vst.msk [vmem:[#allocation3 + $0xf0] sm:$0xff] %vm7536_vm3, %v7405_v45  ;;  %9106 = vmatprep.subr.msk.mxu1 %vm8436_vm6, %v8402_v25 }
 0x89a   :  { %7551 = vst.msk [vmem:[#allocation3 + $0x70] sm:$0xff] %vm7536_vm3, %v7373_v22  ;;  %7775 = vrot.lane.b32.xlu0 %v13539_v32, %s9338_s12  ;;  %v7620_v22 = vld [vmem:[#allocation2 + $0x111] sm:$0xff] }
 0x89b   :  { %7743 = vrot.lane.b32.xlu1 %v13478_v19, %s9338_s12  ;;  %v13877_v19 = vld [vmem:[#allocation2 + $0x62] sm:$0xff] }
 0x89c   :  { %v7790_v30 = vpop.permute.xlu0 %7789  ;;  %v8386_v54 = vld [vmem:[#allocation3 + $0x78] sm:$0xff] }
 0x89d   :  { %v7758_v28 = vpop.permute.xlu1 %7757  ;;  %7952 = vst.msk [vmem:[#allocation3 + $0xf0] sm:$0xff] %vm7921_vm4, %v7790_v30  ;;  %9107 = vmatpush3.xpose.msk.msra.mxu1 %vm8436_vm6, %v8386_v54  ;;  %v7604_v30 = vld [vmem:[#allocation2 + $0x51] sm:$0xff] }
 0x89e   :  { %7936 = vst.msk [vmem:[#allocation3 + $0x70] sm:$0xff] %vm7921_vm4, %v7758_v28  ;;  %8160 = vrot.lane.b32.xlu0 %v13789_v56, %s9339_s13 }
 0x89f   :  { %7003 = vrot.lane.b32.xlu1 %v13869_v14, %s9336_s2 }
 0x8a0   :  { %v8175_v32 = vpop.permute.xlu0 %8174 }
 0x8a1   :  { %v7018_v38 = vpop.permute.xlu1 %7017  ;;  %8337 = vst.msk [vmem:[#allocation3 + $0xf0] sm:$0xff] %vm8306_vm5, %v8175_v32  ;;  %v13974_v32 = vld [vmem:[#allocation2 + $0xf2] sm:$0xff] }
 0x8a2   :  { %7181 = vst.msk [vmem:[#allocation3 + $0xe8] sm:$0xff] %vm7151_vm2, %v7018_v38  ;;  %8128 = vrot.lane.b32.xlu0 %v13797_v53, %s9339_s13  ;;  %v7606_v53 = vld [vmem:[#allocation2 + $0x69] sm:$0xff] }
 0x8a3   :  { %6971 = vrot.lane.b32.xlu1 %v13877_v19, %s9336_s2 }
 0x8a4   :  { %v8143_v13 = vpop.permute.xlu0 %8142 }
 0x8a5   :  { %v6986_v62 = vpop.permute.xlu1 %6985  ;;  %8321 = vst.msk [vmem:[#allocation3 + $0x70] sm:$0xff] %vm8306_vm5, %v8143_v13  ;;  %v13982_v13 = vld [vmem:[#allocation2 + $0x32] sm:$0xff] }
 0x8a6   :  { %7165 = vst.msk [vmem:[#allocation3 + $0x68] sm:$0xff] %vm7151_vm2, %v6986_v62  ;;  %7388 = vrot.lane.b32.xlu0 %v7238_v34, %s9337_s3 }
 0x8a7   :  { %7356 = vrot.lane.b32.xlu1 %v7222_v58, %s9337_s3  ;;  %v7234_v58 = vld [vmem:[#allocation2 + $0x108] sm:$0xff] }
 0x8a8   :  { %v7403_v23 = vpop.permute.xlu0 %7402  ;;  %v8401_v10 = vld [vmem:[#allocation3 + $0xf0] sm:$0xff] }
 0x8a9   :  { %v7371_v12 = vpop.permute.xlu1 %7370  ;;  %7566 = vst.msk [vmem:[#allocation3 + $0xe8] sm:$0xff] %vm7536_vm3, %v7403_v23  ;;  %9108 = vmatprep.subr.msk.mxu1 %vm8436_vm6, %v8401_v10  ;;  %v7218_v23 = vld [vmem:[#allocation2 + $0x48] sm:$0xff] }
 0x8aa   :  { %7550 = vst.msk [vmem:[#allocation3 + $0x68] sm:$0xff] %vm7536_vm3, %v7371_v12  ;;  %7773 = vrot.lane.b32.xlu0 %v13536_v33, %s9338_s12 }
 0x8ab   :  { %7741 = vrot.lane.b32.xlu1 %v7607_v44, %s9338_s12 }
 0x8ac   :  { %v7788_v49 = vpop.permute.xlu0 %7787  ;;  %v8385_v52 = vld [vmem:[#allocation3 + $0x70] sm:$0xff] }
 0x8ad   :  { %v7756_v29 = vpop.permute.xlu1 %7755  ;;  %7951 = vst.msk [vmem:[#allocation3 + $0xe8] sm:$0xff] %vm7921_vm4, %v7788_v49  ;;  %9109 = vmatpush3.xpose.msk.msra.mxu1 %vm8436_vm6, %v8385_v52  ;;  %v7619_v49 = vld [vmem:[#allocation2 + $0x109] sm:$0xff] }
 0x8ae   :  { %7935 = vst.msk [vmem:[#allocation3 + $0x68] sm:$0xff] %vm7921_vm4, %v7756_v29  ;;  %8158 = vrot.lane.b32.xlu0 %v13815_v41, %s9339_s13  ;;  %v7603_v52 = vld [vmem:[#allocation2 + $0x49] sm:$0xff] }
 0x8af   :  { %7001 = vrot.lane.b32.xlu1 %v13896_v24, %s9336_s2 }
 0x8b0   :  { %v8173_v33 = vpop.permute.xlu0 %8172 }
 0x8b1   :  { %v7016_v51 = vpop.permute.xlu1 %7015  ;;  %8336 = vst.msk [vmem:[#allocation3 + $0xe8] sm:$0xff] %vm8306_vm5, %v8173_v33 }
 0x8b2   :  { %7180 = vst.msk [vmem:[#allocation3 + $0xe0] sm:$0xff] %vm7151_vm2, %v7016_v51  ;;  %8126 = vrot.lane.b32.xlu0 %v13823_v35, %s9339_s13 }
 0x8b3   :  { %6969 = vrot.lane.b32.xlu1 %v13904_v3, %s9336_s2 }
 0x8b4   :  { %v8141_v31 = vpop.permute.xlu0 %8140 }
 0x8b5   :  { %v6984_v16 = vpop.permute.xlu1 %6983  ;;  %8320 = vst.msk [vmem:[#allocation3 + $0x68] sm:$0xff] %vm8306_vm5, %v8141_v31  ;;  %v6832_v31 = vld [vmem:[#allocation2 + $0x22] sm:$0xff] }
 0x8b6   :  { %7164 = vst.msk [vmem:[#allocation3 + $0x60] sm:$0xff] %vm7151_vm2, %v6984_v16  ;;  %7386 = vrot.lane.b32.xlu0 %v7237_v39, %s9337_s3 }
 0x8b7   :  { %7354 = vrot.lane.b32.xlu1 %v7221_v37, %s9337_s3  ;;  %v7233_v37 = vld [vmem:[#allocation2 + $0xf8] sm:$0xff] }
 0x8b8   :  { %v7401_v40 = vpop.permute.xlu0 %7400  ;;  %v8400_v56 = vld [vmem:[#allocation3 + $0xe8] sm:$0xff] }
 0x8b9   :  { %v7369_v5 = vpop.permute.xlu1 %7368  ;;  %7565 = vst.msk [vmem:[#allocation3 + $0xe0] sm:$0xff] %vm7536_vm3, %v7401_v40  ;;  %9110 = vmatprep.subr.msk.mxu1 %vm8436_vm6, %v8400_v56 }
 0x8ba   :  { %7549 = vst.msk [vmem:[#allocation3 + $0x60] sm:$0xff] %vm7536_vm3, %v7369_v5  ;;  %7771 = vrot.lane.b32.xlu0 %v7622_v18, %s9338_s12  ;;  %v7618_v18 = vld [vmem:[#allocation2 + $0xf9] sm:$0xff] }
 0x8bb   :  { %7739 = vrot.lane.b32.xlu1 %v7606_v53, %s9338_s12  ;;  %v7602_v53 = vld [vmem:[#allocation2 + $0x39] sm:$0xff] }
 0x8bc   :  { %v7786_v15 = vpop.permute.xlu0 %7785  ;;  %v8384_v46 = vld [vmem:[#allocation3 + $0x68] sm:$0xff] }
 0x8bd   :  { %v7754_v20 = vpop.permute.xlu1 %7753  ;;  %7950 = vst.msk [vmem:[#allocation3 + $0xe0] sm:$0xff] %vm7921_vm4, %v7786_v15  ;;  %9111 = vmatpush3.xpose.msk.msra.mxu1 %vm8436_vm6, %v8384_v46 }
 0x8be   :  { %7934 = vst.msk [vmem:[#allocation3 + $0x60] sm:$0xff] %vm7921_vm4, %v7754_v20  ;;  %8156 = vrot.lane.b32.xlu0 %v13841_v57, %s9339_s13 }
 0x8bf   :  { %6999 = vrot.lane.b32.xlu1 %v13922_v4, %s9336_s2 }
 0x8c0   :  { %v8171_v47 = vpop.permute.xlu0 %8170 }
 0x8c1   :  { %v7014_v9 = vpop.permute.xlu1 %7013  ;;  %8335 = vst.msk [vmem:[#allocation3 + $0xe0] sm:$0xff] %vm8306_vm5, %v8171_v47 }
 0x8c2   :  { %7179 = vst.msk [vmem:[#allocation3 + $0xd8] sm:$0xff] %vm7151_vm2, %v7014_v9  ;;  %8124 = vrot.lane.b32.xlu0 %v13849_v8, %s9339_s13  ;;  %v6831_v9 = vld [vmem:[#allocation2 + $0x1a] sm:$0xff] }
 0x8c3   :  { %6967 = vrot.lane.b32.xlu1 %v13930_v48, %s9336_s2 }
 0x8c4   :  { %v8139_v6 = vpop.permute.xlu0 %8138 }
 0x8c5   :  { %v6982_v41 = vpop.permute.xlu1 %6981  ;;  %8319 = vst.msk [vmem:[#allocation3 + $0x60] sm:$0xff] %vm8306_vm5, %v8139_v6 }
 0x8c6   :  { %7163 = vst.msk [vmem:[#allocation3 + $0x58] sm:$0xff] %vm7151_vm2, %v6982_v41  ;;  %7384 = vrot.lane.b32.xlu0 %v7236_v7, %s9337_s3  ;;  %v7232_v41 = vld [vmem:[#allocation2 + $0xf0] sm:$0xff] }
 0x8c7   :  { %7352 = vrot.lane.b32.xlu1 %v7220_v2, %s9337_s3 }
 0x8c8   :  { %v7399_v35 = vpop.permute.xlu0 %7398  ;;  %v8399_v11 = vld [vmem:[#allocation3 + $0xe0] sm:$0xff] }
 0x8c9   :  { %v7367_v59 = vpop.permute.xlu1 %7366  ;;  %7564 = vst.msk [vmem:[#allocation3 + $0xd8] sm:$0xff] %vm7536_vm3, %v7399_v35  ;;  %9112 = vmatprep.subr.msk.mxu1 %vm8436_vm6, %v8399_v11  ;;  %v7617_v11 = vld [vmem:[#allocation2 + $0xf1] sm:$0xff] }
 0x8ca   :  { %7548 = vst.msk [vmem:[#allocation3 + $0x58] sm:$0xff] %vm7536_vm3, %v7367_v59  ;;  %7769 = vrot.lane.b32.xlu0 %v7621_v63, %s9338_s12  ;;  %v14037_v59 = vld [vmem:[#allocation2 + $0x339] sm:$0xff] }
 0x8cb   :  { %7737 = vrot.lane.b32.xlu1 %v7605_v50, %s9338_s12 }
 0x8cc   :  { %v7784_v17 = vpop.permute.xlu0 %7783  ;;  %v8383_v60 = vld [vmem:[#allocation3 + $0x60] sm:$0xff] }
 0x8cd   :  { %v7752_v27 = vpop.permute.xlu1 %7751  ;;  %7949 = vst.msk [vmem:[#allocation3 + $0xd8] sm:$0xff] %vm7921_vm4, %v7784_v17  ;;  %9113 = vmatpush3.xpose.msk.msra.mxu1 %vm8436_vm6, %v8383_v60  ;;  %v7601_v60 = vld [vmem:[#allocation2 + $0x31] sm:$0xff] }
 0x8ce   :  { %7933 = vst.msk [vmem:[#allocation3 + $0x58] sm:$0xff] %vm7921_vm4, %v7752_v27  ;;  %8154 = vrot.lane.b32.xlu0 %v13869_v14, %s9339_s13 }
 0x8cf   :  { %6997 = vrot.lane.b32.xlu1 %v13948_v42, %s9336_s2 }
 0x8d0   :  { %v8169_v57 = vpop.permute.xlu0 %8168 }
 0x8d1   :  { %v7012_v1 = vpop.permute.xlu1 %7011  ;;  %8334 = vst.msk [vmem:[#allocation3 + $0xd8] sm:$0xff] %vm8306_vm5, %v8169_v57  ;;  %v14049_v57 = vld [vmem:[#allocation2 + $0x33a] sm:$0xff] }
 0x8d2   :  { %7178 = vst.msk [vmem:[#allocation3 + $0xd0] sm:$0xff] %vm7151_vm2, %v7012_v1  ;;  %8122 = vrot.lane.b32.xlu0 %v13877_v19, %s9339_s13 }
 0x8d3   :  { %6965 = vrot.lane.b32.xlu1 %v13956_v61, %s9336_s2 }
 0x8d4   :  { %v8137_v8 = vpop.permute.xlu0 %8136 }
 0x8d5   :  { %v6980_v26 = vpop.permute.xlu1 %6979  ;;  %8318 = vst.msk [vmem:[#allocation3 + $0x58] sm:$0xff] %vm8306_vm5, %v8137_v8 }
 0x8d6   :  { %7162 = vst.msk [vmem:[#allocation3 + $0x50] sm:$0xff] %vm7151_vm2, %v6980_v26  ;;  %7382 = vrot.lane.b32.xlu0 %v7235_v55, %s9337_s3  ;;  %v14057_v26 = vld [vmem:[#allocation2 + $0x27a] sm:$0xff] }
 0x8d7   :  { %7350 = vrot.lane.b32.xlu1 %v7219_v21, %s9337_s3 }
 0x8d8   :  { %v7397_v36 = vpop.permute.xlu0 %7396  ;;  %v8398_v45 = vld [vmem:[#allocation3 + $0xd8] sm:$0xff] }
 0x8d9   :  { %v7365_v25 = vpop.permute.xlu1 %7364  ;;  %7563 = vst.msk [vmem:[#allocation3 + $0xd0] sm:$0xff] %vm7536_vm3, %v7397_v36  ;;  %9114 = vmatprep.subr.msk.mxu1 %vm8436_vm6, %v8398_v45  ;;  %v7664_v36 = vld [vmem:[#allocation2 + $0x351] sm:$0xff] }
 0x8da   :  { %7547 = vst.msk [vmem:[#allocation3 + $0x50] sm:$0xff] %vm7536_vm3, %v7365_v25  ;;  %7767 = vrot.lane.b32.xlu0 %v7620_v22, %s9338_s12  ;;  %v7263_v25 = vld [vmem:[#allocation2 + $0x290] sm:$0xff] }
 0x8db   :  { %7735 = vrot.lane.b32.xlu1 %v7604_v30, %s9338_s12 }
 0x8dc   :  { %v7782_v54 = vpop.permute.xlu0 %7781  ;;  %v8382_v28 = vld [vmem:[#allocation3 + $0x58] sm:$0xff] }
 0x8dd   :  { %v7750_v14 = vpop.permute.xlu1 %7749  ;;  %7948 = vst.msk [vmem:[#allocation3 + $0xd0] sm:$0xff] %vm7921_vm4, %v7782_v54  ;;  %9115 = vmatpush3.xpose.msk.msra.mxu1 %vm8436_vm6, %v8382_v28  ;;  %v14070_v28 = vld [vmem:[#allocation2 + $0x331] sm:$0xff] }
 0x8de   :  { %7932 = vst.msk [vmem:[#allocation3 + $0x50] sm:$0xff] %vm7921_vm4, %v7750_v14  ;;  %8152 = vrot.lane.b32.xlu0 %v13896_v24, %s9339_s13  ;;  %v7648_v14 = vld [vmem:[#allocation2 + $0x291] sm:$0xff] }
 0x8df   :  { %6995 = vrot.lane.b32.xlu1 %v13974_v32, %s9336_s2 }
 0x8e0   :  { %v8167_v38 = vpop.permute.xlu0 %8166 }
 0x8e1   :  { %v7010_v19 = vpop.permute.xlu1 %7009  ;;  %8333 = vst.msk [vmem:[#allocation3 + $0xd0] sm:$0xff] %vm8306_vm5, %v8167_v38  ;;  %v14079_v38 = vld [vmem:[%s14569_s4] sm:$0xff] }
 0x8e2   :  { %7177 = vst.msk [vmem:[#allocation3 + $0xc8] sm:$0xff] %vm7151_vm2, %v7010_v19  ;;  %8120 = vrot.lane.b32.xlu0 %v13904_v3, %s9339_s13  ;;  %9138 = vmatprep.mubr.msk.f32.mxu1 %vm8436_vm6, %v14079_v38 }
 0x8e3   :  { %6963 = vrot.lane.b32.xlu1 %v13982_v13, %s9336_s2 }
 0x8e4   :  { %v8135_v62 = vpop.permute.xlu0 %8134 }
 0x8e5   :  { %v6978_v34 = vpop.permute.xlu1 %6977  ;;  %8317 = vst.msk [vmem:[#allocation3 + $0x50] sm:$0xff] %vm8306_vm5, %v8135_v62  ;;  %v14085_v62 = vld [vmem:[#allocation2 + $0x332] sm:$0xff] }
 0x8e6   :  { %7161 = vst.msk [vmem:[#allocation3 + $0x48] sm:$0xff] %vm7151_vm2, %v6978_v34  ;;  %7380 = vrot.lane.b32.xlu0 %v7234_v58, %s9337_s3 }
 0x8e7   :  { %7348 = vrot.lane.b32.xlu1 %v7218_v23, %s9337_s3  ;;  %v14091_v23 = vld [vmem:[#allocation2 + $0x292] sm:$0xff] }
 0x8e8   :  { %v7395_v10 = vpop.permute.xlu0 %7394  ;;  %v8397_v12 = vld [vmem:[#allocation3 + $0xd0] sm:$0xff] }
 0x8e9   :  { %v7363_v44 = vpop.permute.xlu1 %7362  ;;  %7562 = vst.msk [vmem:[#allocation3 + $0xc8] sm:$0xff] %vm7536_vm3, %v7395_v10  ;;  %9116 = vmatprep.subr.msk.mxu1 %vm8436_vm6, %v8397_v12  ;;  %v14094_v10 = vld [vmem:[#allocation2 + $0x272] sm:$0xff]  ;;  %v7278_v12 = vld [vmem:[#allocation2 + $0x348] sm:$0xff] }
 0x8ea   :  { %7546 = vst.msk [vmem:[#allocation3 + $0x48] sm:$0xff] %vm7536_vm3, %v7363_v44  ;;  %7765 = vrot.lane.b32.xlu0 %v7619_v49, %s9338_s12 }
 0x8eb   :  { %7733 = vrot.lane.b32.xlu1 %v7603_v52, %s9338_s12 }
 0x8ec   :  { %v7780_v29 = vpop.permute.xlu0 %7779  ;;  %v8381_v24 = vld [vmem:[#allocation3 + $0x50] sm:$0xff] }
 0x8ed   :  { %v7748_v33 = vpop.permute.xlu1 %7747  ;;  %7947 = vst.msk [vmem:[#allocation3 + $0xc8] sm:$0xff] %vm7921_vm4, %v7780_v29  ;;  %9117 = vmatpush3.xpose.msk.msra.mxu1 %vm8436_vm6, %v8381_v24  ;;  %v7262_v29 = vld [vmem:[#allocation2 + $0x288] sm:$0xff] }
 0x8ee   :  { %7931 = vst.msk [vmem:[#allocation3 + $0x48] sm:$0xff] %vm7921_vm4, %v7748_v33  ;;  %8150 = vrot.lane.b32.xlu0 %v13922_v4, %s9339_s13  ;;  %v7663_v24 = vld [vmem:[#allocation2 + $0x349] sm:$0xff] }
 0x8ef   :  { %6993 = vrot.lane.b32.xlu1 %v13662_v43, %s9336_s2  ;;  %v7217_v43 = vld [vmem:[#allocation2 + $0x38] sm:$0xff] }
 0x8f0   :  { %v8165_v51 = vpop.permute.xlu0 %8164 }
 0x8f1   :  { %v7008_v3 = vpop.permute.xlu1 %7007  ;;  %8332 = vst.msk [vmem:[#allocation3 + $0xc8] sm:$0xff] %vm8306_vm5, %v8165_v51 }
 0x8f2   :  { %7176 = vst.msk [vmem:[#allocation3 + $0xc0] sm:$0xff] %vm7151_vm2, %v7008_v3  ;;  %8118 = vrot.lane.b32.xlu0 %v13930_v48, %s9339_s13 }
 0x8f3   :  { %6961 = vrot.lane.b32.xlu1 %v6832_v31, %s9336_s2  ;;  %v7647_v31 = vld [vmem:[#allocation2 + $0x289] sm:$0xff] }
 0x8f4   :  { %v8133_v16 = vpop.permute.xlu0 %8132 }
 0x8f5   :  { %v6976_v39 = vpop.permute.xlu1 %6975  ;;  %8316 = vst.msk [vmem:[#allocation3 + $0x48] sm:$0xff] %vm8306_vm5, %v8133_v16  ;;  %v8048_v16 = vld [vmem:[#allocation2 + $0x34a] sm:$0xff] }
 0x8f6   :  { %7160 = vst.msk [vmem:[#allocation3 + $0x40] sm:$0xff] %vm7151_vm2, %v6976_v39  ;;  %7378 = vrot.lane.b32.xlu0 %v7233_v37, %s9337_s3 }
 0x8f7   :  { %7346 = vrot.lane.b32.xlu1 %v7217_v43, %s9337_s3  ;;  %v14112_v43 = vld [vmem:[#allocation2 + $0x322] sm:$0xff] }
 0x8f8   :  { %v7393_v40 = vpop.permute.xlu0 %7392  ;;  %v8396_v56 = vld [vmem:[#allocation3 + $0xc8] sm:$0xff] }
 0x8f9   :  { %v7361_v5 = vpop.permute.xlu1 %7360  ;;  %7561 = vst.msk [vmem:[#allocation3 + $0xc0] sm:$0xff] %vm7536_vm3, %v7393_v40  ;;  %9118 = vmatprep.subr.msk.mxu1 %vm8436_vm6, %v8396_v56 }
 0x8fa   :  { %7545 = vst.msk [vmem:[#allocation3 + $0x40] sm:$0xff] %vm7536_vm3, %v7361_v5  ;;  %7763 = vrot.lane.b32.xlu0 %v7618_v18, %s9338_s12  ;;  %v14118_v5 = vld [vmem:[#allocation2 + $0x28a] sm:$0xff]  ;;  %v14121_v18 = vld [vmem:[#allocation2 + $0x262] sm:$0xff] }
 0x8fb   :  { %7731 = vrot.lane.b32.xlu1 %v7602_v53, %s9338_s12 }
 0x8fc   :  { %v7778_v15 = vpop.permute.xlu0 %7777  ;;  %v8380_v46 = vld [vmem:[#allocation3 + $0x48] sm:$0xff] }
 0x8fd   :  { %v7746_v20 = vpop.permute.xlu1 %7745  ;;  %7946 = vst.msk [vmem:[#allocation3 + $0xc0] sm:$0xff] %vm7921_vm4, %v7778_v15  ;;  %9119 = vmatpush3.xpose.msk.msra.mxu1 %vm8436_vm6, %v8380_v46 }
 0x8fe   :  { %7930 = vst.msk [vmem:[#allocation3 + $0x40] sm:$0xff] %vm7921_vm4, %v7746_v20  ;;  %8148 = vrot.lane.b32.xlu0 %v13948_v42, %s9339_s13  ;;  %v7277_v20 = vld [vmem:[#allocation2 + $0x338] sm:$0xff] }
 0x8ff   :  { %6991 = vrot.lane.b32.xlu1 %v13688_v0, %s9336_s2  ;;  %v7216_v0 = vld [vmem:[#allocation2 + $0x30] sm:$0xff] }
 0x900   :  { %v8163_v4 = vpop.permute.xlu0 %8162 }
 0x901   :  { %v7006_v47 = vpop.permute.xlu1 %7005  ;;  %8331 = vst.msk [vmem:[#allocation3 + $0xc0] sm:$0xff] %vm8306_vm5, %v8163_v4  ;;  %v7261_v4 = vld [vmem:[#allocation2 + $0x278] sm:$0xff] }
 0x902   :  { %7175 = vst.msk [vmem:[#allocation3 + $0xb8] sm:$0xff] %vm7151_vm2, %v7006_v47  ;;  %8116 = vrot.lane.b32.xlu0 %v13956_v61, %s9339_s13  ;;  %v7279_v61 = vld [vmem:[#allocation2 + $0x350] sm:$0xff] }
 0x903   :  { %6959 = vrot.lane.b32.xlu1 %v6831_v9, %s9336_s2 }
 0x904   :  { %v8131_v48 = vpop.permute.xlu0 %8130 }
 0x905   :  { %v6974_v6 = vpop.permute.xlu1 %6973  ;;  %8315 = vst.msk [vmem:[#allocation3 + $0x40] sm:$0xff] %vm8306_vm5, %v8131_v48 }
 0x906   :  { %7159 = vst.msk [vmem:[#allocation3 + $0x38] sm:$0xff] %vm7151_vm2, %v6974_v6  ;;  %7376 = vrot.lane.b32.xlu0 %v7232_v41, %s9337_s3  ;;  %v7646_v6 = vld [vmem:[#allocation2 + $0x279] sm:$0xff] }
 0x907   :  { %7344 = vrot.lane.b32.xlu1 %v7216_v0, %s9337_s3 }
 0x908   :  { %v7391_v7 = vpop.permute.xlu0 %7390  ;;  %v8395_v2 = vld [vmem:[#allocation3 + $0xc0] sm:$0xff] }
 0x909   :  { %v7359_v35 = vpop.permute.xlu1 %7358  ;;  %7560 = vst.msk [vmem:[#allocation3 + $0xb8] sm:$0xff] %vm7536_vm3, %v7391_v7  ;;  %9120 = vmatprep.subr.msk.mxu1 %vm8436_vm6, %v8395_v2  ;;  %v14140_v7 = vld [vmem:[#allocation2 + $0x31a] sm:$0xff] }
 0x90a   :  { %7544 = vst.msk [vmem:[#allocation3 + $0x38] sm:$0xff] %vm7536_vm3, %v7359_v35  ;;  %7761 = vrot.lane.b32.xlu0 %v7617_v11, %s9338_s12  ;;  %v14148_v11 = vld [vmem:[#allocation2 + $0x25a] sm:$0xff] }
 0x90b   :  { %6700 = vrot.lane.b32.xlu1 %v14037_v59, %s9335_s1 }
 0x90c   :  { %v7776_v63 = vpop.permute.xlu0 %7775  ;;  %v8379_v50 = vld [vmem:[#allocation3 + $0x40] sm:$0xff] }
 0x90d   :  { %v7744_v17 = vpop.permute.xlu1 %7743  ;;  %7945 = vst.msk [vmem:[#allocation3 + $0xb8] sm:$0xff] %vm7921_vm4, %v7776_v63  ;;  %9121 = vmatpush3.xpose.msk.msra.mxu1 %vm8436_vm6, %v8379_v50 }
 0x90e   :  { %7929 = vst.msk [vmem:[#allocation3 + $0x38] sm:$0xff] %vm7921_vm4, %v7744_v17  ;;  %7729 = vrot.lane.b32.xlu0 %v7601_v60, %s9338_s12  ;;  %v7276_v17 = vld [vmem:[#allocation2 + $0x330] sm:$0xff] }
 0x90f   :  { %8146 = vrot.lane.b32.xlu1 %v13974_v32, %s9339_s13  ;;  %v8049_v32 = vld [vmem:[#allocation2 + $0x352] sm:$0xff] }
 0x910   :  { %v8161_v27 = vpop.permute.xlu0 %8160  ;;  %v7260_v60 = vld [vmem:[#allocation2 + $0x270] sm:$0xff] }
 0x911   :  { %v7004_v42 = vpop.permute.xlu1 %7003  ;;  %8330 = vst.msk [vmem:[#allocation3 + $0xb8] sm:$0xff] %vm8306_vm5, %v8161_v27 }
 0x912   :  { %7174 = vst.msk [vmem:[#allocation3 + $0xb0] sm:$0xff] %vm7151_vm2, %v7004_v42  ;;  %7085 = vrot.lane.b32.xlu0 %v14049_v57, %s9336_s2 }
 0x913   :  { %8114 = vrot.lane.b32.xlu1 %v13982_v13, %s9339_s13 }
 0x914   :  { %v8129_v1 = vpop.permute.xlu0 %8128 }
 0x915   :  { %v6972_v8 = vpop.permute.xlu1 %6971  ;;  %8314 = vst.msk [vmem:[#allocation3 + $0x38] sm:$0xff] %vm8306_vm5, %v8129_v1  ;;  %v7645_v1 = vld [vmem:[#allocation2 + $0x271] sm:$0xff] }
 0x916   :  { %7158 = vst.msk [vmem:[#allocation3 + $0x30] sm:$0xff] %vm7151_vm2, %v6972_v8  ;;  %7053 = vrot.lane.b32.xlu0 %v14057_v26, %s9336_s2 }
 0x917   :  { %7470 = vrot.lane.b32.xlu1 %v7279_v61, %s9337_s3 }
 0x918   :  { %v7389_v55 = vpop.permute.xlu0 %7388  ;;  %v8394_v21 = vld [vmem:[#allocation3 + $0xb8] sm:$0xff] }
 0x919   :  { %v7357_v45 = vpop.permute.xlu1 %7356  ;;  %7559 = vst.msk [vmem:[#allocation3 + $0xb0] sm:$0xff] %vm7536_vm3, %v7389_v55  ;;  %9122 = vmatprep.subr.msk.mxu1 %vm8436_vm6, %v8394_v21 }
 0x91a   :  { %7543 = vst.msk [vmem:[#allocation3 + $0x30] sm:$0xff] %vm7536_vm3, %v7357_v45  ;;  %7438 = vrot.lane.b32.xlu0 %v7263_v25, %s9337_s3 }
 0x91b   :  { %7855 = vrot.lane.b32.xlu1 %v7664_v36, %s9338_s12  ;;  %v14175_v36 = vld [vmem:[#allocation2 + $0x24a] sm:$0xff] }
 0x91c   :  { %v7774_v22 = vpop.permute.xlu0 %7773  ;;  %v8378_v30 = vld [vmem:[#allocation3 + $0x38] sm:$0xff] }
 0x91d   :  { %v7742_v54 = vpop.permute.xlu1 %7741  ;;  %7944 = vst.msk [vmem:[#allocation3 + $0xb0] sm:$0xff] %vm7921_vm4, %v7774_v22  ;;  %9123 = vmatpush3.xpose.msk.msra.mxu1 %vm8436_vm6, %v8378_v30  ;;  %v7275_v30 = vld [vmem:[#allocation2 + $0x320] sm:$0xff] }
 0x91e   :  { %7928 = vst.msk [vmem:[#allocation3 + $0x30] sm:$0xff] %vm7921_vm4, %v7742_v54  ;;  %6698 = vrot.lane.b32.xlu0 %v14070_v28, %s9335_s1  ;;  %v7259_v54 = vld [vmem:[#allocation2 + $0x260] sm:$0xff] }
 0x91f   :  { %7823 = vrot.lane.b32.xlu1 %v7648_v14, %s9338_s12 }
 0x920   :  { %v8159_v19 = vpop.permute.xlu0 %8158 }
 0x921   :  { %v7002_v13 = vpop.permute.xlu1 %7001  ;;  %8329 = vst.msk [vmem:[#allocation3 + $0xb0] sm:$0xff] %vm8306_vm5, %v8159_v19  ;;  %v7660_v19 = vld [vmem:[#allocation2 + $0x321] sm:$0xff] }
 0x922   :  { %7173 = vst.msk [vmem:[#allocation3 + $0xa8] sm:$0xff] %vm7151_vm2, %v7002_v13  ;;  %8240 = vrot.lane.b32.xlu0 %v8049_v32, %s9339_s13  ;;  %v7644_v13 = vld [vmem:[#allocation2 + $0x261] sm:$0xff] }
 0x923   :  { %7083 = vrot.lane.b32.xlu1 %v14085_v62, %s9336_s2 }
 0x924   :  { %v8127_v34 = vpop.permute.xlu0 %8126 }
 0x925   :  { %v6970_v58 = vpop.permute.xlu1 %6969  ;;  %8313 = vst.msk [vmem:[#allocation3 + $0x30] sm:$0xff] %vm8306_vm5, %v8127_v34 }
 0x926   :  { %7157 = vst.msk [vmem:[#allocation3 + $0x28] sm:$0xff] %vm7151_vm2, %v6970_v58  ;;  %8208 = vrot.lane.b32.xlu0 %v14091_v23, %s9339_s13  ;;  %v14193_v58 = vld [vmem:[#allocation2 + $0x302] sm:$0xff] }
 0x927   :  { %7051 = vrot.lane.b32.xlu1 %v14094_v10, %s9336_s2 }
 0x928   :  { %v7387_v44 = vpop.permute.xlu0 %7386  ;;  %v8393_v49 = vld [vmem:[#allocation3 + $0xb0] sm:$0xff] }
 0x929   :  { %v7355_v52 = vpop.permute.xlu1 %7354  ;;  %7558 = vst.msk [vmem:[#allocation3 + $0xa8] sm:$0xff] %vm7536_vm3, %v7387_v44  ;;  %9124 = vmatprep.subr.msk.mxu1 %vm8436_vm6, %v8393_v49  ;;  %v14201_v44 = vld [vmem:[#allocation2 + $0x242] sm:$0xff] }
 0x92a   :  { %7542 = vst.msk [vmem:[#allocation3 + $0x28] sm:$0xff] %vm7536_vm3, %v7355_v52  ;;  %7468 = vrot.lane.b32.xlu0 %v7278_v12, %s9337_s3 }
 0x92b   :  { %7436 = vrot.lane.b32.xlu1 %v7262_v29, %s9337_s3 }
 0x92c   :  { %v7772_v33 = vpop.permute.xlu0 %7771  ;;  %v8377_v51 = vld [vmem:[#allocation3 + $0x30] sm:$0xff] }
 0x92d   :  { %v7740_v3 = vpop.permute.xlu1 %7739  ;;  %7943 = vst.msk [vmem:[#allocation3 + $0xa8] sm:$0xff] %vm7921_vm4, %v7772_v33  ;;  %9125 = vmatpush3.xpose.msk.msra.mxu1 %vm8436_vm6, %v8377_v51  ;;  %v7258_v33 = vld [vmem:[#allocation2 + $0x258] sm:$0xff] }
 0x92e   :  { %7927 = vst.msk [vmem:[#allocation3 + $0x28] sm:$0xff] %vm7921_vm4, %v7740_v3  ;;  %7853 = vrot.lane.b32.xlu0 %v7663_v24, %s9338_s12  ;;  %v7274_v24 = vld [vmem:[#allocation2 + $0x318] sm:$0xff] }
 0x92f   :  { %7821 = vrot.lane.b32.xlu1 %v7647_v31, %s9338_s12 }
 0x930   :  { %v8157_v39 = vpop.permute.xlu0 %8156 }
 0x931   :  { %v7000_v37 = vpop.permute.xlu1 %6999  ;;  %8328 = vst.msk [vmem:[#allocation3 + $0xa8] sm:$0xff] %vm8306_vm5, %v8157_v39  ;;  %v7643_v39 = vld [vmem:[#allocation2 + $0x259] sm:$0xff] }
 0x932   :  { %7172 = vst.msk [vmem:[#allocation3 + $0xa0] sm:$0xff] %vm7151_vm2, %v7000_v37  ;;  %8238 = vrot.lane.b32.xlu0 %v8048_v16, %s9339_s13  ;;  %v7659_v16 = vld [vmem:[#allocation2 + $0x319] sm:$0xff] }
 0x933   :  { %7081 = vrot.lane.b32.xlu1 %v14112_v43, %s9336_s2 }
 0x934   :  { %v8125_v40 = vpop.permute.xlu0 %8124 }
 0x935   :  { %v6968_v56 = vpop.permute.xlu1 %6967  ;;  %8312 = vst.msk [vmem:[#allocation3 + $0x28] sm:$0xff] %vm8306_vm5, %v8125_v40  ;;  %v14219_v40 = vld [vmem:[#allocation2 + $0x2f2] sm:$0xff] }
 0x936   :  { %7156 = vst.msk [vmem:[#allocation3 + $0x20] sm:$0xff] %vm7151_vm2, %v6968_v56  ;;  %8206 = vrot.lane.b32.xlu0 %v14118_v5, %s9339_s13 }
 0x937   :  { %7049 = vrot.lane.b32.xlu1 %v14121_v18, %s9336_s2 }
 0x938   :  { %v7385_v53 = vpop.permute.xlu0 %7384  ;;  %v8392_v15 = vld [vmem:[#allocation3 + $0xa8] sm:$0xff] }
 0x939   :  { %v7353_v46 = vpop.permute.xlu1 %7352  ;;  %7557 = vst.msk [vmem:[#allocation3 + $0xa0] sm:$0xff] %vm7536_vm3, %v7385_v53  ;;  %9126 = vmatprep.subr.msk.mxu1 %vm8436_vm6, %v8392_v15  ;;  %v14227_v53 = vld [vmem:[#allocation2 + $0x232] sm:$0xff] }
 0x93a   :  { %7541 = vst.msk [vmem:[#allocation3 + $0x20] sm:$0xff] %vm7536_vm3, %v7353_v46  ;;  %7466 = vrot.lane.b32.xlu0 %v7277_v20, %s9337_s3 }
 0x93b   :  { %7434 = vrot.lane.b32.xlu1 %v7261_v4, %s9337_s3  ;;  %v7273_v4 = vld [vmem:[#allocation2 + $0x308] sm:$0xff] }
 0x93c   :  { %v7770_v47 = vpop.permute.xlu0 %7769  ;;  %v8376_v9 = vld [vmem:[#allocation3 + $0x28] sm:$0xff] }
 0x93d   :  { %v7738_v48 = vpop.permute.xlu1 %7737  ;;  %7942 = vst.msk [vmem:[#allocation3 + $0xa0] sm:$0xff] %vm7921_vm4, %v7770_v47  ;;  %9127 = vmatpush3.xpose.msk.msra.mxu1 %vm8436_vm6, %v8376_v9  ;;  %v7257_v47 = vld [vmem:[#allocation2 + $0x248] sm:$0xff] }
 0x93e   :  { %7926 = vst.msk [vmem:[#allocation3 + $0x20] sm:$0xff] %vm7921_vm4, %v7738_v48  ;;  %7851 = vrot.lane.b32.xlu0 %v14037_v59, %s9338_s12 }
 0x93f   :  { %7819 = vrot.lane.b32.xlu1 %v7646_v6, %s9338_s12 }
 0x940   :  { %v8155_v41 = vpop.permute.xlu0 %8154 }
 0x941   :  { %v6998_v0 = vpop.permute.xlu1 %6997  ;;  %8327 = vst.msk [vmem:[#allocation3 + $0xa0] sm:$0xff] %vm8306_vm5, %v8155_v41  ;;  %v7658_v41 = vld [vmem:[#allocation2 + $0x309] sm:$0xff] }
 0x942   :  { %7171 = vst.msk [vmem:[#allocation3 + $0x98] sm:$0xff] %vm7151_vm2, %v6998_v0  ;;  %8236 = vrot.lane.b32.xlu0 %v14049_v57, %s9339_s13  ;;  %v7642_v0 = vld [vmem:[#allocation2 + $0x249] sm:$0xff] }
 0x943   :  { %7079 = vrot.lane.b32.xlu1 %v14140_v7, %s9336_s2 }
 0x944   :  { %v8123_v2 = vpop.permute.xlu0 %8122 }
 0x945   :  { %v6966_v35 = vpop.permute.xlu1 %6965  ;;  %8311 = vst.msk [vmem:[#allocation3 + $0x20] sm:$0xff] %vm8306_vm5, %v8123_v2 }
 0x946   :  { %7155 = vst.msk [vmem:[#allocation3 + $0x18] sm:$0xff] %vm7151_vm2, %v6966_v35  ;;  %8204 = vrot.lane.b32.xlu0 %v14057_v26, %s9339_s13  ;;  %v14167_v26 = vld [vmem:[#allocation2 + $0x30a] sm:$0xff] }
 0x947   :  { %7047 = vrot.lane.b32.xlu1 %v14148_v11, %s9336_s2  ;;  %v14245_v35 = vld [vmem:[#allocation2 + $0x2ea] sm:$0xff] }
 0x948   :  { %v7383_v59 = vpop.permute.xlu0 %7382  ;;  %v8391_v63 = vld [vmem:[#allocation3 + $0xa0] sm:$0xff] }
 0x949   :  { %v7351_v50 = vpop.permute.xlu1 %7350  ;;  %7556 = vst.msk [vmem:[#allocation3 + $0x98] sm:$0xff] %vm7536_vm3, %v7383_v59  ;;  %9128 = vmatprep.subr.msk.mxu1 %vm8436_vm6, %v8391_v63  ;;  %v14253_v63 = vld [vmem:[#allocation2 + $0x22a] sm:$0xff] }
 0x94a   :  { %7540 = vst.msk [vmem:[#allocation3 + $0x18] sm:$0xff] %vm7536_vm3, %v7351_v50  ;;  %7464 = vrot.lane.b32.xlu0 %v7276_v17, %s9337_s3 }
 0x94b   :  { %7432 = vrot.lane.b32.xlu1 %v7260_v60, %s9337_s3 }
 0x94c   :  { %v7768_v27 = vpop.permute.xlu0 %7767  ;;  %v8375_v42 = vld [vmem:[#allocation3 + $0x20] sm:$0xff] }
 0x94d   :  { %v7736_v57 = vpop.permute.xlu1 %7735  ;;  %7941 = vst.msk [vmem:[#allocation3 + $0x98] sm:$0xff] %vm7921_vm4, %v7768_v27  ;;  %9129 = vmatpush3.xpose.msk.msra.mxu1 %vm8436_vm6, %v8375_v42  ;;  %v7272_v27 = vld [vmem:[#allocation2 + $0x300] sm:$0xff] }
 0x94e   :  { %7925 = vst.msk [vmem:[#allocation3 + $0x18] sm:$0xff] %vm7921_vm4, %v7736_v57  ;;  %7849 = vrot.lane.b32.xlu0 %v14070_v28, %s9338_s12  ;;  %v7256_v42 = vld [vmem:[#allocation2 + $0x240] sm:$0xff] }
 0x94f   :  { %7817 = vrot.lane.b32.xlu1 %v7645_v1, %s9338_s12 }
 0x950   :  { %v8153_v61 = vpop.permute.xlu0 %8152 }
 0x951   :  { %v6996_v8 = vpop.permute.xlu1 %6995  ;;  %8326 = vst.msk [vmem:[#allocation3 + $0x98] sm:$0xff] %vm8306_vm5, %v8153_v61 }
 0x952   :  { %7170 = vst.msk [vmem:[#allocation3 + $0x90] sm:$0xff] %vm7151_vm2, %v6996_v8  ;;  %8234 = vrot.lane.b32.xlu0 %v14085_v62, %s9339_s13  ;;  %v7657_v8 = vld [vmem:[#allocation2 + $0x301] sm:$0xff] }
 0x953   :  { %7077 = vrot.lane.b32.xlu1 %v14167_v26, %s9336_s2 }
 0x954   :  { %v8121_v55 = vpop.permute.xlu0 %8120 }
 0x955   :  { %v6964_v21 = vpop.permute.xlu1 %6963  ;;  %8310 = vst.msk [vmem:[#allocation3 + $0x18] sm:$0xff] %vm8306_vm5, %v8121_v55 }
 0x956   :  { %7154 = vst.msk [vmem:[#allocation3 + $0x10] sm:$0xff] %vm7151_vm2, %v6964_v21  ;;  %8202 = vrot.lane.b32.xlu0 %v14094_v10, %s9339_s13 }
 0x957   :  { %7045 = vrot.lane.b32.xlu1 %v14175_v36, %s9336_s2 }
 0x958   :  { %v7381_v45 = vpop.permute.xlu0 %7380  ;;  %v8390_v25 = vld [vmem:[#allocation3 + $0x98] sm:$0xff] }
 0x959   :  { %v7349_v22 = vpop.permute.xlu1 %7348  ;;  %7555 = vst.msk [vmem:[#allocation3 + $0x90] sm:$0xff] %vm7536_vm3, %v7381_v45  ;;  %9130 = vmatprep.subr.msk.mxu1 %vm8436_vm6, %v8390_v25 }
 0x95a   :  { %7539 = vst.msk [vmem:[#allocation3 + $0x10] sm:$0xff] %vm7536_vm3, %v7349_v22  ;;  %7462 = vrot.lane.b32.xlu0 %v7275_v30, %s9337_s3  ;;  %v14283_v22 = vld [vmem:[#allocation2 + $0x21a] sm:$0xff] }
 0x95b   :  { %7430 = vrot.lane.b32.xlu1 %v7259_v54, %s9337_s3 }
 0x95c   :  { %v7766_v28 = vpop.permute.xlu0 %7765  ;;  %v8374_v14 = vld [vmem:[#allocation3 + $0x18] sm:$0xff] }
 0x95d   :  { %v7734_v32 = vpop.permute.xlu1 %7733  ;;  %7940 = vst.msk [vmem:[#allocation3 + $0x90] sm:$0xff] %vm7921_vm4, %v7766_v28  ;;  %9131 = vmatpush3.xpose.msk.msra.mxu1 %vm8436_vm6, %v8374_v14  ;;  %v7255_v28 = vld [vmem:[#allocation2 + $0x230] sm:$0xff] }
 0x95e   :  { %7924 = vst.msk [vmem:[#allocation3 + $0x10] sm:$0xff] %vm7921_vm4, %v7734_v32  ;;  %7847 = vrot.lane.b32.xlu0 %v7660_v19, %s9338_s12 }
 0x95f   :  { %7815 = vrot.lane.b32.xlu1 %v7644_v13, %s9338_s12  ;;  %v7656_v13 = vld [vmem:[#allocation2 + $0x2f1] sm:$0xff] }
 0x960   :  { %v8151_v62 = vpop.permute.xlu0 %8150 }
 0x961   :  { %v6994_v34 = vpop.permute.xlu1 %6993  ;;  %8325 = vst.msk [vmem:[#allocation3 + $0x90] sm:$0xff] %vm8306_vm5, %v8151_v62  ;;  %v7640_v62 = vld [vmem:[#allocation2 + $0x231] sm:$0xff] }
 0x962   :  { %7169 = vst.msk [vmem:[#allocation3 + $0x88] sm:$0xff] %vm7151_vm2, %v6994_v34  ;;  %8232 = vrot.lane.b32.xlu0 %v14112_v43, %s9339_s13 }
 0x963   :  { %7075 = vrot.lane.b32.xlu1 %v14193_v58, %s9336_s2 }
 0x964   :  { %v8119_v10 = vpop.permute.xlu0 %8118 }
 0x965   :  { %v6962_v12 = vpop.permute.xlu1 %6961  ;;  %8309 = vst.msk [vmem:[#allocation3 + $0x10] sm:$0xff] %vm8306_vm5, %v8119_v10 }
 0x966   :  { %7153 = vst.msk [vmem:[#allocation3 + $0x8] sm:$0xff] %vm7151_vm2, %v6962_v12  ;;  %8200 = vrot.lane.b32.xlu0 %v14121_v18, %s9339_s13  ;;  %v14301_v12 = vld [vmem:[#allocation2 + $0x2d2] sm:$0xff] }
 0x967   :  { %7043 = vrot.lane.b32.xlu1 %v14201_v44, %s9336_s2 }
 0x968   :  { %v7379_v49 = vpop.permute.xlu0 %7378  ;;  %v8389_v52 = vld [vmem:[#allocation3 + $0x90] sm:$0xff] }
 0x969   :  { %v7347_v29 = vpop.permute.xlu1 %7346  ;;  %7554 = vst.msk [vmem:[#allocation3 + $0x88] sm:$0xff] %vm7536_vm3, %v7379_v49  ;;  %9132 = vmatprep.subr.msk.mxu1 %vm8436_vm6, %v8389_v52  ;;  %v14309_v52 = vld [vmem:[#allocation2 + $0x212] sm:$0xff] }
 0x96a   :  { %7538 = vst.msk [vmem:[#allocation3 + $0x8] sm:$0xff] %vm7536_vm3, %v7347_v29  ;;  %7460 = vrot.lane.b32.xlu0 %v7274_v24, %s9337_s3 }
 0x96b   :  { %7428 = vrot.lane.b32.xlu1 %v7258_v33, %s9337_s3  ;;  %v7270_v33 = vld [vmem:[#allocation2 + $0x2e8] sm:$0xff] }
 0x96c   :  { %v7764_v51 = vpop.permute.xlu0 %7763  ;;  %v8373_v3 = vld [vmem:[#allocation3 + $0x10] sm:$0xff] }
 0x96d   :  { %v7732_v31 = vpop.permute.xlu1 %7731  ;;  %7939 = vst.msk [vmem:[#allocation3 + $0x88] sm:$0xff] %vm7921_vm4, %v7764_v51  ;;  %9133 = vmatpush3.xpose.msk.msra.mxu1 %vm8436_vm6, %v8373_v3  ;;  %v7254_v51 = vld [vmem:[#allocation2 + $0x228] sm:$0xff] }
 0x96e   :  { %7923 = vst.msk [vmem:[#allocation3 + $0x8] sm:$0xff] %vm7921_vm4, %v7732_v31  ;;  %7845 = vrot.lane.b32.xlu0 %v7659_v16, %s9338_s12 }
 0x96f   :  { %7813 = vrot.lane.b32.xlu1 %v7643_v39, %s9338_s12  ;;  %v7655_v39 = vld [vmem:[#allocation2 + $0x2e9] sm:$0xff] }
 0x970   :  { %v8149_v37 = vpop.permute.xlu0 %8148 }
 0x971   :  { %v6992_v43 = vpop.permute.xlu1 %6991  ;;  %8324 = vst.msk [vmem:[#allocation3 + $0x88] sm:$0xff] %vm8306_vm5, %v8149_v37  ;;  %v7639_v37 = vld [vmem:[#allocation2 + $0x229] sm:$0xff] }
 0x972   :  { %7168 = vst.msk [vmem:[#allocation3 + $0x80] sm:$0xff] %vm7151_vm2, %v6992_v43  ;;  %8230 = vrot.lane.b32.xlu0 %v14140_v7, %s9339_s13 }
 0x973   :  { %7073 = vrot.lane.b32.xlu1 %v14219_v40, %s9336_s2 }
 0x974   :  { %v8117_v56 = vpop.permute.xlu0 %8116 }
 0x975   :  { %v6960_v18 = vpop.permute.xlu1 %6959  ;;  %8308 = vst.msk [vmem:[#allocation3 + $0x8] sm:$0xff] %vm8306_vm5, %v8117_v56 }
 0x976   :  { %7152 = vst.msk [vmem:[#allocation3] sm:$0xff] %vm7151_vm2, %v6960_v18  ;;  %8198 = vrot.lane.b32.xlu0 %v14148_v11, %s9339_s13  ;;  %v14327_v18 = vld [vmem:[#allocation2 + $0x2c2] sm:$0xff] }
 0x977   :  { %7041 = vrot.lane.b32.xlu1 %v14227_v53, %s9336_s2 }
 0x978   :  { %v7377_v15 = vpop.permute.xlu0 %7376  ;;  %v8388_v46 = vld [vmem:[#allocation3 + $0x88] sm:$0xff] }
 0x979   :  { %v7345_v20 = vpop.permute.xlu1 %7344  ;;  %7553 = vst.msk [vmem:[#allocation3 + $0x80] sm:$0xff] %vm7536_vm3, %v7377_v15  ;;  %9134 = vmatprep.subr.msk.mxu1 %vm8436_vm6, %v8388_v46  ;;  %v14335_v46 = vld [vmem:[#allocation2 + $0x202] sm:$0xff] }
 0x97a   :  { %7537 = vst.msk [vmem:[#allocation3] sm:$0xff] %vm7536_vm3, %v7345_v20  ;;  %7458 = vrot.lane.b32.xlu0 %v7273_v4, %s9337_s3 }
 0x97b   :  { %7426 = vrot.lane.b32.xlu1 %v7257_v47, %s9337_s3  ;;  %v7269_v47 = vld [vmem:[#allocation2 + $0x2d8] sm:$0xff] }
 0x97c   :  { %v7762_v9 = vpop.permute.xlu0 %7761  ;;  %v8372_v48 = vld [vmem:[#allocation3 + $0x8] sm:$0xff] }
 0x97d   :  { %v6701_v6 = vpop.permute.xlu1 %6700  ;;  %7938 = vst.msk [vmem:[#allocation3 + $0x80] sm:$0xff] %vm7921_vm4, %v7762_v9  ;;  %9135 = vmatpush3.xpose.msk.msra.mxu1 %vm8436_vm6, %v8372_v48  ;;  %v7253_v9 = vld [vmem:[#allocation2 + $0x218] sm:$0xff] }
 0x97e   :  { %6830 = vst.msk [vmem:[#allocation3 + $0x1f8] sm:$0xff] %vm6766_vm1, %v6701_v6  ;;  %7843 = vrot.lane.b32.xlu0 %v7658_v41, %s9338_s12 }
 0x97f   :  { %7811 = vrot.lane.b32.xlu1 %v7642_v0, %s9338_s12  ;;  %v7654_v0 = vld [vmem:[#allocation2 + $0x2d9] sm:$0xff] }
 0x980   :  { %v7730_v7 = vpop.permute.xlu0 %7729 }
 0x981   :  { %v8147_v2 = vpop.permute.xlu1 %8146  ;;  %7922 = vst.msk [vmem:[#allocation3] sm:$0xff] %vm7921_vm4, %v7730_v7  ;;  %v7638_v7 = vld [vmem:[#allocation2 + $0x219] sm:$0xff] }
 0x982   :  { %8323 = vst.msk [vmem:[#allocation3 + $0x80] sm:$0xff] %vm8306_vm5, %v8147_v2  ;;  %8228 = vrot.lane.b32.xlu0 %v14167_v26, %s9339_s13  ;;  %v7641_v26 = vld [vmem:[#allocation2 + $0x241] sm:$0xff] }
 0x983   :  { %7071 = vrot.lane.b32.xlu1 %v14245_v35, %s9336_s2 }
 0x984   :  { %v7086_v11 = vpop.permute.xlu0 %7085 }
 0x985   :  { %v8115_v59 = vpop.permute.xlu1 %8114  ;;  %7215 = vst.msk [vmem:[#allocation3 + $0x1f8] sm:$0xff] %vm7151_vm2, %v7086_v11 }
 0x986   :  { %8307 = vst.msk [vmem:[#allocation3] sm:$0xff] %vm8306_vm5, %v8115_v59  ;;  %8196 = vrot.lane.b32.xlu0 %v14175_v36, %s9339_s13  ;;  %v14273_v36 = vld [vmem:[#allocation2 + $0x2da] sm:$0xff] }
 0x987   :  { %7039 = vrot.lane.b32.xlu1 %v14253_v63, %s9336_s2  ;;  %v14353_v59 = vld [vmem:[#allocation2 + $0x2ba] sm:$0xff] }
 0x988   :  { %v7054_v50 = vpop.permute.xlu0 %7053 }
 0x989   :  { %v7471_v17 = vpop.permute.xlu1 %7470  ;;  %7199 = vst.msk [vmem:[#allocation3 + $0x178] sm:$0xff] %vm7151_vm2, %v7054_v50  ;;  %v8387_v60 = vld [vmem:[#allocation3 + $0x80] sm:$0xff] }
 0x98a   :  { %7600 = vst.msk [vmem:[#allocation3 + $0x1f8] sm:$0xff] %vm7536_vm3, %v7471_v17  ;;  %9136 = vmatprep.subr.msk.mxu1 %vm8436_vm6, %v8387_v60  ;;  %7456 = vrot.lane.b32.xlu0 %v7272_v27, %s9337_s3  ;;  %v14361_v17 = vld [vmem:[#allocation2 + $0x1fa] sm:$0xff] }
 0x98b   :  { %7424 = vrot.lane.b32.xlu1 %v7256_v42, %s9337_s3  ;;  %v7268_v42 = vld [vmem:[#allocation2 + $0x2d0] sm:$0xff] }
 0x98c   :  { %v7439_v57 = vpop.permute.xlu0 %7438 }
 0x98d   :  { %v7856_v1 = vpop.permute.xlu1 %7855  ;;  %7584 = vst.msk [vmem:[#allocation3 + $0x178] sm:$0xff] %vm7536_vm3, %v7439_v57  ;;  %v8371_v61 = vld [vmem:[#allocation3] sm:$0xff]  ;;  %v7252_v57 = vld [vmem:[#allocation2 + $0x210] sm:$0xff] }
 0x98e   :  { %7985 = vst.msk [vmem:[#allocation3 + $0x1f8] sm:$0xff] %vm7921_vm4, %v7856_v1  ;;  %9137 = vmatpush3.xpose.msk.msra.mxu1 %vm8436_vm6, %v8371_v61  ;;  %7841 = vrot.lane.b32.xlu0 %v7657_v8, %s9338_s12 }
 0x98f   :  { %7809 = vrot.lane.b32.xlu1 %v7641_v26, %s9338_s12  ;;  %v7653_v26 = vld [vmem:[#allocation2 + $0x2d1] sm:$0xff] }
 0x990   :  { %v6699_v55 = vpop.permute.xlu0 %6698 }
 0x991   :  { %v7824_v21 = vpop.permute.xlu1 %7823  ;;  %6829 = vst.msk [vmem:[#allocation3 + $0x1f0] sm:$0xff] %vm6766_vm1, %v6699_v55  ;;  %9139 = vmatmul.mubr.msk.f32.vlgmr.msra.gmra.mxu1 %vm8436_vm6, %v14079_v38  ;;  %v7637_v55 = vld [vmem:[#allocation2 + $0x211] sm:$0xff] }
 0x992   :  { %7969 = vst.msk [vmem:[#allocation3 + $0x178] sm:$0xff] %vm7921_vm4, %v7824_v21  ;;  %8226 = vrot.lane.b32.xlu0 %v14193_v58, %s9339_s13  ;;  %9172 = vmatprep.mubr.msk.f32.mxu1 %vm8436_vm6, %v14079_v38  ;;  %v7271_v38 = vld [vmem:[#allocation2 + $0x2f0] sm:$0xff] }
 0x993   :  { %7069 = vrot.lane.b32.xlu1 %v14273_v36, %s9336_s2 }
 0x994   :  { %v8241_v45 = vpop.permute.xlu0 %8240 }
 0x995   :  { %v7084_v25 = vpop.permute.xlu1 %7083  ;;  %8370 = vst.msk [vmem:[#allocation3 + $0x1f8] sm:$0xff] %vm8306_vm5, %v8241_v45 }
 0x996   :  { %7214 = vst.msk [vmem:[#allocation3 + $0x1f0] sm:$0xff] %vm7151_vm2, %v7084_v25  ;;  %8194 = vrot.lane.b32.xlu0 %v14201_v44, %s9339_s13  ;;  %v14379_v25 = vld [vmem:[#allocation2 + $0x2aa] sm:$0xff] }
 0x997   :  { %7037 = vrot.lane.b32.xlu1 %v14283_v22, %s9336_s2 }
 0x998   :  { %v8209_v30 = vpop.permute.xlu0 %8208 }
 0x999   :  { %v7052_v54 = vpop.permute.xlu1 %7051  ;;  %8354 = vst.msk [vmem:[#allocation3 + $0x178] sm:$0xff] %vm8306_vm5, %v8209_v30 }
 0x99a   :  { %7198 = vst.msk [vmem:[#allocation3 + $0x170] sm:$0xff] %vm7151_vm2, %v7052_v54  ;;  %7454 = vrot.lane.b32.xlu0 %v7271_v38, %s9337_s3  ;;  %v14387_v54 = vld [vmem:[#allocation2 + $0x1ea] sm:$0xff] }
 0x99b   :  { %7422 = vrot.lane.b32.xlu1 %v7255_v28, %s9337_s3 }
 0x99c   :  { %v7469_v14 = vpop.permute.xlu0 %7468  ;;  %v8434_v32 = vld [vmem:[#allocation3 + $0x1f8] sm:$0xff] }
 0x99d   :  { %v7437_v19 = vpop.permute.xlu1 %7436  ;;  %7599 = vst.msk [vmem:[#allocation3 + $0x1f0] sm:$0xff] %vm7536_vm3, %v7469_v14  ;;  %9140 = vmatprep.subr.msk.mxu1 %vm8436_vm6, %v8434_v32  ;;  %v7267_v14 = vld [vmem:[#allocation2 + $0x2c0] sm:$0xff] }
 0x99e   :  { %7583 = vst.msk [vmem:[#allocation3 + $0x170] sm:$0xff] %vm7536_vm3, %v7437_v19  ;;  %7839 = vrot.lane.b32.xlu0 %v7656_v13, %s9338_s12  ;;  %v7251_v32 = vld [vmem:[#allocation2 + $0x200] sm:$0xff] }
 0x99f   :  { %7807 = vrot.lane.b32.xlu1 %v7640_v62, %s9338_s12 }
 0x9a0   :  { %v7854_v34 = vpop.permute.xlu0 %7853  ;;  %v8418_v58 = vld [vmem:[#allocation3 + $0x178] sm:$0xff] }
 0x9a1   :  { %v7822_v10 = vpop.permute.xlu1 %7821  ;;  %7984 = vst.msk [vmem:[#allocation3 + $0x1f0] sm:$0xff] %vm7921_vm4, %v7854_v34  ;;  %9141 = vmatpush3.xpose.msk.msra.mxu1 %vm8436_vm6, %v8418_v58  ;;  %v7652_v34 = vld [vmem:[#allocation2 + $0x2c1] sm:$0xff] }
 0x9a2   :  { %7968 = vst.msk [vmem:[#allocation3 + $0x170] sm:$0xff] %vm7921_vm4, %v7822_v10  ;;  %8224 = vrot.lane.b32.xlu0 %v14219_v40, %s9339_s13  ;;  %v7636_v58 = vld [vmem:[#allocation2 + $0x201] sm:$0xff] }
 0x9a3   :  { %7067 = vrot.lane.b32.xlu1 %v14301_v12, %s9336_s2 }
 0x9a4   :  { %v8239_v44 = vpop.permute.xlu0 %8238 }
 0x9a5   :  { %v7082_v49 = vpop.permute.xlu1 %7081  ;;  %8369 = vst.msk [vmem:[#allocation3 + $0x1f0] sm:$0xff] %vm8306_vm5, %v8239_v44 }
 0x9a6   :  { %7213 = vst.msk [vmem:[#allocation3 + $0x1e8] sm:$0xff] %vm7151_vm2, %v7082_v49  ;;  %8192 = vrot.lane.b32.xlu0 %v14227_v53, %s9339_s13  ;;  %v14405_v49 = vld [vmem:[#allocation2 + $0x2a2] sm:$0xff] }
 0x9a7   :  { %7035 = vrot.lane.b32.xlu1 %v14309_v52, %s9336_s2 }
 0x9a8   :  { %v8207_v29 = vpop.permute.xlu0 %8206 }
 0x9a9   :  { %v7050_v24 = vpop.permute.xlu1 %7049  ;;  %8353 = vst.msk [vmem:[#allocation3 + $0x170] sm:$0xff] %vm8306_vm5, %v8207_v29 }
 0x9aa   :  { %7197 = vst.msk [vmem:[#allocation3 + $0x168] sm:$0xff] %vm7151_vm2, %v7050_v24  ;;  %7452 = vrot.lane.b32.xlu0 %v7270_v33, %s9337_s3  ;;  %v14413_v24 = vld [vmem:[#allocation2 + $0x1e2] sm:$0xff] }
 0x9ab   :  { %7420 = vrot.lane.b32.xlu1 %v7254_v51, %s9337_s3 }
 0x9ac   :  { %v7467_v3 = vpop.permute.xlu0 %7466  ;;  %v8433_v31 = vld [vmem:[#allocation3 + $0x1f0] sm:$0xff] }
 0x9ad   :  { %v7435_v16 = vpop.permute.xlu1 %7434  ;;  %7598 = vst.msk [vmem:[#allocation3 + $0x1e8] sm:$0xff] %vm7536_vm3, %v7467_v3  ;;  %9142 = vmatprep.subr.msk.mxu1 %vm8436_vm6, %v8433_v31  ;;  %v7266_v3 = vld [vmem:[#allocation2 + $0x2b8] sm:$0xff] }
 0x9ae   :  { %7582 = vst.msk [vmem:[#allocation3 + $0x168] sm:$0xff] %vm7536_vm3, %v7435_v16  ;;  %7837 = vrot.lane.b32.xlu0 %v7655_v39, %s9338_s12  ;;  %v7250_v31 = vld [vmem:[#allocation2 + $0x1f8] sm:$0xff] }
 0x9af   :  { %7805 = vrot.lane.b32.xlu1 %v7639_v37, %s9338_s12 }
 0x9b0   :  { %v7852_v43 = vpop.permute.xlu0 %7851  ;;  %v8417_v40 = vld [vmem:[#allocation3 + $0x170] sm:$0xff] }
 0x9b1   :  { %v7820_v56 = vpop.permute.xlu1 %7819  ;;  %7983 = vst.msk [vmem:[#allocation3 + $0x1e8] sm:$0xff] %vm7921_vm4, %v7852_v43  ;;  %9143 = vmatpush3.xpose.msk.msra.mxu1 %vm8436_vm6, %v8417_v40  ;;  %v7651_v43 = vld [vmem:[#allocation2 + $0x2b9] sm:$0xff] }
 0x9b2   :  { %7967 = vst.msk [vmem:[#allocation3 + $0x168] sm:$0xff] %vm7921_vm4, %v7820_v56  ;;  %8222 = vrot.lane.b32.xlu0 %v14245_v35, %s9339_s13  ;;  %v7635_v40 = vld [vmem:[#allocation2 + $0x1f9] sm:$0xff] }
 0x9b3   :  { %7065 = vrot.lane.b32.xlu1 %v14327_v18, %s9336_s2 }
 0x9b4   :  { %v8237_v53 = vpop.permute.xlu0 %8236 }
 0x9b5   :  { %v7080_v15 = vpop.permute.xlu1 %7079  ;;  %8368 = vst.msk [vmem:[#allocation3 + $0x1e8] sm:$0xff] %vm8306_vm5, %v8237_v53 }
 0x9b6   :  { %7212 = vst.msk [vmem:[#allocation3 + $0x1e0] sm:$0xff] %vm7151_vm2, %v7080_v15  ;;  %8190 = vrot.lane.b32.xlu0 %v14253_v63, %s9339_s13 }
 0x9b7   :  { %7033 = vrot.lane.b32.xlu1 %v14335_v46, %s9336_s2 }
 0x9b8   :  { %v8205_v20 = vpop.permute.xlu0 %8204 }
 0x9b9   :  { %v7048_v4 = vpop.permute.xlu1 %7047  ;;  %8352 = vst.msk [vmem:[#allocation3 + $0x168] sm:$0xff] %vm8306_vm5, %v8205_v20  ;;  %v6864_v20 = vld [vmem:[#allocation2 + $0x1d2] sm:$0xff] }
 0x9ba   :  { %7196 = vst.msk [vmem:[#allocation3 + $0x160] sm:$0xff] %vm7151_vm2, %v7048_v4  ;;  %7450 = vrot.lane.b32.xlu0 %v7269_v47, %s9337_s3 }
 0x9bb   :  { %7418 = vrot.lane.b32.xlu1 %v7253_v9, %s9337_s3  ;;  %v7265_v9 = vld [vmem:[#allocation2 + $0x2a8] sm:$0xff] }
 0x9bc   :  { %v7465_v48 = vpop.permute.xlu0 %7464  ;;  %v8432_v6 = vld [vmem:[#allocation3 + $0x1e8] sm:$0xff] }
 0x9bd   :  { %v7433_v41 = vpop.permute.xlu1 %7432  ;;  %7597 = vst.msk [vmem:[#allocation3 + $0x1e0] sm:$0xff] %vm7536_vm3, %v7465_v48  ;;  %9144 = vmatprep.subr.msk.mxu1 %vm8436_vm6, %v8432_v6 }
 0x9be   :  { %7581 = vst.msk [vmem:[#allocation3 + $0x160] sm:$0xff] %vm7536_vm3, %v7433_v41  ;;  %7835 = vrot.lane.b32.xlu0 %v7654_v0, %s9338_s12  ;;  %v7650_v0 = vld [vmem:[#allocation2 + $0x2a9] sm:$0xff] }
 0x9bf   :  { %7803 = vrot.lane.b32.xlu1 %v7638_v7, %s9338_s12  ;;  %v7634_v7 = vld [vmem:[#allocation2 + $0x1e9] sm:$0xff] }
 0x9c0   :  { %v7850_v2 = vpop.permute.xlu0 %7849  ;;  %v8416_v35 = vld [vmem:[#allocation3 + $0x168] sm:$0xff] }
 0x9c1   :  { %v7818_v11 = vpop.permute.xlu1 %7817  ;;  %7982 = vst.msk [vmem:[#allocation3 + $0x1e0] sm:$0xff] %vm7921_vm4, %v7850_v2  ;;  %9145 = vmatpush3.xpose.msk.msra.mxu1 %vm8436_vm6, %v8416_v35 }
 0x9c2   :  { %7966 = vst.msk [vmem:[#allocation3 + $0x160] sm:$0xff] %vm7921_vm4, %v7818_v11  ;;  %8220 = vrot.lane.b32.xlu0 %v14273_v36, %s9339_s13 }
 0x9c3   :  { %7063 = vrot.lane.b32.xlu1 %v14353_v59, %s9336_s2 }
 0x9c4   :  { %v8235_v63 = vpop.permute.xlu0 %8234 }
 0x9c5   :  { %v7078_v50 = vpop.permute.xlu1 %7077  ;;  %8367 = vst.msk [vmem:[#allocation3 + $0x1e0] sm:$0xff] %vm8306_vm5, %v8235_v63 }
 0x9c6   :  { %7211 = vst.msk [vmem:[#allocation3 + $0x1d8] sm:$0xff] %vm7151_vm2, %v7078_v50  ;;  %8188 = vrot.lane.b32.xlu0 %v14283_v22, %s9339_s13  ;;  %v6863_v50 = vld [vmem:[#allocation2 + $0x1ca] sm:$0xff] }
 0x9c7   :  { %7031 = vrot.lane.b32.xlu1 %v14361_v17, %s9336_s2 }
 0x9c8   :  { %v8203_v60 = vpop.permute.xlu0 %8202 }
 0x9c9   :  { %v7046_v27 = vpop.permute.xlu1 %7045  ;;  %8351 = vst.msk [vmem:[#allocation3 + $0x160] sm:$0xff] %vm8306_vm5, %v8203_v60 }
 0x9ca   :  { %7195 = vst.msk [vmem:[#allocation3 + $0x158] sm:$0xff] %vm7151_vm2, %v7046_v27  ;;  %7448 = vrot.lane.b32.xlu0 %v7268_v42, %s9337_s3  ;;  %v7264_v27 = vld [vmem:[#allocation2 + $0x2a0] sm:$0xff] }
 0x9cb   :  { %7416 = vrot.lane.b32.xlu1 %v7252_v57, %s9337_s3 }
 0x9cc   :  { %v7463_v1 = vpop.permute.xlu0 %7462  ;;  %v8431_v61 = vld [vmem:[#allocation3 + $0x1e0] sm:$0xff] }
 0x9cd   :  { %v7431_v8 = vpop.permute.xlu1 %7430  ;;  %7596 = vst.msk [vmem:[#allocation3 + $0x1d8] sm:$0xff] %vm7536_vm3, %v7463_v1  ;;  %9146 = vmatprep.subr.msk.mxu1 %vm8436_vm6, %v8431_v61  ;;  %v7649_v61 = vld [vmem:[#allocation2 + $0x2a1] sm:$0xff] }
 0x9ce   :  { %7580 = vst.msk [vmem:[#allocation3 + $0x158] sm:$0xff] %vm7536_vm3, %v7431_v8  ;;  %7833 = vrot.lane.b32.xlu0 %v7653_v26, %s9338_s12  ;;  %v7633_v8 = vld [vmem:[#allocation2 + $0x1e1] sm:$0xff] }
 0x9cf   :  { %7801 = vrot.lane.b32.xlu1 %v7637_v55, %s9338_s12 }
 0x9d0   :  { %v7848_v21 = vpop.permute.xlu0 %7847  ;;  %v8415_v36 = vld [vmem:[#allocation3 + $0x160] sm:$0xff] }
 0x9d1   :  { %v7816_v45 = vpop.permute.xlu1 %7815  ;;  %7981 = vst.msk [vmem:[#allocation3 + $0x1d8] sm:$0xff] %vm7921_vm4, %v7848_v21  ;;  %9147 = vmatpush3.xpose.msk.msra.mxu1 %vm8436_vm6, %v8415_v36 }
 0x9d2   :  { %7965 = vst.msk [vmem:[#allocation3 + $0x158] sm:$0xff] %vm7921_vm4, %v7816_v45  ;;  %8218 = vrot.lane.b32.xlu0 %v14301_v12, %s9339_s13 }
 0x9d3   :  { %7061 = vrot.lane.b32.xlu1 %v14379_v25, %s9336_s2 }
 0x9d4   :  { %v8233_v22 = vpop.permute.xlu0 %8232 }
 0x9d5   :  { %v7076_v30 = vpop.permute.xlu1 %7075  ;;  %8366 = vst.msk [vmem:[#allocation3 + $0x1d8] sm:$0xff] %vm8306_vm5, %v8233_v22 }
 0x9d6   :  { %7210 = vst.msk [vmem:[#allocation3 + $0x1d0] sm:$0xff] %vm7151_vm2, %v7076_v30  ;;  %8186 = vrot.lane.b32.xlu0 %v14309_v52, %s9339_s13 }
 0x9d7   :  { %7029 = vrot.lane.b32.xlu1 %v14387_v54, %s9336_s2 }
 0x9d8   :  { %v8201_v38 = vpop.permute.xlu0 %8200 }
 0x9d9   :  { %v7044_v28 = vpop.permute.xlu1 %7043  ;;  %8350 = vst.msk [vmem:[#allocation3 + $0x158] sm:$0xff] %vm8306_vm5, %v8201_v38 }
 0x9da   :  { %7194 = vst.msk [vmem:[#allocation3 + $0x150] sm:$0xff] %vm7151_vm2, %v7044_v28  ;;  %7446 = vrot.lane.b32.xlu0 %v7267_v14, %s9337_s3 }
 0x9db   :  { %7414 = vrot.lane.b32.xlu1 %v7251_v32, %s9337_s3 }
 0x9dc   :  { %v7461_v19 = vpop.permute.xlu0 %7460  ;;  %v8430_v13 = vld [vmem:[#allocation3 + $0x1d8] sm:$0xff] }
 0x9dd   :  { %v7429_v62 = vpop.permute.xlu1 %7428  ;;  %7595 = vst.msk [vmem:[#allocation3 + $0x1d0] sm:$0xff] %vm7536_vm3, %v7461_v19  ;;  %9148 = vmatprep.subr.msk.mxu1 %vm8436_vm6, %v8430_v13 }
 0x9de   :  { %7579 = vst.msk [vmem:[#allocation3 + $0x150] sm:$0xff] %vm7536_vm3, %v7429_v62  ;;  %7831 = vrot.lane.b32.xlu0 %v7652_v34, %s9338_s12 }
 0x9df   :  { %7799 = vrot.lane.b32.xlu1 %v7636_v58, %s9338_s12 }
 0x9e0   :  { %v7846_v10 = vpop.permute.xlu0 %7845  ;;  %v8414_v12 = vld [vmem:[#allocation3 + $0x158] sm:$0xff] }
 0x9e1   :  { %v7814_v44 = vpop.permute.xlu1 %7813  ;;  %7980 = vst.msk [vmem:[#allocation3 + $0x1d0] sm:$0xff] %vm7921_vm4, %v7846_v10  ;;  %9149 = vmatpush3.xpose.msk.msra.mxu1 %vm8436_vm6, %v8414_v12 }
 0x9e2   :  { %7964 = vst.msk [vmem:[#allocation3 + $0x150] sm:$0xff] %vm7921_vm4, %v7814_v44  ;;  %8216 = vrot.lane.b32.xlu0 %v14327_v18, %s9339_s13 }
 0x9e3   :  { %7059 = vrot.lane.b32.xlu1 %v14405_v49, %s9336_s2 }
 0x9e4   :  { %v8231_v52 = vpop.permute.xlu0 %8230 }
 0x9e5   :  { %v7074_v29 = vpop.permute.xlu1 %7073  ;;  %8365 = vst.msk [vmem:[#allocation3 + $0x1d0] sm:$0xff] %vm8306_vm5, %v8231_v52 }
 0x9e6   :  { %7209 = vst.msk [vmem:[#allocation3 + $0x1c8] sm:$0xff] %vm7151_vm2, %v7074_v29  ;;  %8184 = vrot.lane.b32.xlu0 %v14335_v46, %s9339_s13 }
 0x9e7   :  { %7027 = vrot.lane.b32.xlu1 %v14413_v24, %s9336_s2 }
 0x9e8   :  { %v8199_v33 = vpop.permute.xlu0 %8198 }
 0x9e9   :  { %v7042_v51 = vpop.permute.xlu1 %7041  ;;  %8349 = vst.msk [vmem:[#allocation3 + $0x150] sm:$0xff] %vm8306_vm5, %v8199_v33 }
 0x9ea   :  { %7193 = vst.msk [vmem:[#allocation3 + $0x148] sm:$0xff] %vm7151_vm2, %v7042_v51  ;;  %7444 = vrot.lane.b32.xlu0 %v7266_v3, %s9337_s3 }
 0x9eb   :  { %7412 = vrot.lane.b32.xlu1 %v7250_v31, %s9337_s3 }
 0x9ec   :  { %v7459_v16 = vpop.permute.xlu0 %7458  ;;  %v8429_v39 = vld [vmem:[#allocation3 + $0x1d0] sm:$0xff] }
 0x9ed   :  { %v7427_v37 = vpop.permute.xlu1 %7426  ;;  %7594 = vst.msk [vmem:[#allocation3 + $0x1c8] sm:$0xff] %vm7536_vm3, %v7459_v16  ;;  %9150 = vmatprep.subr.msk.mxu1 %vm8436_vm6, %v8429_v39 }
 0x9ee   :  { %7578 = vst.msk [vmem:[#allocation3 + $0x148] sm:$0xff] %vm7536_vm3, %v7427_v37  ;;  %7829 = vrot.lane.b32.xlu0 %v7651_v43, %s9338_s12 }
 0x9ef   :  { %7797 = vrot.lane.b32.xlu1 %v7635_v40, %s9338_s12 }
 0x9f0   :  { %v7844_v56 = vpop.permute.xlu0 %7843  ;;  %v8413_v18 = vld [vmem:[#allocation3 + $0x150] sm:$0xff] }
 0x9f1   :  { %v7812_v53 = vpop.permute.xlu1 %7811  ;;  %7979 = vst.msk [vmem:[#allocation3 + $0x1c8] sm:$0xff] %vm7921_vm4, %v7844_v56  ;;  %9151 = vmatpush3.xpose.msk.msra.mxu1 %vm8436_vm6, %v8413_v18 }
 0x9f2   :  { %7963 = vst.msk [vmem:[#allocation3 + $0x148] sm:$0xff] %vm7921_vm4, %v7812_v53  ;;  %8214 = vrot.lane.b32.xlu0 %v14353_v59, %s9339_s13 }
 0x9f3   :  { %7057 = vrot.lane.b32.xlu1 %v14091_v23, %s9336_s2  ;;  %v7249_v23 = vld [vmem:[#allocation2 + $0x1e8] sm:$0xff] }
 0x9f4   :  { %v8229_v15 = vpop.permute.xlu0 %8228 }
 0x9f5   :  { %v7072_v46 = vpop.permute.xlu1 %7071  ;;  %8364 = vst.msk [vmem:[#allocation3 + $0x1c8] sm:$0xff] %vm8306_vm5, %v8229_v15 }
 0x9f6   :  { %7208 = vst.msk [vmem:[#allocation3 + $0x1c0] sm:$0xff] %vm7151_vm2, %v7072_v46  ;;  %8182 = vrot.lane.b32.xlu0 %v14361_v17, %s9339_s13 }
 0x9f7   :  { %7025 = vrot.lane.b32.xlu1 %v6864_v20, %s9336_s2 }
 0x9f8   :  { %v8197_v4 = vpop.permute.xlu0 %8196 }
 0x9f9   :  { %v7040_v47 = vpop.permute.xlu1 %7039  ;;  %8348 = vst.msk [vmem:[#allocation3 + $0x148] sm:$0xff] %vm8306_vm5, %v8197_v4 }
 0x9fa   :  { %7192 = vst.msk [vmem:[#allocation3 + $0x140] sm:$0xff] %vm7151_vm2, %v7040_v47  ;;  %7442 = vrot.lane.b32.xlu0 %v7265_v9, %s9337_s3 }
 0x9fb   :  { %7410 = vrot.lane.b32.xlu1 %v7249_v23, %s9337_s3 }
 0x9fc   :  { %v7457_v48 = vpop.permute.xlu0 %7456  ;;  %v8428_v6 = vld [vmem:[#allocation3 + $0x1c8] sm:$0xff] }
 0x9fd   :  { %v7425_v41 = vpop.permute.xlu1 %7424  ;;  %7593 = vst.msk [vmem:[#allocation3 + $0x1c0] sm:$0xff] %vm7536_vm3, %v7457_v48  ;;  %9152 = vmatprep.subr.msk.mxu1 %vm8436_vm6, %v8428_v6 }
 0x9fe   :  { %7577 = vst.msk [vmem:[#allocation3 + $0x140] sm:$0xff] %vm7536_vm3, %v7425_v41  ;;  %7827 = vrot.lane.b32.xlu0 %v7650_v0, %s9338_s12 }
 0x9ff   :  { %7795 = vrot.lane.b32.xlu1 %v7634_v7, %s9338_s12 }
 0xa00   :  { %v7842_v2 = vpop.permute.xlu0 %7841  ;;  %v8412_v35 = vld [vmem:[#allocation3 + $0x148] sm:$0xff] }
 0xa01   :  { %v7810_v11 = vpop.permute.xlu1 %7809  ;;  %7978 = vst.msk [vmem:[#allocation3 + $0x1c0] sm:$0xff] %vm7921_vm4, %v7842_v2  ;;  %9153 = vmatpush3.xpose.msk.msra.mxu1 %vm8436_vm6, %v8412_v35 }
 0xa02   :  { %7962 = vst.msk [vmem:[#allocation3 + $0x140] sm:$0xff] %vm7921_vm4, %v7810_v11  ;;  %8212 = vrot.lane.b32.xlu0 %v14379_v25, %s9339_s13 }
 0xa03   :  { %7055 = vrot.lane.b32.xlu1 %v14118_v5, %s9336_s2  ;;  %v7248_v5 = vld [vmem:[#allocation2 + $0x1e0] sm:$0xff] }
 0xa04   :  { %v8227_v59 = vpop.permute.xlu0 %8226 }
 0xa05   :  { %v7070_v63 = vpop.permute.xlu1 %7069  ;;  %8363 = vst.msk [vmem:[#allocation3 + $0x1c0] sm:$0xff] %vm8306_vm5, %v8227_v59 }
 0xa06   :  { %7207 = vst.msk [vmem:[#allocation3 + $0x1b8] sm:$0xff] %vm7151_vm2, %v7070_v63  ;;  %8180 = vrot.lane.b32.xlu0 %v14387_v54, %s9339_s13 }
 0xa07   :  { %7023 = vrot.lane.b32.xlu1 %v6863_v50, %s9336_s2 }
 0xa08   :  { %v8195_v17 = vpop.permute.xlu0 %8194 }
 0xa09   :  { %v7038_v60 = vpop.permute.xlu1 %7037  ;;  %8347 = vst.msk [vmem:[#allocation3 + $0x140] sm:$0xff] %vm8306_vm5, %v8195_v17 }
 0xa0a   :  { %7191 = vst.msk [vmem:[#allocation3 + $0x138] sm:$0xff] %vm7151_vm2, %v7038_v60  ;;  %7440 = vrot.lane.b32.xlu0 %v7264_v27, %s9337_s3 }
 0xa0b   :  { %7408 = vrot.lane.b32.xlu1 %v7248_v5, %s9337_s3 }
 0xa0c   :  { %v7455_v42 = vpop.permute.xlu0 %7454  ;;  %v8427_v57 = vld [vmem:[#allocation3 + $0x1c0] sm:$0xff] }
 0xa0d   :  { %v7423_v1 = vpop.permute.xlu1 %7422  ;;  %7592 = vst.msk [vmem:[#allocation3 + $0x1b8] sm:$0xff] %vm7536_vm3, %v7455_v42  ;;  %9154 = vmatprep.subr.msk.mxu1 %vm8436_vm6, %v8427_v57 }
 0xa0e   :  { %7576 = vst.msk [vmem:[#allocation3 + $0x138] sm:$0xff] %vm7536_vm3, %v7423_v1  ;;  %7825 = vrot.lane.b32.xlu0 %v7649_v61, %s9338_s12 }
 0xa0f   :  { %7793 = vrot.lane.b32.xlu1 %v7633_v8, %s9338_s12 }
 0xa10   :  { %v7840_v26 = vpop.permute.xlu0 %7839  ;;  %v8411_v55 = vld [vmem:[#allocation3 + $0x140] sm:$0xff] }
 0xa11   :  { %v7808_v21 = vpop.permute.xlu1 %7807  ;;  %7977 = vst.msk [vmem:[#allocation3 + $0x1b8] sm:$0xff] %vm7921_vm4, %v7840_v26  ;;  %9155 = vmatpush3.xpose.msk.msra.mxu1 %vm8436_vm6, %v8411_v55 }
 0xa12   :  { %7961 = vst.msk [vmem:[#allocation3 + $0x138] sm:$0xff] %vm7921_vm4, %v7808_v21  ;;  %8210 = vrot.lane.b32.xlu0 %v14405_v49, %s9339_s13 }
 0xa13   :  { %8178 = vrot.lane.b32.xlu1 %v14413_v24, %s9339_s13 }
 0xa14   :  { %v8225_v36 = vpop.permute.xlu0 %8224 }
 0xa15   :  { %v7068_v45 = vpop.permute.xlu1 %7067  ;;  %8362 = vst.msk [vmem:[#allocation3 + $0x1b8] sm:$0xff] %vm8306_vm5, %v8225_v36 }
 0xa16   :  { %7206 = vst.msk [vmem:[#allocation3 + $0x1b0] sm:$0xff] %vm7151_vm2, %v7068_v45 }
 0xa18   :  { %v8193_v25 = vpop.permute.xlu0 %8192 }
 0xa19   :  { %v7036_v22 = vpop.permute.xlu1 %7035  ;;  %8346 = vst.msk [vmem:[#allocation3 + $0x138] sm:$0xff] %vm8306_vm5, %v8193_v25 }
 0xa1a   :  { %7190 = vst.msk [vmem:[#allocation3 + $0x130] sm:$0xff] %vm7151_vm2, %v7036_v22 }
 0xa1c   :  { %v7453_v30 = vpop.permute.xlu0 %7452  ;;  %v8426_v54 = vld [vmem:[#allocation3 + $0x1b8] sm:$0xff] }
 0xa1d   :  { %v7421_v38 = vpop.permute.xlu1 %7420  ;;  %7591 = vst.msk [vmem:[#allocation3 + $0x1b0] sm:$0xff] %vm7536_vm3, %v7453_v30  ;;  %9156 = vmatprep.subr.msk.mxu1 %vm8436_vm6, %v8426_v54 }
 0xa1e   :  { %7575 = vst.msk [vmem:[#allocation3 + $0x130] sm:$0xff] %vm7536_vm3, %v7421_v38 }
 0xa20   :  { %v7838_v28 = vpop.permute.xlu0 %7837  ;;  %v8410_v14 = vld [vmem:[#allocation3 + $0x138] sm:$0xff] }
 0xa21   :  { %v7806_v32 = vpop.permute.xlu1 %7805  ;;  %7976 = vst.msk [vmem:[#allocation3 + $0x1b0] sm:$0xff] %vm7921_vm4, %v7838_v28  ;;  %9157 = vmatpush3.xpose.msk.msra.mxu1 %vm8436_vm6, %v8410_v14 }
 0xa22   :  { %7960 = vst.msk [vmem:[#allocation3 + $0x130] sm:$0xff] %vm7921_vm4, %v7806_v32 }
 0xa24   :  { %v8223_v19 = vpop.permute.xlu0 %8222 }
 0xa25   :  { %v7066_v13 = vpop.permute.xlu1 %7065  ;;  %8361 = vst.msk [vmem:[#allocation3 + $0x1b0] sm:$0xff] %vm8306_vm5, %v8223_v19  ;;  %v9303_v19 = vld [vmem:[%s14569_s4] sm:$0xff] }
 0xa26   :  { %7205 = vst.msk [vmem:[#allocation3 + $0x1a8] sm:$0xff] %vm7151_vm2, %v7066_v13 }
 0xa28   :  { %v8191_v62 = vpop.permute.xlu0 %8190 }
 0xa29   :  { %v7034_v34 = vpop.permute.xlu1 %7033  ;;  %8345 = vst.msk [vmem:[#allocation3 + $0x130] sm:$0xff] %vm8306_vm5, %v8191_v62 }
 0xa2a   :  { %7189 = vst.msk [vmem:[#allocation3 + $0x128] sm:$0xff] %vm7151_vm2, %v7034_v34 }
 0xa2c   :  { %v7451_v58 = vpop.permute.xlu0 %7450  ;;  %v8425_v10 = vld [vmem:[#allocation3 + $0x1b0] sm:$0xff] }
 0xa2d   :  { %v7419_v12 = vpop.permute.xlu1 %7418  ;;  %7590 = vst.msk [vmem:[#allocation3 + $0x1a8] sm:$0xff] %vm7536_vm3, %v7451_v58  ;;  %9158 = vmatprep.subr.msk.mxu1 %vm8436_vm6, %v8425_v10 }
 0xa2e   :  { %7574 = vst.msk [vmem:[#allocation3 + $0x128] sm:$0xff] %vm7536_vm3, %v7419_v12 }
 0xa30   :  { %v7836_v44 = vpop.permute.xlu0 %7835  ;;  %v8409_v49 = vld [vmem:[#allocation3 + $0x130] sm:$0xff] }
 0xa31   :  { %v7804_v52 = vpop.permute.xlu1 %7803  ;;  %7975 = vst.msk [vmem:[#allocation3 + $0x1a8] sm:$0xff] %vm7921_vm4, %v7836_v44  ;;  %9159 = vmatpush3.xpose.msk.msra.mxu1 %vm8436_vm6, %v8409_v49 }
 0xa32   :  { %7959 = vst.msk [vmem:[#allocation3 + $0x128] sm:$0xff] %vm7921_vm4, %v7804_v52 }
 0xa34   :  { %v8221_v29 = vpop.permute.xlu0 %8220 }
 0xa35   :  { %v7064_v24 = vpop.permute.xlu1 %7063  ;;  %8360 = vst.msk [vmem:[#allocation3 + $0x1a8] sm:$0xff] %vm8306_vm5, %v8221_v29 }
 0xa36   :  { %7204 = vst.msk [vmem:[#allocation3 + $0x1a0] sm:$0xff] %vm7151_vm2, %v7064_v24 }
 0xa38   :  { %v8189_v33 = vpop.permute.xlu0 %8188 }
 0xa39   :  { %v7032_v51 = vpop.permute.xlu1 %7031  ;;  %8344 = vst.msk [vmem:[#allocation3 + $0x128] sm:$0xff] %vm8306_vm5, %v8189_v33 }
 0xa3a   :  { %7188 = vst.msk [vmem:[#allocation3 + $0x120] sm:$0xff] %vm7151_vm2, %v7032_v51 }
 0xa3c   :  { %v7449_v3 = vpop.permute.xlu0 %7448  ;;  %v8424_v31 = vld [vmem:[#allocation3 + $0x1a8] sm:$0xff] }
 0xa3d   :  { %v7417_v16 = vpop.permute.xlu1 %7416  ;;  %7589 = vst.msk [vmem:[#allocation3 + $0x1a0] sm:$0xff] %vm7536_vm3, %v7449_v3  ;;  %9160 = vmatprep.subr.msk.mxu1 %vm8436_vm6, %v8424_v31  ;;  %v9340_v31 = vmov 0  }
 0xa3e   :  { %7573 = vst.msk [vmem:[#allocation3 + $0x120] sm:$0xff] %vm7536_vm3, %v7417_v16  ;;  %9297 = vset.pattern.permute.xlu0 %v9340_v31  ;;  %9298 = vset.pattern.permute.xlu1 %v9340_v31 }
 0xa40   :  { %v7834_v39 = vpop.permute.xlu0 %7833  ;;  %v8408_v37 = vld [vmem:[#allocation3 + $0x128] sm:$0xff] }
 0xa41   :  { %v7802_v43 = vpop.permute.xlu1 %7801  ;;  %7974 = vst.msk [vmem:[#allocation3 + $0x1a0] sm:$0xff] %vm7921_vm4, %v7834_v39  ;;  %9161 = vmatpush3.xpose.msk.msra.mxu1 %vm8436_vm6, %v8408_v37 }
 0xa42   :  { %7958 = vst.msk [vmem:[#allocation3 + $0x120] sm:$0xff] %vm7921_vm4, %v7802_v43 }
 0xa44   :  { %v8219_v40 = vpop.permute.xlu0 %8218 }
 0xa45   :  { %v7062_v56 = vpop.permute.xlu1 %7061  ;;  %8359 = vst.msk [vmem:[#allocation3 + $0x1a0] sm:$0xff] %vm8306_vm5, %v8219_v40 }
 0xa46   :  { %7203 = vst.msk [vmem:[#allocation3 + $0x198] sm:$0xff] %vm7151_vm2, %v7062_v56 }
 0xa48   :  { %v8187_v18 = vpop.permute.xlu0 %8186 }
 0xa49   :  { %v7030_v53 = vpop.permute.xlu1 %7029  ;;  %8343 = vst.msk [vmem:[#allocation3 + $0x120] sm:$0xff] %vm8306_vm5, %v8187_v18 }
 0xa4a   :  { %7187 = vst.msk [vmem:[#allocation3 + $0x118] sm:$0xff] %vm7151_vm2, %v7030_v53  ;;  %v8790_v53 = vld [vmem:[%s14570_s5] sm:$0xff]  ;;  %s9304_s5 = scalar_lea.vmem %s8832_s22, 512 }
 0xa4b   :  { %p9305_p0 = scmp.ne.s32.totalorder %s8832_s22, %s9304_s5  ;;  %p9310_p2 = scmp.lt.s32.totalorder %s9304_s5, %s9304_s5 }
 0xa4c   :  { %v7447_v15 = vpop.permute.xlu0 %7446  ;;  %v8423_v46 = vld [vmem:[#allocation3 + $0x1a0] sm:$0xff] }
 0xa4d   :  { %v7415_v20 = vpop.permute.xlu1 %7414  ;;  %7588 = vst.msk [vmem:[#allocation3 + $0x198] sm:$0xff] %vm7536_vm3, %v7447_v15  ;;  %9162 = vmatprep.subr.msk.mxu1 %vm8436_vm6, %v8423_v46  ;;  %p9311_p3 = por %p9310_p2, %p9309_p1 }
 0xa4e   :  { %7572 = vst.msk [vmem:[#allocation3 + $0x118] sm:$0xff] %vm7536_vm3, %v7415_v20  ;;  %v8796_v20 = vld [vmem:[%s14571_s6] sm:$0xff] }
 0xa4f   :  { %p9312_p4 = pnand %p9311_p3, %p9305_p0 }
 0xa50   :  { %v7832_v4 = vpop.permute.xlu0 %7831  ;;  %v8407_v47 = vld [vmem:[#allocation3 + $0x120] sm:$0xff] }
 0xa51   :  { %v7800_v9 = vpop.permute.xlu1 %7799  ;;  %7973 = vst.msk [vmem:[#allocation3 + $0x198] sm:$0xff] %vm7921_vm4, %v7832_v4  ;;  %9163 = vmatpush3.xpose.msk.msra.mxu1 %vm8436_vm6, %v8407_v47  ;;  %v8698_v13 = vpop.f32.mrf.mxu1 }
 0xa52   :  { %7957 = vst.msk [vmem:[#allocation3 + $0x118] sm:$0xff] %vm7921_vm4, %v7800_v9  ;;  %v8780_v34 = vmul.f32 %v8698_v13, %v8698_v13 }
 0xa53   :  { %v8700_v62 = vpop.f32.mrf.mxu1 }
 0xa54   :  { %v8217_v23 = vpop.permute.xlu0 %8216  ;;  %v8781_v58 = vmul.f32 %v8700_v62, %v8700_v62  ;;  %v8774_v10 = vadd.f32 %v8700_v62, %v8698_v13 }
 0xa55   :  { %v7060_v48 = vpop.permute.xlu1 %7059  ;;  %8358 = vst.msk [vmem:[#allocation3 + $0x198] sm:$0xff] %vm8306_vm5, %v8217_v23 }
 0xa56   :  { %7202 = vst.msk [vmem:[#allocation3 + $0x190] sm:$0xff] %vm7151_vm2, %v7060_v48  ;;  %v8784_v44 = vadd.f32 %v8781_v58, %v8780_v34 }
 0xa58   :  { %v8185_v6 = vpop.permute.xlu0 %8184 }
 0xa59   :  { %v7028_v41 = vpop.permute.xlu1 %7027  ;;  %8342 = vst.msk [vmem:[#allocation3 + $0x118] sm:$0xff] %vm8306_vm5, %v8185_v6 }
 0xa5a   :  { %7186 = vst.msk [vmem:[#allocation3 + $0x110] sm:$0xff] %vm7151_vm2, %v7028_v41 }
 0xa5c   :  { %v7445_v0 = vpop.permute.xlu0 %7444  ;;  %v8422_v7 = vld [vmem:[#allocation3 + $0x198] sm:$0xff] }
 0xa5d   :  { %v7413_v2 = vpop.permute.xlu1 %7412  ;;  %7587 = vst.msk [vmem:[#allocation3 + $0x190] sm:$0xff] %vm7536_vm3, %v7445_v0  ;;  %9164 = vmatprep.subr.msk.mxu1 %vm8436_vm6, %v8422_v7 }
 0xa5e   :  { %7571 = vst.msk [vmem:[#allocation3 + $0x110] sm:$0xff] %vm7536_vm3, %v7413_v2 }
 0xa60   :  { %v7830_v35 = vpop.permute.xlu0 %7829  ;;  %v8406_v11 = vld [vmem:[#allocation3 + $0x118] sm:$0xff] }
 0xa61   :  { %v7798_v59 = vpop.permute.xlu1 %7797  ;;  %7972 = vst.msk [vmem:[#allocation3 + $0x190] sm:$0xff] %vm7921_vm4, %v7830_v35  ;;  %9165 = vmatpush3.xpose.msk.msra.mxu1 %vm8436_vm6, %v8406_v11 }
 0xa62   :  { %7956 = vst.msk [vmem:[#allocation3 + $0x110] sm:$0xff] %vm7921_vm4, %v7798_v59 }
 0xa64   :  { %v8215_v63 = vpop.permute.xlu0 %8214 }
 0xa65   :  { %v7058_v50 = vpop.permute.xlu1 %7057  ;;  %8357 = vst.msk [vmem:[#allocation3 + $0x190] sm:$0xff] %vm8306_vm5, %v8215_v63 }
 0xa66   :  { %7201 = vst.msk [vmem:[#allocation3 + $0x188] sm:$0xff] %vm7151_vm2, %v7058_v50 }
 0xa68   :  { %v8183_v17 = vpop.permute.xlu0 %8182 }
 0xa69   :  { %v7026_v60 = vpop.permute.xlu1 %7025  ;;  %8341 = vst.msk [vmem:[#allocation3 + $0x110] sm:$0xff] %vm8306_vm5, %v8183_v17 }
 0xa6a   :  { %7185 = vst.msk [vmem:[#allocation3 + $0x108] sm:$0xff] %vm7151_vm2, %v7026_v60 }
 0xa6c   :  { %v7443_v27 = vpop.permute.xlu0 %7442  ;;  %v8421_v5 = vld [vmem:[#allocation3 + $0x190] sm:$0xff] }
 0xa6d   :  { %v7411_v42 = vpop.permute.xlu1 %7410  ;;  %7586 = vst.msk [vmem:[#allocation3 + $0x188] sm:$0xff] %vm7536_vm3, %v7443_v27  ;;  %9166 = vmatprep.subr.msk.mxu1 %vm8436_vm6, %v8421_v5 }
 0xa6e   :  { %7570 = vst.msk [vmem:[#allocation3 + $0x108] sm:$0xff] %vm7536_vm3, %v7411_v42 }
 0xa70   :  { %v7828_v57 = vpop.permute.xlu0 %7827  ;;  %v8405_v1 = vld [vmem:[#allocation3 + $0x110] sm:$0xff] }
 0xa71   :  { %v7796_v61 = vpop.permute.xlu1 %7795  ;;  %7971 = vst.msk [vmem:[#allocation3 + $0x188] sm:$0xff] %vm7921_vm4, %v7828_v57  ;;  %9167 = vmatpush3.xpose.msk.msra.mxu1 %vm8436_vm6, %v8405_v1 }
 0xa72   :  { %7955 = vst.msk [vmem:[#allocation3 + $0x108] sm:$0xff] %vm7921_vm4, %v7796_v61 }
 0xa74   :  { %v8213_v8 = vpop.permute.xlu0 %8212 }
 0xa75   :  { %v7056_v26 = vpop.permute.xlu1 %7055  ;;  %8356 = vst.msk [vmem:[#allocation3 + $0x188] sm:$0xff] %vm8306_vm5, %v8213_v8 }
 0xa76   :  { %7200 = vst.msk [vmem:[#allocation3 + $0x180] sm:$0xff] %vm7151_vm2, %v7056_v26 }
 0xa78   :  { %v8181_v55 = vpop.permute.xlu0 %8180 }
 0xa79   :  { %v7024_v21 = vpop.permute.xlu1 %7023  ;;  %8340 = vst.msk [vmem:[#allocation3 + $0x108] sm:$0xff] %vm8306_vm5, %v8181_v55 }
 0xa7a   :  { %7184 = vst.msk [vmem:[#allocation3 + $0x100] sm:$0xff] %vm7151_vm2, %v7024_v21 }
 0xa7c   :  { %v7441_v36 = vpop.permute.xlu0 %7440  ;;  %v8420_v45 = vld [vmem:[#allocation3 + $0x188] sm:$0xff] }
 0xa7d   :  { %v7409_v25 = vpop.permute.xlu1 %7408  ;;  %7585 = vst.msk [vmem:[#allocation3 + $0x180] sm:$0xff] %vm7536_vm3, %v7441_v36  ;;  %9168 = vmatprep.subr.msk.mxu1 %vm8436_vm6, %v8420_v45 }
 0xa7e   :  { %7569 = vst.msk [vmem:[#allocation3 + $0x100] sm:$0xff] %vm7536_vm3, %v7409_v25 }
 0xa80   :  { %v7826_v22 = vpop.permute.xlu0 %7825  ;;  %v8404_v30 = vld [vmem:[#allocation3 + $0x108] sm:$0xff] }
 0xa81   :  { %v7794_v54 = vpop.permute.xlu1 %7793  ;;  %7970 = vst.msk [vmem:[#allocation3 + $0x180] sm:$0xff] %vm7921_vm4, %v7826_v22  ;;  %9169 = vmatpush3.xpose.msk.msra.mxu1 %vm8436_vm6, %v8404_v30 }
 0xa82   :  { %7954 = vst.msk [vmem:[#allocation3 + $0x100] sm:$0xff] %vm7921_vm4, %v7794_v54 }
 0xa84   :  { %v8211_v38 = vpop.permute.xlu0 %8210 }
 0xa85   :  { %v8179_v28 = vpop.permute.xlu1 %8178  ;;  %8355 = vst.msk [vmem:[#allocation3 + $0x180] sm:$0xff] %vm8306_vm5, %v8211_v38 }
 0xa86   :  { %8339 = vst.msk [vmem:[#allocation3 + $0x100] sm:$0xff] %vm8306_vm5, %v8179_v28 }
 0xa8c   :  { %v8419_v14 = vld [vmem:[#allocation3 + $0x180] sm:$0xff] }
 0xa8d   :  { %9170 = vmatprep.subr.msk.mxu1 %vm8436_vm6, %v8419_v14  ;;  %v8403_v32 = vld [vmem:[#allocation3 + $0x100] sm:$0xff] }
 0xa8e   :  { %9171 = vmatpush3.xpose.msk.msra.mxu1 %vm8436_vm6, %v8403_v32 }
 0xa91   :  { %9173 = vmatmul.mubr.msk.f32.vlgmr.msra.gmra.mxu1 %vm8436_vm6, %v9303_v19 }
 0xb51   :  { %v8769_v12 = vpop.f32.mrf.mxu1 }
 0xb52   :  { %v8775_v49 = vadd.f32 %v8774_v10, %v8769_v12  ;;  %v8782_v52 = vmul.f32 %v8769_v12, %v8769_v12 }
 0xb53   :  { %v8771_v29 = vpop.f32.mrf.mxu1 }
 0xb54   :  { %v8785_v24 = vadd.f32 %v8784_v44, %v8782_v52  ;;  %v8776_v33 = vadd.f32 %v8775_v49, %v8771_v29  ;;  %v8783_v51 = vmul.f32 %v8771_v29, %v8771_v29 }
 0xb56   :  { %v8786_v3 = vadd.f32 %v8785_v24, %v8783_v51  ;;  %8777 = vadd.xlane.f32.xlu0 %v8776_v33 }
 0xb58   :  { %8787 = vadd.xlane.f32.xlu1 %v8786_v3 }
 0xbdf   :  { %v8778_v16 = vpop.xlane.xlu0 %8777 }
 0xbe0   :  { %v8779_v39 = vmul.f32 0.001953125, %v8778_v16 }
 0xbe1   :  { %v8788_v37 = vpop.xlane.xlu1 %8787 }
 0xbe2   :  { %v8791_v43 = vmul.f32 %v8779_v39, %v8779_v39  ;;  %v8789_v40 = vmul.f32 0.001953125, %v8788_v37 }
 0xbe4   :  { %v8792_v56 = vsub.f32 %v8789_v40, %v8791_v43 }
 0xbe6   :  { %v8793_v18 = vadd.f32 1e-05, %v8792_v56 }
 0xbe8   :  { %9301 = vrsqrt.f32 %v8793_v18 }
 0xbf5   :  { %v9302_v15 = vpop.eup %9301 }
 0xbf6   :  { %v8795_v46 = vmul.f32 %v9302_v15, %v8790_v53 }
 0xbf8   :  { %8801 = vperm.xlu0 %9297, %v8795_v46   ;;  %v8797_v4 = vmul.f32 %v8795_v46, %v8779_v39 }
 0xbfa   :  { %v8798_v47 = vsub.f32 %v8796_v20, %v8797_v4 }
 0xbfc   :  { %8810 = vperm.xlu1 %9298, %v8798_v47  }
 0xc73   :  { %v8802_v9 = vpop.permute.xlu0 %8801 }
 0xc74   :  { %v8804_v23 = vmul.f32 %v8802_v9, %v8698_v13  ;;  %v8805_v48 = vmul.f32 %v8802_v9, %v8700_v62  ;;  %v8806_v6 = vmul.f32 %v8802_v9, %v8769_v12  ;;  %v8807_v41 = vmul.f32 %v8802_v9, %v8771_v29 }
 0xc77   :  { %v8811_v0 = vpop.permute.xlu1 %8810 }
 0xc78   :  { %v8813_v7 = vadd.f32 %v8811_v0, %v8804_v23  ;;  %v8814_v2 = vadd.f32 %v8811_v0, %v8805_v48  ;;  %v8815_v35 = vadd.f32 %v8811_v0, %v8806_v6  ;;  %v8816_v11 = vadd.f32 %v8811_v0, %v8807_v41 }
 0xc7a   :  { %v8817_v59 = vmax.f32 %v8813_v7, 0.0  ;;  %v8818_v63 = vmax.f32 %v8814_v2, 0.0  ;;  %v8819_v50 = vmax.f32 %v8815_v35, 0.0  ;;  %v8820_v17 = vmax.f32 %v8816_v11, 0.0 }
 0xc7c   :  { %8821 = vst [vmem:[#allocation4] sm:$0xff] %v8817_v59  ;;  %8822 = vst [vmem:[#allocation4 + $0x8] sm:$0xff] %v8818_v63 }
 0xc7d   :  { %8824 = vst [vmem:[#allocation4 + $0x10] sm:$0xff] %v8819_v50  ;;  %8825 = vst [vmem:[#allocation4 + $0x18] sm:$0xff] %v8820_v17 }
 0xc7e   :  { %9315 = shalt.err (!%p9312_p4)
}
 0xc7f   :  { %s9342_s6 = smov 256  }
 0xc80   :  { %8837 = dma.vmem_to_hbm [thread:$0]  %s8832_s22, 512, %s14572_s7, [#allocation5], %s9342_s6, %s9342_s6, %s9331_s16  }
 0xc81   :  { %9324 = dma.done.wait [#allocation5], 512  }
 0xc82   :  { %9325 = vsyncadd [#allocation5], 4294966784 }
 0xc83   :  { %8841 = vsyncpa [#allocation5], 1 }

</bundles_post_ra>
